<compile_context>
chip_gen: v7x
topology: tpu7x:2x2x1
jax: 0.10.0
libtpu: 0.0.40
codegen_flags: <defaults>
</compile_context>

<pallas_src>
import functools

import jax
import jax.numpy as jnp
from jax.experimental import pallas as pl
from jax.experimental.pallas import tpu as pltpu

_EPS = 1e-5            # nn.BatchNorm2d default eps
_NEG_SLOPE = 0.1       # nn.LeakyReLU(0.1)
_VMEM_LIMIT = 32 * 1024 * 1024        # explicit scoped-VMEM limit (all gens)
_FUSED_VMEM_BUDGET = 8 * 1024 * 1024  # fused-path gate (v7x-safe)


def _round_up(x, m):
    return ((x + m - 1) // m) * m


def _pick_tile(dim, cap):
    """Largest tile <= cap that divides dim and is a multiple of 128 (or dim)."""
    if dim <= cap:
        return dim
    best = None
    c = 128
    while c <= cap:
        if dim % c == 0:
            best = c
        c += 128
    return best if best is not None else dim


# ----------------------------- Pallas kernels ------------------------------ #

def _fused_body(p_ref, w_ref, g_ref, b_ref, r_ref, o_ref, acc_ref, m_true):
    """Fused ConvBlock: matmul (f32 acc) + BN stats + BN + LeakyReLU (+res).

    grid = (n, k): n "parallel" (independent output-channel slabs), k
    "arbitrary" (contraction).  The whole M extent lives in one block, so the
    per-channel batch statistics are exact; zero-padded M rows contribute
    nothing to the sums (mean/var divide by the true M).
    """
    k = pl.program_id(1)

    @pl.when(k == 0)
    def _():
        acc_ref[...] = jnp.zeros_like(acc_ref)

    acc_ref[...] += jnp.dot(p_ref[...], w_ref[...],
                            preferred_element_type=jnp.float32)

    @pl.when(k == pl.num_programs(1) - 1)
    def _():
        y = acc_ref[...]
        inv_m = 1.0 / m_true
        mean = jnp.sum(y, axis=0, keepdims=True) * inv_m
        var = jnp.maximum(
            jnp.sum(y * y, axis=0, keepdims=True) * inv_m - mean * mean, 0.0)
        scale = g_ref[...] * jax.lax.rsqrt(var + _EPS)
        shift = b_ref[...] - mean * scale
        z = y * scale + shift
        z = jnp.where(z >= 0, z, _NEG_SLOPE * z)
        if r_ref is not None:
            z = z + r_ref[...].astype(jnp.float32)
        o_ref[...] = z.astype(o_ref.dtype)


def _fused_kernel(p_ref, w_ref, g_ref, b_ref, o_ref, acc_ref, *, m_true):
    _fused_body(p_ref, w_ref, g_ref, b_ref, None, o_ref, acc_ref, m_true)


def _fused_res_kernel(p_ref, w_ref, g_ref, b_ref, r_ref, o_ref, acc_ref, *,
                      m_true):
    _fused_body(p_ref, w_ref, g_ref, b_ref, r_ref, o_ref, acc_ref, m_true)


def _mm_stats_kernel(p_ref, w_ref, y_ref, ps_ref, pss_ref, acc_ref):
    """Tiled matmul (bf16 MXU, f32 accum) + per-(M-block) partial BN sums.

    grid = (m, n, k): m and n "parallel" (each (m, n) block writes its own
    partial-stat row, so there is no cross-block reduction in the kernel and
    v7x megacore can split either axis), k "arbitrary" (contraction).
    """
    k = pl.program_id(2)

    @pl.when(k == 0)
    def _():
        acc_ref[...] = jnp.zeros_like(acc_ref)

    acc_ref[...] += jnp.dot(p_ref[...], w_ref[...],
                            preferred_element_type=jnp.float32)

    @pl.when(k == pl.num_programs(2) - 1)
    def _():
        y = acc_ref[...]
        y_ref[...] = y.astype(y_ref.dtype)
        ps_ref[...] = jnp.sum(y, axis=0, keepdims=True)
        pss_ref[...] = jnp.sum(y * y, axis=0, keepdims=True)


def _bn_act_kernel(y_ref, scale_ref, shift_ref, o_ref):
    # fp32 elementwise (v5e has no bf16 VPU): z = yhat*gamma + beta, folded.
    z = y_ref[...].astype(jnp.float32) * scale_ref[...] + shift_ref[...]
    o_ref[...] = jnp.where(z >= 0, z, _NEG_SLOPE * z).astype(o_ref.dtype)


def _bn_act_res_kernel(y_ref, scale_ref, shift_ref, r_ref, o_ref):
    z = y_ref[...].astype(jnp.float32) * scale_ref[...] + shift_ref[...]
    z = jnp.where(z >= 0, z, _NEG_SLOPE * z) + r_ref[...].astype(jnp.float32)
    o_ref[...] = z.astype(o_ref.dtype)


# ------------------------------ glue (JAX) --------------------------------- #

def _im2col(x, K, stride, padding):
    # x: (B, H, W, Cin) -> patches (B*Ho*Wo, K*K*Cin), flattened in (ky,kx,ci) order.
    B, H, W, Cin = x.shape
    xp = jnp.pad(x, ((0, 0), (padding, padding), (padding, padding), (0, 0)))
    Hp, Wp = H + 2 * padding, W + 2 * padding
    Ho = (Hp - K) // stride + 1
    Wo = (Wp - K) // stride + 1
    cols = []
    for ky in range(K):
        for kx in range(K):
            cols.append(jax.lax.slice(
                xp,
                (0, ky, kx, 0),
                (B, ky + stride * (Ho - 1) + 1, kx + stride * (Wo - 1) + 1, Cin),
                (1, stride, stride, 1)))
    p = jnp.stack(cols, axis=3)                     # (B, Ho, Wo, K*K, Cin)
    return p.reshape(B * Ho * Wo, K * K * Cin), Ho, Wo


def _conv_block_fused(p, w, gamma, beta, r, M, Np, tn, tk):
    """Single pallas_call: matmul + BN(train) + LeakyReLU (+ residual)."""
    Kd = w.shape[0]
    Mp = _round_up(M, 8)
    if Mp != M:
        p = jnp.pad(p, ((0, Mp - M), (0, 0)))
        if r is not None:
            r = jnp.pad(r, ((0, Mp - M), (0, 0)))

    grid = (Np // tn, Kd // tk)
    in_specs = [pl.BlockSpec((Mp, tk), lambda n, k: (0, k)),
                pl.BlockSpec((tk, tn), lambda n, k: (k, n)),
                pl.BlockSpec((1, tn), lambda n, k: (0, n)),
                pl.BlockSpec((1, tn), lambda n, k: (0, n))]
    args = [p, w, gamma, beta]
    if r is None:
        kernel = functools.partial(_fused_kernel, m_true=M)
    else:
        in_specs.append(pl.BlockSpec((Mp, tn), lambda n, k: (0, n)))
        args.append(r)
        kernel = functools.partial(_fused_res_kernel, m_true=M)

    out = pl.pallas_call(
        kernel,
        out_shape=jax.ShapeDtypeStruct((Mp, Np), jnp.bfloat16),
        grid_spec=pltpu.PrefetchScalarGridSpec(
            num_scalar_prefetch=0,
            grid=grid,
            in_specs=in_specs,
            out_specs=pl.BlockSpec((Mp, tn), lambda n, k: (0, n)),
            scratch_shapes=[pltpu.VMEM((Mp, tn), jnp.float32)]),
        compiler_params=pltpu.CompilerParams(
            dimension_semantics=("parallel", "arbitrary"),
            vmem_limit_bytes=_VMEM_LIMIT),
        cost_estimate=pl.CostEstimate(
            flops=2 * Mp * Kd * Np,
            transcendentals=Np,
            bytes_accessed=p.size * 2 + w.size * 2 + Mp * Np * 2),
    )(*args)

    if Mp != M:
        out = out[:M]
    return out


def _conv_block_tiled(p, w, gamma, beta, r, M, Np):
    """Two pallas_calls for large-M layers: tiled matmul+partial stats, then
    BN + LeakyReLU (+residual) epilogue."""
    Kd = w.shape[0]
    tm = min(1024, _round_up(M, 8))
    Mp = _round_up(M, tm)
    if Mp != M:
        p = jnp.pad(p, ((0, Mp - M), (0, 0)))
    tn = _pick_tile(Np, 512)
    tk = _pick_tile(Kd, 1152)
    nm = Mp // tm
    grid1 = (nm, Np // tn, Kd // tk)

    y, ps, pss = pl.pallas_call(
        _mm_stats_kernel,
        out_shape=(jax.ShapeDtypeStruct((Mp, Np), jnp.bfloat16),
                   jax.ShapeDtypeStruct((nm, Np), jnp.float32),
                   jax.ShapeDtypeStruct((nm, Np), jnp.float32)),
        grid_spec=pltpu.PrefetchScalarGridSpec(
            num_scalar_prefetch=0,
            grid=grid1,
            in_specs=[pl.BlockSpec((tm, tk), lambda m, n, k: (m, k)),
                      pl.BlockSpec((tk, tn), lambda m, n, k: (k, n))],
            out_specs=(pl.BlockSpec((tm, tn), lambda m, n, k: (m, n)),
                       pl.BlockSpec((1, tn), lambda m, n, k: (m, n)),
                       pl.BlockSpec((1, tn), lambda m, n, k: (m, n))),
            scratch_shapes=[pltpu.VMEM((tm, tn), jnp.float32)]),
        compiler_params=pltpu.CompilerParams(
            dimension_semantics=("parallel", "parallel", "arbitrary"),
            vmem_limit_bytes=_VMEM_LIMIT),
        cost_estimate=pl.CostEstimate(
            flops=2 * Mp * Kd * Np,
            transcendentals=0,
            bytes_accessed=p.size * 2 + w.size * 2 + Mp * Np * 2),
    )(p, w)

    # BN train-mode stats over the TRUE M (zero-padded rows contribute nothing);
    # reduce the tiny (nm, Np) partials in XLA, fold to per-channel scale/shift.
    s = jnp.sum(ps, axis=0, keepdims=True)
    ss = jnp.sum(pss, axis=0, keepdims=True)
    mean = s / M
    var = jnp.maximum(ss / M - mean * mean, 0.0)
    scale = gamma * jax.lax.rsqrt(var + _EPS)
    shift = beta - mean * scale

    tn2 = _pick_tile(Np, 512)
    grid2 = (Mp // tm, Np // tn2)
    if r is None:
        kernel = _bn_act_kernel
        args = (y, scale, shift)
        in_specs = [pl.BlockSpec((tm, tn2), lambda m, n: (m, n)),
                    pl.BlockSpec((1, tn2), lambda m, n: (0, n)),
                    pl.BlockSpec((1, tn2), lambda m, n: (0, n))]
    else:
        if Mp != M:
            r = jnp.pad(r, ((0, Mp - M), (0, 0)))
        kernel = _bn_act_res_kernel
        args = (y, scale, shift, r)
        in_specs = [pl.BlockSpec((tm, tn2), lambda m, n: (m, n)),
                    pl.BlockSpec((1, tn2), lambda m, n: (0, n)),
                    pl.BlockSpec((1, tn2), lambda m, n: (0, n)),
                    pl.BlockSpec((tm, tn2), lambda m, n: (m, n))]

    out = pl.pallas_call(
        kernel,
        out_shape=jax.ShapeDtypeStruct((Mp, Np), jnp.bfloat16),
        grid_spec=pltpu.PrefetchScalarGridSpec(
            num_scalar_prefetch=0,
            grid=grid2,
            in_specs=in_specs,
            out_specs=pl.BlockSpec((tm, tn2), lambda m, n: (m, n))),
        compiler_params=pltpu.CompilerParams(
            dimension_semantics=("parallel", "parallel"),
            vmem_limit_bytes=_VMEM_LIMIT),
    )(*args)

    if Mp != M:
        out = out[:M]
    return out


def conv_block(x, params, K, stride, padding, residual=None, force_path=None):
    """x: (B, H, W, Cin[_padded]) bf16 NHWC  ->  (B, Ho, Wo, Cout_padded) bf16."""
    w, gamma, beta = params                     # w: (K*K*Cin_p, Cout_p) bf16
    B, H, W, _ = x.shape
    Kd, Np = w.shape

    if K == 1 and stride == 1 and padding == 0:
        Ho, Wo = H, W
        p = x.reshape(B * H * W, Kd)            # no im2col for 1x1 convs
    else:
        # TODO(synk): fuse im2col into the kernel (shifted-window DMA) to avoid
        # the ~9x HBM expansion of the patch matrix.
        p, Ho, Wo = _im2col(x, K, stride, padding)
    M = B * Ho * Wo

    r = None if residual is None else residual.reshape(M, Np)

    # Fused-path gate: full (M, tn) accumulator + output (+residual) and the
    # double-buffered LHS/RHS tiles must fit a conservative VMEM budget.
    Mp8 = _round_up(M, 8)
    tn_f = _pick_tile(Np, 512)
    tk_f = _pick_tile(Kd, 512)
    fused_bytes = (Mp8 * tn_f * 4                       # f32 accumulator
                   + 2 * Mp8 * tn_f * 2                 # bf16 output
                   + (2 * Mp8 * tn_f * 2 if r is not None else 0)
                   + 2 * Mp8 * tk_f * 2                 # LHS (double-buffered)
                   + 2 * tk_f * tn_f * 2)               # RHS (double-buffered)
    use_fused = fused_bytes <= _FUSED_VMEM_BUDGET
    if force_path == "fused":
        use_fused = True
    elif force_path == "tiled":
        use_fused = False

    if use_fused:
        out = _conv_block_fused(p, w, gamma, beta, r, M, Np, tn_f, tk_f)
    else:
        out = _conv_block_tiled(p, w, gamma, beta, r, M, Np)
    return out.reshape(B, Ho, Wo, Np)


# --------------------------- parameters / model ---------------------------- #

def _make_conv_params(key, cin, cout, K, pad_cin=True):
    """Conv weight (Cout,Cin,K,K) -> lane-dense, channel-padded (K*K*Cin_p, Cout_p)."""
    cin_p = _round_up(cin, 128) if pad_cin else cin
    cout_p = _round_up(cout, 128)
    w = jax.random.normal(key, (cout, cin, K, K), jnp.float32) * (1.0 / (cin * K * K) ** 0.5)
    w = jnp.transpose(w, (2, 3, 1, 0))                           # (K, K, Cin, Cout)
    w = jnp.pad(w, ((0, 0), (0, 0), (0, cin_p - cin), (0, cout_p - cout)))
    w = w.reshape(K * K * cin_p, cout_p).astype(jnp.bfloat16)
    gamma = jnp.pad(jnp.ones((1, cout), jnp.float32), ((0, 0), (0, cout_p - cout)))
    beta = jnp.zeros((1, cout_p), jnp.float32)                   # padded channels stay 0
    return (w, gamma, beta)


def build_darknet53(key, num_blocks):
    keys = iter(jax.random.split(key, 512))
    layers = []

    def cb(cin, cout, K, s, p, pad_cin=True):
        layers.append(dict(kind="conv",
                           params=_make_conv_params(next(keys), cin, cout, K, pad_cin),
                           K=K, s=s, p=p))

    def res_stage(cin, cmid, n):
        for _ in range(n):
            layers.append(dict(kind="res",
                               c1=_make_conv_params(next(keys), cin, cmid, 1),
                               c2=_make_conv_params(next(keys), cmid, cin, 3)))

    cb(3, 32, 3, 1, 1, pad_cin=False)   # conv1 (raw 3-channel stem, K-dim = 27)
    cb(32, 64, 3, 2, 1)                 # conv2
    res_stage(64, 32, num_blocks[0])    # residual1
    cb(64, 128, 3, 2, 1)                # conv3
    res_stage(128, 64, num_blocks[1])   # residual2
    cb(128, 256, 3, 2, 1)               # conv4
    res_stage(256, 128, num_blocks[2])  # residual3
    cb(256, 512, 3, 2, 1)               # conv5
    res_stage(512, 256, num_blocks[3])  # residual4
    cb(512, 1024, 3, 2, 1)              # conv6
    res_stage(1024, 512, num_blocks[4])  # residual5
    return layers


def darknet53_forward(layers, x_nchw, final_channels=1024):
    # x_nchw: (B, 3, H, W) float32 — same convention as the PyTorch module.
    x = jnp.transpose(x_nchw, (0, 2, 3, 1)).astype(jnp.bfloat16)   # NCHW -> NHWC bf16
    for layer in layers:
        if layer["kind"] == "conv":
            x = conv_block(x, layer["params"], layer["K"], layer["s"], layer["p"])
        else:  # ResidualBlock: 1x1 conv -> 3x3 conv (+ fused identity add)
            identity = x
            h = conv_block(x, layer["c1"], 1, 1, 0)
            x = conv_block(h, layer["c2"], 3, 1, 1, residual=identity)
    x = x[..., :final_channels]                                    # drop channel padding
    return jnp.transpose(x, (0, 3, 1, 2)).astype(jnp.float32)      # NHWC -> NCHW


# ---------------------------------- main ----------------------------------- #

if __name__ == "__main__":
    key = jax.random.PRNGKey(0)
    kp, kx, kc, kcx = jax.random.split(key, 4)

    # 1) Consistency check: fused single-call path vs. tiled two-call path on a
    #    mid-size 3x3 ConvBlock (M = 2048 -> two M tiles exercise the
    #    partial-statistics reduction of the tiled path).
    params_chk = _make_conv_params(kc, 128, 128, 3)
    x_chk = jax.random.normal(kcx, (2, 32, 32, 128), jnp.float32).astype(jnp.bfloat16)
    f_fused = jax.jit(lambda a: conv_block(a, params_chk, 3, 1, 1, force_path="fused"))
    f_tiled = jax.jit(lambda a: conv_block(a, params_chk, 3, 1, 1, force_path="tiled"))
    o_f = jax.block_until_ready(f_fused(x_chk))
    o_t = jax.block_until_ready(f_tiled(x_chk))
    max_diff = float(jnp.max(jnp.abs(o_f.astype(jnp.float32) - o_t.astype(jnp.float32))))
    assert max_diff < 0.25, f"fused vs tiled mismatch: {max_diff}"

    # 2) Full Darknet53 forward at a small synthetic shape.
    num_blocks = [1, 1, 1, 1, 1]          # small synthetic config of Darknet53
    layers = build_darknet53(kp, num_blocks)

    x = jax.random.normal(kx, (2, 3, 16, 16), jnp.float32)   # NCHW, like PyTorch

    fwd = jax.jit(lambda inp: darknet53_forward(layers, inp))
    out = fwd(x)
    out = jax.block_until_ready(out)

    assert out.shape == (2, 1024, 1, 1), out.shape
    assert bool(jnp.all(jnp.isfinite(out)))
    print("KERNEL_OK")
</pallas_src>

<mosaic_0001>
module attributes {stable_mosaic.version = 11 : i64} {
  func.func @_fused_kernel(%arg0: i32, %arg1: i32, %arg2: memref<2048x384xbf16, #tpu.memory_space<vmem>>, %arg3: memref<384x128xbf16, #tpu.memory_space<vmem>>, %arg4: memref<1x128xf32, #tpu.memory_space<vmem>>, %arg5: memref<1x128xf32, #tpu.memory_space<vmem>>, %arg6: memref<2048x128xbf16, #tpu.memory_space<vmem>>, %arg7: memref<2048x128xf32, #tpu.memory_space<vmem>>) attributes {dimension_semantics = [#tpu.dimension_semantics<parallel>, #tpu.dimension_semantics<arbitrary>], iteration_bounds = array<i64: 1, 3>, scalar_prefetch = 0 : i64, scratch_operands = 1 : i64, tpu.core_type = #tpu.core_type<tc>, window_params = [{transform_indices = @transform_0, window_bounds = array<i64: 2048, 384>}, {transform_indices = @transform_1, window_bounds = array<i64: 384, 128>}, {transform_indices = @transform_2, window_bounds = array<i64: 1, 128>}, {transform_indices = @transform_3, window_bounds = array<i64: 1, 128>}, {transform_indices = @transform_4, window_bounds = array<i64: 2048, 128>}]} {
    %c0_i32 = arith.constant 0 : i32
    %0 = arith.cmpi eq, %arg1, %c0_i32 : i32
    %1 = arith.extui %0 : i1 to i32
    %c0_i32_0 = arith.constant 0 : i32
    %2 = arith.cmpi ne, %1, %c0_i32_0 : i32
    scf.if %2 {
      %cst_9 = arith.constant 0.000000e+00 : f32
      %12 = vector.broadcast %cst_9 : f32 to vector<2048x128xf32>
      %c0_10 = arith.constant 0 : index
      %c0_11 = arith.constant 0 : index
      %13 = vector.load %arg7[%c0_10, %c0_11] : memref<2048x128xf32, #tpu.memory_space<vmem>>, vector<2048x128xf32>
      tpu.vector_store %arg7[%c0_10, %c0_11], %12 {strides = array<i32>} : memref<2048x128xf32, #tpu.memory_space<vmem>>, vector<2048x128xf32>,
    } else {
    }
    %c0 = arith.constant 0 : index
    %c0_1 = arith.constant 0 : index
    %3 = vector.load %arg7[%c0, %c0_1] : memref<2048x128xf32, #tpu.memory_space<vmem>>, vector<2048x128xf32>
    %c0_2 = arith.constant 0 : index
    %c0_3 = arith.constant 0 : index
    %4 = vector.load %arg2[%c0_2, %c0_3] : memref<2048x384xbf16, #tpu.memory_space<vmem>>, vector<2048x384xbf16>
    %c0_4 = arith.constant 0 : index
    %c0_5 = arith.constant 0 : index
    %5 = vector.load %arg3[%c0_4, %c0_5] : memref<384x128xbf16, #tpu.memory_space<vmem>>, vector<384x128xbf16>
    %cst = arith.constant dense<0.000000e+00> : vector<2048x128xf32>
    %6 = tpu.matmul %4, %5, %cst {dimension_numbers = #tpu.dot_dimension_numbers<[1], [0], [0], [1], [0, 0, 1, 1], [], []>} : vector<2048x384xbf16>, vector<384x128xbf16>, vector<2048x128xf32> -> vector<2048x128xf32>
    %7 = arith.addf %3, %6 : vector<2048x128xf32>
    %c0_6 = arith.constant 0 : index
    %c0_7 = arith.constant 0 : index
    %8 = vector.load %arg7[%c0_6, %c0_7] : memref<2048x128xf32, #tpu.memory_space<vmem>>, vector<2048x128xf32>
    tpu.vector_store %arg7[%c0_6, %c0_7], %7 {strides = array<i32>} : memref<2048x128xf32, #tpu.memory_space<vmem>>, vector<2048x128xf32>,
    %c2_i32 = arith.constant 2 : i32
    %9 = arith.cmpi eq, %arg1, %c2_i32 : i32
    %10 = arith.extui %9 : i1 to i32
    %c0_i32_8 = arith.constant 0 : i32
    %11 = arith.cmpi ne, %10, %c0_i32_8 : i32
    scf.if %11 {
      %c0_9 = arith.constant 0 : index
      %c0_10 = arith.constant 0 : index
      %12 = vector.load %arg7[%c0_9, %c0_10] : memref<2048x128xf32, #tpu.memory_space<vmem>>, vector<2048x128xf32>
      %cst_11 = arith.constant dense<0.000000e+00> : vector<128xf32>
      %13 = vector.multi_reduction <add>, %12, %cst_11 [0] : vector<2048x128xf32> to vector<128xf32>
      %14 = vector.shape_cast %13 : vector<128xf32> to vector<1x128xf32>
      %cst_12 = arith.constant 4.8828125E-4 : f32
      %15 = vector.broadcast %cst_12 : f32 to vector<1x128xf32>
      %16 = arith.mulf %14, %15 : vector<1x128xf32>
      %17 = arith.mulf %12, %12 : vector<2048x128xf32>
      %cst_13 = arith.constant dense<0.000000e+00> : vector<128xf32>
      %18 = vector.multi_reduction <add>, %17, %cst_13 [0] : vector<2048x128xf32> to vector<128xf32>
      %19 = vector.shape_cast %18 : vector<128xf32> to vector<1x128xf32>
      %cst_14 = arith.constant 4.8828125E-4 : f32
      %20 = vector.broadcast %cst_14 : f32 to vector<1x128xf32>
      %21 = arith.mulf %19, %20 : vector<1x128xf32>
      %22 = arith.mulf %16, %16 : vector<1x128xf32>
      %23 = arith.subf %21, %22 : vector<1x128xf32>
      %cst_15 = arith.constant 0.000000e+00 : f32
      %24 = vector.broadcast %cst_15 : f32 to vector<1x128xf32>
      %25 = arith.maximumf %23, %24 : vector<1x128xf32>
      %c0_16 = arith.constant 0 : index
      %c0_17 = arith.constant 0 : index
      %26 = vector.load %arg4[%c0_16, %c0_17] : memref<1x128xf32, #tpu.memory_space<vmem>>, vector<1x128xf32>
      %cst_18 = arith.constant 9.99999974E-6 : f32
      %27 = vector.broadcast %cst_18 : f32 to vector<1x128xf32>
      %28 = arith.addf %25, %27 : vector<1x128xf32>
      %29 = math.rsqrt %28 : vector<1x128xf32>
      %30 = arith.mulf %26, %29 : vector<1x128xf32>
      %c0_19 = arith.constant 0 : index
      %c0_20 = arith.constant 0 : index
      %31 = vector.load %arg5[%c0_19, %c0_20] : memref<1x128xf32, #tpu.memory_space<vmem>>, vector<1x128xf32>
      %32 = arith.mulf %16, %30 : vector<1x128xf32>
      %33 = arith.subf %31, %32 : vector<1x128xf32>
      %34 = vector.broadcast %30 : vector<1x128xf32> to vector<2048x128xf32>
      %35 = arith.mulf %12, %34 : vector<2048x128xf32>
      %36 = vector.broadcast %33 : vector<1x128xf32> to vector<2048x128xf32>
      %37 = arith.addf %35, %36 : vector<2048x128xf32>
      %cst_21 = arith.constant 0.000000e+00 : f32
      %38 = vector.broadcast %cst_21 : f32 to vector<2048x128xf32>
      %39 = arith.cmpf oge, %37, %38 : vector<2048x128xf32>
      %cst_22 = arith.constant 1.000000e-01 : f32
      %40 = vector.broadcast %cst_22 : f32 to vector<2048x128xf32>
      %41 = arith.mulf %40, %37 : vector<2048x128xf32>
      %42 = arith.select %39, %37, %41 : vector<2048x128xi1>, vector<2048x128xf32>
      %43 = arith.truncf %42 : vector<2048x128xf32> to vector<2048x128xbf16>
      %c0_23 = arith.constant 0 : index
      %c0_24 = arith.constant 0 : index
      %44 = vector.load %arg6[%c0_23, %c0_24] : memref<2048x128xbf16, #tpu.memory_space<vmem>>, vector<2048x128xbf16>
      tpu.vector_store %arg6[%c0_23, %c0_24], %43 {strides = array<i32>} : memref<2048x128xbf16, #tpu.memory_space<vmem>>, vector<2048x128xbf16>,
    } else {
    }
    return
  }
  func.func @transform_0(%arg0: i32, %arg1: i32) -> (i32, i32) {
    %c0_i32 = arith.constant 0 : i32
    %c0_i32_0 = arith.constant 0 : i32
    return %c0_i32, %arg1 : i32, i32
  }
  func.func @transform_1(%arg0: i32, %arg1: i32) -> (i32, i32) {
    %c0_i32 = arith.constant 0 : i32
    return %arg1, %arg0 : i32, i32
  }
  func.func @transform_2(%arg0: i32, %arg1: i32) -> (i32, i32) {
    %c0_i32 = arith.constant 0 : i32
    %c0_i32_0 = arith.constant 0 : i32
    return %c0_i32, %arg0 : i32, i32
  }
  func.func @transform_3(%arg0: i32, %arg1: i32) -> (i32, i32) {
    %c0_i32 = arith.constant 0 : i32
    %c0_i32_0 = arith.constant 0 : i32
    return %c0_i32, %arg0 : i32, i32
  }
  func.func @transform_4(%arg0: i32, %arg1: i32) -> (i32, i32) {
    %c0_i32 = arith.constant 0 : i32
    %c0_i32_0 = arith.constant 0 : i32
    return %c0_i32, %arg0 : i32, i32
  }
}

</mosaic_0001>

<bundles_post_ra>
// kernel: _lambda_.1
= control target key start
LH: loop header
LB: loop body
LE: loop exit
PB: predicated region body
PF: predicated region fallthrough
CT: control target
= control target key end

     0   :  { %9 = vsyncpa [#allocation5], 0  ;;  %s14542_s15 = smov 0   ;;  %s14544_s16 = smov 0   ;;  %s17612_s0 = inlined_call_operand.vmem [shape: bf16[2048,1152], index: 0, kind: input, shape index: {}]   ;;  %s17613_s1 = inlined_call_operand.vmem [shape: bf16[1152,128], index: 1, kind: input, shape index: {}]   ;;  %s17614_s2 = inlined_call_operand.vmem [shape: f32[1,128], index: 2, kind: input, shape index: {}]   ;;  %s17615_s3 = inlined_call_operand.vmem [shape: f32[1,128], index: 3, kind: input, shape index: {}]   ;;  %s17616_s4 = inlined_call_operand.hbm [shape: bf16[2048,128], index: 4, kind: output, shape index: {}]  }
   0x1   :  { %s14546_s17 = smov 0   ;;  %s14548_s18 = smov 0  }
   0x2   :  { %s14550_s19 = smov 0  }
   0x3 LB: > { %s10941_s20 = sadd.s32 4294967295, %s14510_s19   ;;  %s24_s21 = sadd.s32 1, %s14506_s18  ;;  %s14510_s19 = sphi %s14550_s19, %s15_s19   ;;  %s14506_s18 = sphi %s14548_s18, %s17789_s18   ;;  %s14502_s17 = sphi %s14546_s17, %s17788_s17   ;;  %s14498_s16 = sphi %s14544_s16, %s17787_s16   ;;  %s14494_s15 = sphi %s14542_s15, %s17786_s15  }
   0x4   : > { %p25_p0 = scmp.ge.s32.totalorder %s24_s21, 3  ;;  %p41_p1 = scmp.ne.s32.totalorder %s14498_s16, %s14494_s15 }
   0x5   : > { %p42_p2 = scmp.eq.s32.totalorder %s14510_s19, 0  ;;  %s34_s23 = sadd.s32 1, %s14498_s16 }
   0x6   : > { %s17791_s21 = smov (%p25_p0, %s24_s21), 0  ;;  %p10945_p5 = scmp.ge.s32.totalorder %s14510_s19, 3 }
   0x7   : > { %p43_p3 = por %p42_p2, %p41_p1  ;;  %s31_s22 = ssub.s32 %s14506_s18, %s17791_s21 }
   0x8   : > { %p32_p4 = scmp.eq.s32.totalorder %s31_s22, 0  ;;  %185 = sbr.rel (%p10945_p5) target bundleno = 318 (0x13e), region = 24 }
   0xa   : > { %s14578_s24 = scalar_select %p32_p4, %s14498_s16, %s34_s23  }
   0xf   : > { %188 = sbr.rel (!%p43_p3) target bundleno = 318 (0x13e), region = 28  ;;  %s190_s25 = sand.u32 (%p43_p3), 1, %s14498_s16  }
  0x10   : > { %s12131_s26 = smul.u32 (%p43_p3), 12, %s14506_s18 }
  0x11   : > { %s13595_s27 = smul.u32 (%p43_p3), 3072, %s190_s25 }
  0x12   : > { %s14586_s30 = scalar_lea.vmem (%p43_p3), %s17612_s0, %s12131_s26 }
  0x13   : > { %v210_v0 = vld [vmem:[%s14586_s30] sm:$0xff] (%p43_p3)  ;;  %v214_v2 = vld [vmem:[%s14586_s30 + $0x48] sm:$0xff] (%p43_p3)  ;;  %s14591_s5 = scalar_lea.vmem (%p43_p3), [#allocation3], %s13595_s27  ;;  %v218_v4 = vld [vmem:[%s14586_s30 + $0x90] sm:$0xff] (%p43_p3) }
  0x14   : > { %v212_v1 = vld [vmem:[%s14586_s30 + $0x24] sm:$0xff] (%p43_p3)  ;;  %211 = vst [vmem:[%s14591_s5] sm:$0xff] (%p43_p3), %v210_v0  ;;  %215 = vst [vmem:[%s14591_s5 + $0x18] sm:$0xff] (%p43_p3), %v214_v2  ;;  %v216_v3 = vld [vmem:[%s14586_s30 + $0x6c] sm:$0xff] (%p43_p3) }
  0x15   : > { %213 = vst [vmem:[%s14591_s5 + $0xc] sm:$0xff] (%p43_p3), %v212_v1  ;;  %v220_v5 = vld [vmem:[%s14586_s30 + $0xb4] sm:$0xff] (%p43_p3)  ;;  %217 = vst [vmem:[%s14591_s5 + $0x24] sm:$0xff] (%p43_p3), %v216_v3  ;;  %v224_v7 = vld [vmem:[%s14586_s30 + $0xfc] sm:$0xff] (%p43_p3) }
  0x16   : > { %219 = vst [vmem:[%s14591_s5 + $0x30] sm:$0xff] %v218_v4  ;;  %221 = vst [vmem:[%s14591_s5 + $0x3c] sm:$0xff] %v220_v5  ;;  %v222_v6 = vld [vmem:[%s14586_s30 + $0xd8] sm:$0xff]  ;;  %v226_v8 = vld [vmem:[%s14586_s30 + $0x120] sm:$0xff] }
  0x17   : > { %223 = vst [vmem:[%s14591_s5 + $0x48] sm:$0xff] %v222_v6  ;;  %225 = vst [vmem:[%s14591_s5 + $0x54] sm:$0xff] %v224_v7  ;;  %v228_v9 = vld [vmem:[%s14586_s30 + $0x144] sm:$0xff]  ;;  %v232_v11 = vld [vmem:[%s14586_s30 + $0x18c] sm:$0xff] }
  0x18   : > { %227 = vst [vmem:[%s14591_s5 + $0x60] sm:$0xff] %v226_v8  ;;  %v230_v10 = vld [vmem:[%s14586_s30 + $0x168] sm:$0xff]  ;;  %229 = vst [vmem:[%s14591_s5 + $0x6c] sm:$0xff] %v228_v9  ;;  %v234_v12 = vld [vmem:[%s14586_s30 + $0x1b0] sm:$0xff] }
  0x19   : > { %231 = vst [vmem:[%s14591_s5 + $0x78] sm:$0xff] %v230_v10  ;;  %233 = vst [vmem:[%s14591_s5 + $0x84] sm:$0xff] %v232_v11  ;;  %v236_v13 = vld [vmem:[%s14586_s30 + $0x1d4] sm:$0xff]  ;;  %v240_v15 = vld [vmem:[%s14586_s30 + $0x21c] sm:$0xff] }
  0x1a   : > { %v238_v14 = vld [vmem:[%s14586_s30 + $0x1f8] sm:$0xff]  ;;  %235 = vst [vmem:[%s14591_s5 + $0x90] sm:$0xff] %v234_v12  ;;  %237 = vst [vmem:[%s14591_s5 + $0x9c] sm:$0xff] %v236_v13  ;;  %v242_v16 = vld [vmem:[%s14586_s30 + $0x240] sm:$0xff] }
  0x1b   : > { %239 = vst [vmem:[%s14591_s5 + $0xa8] sm:$0xff] %v238_v14  ;;  %v244_v17 = vld [vmem:[%s14586_s30 + $0x264] sm:$0xff]  ;;  %241 = vst [vmem:[%s14591_s5 + $0xb4] sm:$0xff] %v240_v15  ;;  %v248_v19 = vld [vmem:[%s14586_s30 + $0x2ac] sm:$0xff] }
  0x1c   : > { %243 = vst [vmem:[%s14591_s5 + $0xc0] sm:$0xff] %v242_v16  ;;  %245 = vst [vmem:[%s14591_s5 + $0xcc] sm:$0xff] %v244_v17  ;;  %v246_v18 = vld [vmem:[%s14586_s30 + $0x288] sm:$0xff]  ;;  %v250_v20 = vld [vmem:[%s14586_s30 + $0x2d0] sm:$0xff] }
  0x1d   : > { %247 = vst [vmem:[%s14591_s5 + $0xd8] sm:$0xff] %v246_v18  ;;  %249 = vst [vmem:[%s14591_s5 + $0xe4] sm:$0xff] %v248_v19  ;;  %v252_v21 = vld [vmem:[%s14586_s30 + $0x2f4] sm:$0xff]  ;;  %v256_v23 = vld [vmem:[%s14586_s30 + $0x33c] sm:$0xff] }
  0x1e   : > { %251 = vst [vmem:[%s14591_s5 + $0xf0] sm:$0xff] %v250_v20  ;;  %v254_v22 = vld [vmem:[%s14586_s30 + $0x318] sm:$0xff]  ;;  %253 = vst [vmem:[%s14591_s5 + $0xfc] sm:$0xff] %v252_v21  ;;  %v258_v24 = vld [vmem:[%s14586_s30 + $0x360] sm:$0xff] }
  0x1f   : > { %255 = vst [vmem:[%s14591_s5 + $0x108] sm:$0xff] %v254_v22  ;;  %257 = vst [vmem:[%s14591_s5 + $0x114] sm:$0xff] %v256_v23  ;;  %v260_v25 = vld [vmem:[%s14586_s30 + $0x384] sm:$0xff]  ;;  %v264_v27 = vld [vmem:[%s14586_s30 + $0x3cc] sm:$0xff] }
  0x20   : > { %v262_v26 = vld [vmem:[%s14586_s30 + $0x3a8] sm:$0xff]  ;;  %259 = vst [vmem:[%s14591_s5 + $0x120] sm:$0xff] %v258_v24  ;;  %261 = vst [vmem:[%s14591_s5 + $0x12c] sm:$0xff] %v260_v25  ;;  %v266_v28 = vld [vmem:[%s14586_s30 + $0x3f0] sm:$0xff] }
  0x21   : > { %263 = vst [vmem:[%s14591_s5 + $0x138] sm:$0xff] %v262_v26  ;;  %v268_v29 = vld [vmem:[%s14586_s30 + $0x414] sm:$0xff]  ;;  %265 = vst [vmem:[%s14591_s5 + $0x144] sm:$0xff] %v264_v27  ;;  %v272_v31 = vld [vmem:[%s14586_s30 + $0x45c] sm:$0xff] }
  0x22   : > { %267 = vst [vmem:[%s14591_s5 + $0x150] sm:$0xff] %v266_v28  ;;  %269 = vst [vmem:[%s14591_s5 + $0x15c] sm:$0xff] %v268_v29  ;;  %v270_v30 = vld [vmem:[%s14586_s30 + $0x438] sm:$0xff]  ;;  %v274_v32 = vld [vmem:[%s14586_s30 + $0x480] sm:$0xff] }
  0x23   : > { %271 = vst [vmem:[%s14591_s5 + $0x168] sm:$0xff] %v270_v30  ;;  %273 = vst [vmem:[%s14591_s5 + $0x174] sm:$0xff] %v272_v31  ;;  %v276_v33 = vld [vmem:[%s14586_s30 + $0x4a4] sm:$0xff]  ;;  %v280_v35 = vld [vmem:[%s14586_s30 + $0x4ec] sm:$0xff] }
  0x24   : > { %275 = vst [vmem:[%s14591_s5 + $0x180] sm:$0xff] %v274_v32  ;;  %v278_v34 = vld [vmem:[%s14586_s30 + $0x4c8] sm:$0xff]  ;;  %277 = vst [vmem:[%s14591_s5 + $0x18c] sm:$0xff] %v276_v33  ;;  %v282_v36 = vld [vmem:[%s14586_s30 + $0x510] sm:$0xff] }
  0x25   : > { %279 = vst [vmem:[%s14591_s5 + $0x198] sm:$0xff] %v278_v34  ;;  %281 = vst [vmem:[%s14591_s5 + $0x1a4] sm:$0xff] %v280_v35  ;;  %v284_v37 = vld [vmem:[%s14586_s30 + $0x534] sm:$0xff]  ;;  %v288_v39 = vld [vmem:[%s14586_s30 + $0x57c] sm:$0xff] }
  0x26   : > { %v286_v38 = vld [vmem:[%s14586_s30 + $0x558] sm:$0xff]  ;;  %283 = vst [vmem:[%s14591_s5 + $0x1b0] sm:$0xff] %v282_v36  ;;  %285 = vst [vmem:[%s14591_s5 + $0x1bc] sm:$0xff] %v284_v37  ;;  %v290_v40 = vld [vmem:[%s14586_s30 + $0x5a0] sm:$0xff] }
  0x27   : > { %287 = vst [vmem:[%s14591_s5 + $0x1c8] sm:$0xff] %v286_v38  ;;  %v292_v41 = vld [vmem:[%s14586_s30 + $0x5c4] sm:$0xff]  ;;  %289 = vst [vmem:[%s14591_s5 + $0x1d4] sm:$0xff] %v288_v39  ;;  %v296_v43 = vld [vmem:[%s14586_s30 + $0x60c] sm:$0xff] }
  0x28   : > { %291 = vst [vmem:[%s14591_s5 + $0x1e0] sm:$0xff] %v290_v40  ;;  %293 = vst [vmem:[%s14591_s5 + $0x1ec] sm:$0xff] %v292_v41  ;;  %v294_v42 = vld [vmem:[%s14586_s30 + $0x5e8] sm:$0xff]  ;;  %v298_v44 = vld [vmem:[%s14586_s30 + $0x630] sm:$0xff] }
  0x29   : > { %295 = vst [vmem:[%s14591_s5 + $0x1f8] sm:$0xff] %v294_v42  ;;  %297 = vst [vmem:[%s14591_s5 + $0x204] sm:$0xff] %v296_v43  ;;  %v300_v45 = vld [vmem:[%s14586_s30 + $0x654] sm:$0xff]  ;;  %v304_v47 = vld [vmem:[%s14586_s30 + $0x69c] sm:$0xff] }
  0x2a   : > { %299 = vst [vmem:[%s14591_s5 + $0x210] sm:$0xff] %v298_v44  ;;  %v302_v46 = vld [vmem:[%s14586_s30 + $0x678] sm:$0xff]  ;;  %301 = vst [vmem:[%s14591_s5 + $0x21c] sm:$0xff] %v300_v45  ;;  %v306_v48 = vld [vmem:[%s14586_s30 + $0x6c0] sm:$0xff] }
  0x2b   : > { %303 = vst [vmem:[%s14591_s5 + $0x228] sm:$0xff] %v302_v46  ;;  %305 = vst [vmem:[%s14591_s5 + $0x234] sm:$0xff] %v304_v47  ;;  %v308_v49 = vld [vmem:[%s14586_s30 + $0x6e4] sm:$0xff]  ;;  %v312_v51 = vld [vmem:[%s14586_s30 + $0x72c] sm:$0xff] }
  0x2c   : > { %v310_v50 = vld [vmem:[%s14586_s30 + $0x708] sm:$0xff]  ;;  %307 = vst [vmem:[%s14591_s5 + $0x240] sm:$0xff] %v306_v48  ;;  %309 = vst [vmem:[%s14591_s5 + $0x24c] sm:$0xff] %v308_v49  ;;  %v314_v52 = vld [vmem:[%s14586_s30 + $0x750] sm:$0xff] }
  0x2d   : > { %311 = vst [vmem:[%s14591_s5 + $0x258] sm:$0xff] %v310_v50  ;;  %v316_v53 = vld [vmem:[%s14586_s30 + $0x774] sm:$0xff]  ;;  %313 = vst [vmem:[%s14591_s5 + $0x264] sm:$0xff] %v312_v51  ;;  %v320_v55 = vld [vmem:[%s14586_s30 + $0x7bc] sm:$0xff] }
  0x2e   : > { %315 = vst [vmem:[%s14591_s5 + $0x270] sm:$0xff] %v314_v52  ;;  %317 = vst [vmem:[%s14591_s5 + $0x27c] sm:$0xff] %v316_v53  ;;  %v318_v54 = vld [vmem:[%s14586_s30 + $0x798] sm:$0xff]  ;;  %v322_v56 = vld [vmem:[%s14586_s30 + $0x7e0] sm:$0xff] }
  0x2f   : > { %319 = vst [vmem:[%s14591_s5 + $0x288] sm:$0xff] %v318_v54  ;;  %321 = vst [vmem:[%s14591_s5 + $0x294] sm:$0xff] %v320_v55  ;;  %v324_v57 = vld [vmem:[%s14586_s30 + $0x804] sm:$0xff]  ;;  %v328_v59 = vld [vmem:[%s14586_s30 + $0x84c] sm:$0xff] }
  0x30   : > { %323 = vst [vmem:[%s14591_s5 + $0x2a0] sm:$0xff] %v322_v56  ;;  %v326_v58 = vld [vmem:[%s14586_s30 + $0x828] sm:$0xff]  ;;  %325 = vst [vmem:[%s14591_s5 + $0x2ac] sm:$0xff] %v324_v57  ;;  %v330_v60 = vld [vmem:[%s14586_s30 + $0x870] sm:$0xff] }
  0x31   : > { %327 = vst [vmem:[%s14591_s5 + $0x2b8] sm:$0xff] %v326_v58  ;;  %329 = vst [vmem:[%s14591_s5 + $0x2c4] sm:$0xff] %v328_v59  ;;  %v332_v61 = vld [vmem:[%s14586_s30 + $0x894] sm:$0xff]  ;;  %v336_v63 = vld [vmem:[%s14586_s30 + $0x8dc] sm:$0xff] }
  0x32   : > { %v334_v62 = vld [vmem:[%s14586_s30 + $0x8b8] sm:$0xff]  ;;  %331 = vst [vmem:[%s14591_s5 + $0x2d0] sm:$0xff] %v330_v60  ;;  %333 = vst [vmem:[%s14591_s5 + $0x2dc] sm:$0xff] %v332_v61  ;;  %v338_v0 = vld [vmem:[%s14586_s30 + $0x900] sm:$0xff] }
  0x33   : > { %335 = vst [vmem:[%s14591_s5 + $0x2e8] sm:$0xff] %v334_v62  ;;  %v340_v1 = vld [vmem:[%s14586_s30 + $0x924] sm:$0xff]  ;;  %337 = vst [vmem:[%s14591_s5 + $0x2f4] sm:$0xff] %v336_v63  ;;  %v344_v3 = vld [vmem:[%s14586_s30 + $0x96c] sm:$0xff] }
  0x34   : > { %339 = vst [vmem:[%s14591_s5 + $0x300] sm:$0xff] %v338_v0  ;;  %341 = vst [vmem:[%s14591_s5 + $0x30c] sm:$0xff] %v340_v1  ;;  %v342_v2 = vld [vmem:[%s14586_s30 + $0x948] sm:$0xff]  ;;  %v346_v4 = vld [vmem:[%s14586_s30 + $0x990] sm:$0xff] }
  0x35   : > { %343 = vst [vmem:[%s14591_s5 + $0x318] sm:$0xff] %v342_v2  ;;  %345 = vst [vmem:[%s14591_s5 + $0x324] sm:$0xff] %v344_v3  ;;  %v348_v5 = vld [vmem:[%s14586_s30 + $0x9b4] sm:$0xff]  ;;  %v352_v7 = vld [vmem:[%s14586_s30 + $0x9fc] sm:$0xff] }
  0x36   : > { %347 = vst [vmem:[%s14591_s5 + $0x330] sm:$0xff] %v346_v4  ;;  %v350_v6 = vld [vmem:[%s14586_s30 + $0x9d8] sm:$0xff]  ;;  %349 = vst [vmem:[%s14591_s5 + $0x33c] sm:$0xff] %v348_v5  ;;  %v354_v8 = vld [vmem:[%s14586_s30 + $0xa20] sm:$0xff] }
  0x37   : > { %351 = vst [vmem:[%s14591_s5 + $0x348] sm:$0xff] %v350_v6  ;;  %353 = vst [vmem:[%s14591_s5 + $0x354] sm:$0xff] %v352_v7  ;;  %v356_v9 = vld [vmem:[%s14586_s30 + $0xa44] sm:$0xff]  ;;  %v360_v11 = vld [vmem:[%s14586_s30 + $0xa8c] sm:$0xff] }
  0x38   : > { %v358_v10 = vld [vmem:[%s14586_s30 + $0xa68] sm:$0xff]  ;;  %355 = vst [vmem:[%s14591_s5 + $0x360] sm:$0xff] %v354_v8  ;;  %357 = vst [vmem:[%s14591_s5 + $0x36c] sm:$0xff] %v356_v9  ;;  %v362_v12 = vld [vmem:[%s14586_s30 + $0xab0] sm:$0xff] }
  0x39   : > { %359 = vst [vmem:[%s14591_s5 + $0x378] sm:$0xff] %v358_v10  ;;  %v364_v13 = vld [vmem:[%s14586_s30 + $0xad4] sm:$0xff]  ;;  %361 = vst [vmem:[%s14591_s5 + $0x384] sm:$0xff] %v360_v11  ;;  %v368_v15 = vld [vmem:[%s14586_s30 + $0xb1c] sm:$0xff] }
  0x3a   : > { %363 = vst [vmem:[%s14591_s5 + $0x390] sm:$0xff] %v362_v12  ;;  %365 = vst [vmem:[%s14591_s5 + $0x39c] sm:$0xff] %v364_v13  ;;  %v366_v14 = vld [vmem:[%s14586_s30 + $0xaf8] sm:$0xff]  ;;  %v370_v16 = vld [vmem:[%s14586_s30 + $0xb40] sm:$0xff] }
  0x3b   : > { %367 = vst [vmem:[%s14591_s5 + $0x3a8] sm:$0xff] %v366_v14  ;;  %369 = vst [vmem:[%s14591_s5 + $0x3b4] sm:$0xff] %v368_v15  ;;  %v372_v17 = vld [vmem:[%s14586_s30 + $0xb64] sm:$0xff]  ;;  %v376_v19 = vld [vmem:[%s14586_s30 + $0xbac] sm:$0xff] }
  0x3c   : > { %371 = vst [vmem:[%s14591_s5 + $0x3c0] sm:$0xff] %v370_v16  ;;  %v374_v18 = vld [vmem:[%s14586_s30 + $0xb88] sm:$0xff]  ;;  %373 = vst [vmem:[%s14591_s5 + $0x3cc] sm:$0xff] %v372_v17  ;;  %v378_v20 = vld [vmem:[%s14586_s30 + $0xbd0] sm:$0xff] }
  0x3d   : > { %375 = vst [vmem:[%s14591_s5 + $0x3d8] sm:$0xff] %v374_v18  ;;  %377 = vst [vmem:[%s14591_s5 + $0x3e4] sm:$0xff] %v376_v19  ;;  %v380_v21 = vld [vmem:[%s14586_s30 + $0xbf4] sm:$0xff]  ;;  %v384_v23 = vld [vmem:[%s14586_s30 + $0xc3c] sm:$0xff] }
  0x3e   : > { %v382_v22 = vld [vmem:[%s14586_s30 + $0xc18] sm:$0xff]  ;;  %379 = vst [vmem:[%s14591_s5 + $0x3f0] sm:$0xff] %v378_v20  ;;  %381 = vst [vmem:[%s14591_s5 + $0x3fc] sm:$0xff] %v380_v21  ;;  %v386_v24 = vld [vmem:[%s14586_s30 + $0xc60] sm:$0xff] }
  0x3f   : > { %383 = vst [vmem:[%s14591_s5 + $0x408] sm:$0xff] %v382_v22  ;;  %v388_v25 = vld [vmem:[%s14586_s30 + $0xc84] sm:$0xff]  ;;  %385 = vst [vmem:[%s14591_s5 + $0x414] sm:$0xff] %v384_v23  ;;  %v392_v27 = vld [vmem:[%s14586_s30 + $0xccc] sm:$0xff] }
  0x40   : > { %387 = vst [vmem:[%s14591_s5 + $0x420] sm:$0xff] %v386_v24  ;;  %389 = vst [vmem:[%s14591_s5 + $0x42c] sm:$0xff] %v388_v25  ;;  %v390_v26 = vld [vmem:[%s14586_s30 + $0xca8] sm:$0xff]  ;;  %v394_v28 = vld [vmem:[%s14586_s30 + $0xcf0] sm:$0xff] }
  0x41   : > { %391 = vst [vmem:[%s14591_s5 + $0x438] sm:$0xff] %v390_v26  ;;  %393 = vst [vmem:[%s14591_s5 + $0x444] sm:$0xff] %v392_v27  ;;  %v396_v29 = vld [vmem:[%s14586_s30 + $0xd14] sm:$0xff]  ;;  %v400_v31 = vld [vmem:[%s14586_s30 + $0xd5c] sm:$0xff] }
  0x42   : > { %395 = vst [vmem:[%s14591_s5 + $0x450] sm:$0xff] %v394_v28  ;;  %v398_v30 = vld [vmem:[%s14586_s30 + $0xd38] sm:$0xff]  ;;  %397 = vst [vmem:[%s14591_s5 + $0x45c] sm:$0xff] %v396_v29  ;;  %v402_v32 = vld [vmem:[%s14586_s30 + $0xd80] sm:$0xff] }
  0x43   : > { %399 = vst [vmem:[%s14591_s5 + $0x468] sm:$0xff] %v398_v30  ;;  %401 = vst [vmem:[%s14591_s5 + $0x474] sm:$0xff] %v400_v31  ;;  %v404_v33 = vld [vmem:[%s14586_s30 + $0xda4] sm:$0xff]  ;;  %v408_v35 = vld [vmem:[%s14586_s30 + $0xdec] sm:$0xff] }
  0x44   : > { %v406_v34 = vld [vmem:[%s14586_s30 + $0xdc8] sm:$0xff]  ;;  %403 = vst [vmem:[%s14591_s5 + $0x480] sm:$0xff] %v402_v32  ;;  %405 = vst [vmem:[%s14591_s5 + $0x48c] sm:$0xff] %v404_v33  ;;  %v410_v36 = vld [vmem:[%s14586_s30 + $0xe10] sm:$0xff] }
  0x45   : > { %407 = vst [vmem:[%s14591_s5 + $0x498] sm:$0xff] %v406_v34  ;;  %v412_v37 = vld [vmem:[%s14586_s30 + $0xe34] sm:$0xff]  ;;  %409 = vst [vmem:[%s14591_s5 + $0x4a4] sm:$0xff] %v408_v35  ;;  %v416_v39 = vld [vmem:[%s14586_s30 + $0xe7c] sm:$0xff] }
  0x46   : > { %411 = vst [vmem:[%s14591_s5 + $0x4b0] sm:$0xff] %v410_v36  ;;  %413 = vst [vmem:[%s14591_s5 + $0x4bc] sm:$0xff] %v412_v37  ;;  %v414_v38 = vld [vmem:[%s14586_s30 + $0xe58] sm:$0xff]  ;;  %v418_v40 = vld [vmem:[%s14586_s30 + $0xea0] sm:$0xff] }
  0x47   : > { %415 = vst [vmem:[%s14591_s5 + $0x4c8] sm:$0xff] %v414_v38  ;;  %417 = vst [vmem:[%s14591_s5 + $0x4d4] sm:$0xff] %v416_v39  ;;  %v420_v41 = vld [vmem:[%s14586_s30 + $0xec4] sm:$0xff]  ;;  %v424_v43 = vld [vmem:[%s14586_s30 + $0xf0c] sm:$0xff] }
  0x48   : > { %419 = vst [vmem:[%s14591_s5 + $0x4e0] sm:$0xff] %v418_v40  ;;  %v422_v42 = vld [vmem:[%s14586_s30 + $0xee8] sm:$0xff]  ;;  %421 = vst [vmem:[%s14591_s5 + $0x4ec] sm:$0xff] %v420_v41  ;;  %v426_v44 = vld [vmem:[%s14586_s30 + $0xf30] sm:$0xff] }
  0x49   : > { %423 = vst [vmem:[%s14591_s5 + $0x4f8] sm:$0xff] %v422_v42  ;;  %425 = vst [vmem:[%s14591_s5 + $0x504] sm:$0xff] %v424_v43  ;;  %v428_v45 = vld [vmem:[%s14586_s30 + $0xf54] sm:$0xff]  ;;  %v432_v47 = vld [vmem:[%s14586_s30 + $0xf9c] sm:$0xff] }
  0x4a   : > { %v430_v46 = vld [vmem:[%s14586_s30 + $0xf78] sm:$0xff]  ;;  %427 = vst [vmem:[%s14591_s5 + $0x510] sm:$0xff] %v426_v44  ;;  %429 = vst [vmem:[%s14591_s5 + $0x51c] sm:$0xff] %v428_v45  ;;  %v434_v48 = vld [vmem:[%s14586_s30 + $0xfc0] sm:$0xff] }
  0x4b   : > { %431 = vst [vmem:[%s14591_s5 + $0x528] sm:$0xff] %v430_v46  ;;  %v436_v49 = vld [vmem:[%s14586_s30 + $0xfe4] sm:$0xff]  ;;  %433 = vst [vmem:[%s14591_s5 + $0x534] sm:$0xff] %v432_v47  ;;  %v440_v51 = vld [vmem:[%s14586_s30 + $0x102c] sm:$0xff] }
  0x4c   : > { %435 = vst [vmem:[%s14591_s5 + $0x540] sm:$0xff] %v434_v48  ;;  %437 = vst [vmem:[%s14591_s5 + $0x54c] sm:$0xff] %v436_v49  ;;  %v438_v50 = vld [vmem:[%s14586_s30 + $0x1008] sm:$0xff]  ;;  %v442_v52 = vld [vmem:[%s14586_s30 + $0x1050] sm:$0xff] }
  0x4d   : > { %439 = vst [vmem:[%s14591_s5 + $0x558] sm:$0xff] %v438_v50  ;;  %441 = vst [vmem:[%s14591_s5 + $0x564] sm:$0xff] %v440_v51  ;;  %v444_v53 = vld [vmem:[%s14586_s30 + $0x1074] sm:$0xff]  ;;  %v448_v55 = vld [vmem:[%s14586_s30 + $0x10bc] sm:$0xff] }
  0x4e   : > { %443 = vst [vmem:[%s14591_s5 + $0x570] sm:$0xff] %v442_v52  ;;  %v446_v54 = vld [vmem:[%s14586_s30 + $0x1098] sm:$0xff]  ;;  %445 = vst [vmem:[%s14591_s5 + $0x57c] sm:$0xff] %v444_v53  ;;  %v450_v56 = vld [vmem:[%s14586_s30 + $0x10e0] sm:$0xff] }
  0x4f   : > { %447 = vst [vmem:[%s14591_s5 + $0x588] sm:$0xff] %v446_v54  ;;  %449 = vst [vmem:[%s14591_s5 + $0x594] sm:$0xff] %v448_v55  ;;  %v452_v57 = vld [vmem:[%s14586_s30 + $0x1104] sm:$0xff]  ;;  %v456_v59 = vld [vmem:[%s14586_s30 + $0x114c] sm:$0xff] }
  0x50   : > { %v454_v58 = vld [vmem:[%s14586_s30 + $0x1128] sm:$0xff]  ;;  %451 = vst [vmem:[%s14591_s5 + $0x5a0] sm:$0xff] %v450_v56  ;;  %453 = vst [vmem:[%s14591_s5 + $0x5ac] sm:$0xff] %v452_v57  ;;  %v458_v60 = vld [vmem:[%s14586_s30 + $0x1170] sm:$0xff] }
  0x51   : > { %455 = vst [vmem:[%s14591_s5 + $0x5b8] sm:$0xff] %v454_v58  ;;  %v460_v61 = vld [vmem:[%s14586_s30 + $0x1194] sm:$0xff]  ;;  %457 = vst [vmem:[%s14591_s5 + $0x5c4] sm:$0xff] %v456_v59  ;;  %v464_v63 = vld [vmem:[%s14586_s30 + $0x11dc] sm:$0xff] }
  0x52   : > { %459 = vst [vmem:[%s14591_s5 + $0x5d0] sm:$0xff] %v458_v60  ;;  %461 = vst [vmem:[%s14591_s5 + $0x5dc] sm:$0xff] %v460_v61  ;;  %v462_v62 = vld [vmem:[%s14586_s30 + $0x11b8] sm:$0xff]  ;;  %v466_v0 = vld [vmem:[%s14586_s30 + $0x1200] sm:$0xff] }
  0x53   : > { %463 = vst [vmem:[%s14591_s5 + $0x5e8] sm:$0xff] %v462_v62  ;;  %465 = vst [vmem:[%s14591_s5 + $0x5f4] sm:$0xff] %v464_v63  ;;  %v468_v1 = vld [vmem:[%s14586_s30 + $0x1224] sm:$0xff]  ;;  %v472_v3 = vld [vmem:[%s14586_s30 + $0x126c] sm:$0xff] }
  0x54   : > { %467 = vst [vmem:[%s14591_s5 + $0x600] sm:$0xff] %v466_v0  ;;  %v470_v2 = vld [vmem:[%s14586_s30 + $0x1248] sm:$0xff]  ;;  %469 = vst [vmem:[%s14591_s5 + $0x60c] sm:$0xff] %v468_v1  ;;  %v474_v4 = vld [vmem:[%s14586_s30 + $0x1290] sm:$0xff] }
  0x55   : > { %471 = vst [vmem:[%s14591_s5 + $0x618] sm:$0xff] %v470_v2  ;;  %473 = vst [vmem:[%s14591_s5 + $0x624] sm:$0xff] %v472_v3  ;;  %v476_v5 = vld [vmem:[%s14586_s30 + $0x12b4] sm:$0xff]  ;;  %v480_v7 = vld [vmem:[%s14586_s30 + $0x12fc] sm:$0xff] }
  0x56   : > { %v478_v6 = vld [vmem:[%s14586_s30 + $0x12d8] sm:$0xff]  ;;  %475 = vst [vmem:[%s14591_s5 + $0x630] sm:$0xff] %v474_v4  ;;  %477 = vst [vmem:[%s14591_s5 + $0x63c] sm:$0xff] %v476_v5  ;;  %v482_v8 = vld [vmem:[%s14586_s30 + $0x1320] sm:$0xff] }
  0x57   : > { %479 = vst [vmem:[%s14591_s5 + $0x648] sm:$0xff] %v478_v6  ;;  %v484_v9 = vld [vmem:[%s14586_s30 + $0x1344] sm:$0xff]  ;;  %481 = vst [vmem:[%s14591_s5 + $0x654] sm:$0xff] %v480_v7  ;;  %v488_v11 = vld [vmem:[%s14586_s30 + $0x138c] sm:$0xff] }
  0x58   : > { %483 = vst [vmem:[%s14591_s5 + $0x660] sm:$0xff] %v482_v8  ;;  %485 = vst [vmem:[%s14591_s5 + $0x66c] sm:$0xff] %v484_v9  ;;  %v486_v10 = vld [vmem:[%s14586_s30 + $0x1368] sm:$0xff]  ;;  %v490_v12 = vld [vmem:[%s14586_s30 + $0x13b0] sm:$0xff] }
  0x59   : > { %487 = vst [vmem:[%s14591_s5 + $0x678] sm:$0xff] %v486_v10  ;;  %489 = vst [vmem:[%s14591_s5 + $0x684] sm:$0xff] %v488_v11  ;;  %v492_v13 = vld [vmem:[%s14586_s30 + $0x13d4] sm:$0xff]  ;;  %v496_v15 = vld [vmem:[%s14586_s30 + $0x141c] sm:$0xff] }
  0x5a   : > { %491 = vst [vmem:[%s14591_s5 + $0x690] sm:$0xff] %v490_v12  ;;  %v494_v14 = vld [vmem:[%s14586_s30 + $0x13f8] sm:$0xff]  ;;  %493 = vst [vmem:[%s14591_s5 + $0x69c] sm:$0xff] %v492_v13  ;;  %v498_v16 = vld [vmem:[%s14586_s30 + $0x1440] sm:$0xff] }
  0x5b   : > { %495 = vst [vmem:[%s14591_s5 + $0x6a8] sm:$0xff] %v494_v14  ;;  %497 = vst [vmem:[%s14591_s5 + $0x6b4] sm:$0xff] %v496_v15  ;;  %v500_v17 = vld [vmem:[%s14586_s30 + $0x1464] sm:$0xff]  ;;  %v504_v19 = vld [vmem:[%s14586_s30 + $0x14ac] sm:$0xff] }
  0x5c   : > { %v502_v18 = vld [vmem:[%s14586_s30 + $0x1488] sm:$0xff]  ;;  %499 = vst [vmem:[%s14591_s5 + $0x6c0] sm:$0xff] %v498_v16  ;;  %501 = vst [vmem:[%s14591_s5 + $0x6cc] sm:$0xff] %v500_v17  ;;  %v506_v20 = vld [vmem:[%s14586_s30 + $0x14d0] sm:$0xff] }
  0x5d   : > { %503 = vst [vmem:[%s14591_s5 + $0x6d8] sm:$0xff] %v502_v18  ;;  %v508_v21 = vld [vmem:[%s14586_s30 + $0x14f4] sm:$0xff]  ;;  %505 = vst [vmem:[%s14591_s5 + $0x6e4] sm:$0xff] %v504_v19  ;;  %v512_v23 = vld [vmem:[%s14586_s30 + $0x153c] sm:$0xff] }
  0x5e   : > { %507 = vst [vmem:[%s14591_s5 + $0x6f0] sm:$0xff] %v506_v20  ;;  %509 = vst [vmem:[%s14591_s5 + $0x6fc] sm:$0xff] %v508_v21  ;;  %v510_v22 = vld [vmem:[%s14586_s30 + $0x1518] sm:$0xff]  ;;  %v514_v24 = vld [vmem:[%s14586_s30 + $0x1560] sm:$0xff] }
  0x5f   : > { %511 = vst [vmem:[%s14591_s5 + $0x708] sm:$0xff] %v510_v22  ;;  %513 = vst [vmem:[%s14591_s5 + $0x714] sm:$0xff] %v512_v23  ;;  %v516_v25 = vld [vmem:[%s14586_s30 + $0x1584] sm:$0xff]  ;;  %v520_v27 = vld [vmem:[%s14586_s30 + $0x15cc] sm:$0xff] }
  0x60   : > { %515 = vst [vmem:[%s14591_s5 + $0x720] sm:$0xff] %v514_v24  ;;  %v518_v26 = vld [vmem:[%s14586_s30 + $0x15a8] sm:$0xff]  ;;  %517 = vst [vmem:[%s14591_s5 + $0x72c] sm:$0xff] %v516_v25  ;;  %v522_v28 = vld [vmem:[%s14586_s30 + $0x15f0] sm:$0xff] }
  0x61   : > { %519 = vst [vmem:[%s14591_s5 + $0x738] sm:$0xff] %v518_v26  ;;  %521 = vst [vmem:[%s14591_s5 + $0x744] sm:$0xff] %v520_v27  ;;  %v524_v29 = vld [vmem:[%s14586_s30 + $0x1614] sm:$0xff]  ;;  %v528_v31 = vld [vmem:[%s14586_s30 + $0x165c] sm:$0xff] }
  0x62   : > { %v526_v30 = vld [vmem:[%s14586_s30 + $0x1638] sm:$0xff]  ;;  %523 = vst [vmem:[%s14591_s5 + $0x750] sm:$0xff] %v522_v28  ;;  %525 = vst [vmem:[%s14591_s5 + $0x75c] sm:$0xff] %v524_v29  ;;  %v530_v32 = vld [vmem:[%s14586_s30 + $0x1680] sm:$0xff] }
  0x63   : > { %527 = vst [vmem:[%s14591_s5 + $0x768] sm:$0xff] %v526_v30  ;;  %v532_v33 = vld [vmem:[%s14586_s30 + $0x16a4] sm:$0xff]  ;;  %529 = vst [vmem:[%s14591_s5 + $0x774] sm:$0xff] %v528_v31  ;;  %v536_v35 = vld [vmem:[%s14586_s30 + $0x16ec] sm:$0xff] }
  0x64   : > { %531 = vst [vmem:[%s14591_s5 + $0x780] sm:$0xff] %v530_v32  ;;  %533 = vst [vmem:[%s14591_s5 + $0x78c] sm:$0xff] %v532_v33  ;;  %v534_v34 = vld [vmem:[%s14586_s30 + $0x16c8] sm:$0xff]  ;;  %v538_v36 = vld [vmem:[%s14586_s30 + $0x1710] sm:$0xff] }
  0x65   : > { %535 = vst [vmem:[%s14591_s5 + $0x798] sm:$0xff] %v534_v34  ;;  %537 = vst [vmem:[%s14591_s5 + $0x7a4] sm:$0xff] %v536_v35  ;;  %v540_v37 = vld [vmem:[%s14586_s30 + $0x1734] sm:$0xff]  ;;  %v544_v39 = vld [vmem:[%s14586_s30 + $0x177c] sm:$0xff] }
  0x66   : > { %539 = vst [vmem:[%s14591_s5 + $0x7b0] sm:$0xff] %v538_v36  ;;  %v542_v38 = vld [vmem:[%s14586_s30 + $0x1758] sm:$0xff]  ;;  %541 = vst [vmem:[%s14591_s5 + $0x7bc] sm:$0xff] %v540_v37  ;;  %v546_v40 = vld [vmem:[%s14586_s30 + $0x17a0] sm:$0xff] }
  0x67   : > { %543 = vst [vmem:[%s14591_s5 + $0x7c8] sm:$0xff] %v542_v38  ;;  %545 = vst [vmem:[%s14591_s5 + $0x7d4] sm:$0xff] %v544_v39  ;;  %v548_v41 = vld [vmem:[%s14586_s30 + $0x17c4] sm:$0xff]  ;;  %v552_v43 = vld [vmem:[%s14586_s30 + $0x180c] sm:$0xff] }
  0x68   : > { %v550_v42 = vld [vmem:[%s14586_s30 + $0x17e8] sm:$0xff]  ;;  %547 = vst [vmem:[%s14591_s5 + $0x7e0] sm:$0xff] %v546_v40  ;;  %549 = vst [vmem:[%s14591_s5 + $0x7ec] sm:$0xff] %v548_v41  ;;  %v554_v44 = vld [vmem:[%s14586_s30 + $0x1830] sm:$0xff] }
  0x69   : > { %551 = vst [vmem:[%s14591_s5 + $0x7f8] sm:$0xff] %v550_v42  ;;  %v556_v45 = vld [vmem:[%s14586_s30 + $0x1854] sm:$0xff]  ;;  %553 = vst [vmem:[%s14591_s5 + $0x804] sm:$0xff] %v552_v43  ;;  %v560_v47 = vld [vmem:[%s14586_s30 + $0x189c] sm:$0xff] }
  0x6a   : > { %555 = vst [vmem:[%s14591_s5 + $0x810] sm:$0xff] %v554_v44  ;;  %557 = vst [vmem:[%s14591_s5 + $0x81c] sm:$0xff] %v556_v45  ;;  %v558_v46 = vld [vmem:[%s14586_s30 + $0x1878] sm:$0xff]  ;;  %v562_v48 = vld [vmem:[%s14586_s30 + $0x18c0] sm:$0xff] }
  0x6b   : > { %559 = vst [vmem:[%s14591_s5 + $0x828] sm:$0xff] %v558_v46  ;;  %561 = vst [vmem:[%s14591_s5 + $0x834] sm:$0xff] %v560_v47  ;;  %v564_v49 = vld [vmem:[%s14586_s30 + $0x18e4] sm:$0xff]  ;;  %v568_v51 = vld [vmem:[%s14586_s30 + $0x192c] sm:$0xff] }
  0x6c   : > { %563 = vst [vmem:[%s14591_s5 + $0x840] sm:$0xff] %v562_v48  ;;  %v566_v50 = vld [vmem:[%s14586_s30 + $0x1908] sm:$0xff]  ;;  %565 = vst [vmem:[%s14591_s5 + $0x84c] sm:$0xff] %v564_v49  ;;  %v570_v52 = vld [vmem:[%s14586_s30 + $0x1950] sm:$0xff] }
  0x6d   : > { %567 = vst [vmem:[%s14591_s5 + $0x858] sm:$0xff] %v566_v50  ;;  %569 = vst [vmem:[%s14591_s5 + $0x864] sm:$0xff] %v568_v51  ;;  %v572_v53 = vld [vmem:[%s14586_s30 + $0x1974] sm:$0xff]  ;;  %v576_v55 = vld [vmem:[%s14586_s30 + $0x19bc] sm:$0xff] }
  0x6e   : > { %v574_v54 = vld [vmem:[%s14586_s30 + $0x1998] sm:$0xff]  ;;  %571 = vst [vmem:[%s14591_s5 + $0x870] sm:$0xff] %v570_v52  ;;  %573 = vst [vmem:[%s14591_s5 + $0x87c] sm:$0xff] %v572_v53  ;;  %v578_v56 = vld [vmem:[%s14586_s30 + $0x19e0] sm:$0xff] }
  0x6f   : > { %575 = vst [vmem:[%s14591_s5 + $0x888] sm:$0xff] %v574_v54  ;;  %v580_v57 = vld [vmem:[%s14586_s30 + $0x1a04] sm:$0xff]  ;;  %577 = vst [vmem:[%s14591_s5 + $0x894] sm:$0xff] %v576_v55  ;;  %v584_v59 = vld [vmem:[%s14586_s30 + $0x1a4c] sm:$0xff] }
  0x70   : > { %579 = vst [vmem:[%s14591_s5 + $0x8a0] sm:$0xff] %v578_v56  ;;  %581 = vst [vmem:[%s14591_s5 + $0x8ac] sm:$0xff] %v580_v57  ;;  %v582_v58 = vld [vmem:[%s14586_s30 + $0x1a28] sm:$0xff]  ;;  %v586_v60 = vld [vmem:[%s14586_s30 + $0x1a70] sm:$0xff] }
  0x71   : > { %583 = vst [vmem:[%s14591_s5 + $0x8b8] sm:$0xff] %v582_v58  ;;  %585 = vst [vmem:[%s14591_s5 + $0x8c4] sm:$0xff] %v584_v59  ;;  %v588_v61 = vld [vmem:[%s14586_s30 + $0x1a94] sm:$0xff]  ;;  %v592_v63 = vld [vmem:[%s14586_s30 + $0x1adc] sm:$0xff] }
  0x72   : > { %587 = vst [vmem:[%s14591_s5 + $0x8d0] sm:$0xff] %v586_v60  ;;  %v590_v62 = vld [vmem:[%s14586_s30 + $0x1ab8] sm:$0xff]  ;;  %589 = vst [vmem:[%s14591_s5 + $0x8dc] sm:$0xff] %v588_v61  ;;  %v594_v0 = vld [vmem:[%s14586_s30 + $0x1b00] sm:$0xff] }
  0x73   : > { %591 = vst [vmem:[%s14591_s5 + $0x8e8] sm:$0xff] %v590_v62  ;;  %593 = vst [vmem:[%s14591_s5 + $0x8f4] sm:$0xff] %v592_v63  ;;  %v596_v1 = vld [vmem:[%s14586_s30 + $0x1b24] sm:$0xff]  ;;  %v600_v3 = vld [vmem:[%s14586_s30 + $0x1b6c] sm:$0xff] }
  0x74   : > { %v598_v2 = vld [vmem:[%s14586_s30 + $0x1b48] sm:$0xff]  ;;  %595 = vst [vmem:[%s14591_s5 + $0x900] sm:$0xff] %v594_v0  ;;  %597 = vst [vmem:[%s14591_s5 + $0x90c] sm:$0xff] %v596_v1  ;;  %v602_v4 = vld [vmem:[%s14586_s30 + $0x1b90] sm:$0xff] }
  0x75   : > { %599 = vst [vmem:[%s14591_s5 + $0x918] sm:$0xff] %v598_v2  ;;  %v604_v5 = vld [vmem:[%s14586_s30 + $0x1bb4] sm:$0xff]  ;;  %601 = vst [vmem:[%s14591_s5 + $0x924] sm:$0xff] %v600_v3  ;;  %v608_v7 = vld [vmem:[%s14586_s30 + $0x1bfc] sm:$0xff] }
  0x76   : > { %603 = vst [vmem:[%s14591_s5 + $0x930] sm:$0xff] %v602_v4  ;;  %605 = vst [vmem:[%s14591_s5 + $0x93c] sm:$0xff] %v604_v5  ;;  %v606_v6 = vld [vmem:[%s14586_s30 + $0x1bd8] sm:$0xff]  ;;  %v610_v8 = vld [vmem:[%s14586_s30 + $0x1c20] sm:$0xff] }
  0x77   : > { %607 = vst [vmem:[%s14591_s5 + $0x948] sm:$0xff] %v606_v6  ;;  %609 = vst [vmem:[%s14591_s5 + $0x954] sm:$0xff] %v608_v7  ;;  %v612_v9 = vld [vmem:[%s14586_s30 + $0x1c44] sm:$0xff]  ;;  %v616_v11 = vld [vmem:[%s14586_s30 + $0x1c8c] sm:$0xff] }
  0x78   : > { %611 = vst [vmem:[%s14591_s5 + $0x960] sm:$0xff] %v610_v8  ;;  %v614_v10 = vld [vmem:[%s14586_s30 + $0x1c68] sm:$0xff]  ;;  %613 = vst [vmem:[%s14591_s5 + $0x96c] sm:$0xff] %v612_v9  ;;  %v618_v12 = vld [vmem:[%s14586_s30 + $0x1cb0] sm:$0xff] }
  0x79   : > { %615 = vst [vmem:[%s14591_s5 + $0x978] sm:$0xff] %v614_v10  ;;  %617 = vst [vmem:[%s14591_s5 + $0x984] sm:$0xff] %v616_v11  ;;  %v620_v13 = vld [vmem:[%s14586_s30 + $0x1cd4] sm:$0xff]  ;;  %v624_v15 = vld [vmem:[%s14586_s30 + $0x1d1c] sm:$0xff] }
  0x7a   : > { %v622_v14 = vld [vmem:[%s14586_s30 + $0x1cf8] sm:$0xff]  ;;  %619 = vst [vmem:[%s14591_s5 + $0x990] sm:$0xff] %v618_v12  ;;  %621 = vst [vmem:[%s14591_s5 + $0x99c] sm:$0xff] %v620_v13  ;;  %v626_v16 = vld [vmem:[%s14586_s30 + $0x1d40] sm:$0xff] }
  0x7b   : > { %623 = vst [vmem:[%s14591_s5 + $0x9a8] sm:$0xff] %v622_v14  ;;  %v628_v17 = vld [vmem:[%s14586_s30 + $0x1d64] sm:$0xff]  ;;  %625 = vst [vmem:[%s14591_s5 + $0x9b4] sm:$0xff] %v624_v15  ;;  %v632_v19 = vld [vmem:[%s14586_s30 + $0x1dac] sm:$0xff] }
  0x7c   : > { %627 = vst [vmem:[%s14591_s5 + $0x9c0] sm:$0xff] %v626_v16  ;;  %629 = vst [vmem:[%s14591_s5 + $0x9cc] sm:$0xff] %v628_v17  ;;  %v630_v18 = vld [vmem:[%s14586_s30 + $0x1d88] sm:$0xff]  ;;  %v634_v20 = vld [vmem:[%s14586_s30 + $0x1dd0] sm:$0xff] }
  0x7d   : > { %631 = vst [vmem:[%s14591_s5 + $0x9d8] sm:$0xff] %v630_v18  ;;  %633 = vst [vmem:[%s14591_s5 + $0x9e4] sm:$0xff] %v632_v19  ;;  %v636_v21 = vld [vmem:[%s14586_s30 + $0x1df4] sm:$0xff]  ;;  %v640_v23 = vld [vmem:[%s14586_s30 + $0x1e3c] sm:$0xff] }
  0x7e   : > { %635 = vst [vmem:[%s14591_s5 + $0x9f0] sm:$0xff] %v634_v20  ;;  %v638_v22 = vld [vmem:[%s14586_s30 + $0x1e18] sm:$0xff]  ;;  %637 = vst [vmem:[%s14591_s5 + $0x9fc] sm:$0xff] %v636_v21  ;;  %v642_v24 = vld [vmem:[%s14586_s30 + $0x1e60] sm:$0xff] }
  0x7f   : > { %639 = vst [vmem:[%s14591_s5 + $0xa08] sm:$0xff] %v638_v22  ;;  %641 = vst [vmem:[%s14591_s5 + $0xa14] sm:$0xff] %v640_v23  ;;  %v644_v25 = vld [vmem:[%s14586_s30 + $0x1e84] sm:$0xff]  ;;  %v648_v27 = vld [vmem:[%s14586_s30 + $0x1ecc] sm:$0xff] }
  0x80   : > { %v646_v26 = vld [vmem:[%s14586_s30 + $0x1ea8] sm:$0xff]  ;;  %643 = vst [vmem:[%s14591_s5 + $0xa20] sm:$0xff] %v642_v24  ;;  %645 = vst [vmem:[%s14591_s5 + $0xa2c] sm:$0xff] %v644_v25  ;;  %v650_v28 = vld [vmem:[%s14586_s30 + $0x1ef0] sm:$0xff] }
  0x81   : > { %647 = vst [vmem:[%s14591_s5 + $0xa38] sm:$0xff] %v646_v26  ;;  %v652_v29 = vld [vmem:[%s14586_s30 + $0x1f14] sm:$0xff]  ;;  %649 = vst [vmem:[%s14591_s5 + $0xa44] sm:$0xff] %v648_v27  ;;  %v656_v31 = vld [vmem:[%s14586_s30 + $0x1f5c] sm:$0xff] }
  0x82   : > { %651 = vst [vmem:[%s14591_s5 + $0xa50] sm:$0xff] %v650_v28  ;;  %653 = vst [vmem:[%s14591_s5 + $0xa5c] sm:$0xff] %v652_v29  ;;  %v654_v30 = vld [vmem:[%s14586_s30 + $0x1f38] sm:$0xff]  ;;  %v658_v32 = vld [vmem:[%s14586_s30 + $0x1f80] sm:$0xff] }
  0x83   : > { %655 = vst [vmem:[%s14591_s5 + $0xa68] sm:$0xff] %v654_v30  ;;  %657 = vst [vmem:[%s14591_s5 + $0xa74] sm:$0xff] %v656_v31  ;;  %v660_v33 = vld [vmem:[%s14586_s30 + $0x1fa4] sm:$0xff]  ;;  %v664_v35 = vld [vmem:[%s14586_s30 + $0x1fec] sm:$0xff] }
  0x84   : > { %659 = vst [vmem:[%s14591_s5 + $0xa80] sm:$0xff] %v658_v32  ;;  %v662_v34 = vld [vmem:[%s14586_s30 + $0x1fc8] sm:$0xff]  ;;  %661 = vst [vmem:[%s14591_s5 + $0xa8c] sm:$0xff] %v660_v33  ;;  %v666_v36 = vld [vmem:[%s14586_s30 + $0x2010] sm:$0xff] }
  0x85   : > { %663 = vst [vmem:[%s14591_s5 + $0xa98] sm:$0xff] %v662_v34  ;;  %665 = vst [vmem:[%s14591_s5 + $0xaa4] sm:$0xff] %v664_v35  ;;  %v668_v37 = vld [vmem:[%s14586_s30 + $0x2034] sm:$0xff]  ;;  %v672_v39 = vld [vmem:[%s14586_s30 + $0x207c] sm:$0xff] }
  0x86   : > { %v670_v38 = vld [vmem:[%s14586_s30 + $0x2058] sm:$0xff]  ;;  %667 = vst [vmem:[%s14591_s5 + $0xab0] sm:$0xff] %v666_v36  ;;  %669 = vst [vmem:[%s14591_s5 + $0xabc] sm:$0xff] %v668_v37  ;;  %v674_v40 = vld [vmem:[%s14586_s30 + $0x20a0] sm:$0xff] }
  0x87   : > { %671 = vst [vmem:[%s14591_s5 + $0xac8] sm:$0xff] %v670_v38  ;;  %v676_v41 = vld [vmem:[%s14586_s30 + $0x20c4] sm:$0xff]  ;;  %673 = vst [vmem:[%s14591_s5 + $0xad4] sm:$0xff] %v672_v39  ;;  %v680_v43 = vld [vmem:[%s14586_s30 + $0x210c] sm:$0xff] }
  0x88   : > { %675 = vst [vmem:[%s14591_s5 + $0xae0] sm:$0xff] %v674_v40  ;;  %677 = vst [vmem:[%s14591_s5 + $0xaec] sm:$0xff] %v676_v41  ;;  %v678_v42 = vld [vmem:[%s14586_s30 + $0x20e8] sm:$0xff]  ;;  %v682_v44 = vld [vmem:[%s14586_s30 + $0x2130] sm:$0xff] }
  0x89   : > { %679 = vst [vmem:[%s14591_s5 + $0xaf8] sm:$0xff] %v678_v42  ;;  %681 = vst [vmem:[%s14591_s5 + $0xb04] sm:$0xff] %v680_v43  ;;  %v684_v45 = vld [vmem:[%s14586_s30 + $0x2154] sm:$0xff]  ;;  %v688_v47 = vld [vmem:[%s14586_s30 + $0x219c] sm:$0xff] }
  0x8a   : > { %683 = vst [vmem:[%s14591_s5 + $0xb10] sm:$0xff] %v682_v44  ;;  %v686_v46 = vld [vmem:[%s14586_s30 + $0x2178] sm:$0xff]  ;;  %685 = vst [vmem:[%s14591_s5 + $0xb1c] sm:$0xff] %v684_v45  ;;  %v690_v48 = vld [vmem:[%s14586_s30 + $0x21c0] sm:$0xff] }
  0x8b   : > { %687 = vst [vmem:[%s14591_s5 + $0xb28] sm:$0xff] %v686_v46  ;;  %689 = vst [vmem:[%s14591_s5 + $0xb34] sm:$0xff] %v688_v47  ;;  %v692_v49 = vld [vmem:[%s14586_s30 + $0x21e4] sm:$0xff]  ;;  %v696_v51 = vld [vmem:[%s14586_s30 + $0x222c] sm:$0xff] }
  0x8c   : > { %v694_v50 = vld [vmem:[%s14586_s30 + $0x2208] sm:$0xff]  ;;  %691 = vst [vmem:[%s14591_s5 + $0xb40] sm:$0xff] %v690_v48  ;;  %693 = vst [vmem:[%s14591_s5 + $0xb4c] sm:$0xff] %v692_v49  ;;  %v698_v52 = vld [vmem:[%s14586_s30 + $0x2250] sm:$0xff] }
  0x8d   : > { %695 = vst [vmem:[%s14591_s5 + $0xb58] sm:$0xff] %v694_v50  ;;  %v700_v53 = vld [vmem:[%s14586_s30 + $0x2274] sm:$0xff]  ;;  %697 = vst [vmem:[%s14591_s5 + $0xb64] sm:$0xff] %v696_v51  ;;  %v704_v55 = vld [vmem:[%s14586_s30 + $0x22bc] sm:$0xff] }
  0x8e   : > { %699 = vst [vmem:[%s14591_s5 + $0xb70] sm:$0xff] %v698_v52  ;;  %701 = vst [vmem:[%s14591_s5 + $0xb7c] sm:$0xff] %v700_v53  ;;  %v702_v54 = vld [vmem:[%s14586_s30 + $0x2298] sm:$0xff]  ;;  %v706_v56 = vld [vmem:[%s14586_s30 + $0x22e0] sm:$0xff] }
  0x8f   : > { %703 = vst [vmem:[%s14591_s5 + $0xb88] sm:$0xff] %v702_v54  ;;  %705 = vst [vmem:[%s14591_s5 + $0xb94] sm:$0xff] %v704_v55  ;;  %v708_v57 = vld [vmem:[%s14586_s30 + $0x2304] sm:$0xff]  ;;  %v712_v59 = vld [vmem:[%s14586_s30 + $0x234c] sm:$0xff] }
  0x90   : > { %707 = vst [vmem:[%s14591_s5 + $0xba0] sm:$0xff] %v706_v56  ;;  %v710_v58 = vld [vmem:[%s14586_s30 + $0x2328] sm:$0xff]  ;;  %709 = vst [vmem:[%s14591_s5 + $0xbac] sm:$0xff] %v708_v57  ;;  %v714_v60 = vld [vmem:[%s14586_s30 + $0x2370] sm:$0xff] }
  0x91   : > { %711 = vst [vmem:[%s14591_s5 + $0xbb8] sm:$0xff] %v710_v58  ;;  %713 = vst [vmem:[%s14591_s5 + $0xbc4] sm:$0xff] %v712_v59  ;;  %v716_v61 = vld [vmem:[%s14586_s30 + $0x2394] sm:$0xff]  ;;  %v720_v63 = vld [vmem:[%s14586_s30 + $0x23dc] sm:$0xff] }
  0x92   : > { %v718_v62 = vld [vmem:[%s14586_s30 + $0x23b8] sm:$0xff]  ;;  %715 = vst [vmem:[%s14591_s5 + $0xbd0] sm:$0xff] %v714_v60  ;;  %717 = vst [vmem:[%s14591_s5 + $0xbdc] sm:$0xff] %v716_v61  ;;  %v10947_v0 = vld [vmem:[%s14586_s30 + $0x8] sm:$0xf] }
  0x93   : > { %719 = vst [vmem:[%s14591_s5 + $0xbe8] sm:$0xff] %v718_v62  ;;  %v10949_v1 = vld [vmem:[%s14586_s30 + $0x2c] sm:$0xf]  ;;  %721 = vst [vmem:[%s14591_s5 + $0xbf4] sm:$0xff] %v720_v63  ;;  %v10951_v2 = vld [vmem:[%s14586_s30 + $0x50] sm:$0xf] }
  0x94   : > { %10948 = vst [vmem:[%s14591_s5 + $0x8] sm:$0xf] %v10947_v0  ;;  %10950 = vst [vmem:[%s14591_s5 + $0x14] sm:$0xf] %v10949_v1  ;;  %v10953_v3 = vld [vmem:[%s14586_s30 + $0x74] sm:$0xf] }
  0x95   : > { %v10955_v4 = vld [vmem:[%s14586_s30 + $0x98] sm:$0xf]  ;;  %10952 = vst [vmem:[%s14591_s5 + $0x20] sm:$0xf] %v10951_v2  ;;  %10954 = vst [vmem:[%s14591_s5 + $0x2c] sm:$0xf] %v10953_v3 }
  0x96   : > { %10956 = vst [vmem:[%s14591_s5 + $0x38] sm:$0xf] %v10955_v4  ;;  %v10957_v5 = vld [vmem:[%s14586_s30 + $0xbc] sm:$0xf]  ;;  %v10959_v6 = vld [vmem:[%s14586_s30 + $0xe0] sm:$0xf] }
  0x97   : > { %v10961_v7 = vld [vmem:[%s14586_s30 + $0x104] sm:$0xf]  ;;  %10958 = vst [vmem:[%s14591_s5 + $0x44] sm:$0xf] %v10957_v5  ;;  %10960 = vst [vmem:[%s14591_s5 + $0x50] sm:$0xf] %v10959_v6 }
  0x98   : > { %10962 = vst [vmem:[%s14591_s5 + $0x5c] sm:$0xf] %v10961_v7  ;;  %v10963_v8 = vld [vmem:[%s14586_s30 + $0x128] sm:$0xf]  ;;  %v10965_v9 = vld [vmem:[%s14586_s30 + $0x14c] sm:$0xf] }
  0x99   : > { %v10967_v10 = vld [vmem:[%s14586_s30 + $0x170] sm:$0xf]  ;;  %10964 = vst [vmem:[%s14591_s5 + $0x68] sm:$0xf] %v10963_v8  ;;  %10966 = vst [vmem:[%s14591_s5 + $0x74] sm:$0xf] %v10965_v9 }
  0x9a   : > { %10968 = vst [vmem:[%s14591_s5 + $0x80] sm:$0xf] %v10967_v10  ;;  %v10969_v11 = vld [vmem:[%s14586_s30 + $0x194] sm:$0xf]  ;;  %v10971_v12 = vld [vmem:[%s14586_s30 + $0x1b8] sm:$0xf] }
  0x9b   : > { %v10973_v13 = vld [vmem:[%s14586_s30 + $0x1dc] sm:$0xf]  ;;  %10970 = vst [vmem:[%s14591_s5 + $0x8c] sm:$0xf] %v10969_v11  ;;  %10972 = vst [vmem:[%s14591_s5 + $0x98] sm:$0xf] %v10971_v12 }
  0x9c   : > { %10974 = vst [vmem:[%s14591_s5 + $0xa4] sm:$0xf] %v10973_v13  ;;  %v10975_v14 = vld [vmem:[%s14586_s30 + $0x200] sm:$0xf]  ;;  %v10977_v15 = vld [vmem:[%s14586_s30 + $0x224] sm:$0xf] }
  0x9d   : > { %v10979_v16 = vld [vmem:[%s14586_s30 + $0x248] sm:$0xf]  ;;  %10976 = vst [vmem:[%s14591_s5 + $0xb0] sm:$0xf] %v10975_v14  ;;  %10978 = vst [vmem:[%s14591_s5 + $0xbc] sm:$0xf] %v10977_v15 }
  0x9e   : > { %10980 = vst [vmem:[%s14591_s5 + $0xc8] sm:$0xf] %v10979_v16  ;;  %v10981_v17 = vld [vmem:[%s14586_s30 + $0x26c] sm:$0xf]  ;;  %v10983_v18 = vld [vmem:[%s14586_s30 + $0x290] sm:$0xf] }
  0x9f   : > { %v10985_v19 = vld [vmem:[%s14586_s30 + $0x2b4] sm:$0xf]  ;;  %10982 = vst [vmem:[%s14591_s5 + $0xd4] sm:$0xf] %v10981_v17  ;;  %10984 = vst [vmem:[%s14591_s5 + $0xe0] sm:$0xf] %v10983_v18 }
  0xa0   : > { %10986 = vst [vmem:[%s14591_s5 + $0xec] sm:$0xf] %v10985_v19  ;;  %v10987_v20 = vld [vmem:[%s14586_s30 + $0x2d8] sm:$0xf]  ;;  %v10989_v21 = vld [vmem:[%s14586_s30 + $0x2fc] sm:$0xf] }
  0xa1   : > { %v10991_v22 = vld [vmem:[%s14586_s30 + $0x320] sm:$0xf]  ;;  %10988 = vst [vmem:[%s14591_s5 + $0xf8] sm:$0xf] %v10987_v20  ;;  %10990 = vst [vmem:[%s14591_s5 + $0x104] sm:$0xf] %v10989_v21 }
  0xa2   : > { %10992 = vst [vmem:[%s14591_s5 + $0x110] sm:$0xf] %v10991_v22  ;;  %v10993_v23 = vld [vmem:[%s14586_s30 + $0x344] sm:$0xf]  ;;  %v10995_v24 = vld [vmem:[%s14586_s30 + $0x368] sm:$0xf] }
  0xa3   : > { %v10997_v25 = vld [vmem:[%s14586_s30 + $0x38c] sm:$0xf]  ;;  %10994 = vst [vmem:[%s14591_s5 + $0x11c] sm:$0xf] %v10993_v23  ;;  %10996 = vst [vmem:[%s14591_s5 + $0x128] sm:$0xf] %v10995_v24 }
  0xa4   : > { %10998 = vst [vmem:[%s14591_s5 + $0x134] sm:$0xf] %v10997_v25  ;;  %v10999_v26 = vld [vmem:[%s14586_s30 + $0x3b0] sm:$0xf]  ;;  %v11001_v27 = vld [vmem:[%s14586_s30 + $0x3d4] sm:$0xf] }
  0xa5   : > { %v11003_v28 = vld [vmem:[%s14586_s30 + $0x3f8] sm:$0xf]  ;;  %11000 = vst [vmem:[%s14591_s5 + $0x140] sm:$0xf] %v10999_v26  ;;  %11002 = vst [vmem:[%s14591_s5 + $0x14c] sm:$0xf] %v11001_v27 }
  0xa6   : > { %11004 = vst [vmem:[%s14591_s5 + $0x158] sm:$0xf] %v11003_v28  ;;  %v11005_v29 = vld [vmem:[%s14586_s30 + $0x41c] sm:$0xf]  ;;  %v11007_v30 = vld [vmem:[%s14586_s30 + $0x440] sm:$0xf] }
  0xa7   : > { %v11009_v31 = vld [vmem:[%s14586_s30 + $0x464] sm:$0xf]  ;;  %11006 = vst [vmem:[%s14591_s5 + $0x164] sm:$0xf] %v11005_v29  ;;  %11008 = vst [vmem:[%s14591_s5 + $0x170] sm:$0xf] %v11007_v30 }
  0xa8   : > { %11010 = vst [vmem:[%s14591_s5 + $0x17c] sm:$0xf] %v11009_v31  ;;  %v11011_v32 = vld [vmem:[%s14586_s30 + $0x488] sm:$0xf]  ;;  %v11013_v33 = vld [vmem:[%s14586_s30 + $0x4ac] sm:$0xf] }
  0xa9   : > { %v11015_v34 = vld [vmem:[%s14586_s30 + $0x4d0] sm:$0xf]  ;;  %11012 = vst [vmem:[%s14591_s5 + $0x188] sm:$0xf] %v11011_v32  ;;  %11014 = vst [vmem:[%s14591_s5 + $0x194] sm:$0xf] %v11013_v33 }
  0xaa   : > { %11016 = vst [vmem:[%s14591_s5 + $0x1a0] sm:$0xf] %v11015_v34  ;;  %v11017_v35 = vld [vmem:[%s14586_s30 + $0x4f4] sm:$0xf]  ;;  %v11019_v36 = vld [vmem:[%s14586_s30 + $0x518] sm:$0xf] }
  0xab   : > { %v11021_v37 = vld [vmem:[%s14586_s30 + $0x53c] sm:$0xf]  ;;  %11018 = vst [vmem:[%s14591_s5 + $0x1ac] sm:$0xf] %v11017_v35  ;;  %11020 = vst [vmem:[%s14591_s5 + $0x1b8] sm:$0xf] %v11019_v36 }
  0xac   : > { %11022 = vst [vmem:[%s14591_s5 + $0x1c4] sm:$0xf] %v11021_v37  ;;  %v11023_v38 = vld [vmem:[%s14586_s30 + $0x560] sm:$0xf]  ;;  %v11025_v39 = vld [vmem:[%s14586_s30 + $0x584] sm:$0xf] }
  0xad   : > { %v11027_v40 = vld [vmem:[%s14586_s30 + $0x5a8] sm:$0xf]  ;;  %11024 = vst [vmem:[%s14591_s5 + $0x1d0] sm:$0xf] %v11023_v38  ;;  %11026 = vst [vmem:[%s14591_s5 + $0x1dc] sm:$0xf] %v11025_v39 }
  0xae   : > { %11028 = vst [vmem:[%s14591_s5 + $0x1e8] sm:$0xf] %v11027_v40  ;;  %v11029_v41 = vld [vmem:[%s14586_s30 + $0x5cc] sm:$0xf]  ;;  %v11031_v42 = vld [vmem:[%s14586_s30 + $0x5f0] sm:$0xf] }
  0xaf   : > { %v11033_v43 = vld [vmem:[%s14586_s30 + $0x614] sm:$0xf]  ;;  %11030 = vst [vmem:[%s14591_s5 + $0x1f4] sm:$0xf] %v11029_v41  ;;  %11032 = vst [vmem:[%s14591_s5 + $0x200] sm:$0xf] %v11031_v42 }
  0xb0   : > { %11034 = vst [vmem:[%s14591_s5 + $0x20c] sm:$0xf] %v11033_v43  ;;  %v11035_v44 = vld [vmem:[%s14586_s30 + $0x638] sm:$0xf]  ;;  %v11037_v45 = vld [vmem:[%s14586_s30 + $0x65c] sm:$0xf] }
  0xb1   : > { %v11039_v46 = vld [vmem:[%s14586_s30 + $0x680] sm:$0xf]  ;;  %11036 = vst [vmem:[%s14591_s5 + $0x218] sm:$0xf] %v11035_v44  ;;  %11038 = vst [vmem:[%s14591_s5 + $0x224] sm:$0xf] %v11037_v45 }
  0xb2   : > { %11040 = vst [vmem:[%s14591_s5 + $0x230] sm:$0xf] %v11039_v46  ;;  %v11041_v47 = vld [vmem:[%s14586_s30 + $0x6a4] sm:$0xf]  ;;  %v11043_v48 = vld [vmem:[%s14586_s30 + $0x6c8] sm:$0xf] }
  0xb3   : > { %v11045_v49 = vld [vmem:[%s14586_s30 + $0x6ec] sm:$0xf]  ;;  %11042 = vst [vmem:[%s14591_s5 + $0x23c] sm:$0xf] %v11041_v47  ;;  %11044 = vst [vmem:[%s14591_s5 + $0x248] sm:$0xf] %v11043_v48 }
  0xb4   : > { %11046 = vst [vmem:[%s14591_s5 + $0x254] sm:$0xf] %v11045_v49  ;;  %v11047_v50 = vld [vmem:[%s14586_s30 + $0x710] sm:$0xf]  ;;  %v11049_v51 = vld [vmem:[%s14586_s30 + $0x734] sm:$0xf] }
  0xb5   : > { %v11051_v52 = vld [vmem:[%s14586_s30 + $0x758] sm:$0xf]  ;;  %11048 = vst [vmem:[%s14591_s5 + $0x260] sm:$0xf] %v11047_v50  ;;  %11050 = vst [vmem:[%s14591_s5 + $0x26c] sm:$0xf] %v11049_v51 }
  0xb6   : > { %11052 = vst [vmem:[%s14591_s5 + $0x278] sm:$0xf] %v11051_v52  ;;  %v11053_v53 = vld [vmem:[%s14586_s30 + $0x77c] sm:$0xf]  ;;  %v11055_v54 = vld [vmem:[%s14586_s30 + $0x7a0] sm:$0xf] }
  0xb7   : > { %v11057_v55 = vld [vmem:[%s14586_s30 + $0x7c4] sm:$0xf]  ;;  %11054 = vst [vmem:[%s14591_s5 + $0x284] sm:$0xf] %v11053_v53  ;;  %11056 = vst [vmem:[%s14591_s5 + $0x290] sm:$0xf] %v11055_v54 }
  0xb8   : > { %11058 = vst [vmem:[%s14591_s5 + $0x29c] sm:$0xf] %v11057_v55  ;;  %v11059_v56 = vld [vmem:[%s14586_s30 + $0x7e8] sm:$0xf]  ;;  %v11061_v57 = vld [vmem:[%s14586_s30 + $0x80c] sm:$0xf] }
  0xb9   : > { %v11063_v58 = vld [vmem:[%s14586_s30 + $0x830] sm:$0xf]  ;;  %11060 = vst [vmem:[%s14591_s5 + $0x2a8] sm:$0xf] %v11059_v56  ;;  %11062 = vst [vmem:[%s14591_s5 + $0x2b4] sm:$0xf] %v11061_v57 }
  0xba   : > { %11064 = vst [vmem:[%s14591_s5 + $0x2c0] sm:$0xf] %v11063_v58  ;;  %v11065_v59 = vld [vmem:[%s14586_s30 + $0x854] sm:$0xf]  ;;  %v11067_v60 = vld [vmem:[%s14586_s30 + $0x878] sm:$0xf] }
  0xbb   : > { %v11069_v61 = vld [vmem:[%s14586_s30 + $0x89c] sm:$0xf]  ;;  %11066 = vst [vmem:[%s14591_s5 + $0x2cc] sm:$0xf] %v11065_v59  ;;  %11068 = vst [vmem:[%s14591_s5 + $0x2d8] sm:$0xf] %v11067_v60 }
  0xbc   : > { %11070 = vst [vmem:[%s14591_s5 + $0x2e4] sm:$0xf] %v11069_v61  ;;  %v11071_v62 = vld [vmem:[%s14586_s30 + $0x8c0] sm:$0xf]  ;;  %v11073_v63 = vld [vmem:[%s14586_s30 + $0x8e4] sm:$0xf] }
  0xbd   : > { %v11075_v0 = vld [vmem:[%s14586_s30 + $0x908] sm:$0xf]  ;;  %11072 = vst [vmem:[%s14591_s5 + $0x2f0] sm:$0xf] %v11071_v62  ;;  %11074 = vst [vmem:[%s14591_s5 + $0x2fc] sm:$0xf] %v11073_v63 }
  0xbe   : > { %11076 = vst [vmem:[%s14591_s5 + $0x308] sm:$0xf] %v11075_v0  ;;  %v11077_v1 = vld [vmem:[%s14586_s30 + $0x92c] sm:$0xf]  ;;  %v11079_v2 = vld [vmem:[%s14586_s30 + $0x950] sm:$0xf] }
  0xbf   : > { %v11081_v3 = vld [vmem:[%s14586_s30 + $0x974] sm:$0xf]  ;;  %11078 = vst [vmem:[%s14591_s5 + $0x314] sm:$0xf] %v11077_v1  ;;  %11080 = vst [vmem:[%s14591_s5 + $0x320] sm:$0xf] %v11079_v2 }
  0xc0   : > { %11082 = vst [vmem:[%s14591_s5 + $0x32c] sm:$0xf] %v11081_v3  ;;  %v11083_v4 = vld [vmem:[%s14586_s30 + $0x998] sm:$0xf]  ;;  %v11085_v5 = vld [vmem:[%s14586_s30 + $0x9bc] sm:$0xf] }
  0xc1   : > { %v11087_v6 = vld [vmem:[%s14586_s30 + $0x9e0] sm:$0xf]  ;;  %11084 = vst [vmem:[%s14591_s5 + $0x338] sm:$0xf] %v11083_v4  ;;  %11086 = vst [vmem:[%s14591_s5 + $0x344] sm:$0xf] %v11085_v5 }
  0xc2   : > { %11088 = vst [vmem:[%s14591_s5 + $0x350] sm:$0xf] %v11087_v6  ;;  %v11089_v7 = vld [vmem:[%s14586_s30 + $0xa04] sm:$0xf]  ;;  %v11091_v8 = vld [vmem:[%s14586_s30 + $0xa28] sm:$0xf] }
  0xc3   : > { %v11093_v9 = vld [vmem:[%s14586_s30 + $0xa4c] sm:$0xf]  ;;  %11090 = vst [vmem:[%s14591_s5 + $0x35c] sm:$0xf] %v11089_v7  ;;  %11092 = vst [vmem:[%s14591_s5 + $0x368] sm:$0xf] %v11091_v8 }
  0xc4   : > { %11094 = vst [vmem:[%s14591_s5 + $0x374] sm:$0xf] %v11093_v9  ;;  %v11095_v10 = vld [vmem:[%s14586_s30 + $0xa70] sm:$0xf]  ;;  %v11097_v11 = vld [vmem:[%s14586_s30 + $0xa94] sm:$0xf] }
  0xc5   : > { %v11099_v12 = vld [vmem:[%s14586_s30 + $0xab8] sm:$0xf]  ;;  %11096 = vst [vmem:[%s14591_s5 + $0x380] sm:$0xf] %v11095_v10  ;;  %11098 = vst [vmem:[%s14591_s5 + $0x38c] sm:$0xf] %v11097_v11 }
  0xc6   : > { %11100 = vst [vmem:[%s14591_s5 + $0x398] sm:$0xf] %v11099_v12  ;;  %v11101_v13 = vld [vmem:[%s14586_s30 + $0xadc] sm:$0xf]  ;;  %v11103_v14 = vld [vmem:[%s14586_s30 + $0xb00] sm:$0xf] }
  0xc7   : > { %v11105_v15 = vld [vmem:[%s14586_s30 + $0xb24] sm:$0xf]  ;;  %11102 = vst [vmem:[%s14591_s5 + $0x3a4] sm:$0xf] %v11101_v13  ;;  %11104 = vst [vmem:[%s14591_s5 + $0x3b0] sm:$0xf] %v11103_v14 }
  0xc8   : > { %11106 = vst [vmem:[%s14591_s5 + $0x3bc] sm:$0xf] %v11105_v15  ;;  %v11107_v16 = vld [vmem:[%s14586_s30 + $0xb48] sm:$0xf]  ;;  %v11109_v17 = vld [vmem:[%s14586_s30 + $0xb6c] sm:$0xf] }
  0xc9   : > { %v11111_v18 = vld [vmem:[%s14586_s30 + $0xb90] sm:$0xf]  ;;  %11108 = vst [vmem:[%s14591_s5 + $0x3c8] sm:$0xf] %v11107_v16  ;;  %11110 = vst [vmem:[%s14591_s5 + $0x3d4] sm:$0xf] %v11109_v17 }
  0xca   : > { %11112 = vst [vmem:[%s14591_s5 + $0x3e0] sm:$0xf] %v11111_v18  ;;  %v11113_v19 = vld [vmem:[%s14586_s30 + $0xbb4] sm:$0xf]  ;;  %v11115_v20 = vld [vmem:[%s14586_s30 + $0xbd8] sm:$0xf] }
  0xcb   : > { %v11117_v21 = vld [vmem:[%s14586_s30 + $0xbfc] sm:$0xf]  ;;  %11114 = vst [vmem:[%s14591_s5 + $0x3ec] sm:$0xf] %v11113_v19  ;;  %11116 = vst [vmem:[%s14591_s5 + $0x3f8] sm:$0xf] %v11115_v20 }
  0xcc   : > { %11118 = vst [vmem:[%s14591_s5 + $0x404] sm:$0xf] %v11117_v21  ;;  %v11119_v22 = vld [vmem:[%s14586_s30 + $0xc20] sm:$0xf]  ;;  %v11121_v23 = vld [vmem:[%s14586_s30 + $0xc44] sm:$0xf] }
  0xcd   : > { %v11123_v24 = vld [vmem:[%s14586_s30 + $0xc68] sm:$0xf]  ;;  %11120 = vst [vmem:[%s14591_s5 + $0x410] sm:$0xf] %v11119_v22  ;;  %11122 = vst [vmem:[%s14591_s5 + $0x41c] sm:$0xf] %v11121_v23 }
  0xce   : > { %11124 = vst [vmem:[%s14591_s5 + $0x428] sm:$0xf] %v11123_v24  ;;  %v11125_v25 = vld [vmem:[%s14586_s30 + $0xc8c] sm:$0xf]  ;;  %v11127_v26 = vld [vmem:[%s14586_s30 + $0xcb0] sm:$0xf] }
  0xcf   : > { %v11129_v27 = vld [vmem:[%s14586_s30 + $0xcd4] sm:$0xf]  ;;  %11126 = vst [vmem:[%s14591_s5 + $0x434] sm:$0xf] %v11125_v25  ;;  %11128 = vst [vmem:[%s14591_s5 + $0x440] sm:$0xf] %v11127_v26 }
  0xd0   : > { %11130 = vst [vmem:[%s14591_s5 + $0x44c] sm:$0xf] %v11129_v27  ;;  %v11131_v28 = vld [vmem:[%s14586_s30 + $0xcf8] sm:$0xf]  ;;  %v11133_v29 = vld [vmem:[%s14586_s30 + $0xd1c] sm:$0xf] }
  0xd1   : > { %v11135_v30 = vld [vmem:[%s14586_s30 + $0xd40] sm:$0xf]  ;;  %11132 = vst [vmem:[%s14591_s5 + $0x458] sm:$0xf] %v11131_v28  ;;  %11134 = vst [vmem:[%s14591_s5 + $0x464] sm:$0xf] %v11133_v29 }
  0xd2   : > { %11136 = vst [vmem:[%s14591_s5 + $0x470] sm:$0xf] %v11135_v30  ;;  %v11137_v31 = vld [vmem:[%s14586_s30 + $0xd64] sm:$0xf]  ;;  %v11139_v32 = vld [vmem:[%s14586_s30 + $0xd88] sm:$0xf] }
  0xd3   : > { %v11141_v33 = vld [vmem:[%s14586_s30 + $0xdac] sm:$0xf]  ;;  %11138 = vst [vmem:[%s14591_s5 + $0x47c] sm:$0xf] %v11137_v31  ;;  %11140 = vst [vmem:[%s14591_s5 + $0x488] sm:$0xf] %v11139_v32 }
  0xd4   : > { %11142 = vst [vmem:[%s14591_s5 + $0x494] sm:$0xf] %v11141_v33  ;;  %v11143_v34 = vld [vmem:[%s14586_s30 + $0xdd0] sm:$0xf]  ;;  %v11145_v35 = vld [vmem:[%s14586_s30 + $0xdf4] sm:$0xf] }
  0xd5   : > { %v11147_v36 = vld [vmem:[%s14586_s30 + $0xe18] sm:$0xf]  ;;  %11144 = vst [vmem:[%s14591_s5 + $0x4a0] sm:$0xf] %v11143_v34  ;;  %11146 = vst [vmem:[%s14591_s5 + $0x4ac] sm:$0xf] %v11145_v35 }
  0xd6   : > { %11148 = vst [vmem:[%s14591_s5 + $0x4b8] sm:$0xf] %v11147_v36  ;;  %v11149_v37 = vld [vmem:[%s14586_s30 + $0xe3c] sm:$0xf]  ;;  %v11151_v38 = vld [vmem:[%s14586_s30 + $0xe60] sm:$0xf] }
  0xd7   : > { %v11153_v39 = vld [vmem:[%s14586_s30 + $0xe84] sm:$0xf]  ;;  %11150 = vst [vmem:[%s14591_s5 + $0x4c4] sm:$0xf] %v11149_v37  ;;  %11152 = vst [vmem:[%s14591_s5 + $0x4d0] sm:$0xf] %v11151_v38 }
  0xd8   : > { %11154 = vst [vmem:[%s14591_s5 + $0x4dc] sm:$0xf] %v11153_v39  ;;  %v11155_v40 = vld [vmem:[%s14586_s30 + $0xea8] sm:$0xf]  ;;  %v11157_v41 = vld [vmem:[%s14586_s30 + $0xecc] sm:$0xf] }
  0xd9   : > { %v11159_v42 = vld [vmem:[%s14586_s30 + $0xef0] sm:$0xf]  ;;  %11156 = vst [vmem:[%s14591_s5 + $0x4e8] sm:$0xf] %v11155_v40  ;;  %11158 = vst [vmem:[%s14591_s5 + $0x4f4] sm:$0xf] %v11157_v41 }
  0xda   : > { %11160 = vst [vmem:[%s14591_s5 + $0x500] sm:$0xf] %v11159_v42  ;;  %v11161_v43 = vld [vmem:[%s14586_s30 + $0xf14] sm:$0xf]  ;;  %v11163_v44 = vld [vmem:[%s14586_s30 + $0xf38] sm:$0xf] }
  0xdb   : > { %v11165_v45 = vld [vmem:[%s14586_s30 + $0xf5c] sm:$0xf]  ;;  %11162 = vst [vmem:[%s14591_s5 + $0x50c] sm:$0xf] %v11161_v43  ;;  %11164 = vst [vmem:[%s14591_s5 + $0x518] sm:$0xf] %v11163_v44 }
  0xdc   : > { %11166 = vst [vmem:[%s14591_s5 + $0x524] sm:$0xf] %v11165_v45  ;;  %v11167_v46 = vld [vmem:[%s14586_s30 + $0xf80] sm:$0xf]  ;;  %v11169_v47 = vld [vmem:[%s14586_s30 + $0xfa4] sm:$0xf] }
  0xdd   : > { %v11171_v48 = vld [vmem:[%s14586_s30 + $0xfc8] sm:$0xf]  ;;  %11168 = vst [vmem:[%s14591_s5 + $0x530] sm:$0xf] %v11167_v46  ;;  %11170 = vst [vmem:[%s14591_s5 + $0x53c] sm:$0xf] %v11169_v47 }
  0xde   : > { %11172 = vst [vmem:[%s14591_s5 + $0x548] sm:$0xf] %v11171_v48  ;;  %v11173_v49 = vld [vmem:[%s14586_s30 + $0xfec] sm:$0xf]  ;;  %v11175_v50 = vld [vmem:[%s14586_s30 + $0x1010] sm:$0xf] }
  0xdf   : > { %v11177_v51 = vld [vmem:[%s14586_s30 + $0x1034] sm:$0xf]  ;;  %11174 = vst [vmem:[%s14591_s5 + $0x554] sm:$0xf] %v11173_v49  ;;  %11176 = vst [vmem:[%s14591_s5 + $0x560] sm:$0xf] %v11175_v50 }
  0xe0   : > { %11178 = vst [vmem:[%s14591_s5 + $0x56c] sm:$0xf] %v11177_v51  ;;  %v11179_v52 = vld [vmem:[%s14586_s30 + $0x1058] sm:$0xf]  ;;  %v11181_v53 = vld [vmem:[%s14586_s30 + $0x107c] sm:$0xf] }
  0xe1   : > { %v11183_v54 = vld [vmem:[%s14586_s30 + $0x10a0] sm:$0xf]  ;;  %11180 = vst [vmem:[%s14591_s5 + $0x578] sm:$0xf] %v11179_v52  ;;  %11182 = vst [vmem:[%s14591_s5 + $0x584] sm:$0xf] %v11181_v53 }
  0xe2   : > { %11184 = vst [vmem:[%s14591_s5 + $0x590] sm:$0xf] %v11183_v54  ;;  %v11185_v55 = vld [vmem:[%s14586_s30 + $0x10c4] sm:$0xf]  ;;  %v11187_v56 = vld [vmem:[%s14586_s30 + $0x10e8] sm:$0xf] }
  0xe3   : > { %v11189_v57 = vld [vmem:[%s14586_s30 + $0x110c] sm:$0xf]  ;;  %11186 = vst [vmem:[%s14591_s5 + $0x59c] sm:$0xf] %v11185_v55  ;;  %11188 = vst [vmem:[%s14591_s5 + $0x5a8] sm:$0xf] %v11187_v56 }
  0xe4   : > { %11190 = vst [vmem:[%s14591_s5 + $0x5b4] sm:$0xf] %v11189_v57  ;;  %v11191_v58 = vld [vmem:[%s14586_s30 + $0x1130] sm:$0xf]  ;;  %v11193_v59 = vld [vmem:[%s14586_s30 + $0x1154] sm:$0xf] }
  0xe5   : > { %v11195_v60 = vld [vmem:[%s14586_s30 + $0x1178] sm:$0xf]  ;;  %11192 = vst [vmem:[%s14591_s5 + $0x5c0] sm:$0xf] %v11191_v58  ;;  %11194 = vst [vmem:[%s14591_s5 + $0x5cc] sm:$0xf] %v11193_v59 }
  0xe6   : > { %11196 = vst [vmem:[%s14591_s5 + $0x5d8] sm:$0xf] %v11195_v60  ;;  %v11197_v61 = vld [vmem:[%s14586_s30 + $0x119c] sm:$0xf]  ;;  %v11199_v62 = vld [vmem:[%s14586_s30 + $0x11c0] sm:$0xf] }
  0xe7   : > { %v11201_v63 = vld [vmem:[%s14586_s30 + $0x11e4] sm:$0xf]  ;;  %11198 = vst [vmem:[%s14591_s5 + $0x5e4] sm:$0xf] %v11197_v61  ;;  %11200 = vst [vmem:[%s14591_s5 + $0x5f0] sm:$0xf] %v11199_v62 }
  0xe8   : > { %11202 = vst [vmem:[%s14591_s5 + $0x5fc] sm:$0xf] %v11201_v63  ;;  %v11203_v0 = vld [vmem:[%s14586_s30 + $0x1208] sm:$0xf]  ;;  %v11205_v1 = vld [vmem:[%s14586_s30 + $0x122c] sm:$0xf] }
  0xe9   : > { %v11207_v2 = vld [vmem:[%s14586_s30 + $0x1250] sm:$0xf]  ;;  %11204 = vst [vmem:[%s14591_s5 + $0x608] sm:$0xf] %v11203_v0  ;;  %11206 = vst [vmem:[%s14591_s5 + $0x614] sm:$0xf] %v11205_v1 }
  0xea   : > { %11208 = vst [vmem:[%s14591_s5 + $0x620] sm:$0xf] %v11207_v2  ;;  %v11209_v3 = vld [vmem:[%s14586_s30 + $0x1274] sm:$0xf]  ;;  %v11211_v4 = vld [vmem:[%s14586_s30 + $0x1298] sm:$0xf] }
  0xeb   : > { %v11213_v5 = vld [vmem:[%s14586_s30 + $0x12bc] sm:$0xf]  ;;  %11210 = vst [vmem:[%s14591_s5 + $0x62c] sm:$0xf] %v11209_v3  ;;  %11212 = vst [vmem:[%s14591_s5 + $0x638] sm:$0xf] %v11211_v4 }
  0xec   : > { %11214 = vst [vmem:[%s14591_s5 + $0x644] sm:$0xf] %v11213_v5  ;;  %v11215_v6 = vld [vmem:[%s14586_s30 + $0x12e0] sm:$0xf]  ;;  %v11217_v7 = vld [vmem:[%s14586_s30 + $0x1304] sm:$0xf] }
  0xed   : > { %v11219_v8 = vld [vmem:[%s14586_s30 + $0x1328] sm:$0xf]  ;;  %11216 = vst [vmem:[%s14591_s5 + $0x650] sm:$0xf] %v11215_v6  ;;  %11218 = vst [vmem:[%s14591_s5 + $0x65c] sm:$0xf] %v11217_v7 }
  0xee   : > { %11220 = vst [vmem:[%s14591_s5 + $0x668] sm:$0xf] %v11219_v8  ;;  %v11221_v9 = vld [vmem:[%s14586_s30 + $0x134c] sm:$0xf]  ;;  %v11223_v10 = vld [vmem:[%s14586_s30 + $0x1370] sm:$0xf] }
  0xef   : > { %v11225_v11 = vld [vmem:[%s14586_s30 + $0x1394] sm:$0xf]  ;;  %11222 = vst [vmem:[%s14591_s5 + $0x674] sm:$0xf] %v11221_v9  ;;  %11224 = vst [vmem:[%s14591_s5 + $0x680] sm:$0xf] %v11223_v10 }
  0xf0   : > { %11226 = vst [vmem:[%s14591_s5 + $0x68c] sm:$0xf] %v11225_v11  ;;  %v11227_v12 = vld [vmem:[%s14586_s30 + $0x13b8] sm:$0xf]  ;;  %v11229_v13 = vld [vmem:[%s14586_s30 + $0x13dc] sm:$0xf] }
  0xf1   : > { %v11231_v14 = vld [vmem:[%s14586_s30 + $0x1400] sm:$0xf]  ;;  %11228 = vst [vmem:[%s14591_s5 + $0x698] sm:$0xf] %v11227_v12  ;;  %11230 = vst [vmem:[%s14591_s5 + $0x6a4] sm:$0xf] %v11229_v13 }
  0xf2   : > { %11232 = vst [vmem:[%s14591_s5 + $0x6b0] sm:$0xf] %v11231_v14  ;;  %v11233_v15 = vld [vmem:[%s14586_s30 + $0x1424] sm:$0xf]  ;;  %v11235_v16 = vld [vmem:[%s14586_s30 + $0x1448] sm:$0xf] }
  0xf3   : > { %v11237_v17 = vld [vmem:[%s14586_s30 + $0x146c] sm:$0xf]  ;;  %11234 = vst [vmem:[%s14591_s5 + $0x6bc] sm:$0xf] %v11233_v15  ;;  %11236 = vst [vmem:[%s14591_s5 + $0x6c8] sm:$0xf] %v11235_v16 }
  0xf4   : > { %11238 = vst [vmem:[%s14591_s5 + $0x6d4] sm:$0xf] %v11237_v17  ;;  %v11239_v18 = vld [vmem:[%s14586_s30 + $0x1490] sm:$0xf]  ;;  %v11241_v19 = vld [vmem:[%s14586_s30 + $0x14b4] sm:$0xf] }
  0xf5   : > { %v11243_v20 = vld [vmem:[%s14586_s30 + $0x14d8] sm:$0xf]  ;;  %11240 = vst [vmem:[%s14591_s5 + $0x6e0] sm:$0xf] %v11239_v18  ;;  %11242 = vst [vmem:[%s14591_s5 + $0x6ec] sm:$0xf] %v11241_v19 }
  0xf6   : > { %11244 = vst [vmem:[%s14591_s5 + $0x6f8] sm:$0xf] %v11243_v20  ;;  %v11245_v21 = vld [vmem:[%s14586_s30 + $0x14fc] sm:$0xf]  ;;  %v11247_v22 = vld [vmem:[%s14586_s30 + $0x1520] sm:$0xf] }
  0xf7   : > { %v11249_v23 = vld [vmem:[%s14586_s30 + $0x1544] sm:$0xf]  ;;  %11246 = vst [vmem:[%s14591_s5 + $0x704] sm:$0xf] %v11245_v21  ;;  %11248 = vst [vmem:[%s14591_s5 + $0x710] sm:$0xf] %v11247_v22 }
  0xf8   : > { %11250 = vst [vmem:[%s14591_s5 + $0x71c] sm:$0xf] %v11249_v23  ;;  %v11251_v24 = vld [vmem:[%s14586_s30 + $0x1568] sm:$0xf]  ;;  %v11253_v25 = vld [vmem:[%s14586_s30 + $0x158c] sm:$0xf] }
  0xf9   : > { %v11255_v26 = vld [vmem:[%s14586_s30 + $0x15b0] sm:$0xf]  ;;  %11252 = vst [vmem:[%s14591_s5 + $0x728] sm:$0xf] %v11251_v24  ;;  %11254 = vst [vmem:[%s14591_s5 + $0x734] sm:$0xf] %v11253_v25 }
  0xfa   : > { %11256 = vst [vmem:[%s14591_s5 + $0x740] sm:$0xf] %v11255_v26  ;;  %v11257_v27 = vld [vmem:[%s14586_s30 + $0x15d4] sm:$0xf]  ;;  %v11259_v28 = vld [vmem:[%s14586_s30 + $0x15f8] sm:$0xf] }
  0xfb   : > { %v11261_v29 = vld [vmem:[%s14586_s30 + $0x161c] sm:$0xf]  ;;  %11258 = vst [vmem:[%s14591_s5 + $0x74c] sm:$0xf] %v11257_v27  ;;  %11260 = vst [vmem:[%s14591_s5 + $0x758] sm:$0xf] %v11259_v28 }
  0xfc   : > { %11262 = vst [vmem:[%s14591_s5 + $0x764] sm:$0xf] %v11261_v29  ;;  %v11263_v30 = vld [vmem:[%s14586_s30 + $0x1640] sm:$0xf]  ;;  %v11265_v31 = vld [vmem:[%s14586_s30 + $0x1664] sm:$0xf] }
  0xfd   : > { %v11267_v32 = vld [vmem:[%s14586_s30 + $0x1688] sm:$0xf]  ;;  %11264 = vst [vmem:[%s14591_s5 + $0x770] sm:$0xf] %v11263_v30  ;;  %11266 = vst [vmem:[%s14591_s5 + $0x77c] sm:$0xf] %v11265_v31 }
  0xfe   : > { %11268 = vst [vmem:[%s14591_s5 + $0x788] sm:$0xf] %v11267_v32  ;;  %v11269_v33 = vld [vmem:[%s14586_s30 + $0x16ac] sm:$0xf]  ;;  %v11271_v34 = vld [vmem:[%s14586_s30 + $0x16d0] sm:$0xf] }
  0xff   : > { %v11273_v35 = vld [vmem:[%s14586_s30 + $0x16f4] sm:$0xf]  ;;  %11270 = vst [vmem:[%s14591_s5 + $0x794] sm:$0xf] %v11269_v33  ;;  %11272 = vst [vmem:[%s14591_s5 + $0x7a0] sm:$0xf] %v11271_v34 }
 0x100   : > { %11274 = vst [vmem:[%s14591_s5 + $0x7ac] sm:$0xf] %v11273_v35  ;;  %v11275_v36 = vld [vmem:[%s14586_s30 + $0x1718] sm:$0xf]  ;;  %v11277_v37 = vld [vmem:[%s14586_s30 + $0x173c] sm:$0xf] }
 0x101   : > { %v11279_v38 = vld [vmem:[%s14586_s30 + $0x1760] sm:$0xf]  ;;  %11276 = vst [vmem:[%s14591_s5 + $0x7b8] sm:$0xf] %v11275_v36  ;;  %11278 = vst [vmem:[%s14591_s5 + $0x7c4] sm:$0xf] %v11277_v37 }
 0x102   : > { %11280 = vst [vmem:[%s14591_s5 + $0x7d0] sm:$0xf] %v11279_v38  ;;  %v11281_v39 = vld [vmem:[%s14586_s30 + $0x1784] sm:$0xf]  ;;  %v11283_v40 = vld [vmem:[%s14586_s30 + $0x17a8] sm:$0xf] }
 0x103   : > { %v11285_v41 = vld [vmem:[%s14586_s30 + $0x17cc] sm:$0xf]  ;;  %11282 = vst [vmem:[%s14591_s5 + $0x7dc] sm:$0xf] %v11281_v39  ;;  %11284 = vst [vmem:[%s14591_s5 + $0x7e8] sm:$0xf] %v11283_v40 }
 0x104   : > { %11286 = vst [vmem:[%s14591_s5 + $0x7f4] sm:$0xf] %v11285_v41  ;;  %v11287_v42 = vld [vmem:[%s14586_s30 + $0x17f0] sm:$0xf]  ;;  %v11289_v43 = vld [vmem:[%s14586_s30 + $0x1814] sm:$0xf] }
 0x105   : > { %v11291_v44 = vld [vmem:[%s14586_s30 + $0x1838] sm:$0xf]  ;;  %11288 = vst [vmem:[%s14591_s5 + $0x800] sm:$0xf] %v11287_v42  ;;  %11290 = vst [vmem:[%s14591_s5 + $0x80c] sm:$0xf] %v11289_v43 }
 0x106   : > { %11292 = vst [vmem:[%s14591_s5 + $0x818] sm:$0xf] %v11291_v44  ;;  %v11293_v45 = vld [vmem:[%s14586_s30 + $0x185c] sm:$0xf]  ;;  %v11295_v46 = vld [vmem:[%s14586_s30 + $0x1880] sm:$0xf] }
 0x107   : > { %v11297_v47 = vld [vmem:[%s14586_s30 + $0x18a4] sm:$0xf]  ;;  %11294 = vst [vmem:[%s14591_s5 + $0x824] sm:$0xf] %v11293_v45  ;;  %11296 = vst [vmem:[%s14591_s5 + $0x830] sm:$0xf] %v11295_v46 }
 0x108   : > { %11298 = vst [vmem:[%s14591_s5 + $0x83c] sm:$0xf] %v11297_v47  ;;  %v11299_v48 = vld [vmem:[%s14586_s30 + $0x18c8] sm:$0xf]  ;;  %v11301_v49 = vld [vmem:[%s14586_s30 + $0x18ec] sm:$0xf] }
 0x109   : > { %v11303_v50 = vld [vmem:[%s14586_s30 + $0x1910] sm:$0xf]  ;;  %11300 = vst [vmem:[%s14591_s5 + $0x848] sm:$0xf] %v11299_v48  ;;  %11302 = vst [vmem:[%s14591_s5 + $0x854] sm:$0xf] %v11301_v49 }
 0x10a   : > { %11304 = vst [vmem:[%s14591_s5 + $0x860] sm:$0xf] %v11303_v50  ;;  %v11305_v51 = vld [vmem:[%s14586_s30 + $0x1934] sm:$0xf]  ;;  %v11307_v52 = vld [vmem:[%s14586_s30 + $0x1958] sm:$0xf] }
 0x10b   : > { %v11309_v53 = vld [vmem:[%s14586_s30 + $0x197c] sm:$0xf]  ;;  %11306 = vst [vmem:[%s14591_s5 + $0x86c] sm:$0xf] %v11305_v51  ;;  %11308 = vst [vmem:[%s14591_s5 + $0x878] sm:$0xf] %v11307_v52 }
 0x10c   : > { %11310 = vst [vmem:[%s14591_s5 + $0x884] sm:$0xf] %v11309_v53  ;;  %v11311_v54 = vld [vmem:[%s14586_s30 + $0x19a0] sm:$0xf]  ;;  %v11313_v55 = vld [vmem:[%s14586_s30 + $0x19c4] sm:$0xf] }
 0x10d   : > { %v11315_v56 = vld [vmem:[%s14586_s30 + $0x19e8] sm:$0xf]  ;;  %11312 = vst [vmem:[%s14591_s5 + $0x890] sm:$0xf] %v11311_v54  ;;  %11314 = vst [vmem:[%s14591_s5 + $0x89c] sm:$0xf] %v11313_v55 }
 0x10e   : > { %11316 = vst [vmem:[%s14591_s5 + $0x8a8] sm:$0xf] %v11315_v56  ;;  %v11317_v57 = vld [vmem:[%s14586_s30 + $0x1a0c] sm:$0xf]  ;;  %v11319_v58 = vld [vmem:[%s14586_s30 + $0x1a30] sm:$0xf] }
 0x10f   : > { %v11321_v59 = vld [vmem:[%s14586_s30 + $0x1a54] sm:$0xf]  ;;  %11318 = vst [vmem:[%s14591_s5 + $0x8b4] sm:$0xf] %v11317_v57  ;;  %11320 = vst [vmem:[%s14591_s5 + $0x8c0] sm:$0xf] %v11319_v58 }
 0x110   : > { %11322 = vst [vmem:[%s14591_s5 + $0x8cc] sm:$0xf] %v11321_v59  ;;  %v11323_v60 = vld [vmem:[%s14586_s30 + $0x1a78] sm:$0xf]  ;;  %v11325_v61 = vld [vmem:[%s14586_s30 + $0x1a9c] sm:$0xf] }
 0x111   : > { %v11327_v62 = vld [vmem:[%s14586_s30 + $0x1ac0] sm:$0xf]  ;;  %11324 = vst [vmem:[%s14591_s5 + $0x8d8] sm:$0xf] %v11323_v60  ;;  %11326 = vst [vmem:[%s14591_s5 + $0x8e4] sm:$0xf] %v11325_v61 }
 0x112   : > { %11328 = vst [vmem:[%s14591_s5 + $0x8f0] sm:$0xf] %v11327_v62  ;;  %v11329_v63 = vld [vmem:[%s14586_s30 + $0x1ae4] sm:$0xf]  ;;  %v11331_v0 = vld [vmem:[%s14586_s30 + $0x1b08] sm:$0xf] }
 0x113   : > { %v11333_v1 = vld [vmem:[%s14586_s30 + $0x1b2c] sm:$0xf]  ;;  %11330 = vst [vmem:[%s14591_s5 + $0x8fc] sm:$0xf] %v11329_v63  ;;  %11332 = vst [vmem:[%s14591_s5 + $0x908] sm:$0xf] %v11331_v0 }
 0x114   : > { %11334 = vst [vmem:[%s14591_s5 + $0x914] sm:$0xf] %v11333_v1  ;;  %v11335_v2 = vld [vmem:[%s14586_s30 + $0x1b50] sm:$0xf]  ;;  %v11337_v3 = vld [vmem:[%s14586_s30 + $0x1b74] sm:$0xf] }
 0x115   : > { %v11339_v4 = vld [vmem:[%s14586_s30 + $0x1b98] sm:$0xf]  ;;  %11336 = vst [vmem:[%s14591_s5 + $0x920] sm:$0xf] %v11335_v2  ;;  %11338 = vst [vmem:[%s14591_s5 + $0x92c] sm:$0xf] %v11337_v3 }
 0x116   : > { %11340 = vst [vmem:[%s14591_s5 + $0x938] sm:$0xf] %v11339_v4  ;;  %v11341_v5 = vld [vmem:[%s14586_s30 + $0x1bbc] sm:$0xf]  ;;  %v11343_v6 = vld [vmem:[%s14586_s30 + $0x1be0] sm:$0xf] }
 0x117   : > { %v11345_v7 = vld [vmem:[%s14586_s30 + $0x1c04] sm:$0xf]  ;;  %11342 = vst [vmem:[%s14591_s5 + $0x944] sm:$0xf] %v11341_v5  ;;  %11344 = vst [vmem:[%s14591_s5 + $0x950] sm:$0xf] %v11343_v6 }
 0x118   : > { %11346 = vst [vmem:[%s14591_s5 + $0x95c] sm:$0xf] %v11345_v7  ;;  %v11347_v8 = vld [vmem:[%s14586_s30 + $0x1c28] sm:$0xf]  ;;  %v11349_v9 = vld [vmem:[%s14586_s30 + $0x1c4c] sm:$0xf] }
 0x119   : > { %v11351_v10 = vld [vmem:[%s14586_s30 + $0x1c70] sm:$0xf]  ;;  %11348 = vst [vmem:[%s14591_s5 + $0x968] sm:$0xf] %v11347_v8  ;;  %11350 = vst [vmem:[%s14591_s5 + $0x974] sm:$0xf] %v11349_v9 }
 0x11a   : > { %11352 = vst [vmem:[%s14591_s5 + $0x980] sm:$0xf] %v11351_v10  ;;  %v11353_v11 = vld [vmem:[%s14586_s30 + $0x1c94] sm:$0xf]  ;;  %v11355_v12 = vld [vmem:[%s14586_s30 + $0x1cb8] sm:$0xf] }
 0x11b   : > { %v11357_v13 = vld [vmem:[%s14586_s30 + $0x1cdc] sm:$0xf]  ;;  %11354 = vst [vmem:[%s14591_s5 + $0x98c] sm:$0xf] %v11353_v11  ;;  %11356 = vst [vmem:[%s14591_s5 + $0x998] sm:$0xf] %v11355_v12 }
 0x11c   : > { %11358 = vst [vmem:[%s14591_s5 + $0x9a4] sm:$0xf] %v11357_v13  ;;  %v11359_v14 = vld [vmem:[%s14586_s30 + $0x1d00] sm:$0xf]  ;;  %v11361_v15 = vld [vmem:[%s14586_s30 + $0x1d24] sm:$0xf] }
 0x11d   : > { %v11363_v16 = vld [vmem:[%s14586_s30 + $0x1d48] sm:$0xf]  ;;  %11360 = vst [vmem:[%s14591_s5 + $0x9b0] sm:$0xf] %v11359_v14  ;;  %11362 = vst [vmem:[%s14591_s5 + $0x9bc] sm:$0xf] %v11361_v15 }
 0x11e   : > { %11364 = vst [vmem:[%s14591_s5 + $0x9c8] sm:$0xf] %v11363_v16  ;;  %v11365_v17 = vld [vmem:[%s14586_s30 + $0x1d6c] sm:$0xf]  ;;  %v11367_v18 = vld [vmem:[%s14586_s30 + $0x1d90] sm:$0xf] }
 0x11f   : > { %v11369_v19 = vld [vmem:[%s14586_s30 + $0x1db4] sm:$0xf]  ;;  %11366 = vst [vmem:[%s14591_s5 + $0x9d4] sm:$0xf] %v11365_v17  ;;  %11368 = vst [vmem:[%s14591_s5 + $0x9e0] sm:$0xf] %v11367_v18 }
 0x120   : > { %11370 = vst [vmem:[%s14591_s5 + $0x9ec] sm:$0xf] %v11369_v19  ;;  %v11371_v20 = vld [vmem:[%s14586_s30 + $0x1dd8] sm:$0xf]  ;;  %v11373_v21 = vld [vmem:[%s14586_s30 + $0x1dfc] sm:$0xf] }
 0x121   : > { %v11375_v22 = vld [vmem:[%s14586_s30 + $0x1e20] sm:$0xf]  ;;  %11372 = vst [vmem:[%s14591_s5 + $0x9f8] sm:$0xf] %v11371_v20  ;;  %11374 = vst [vmem:[%s14591_s5 + $0xa04] sm:$0xf] %v11373_v21 }
 0x122   : > { %11376 = vst [vmem:[%s14591_s5 + $0xa10] sm:$0xf] %v11375_v22  ;;  %v11377_v23 = vld [vmem:[%s14586_s30 + $0x1e44] sm:$0xf]  ;;  %v11379_v24 = vld [vmem:[%s14586_s30 + $0x1e68] sm:$0xf] }
 0x123   : > { %v11381_v25 = vld [vmem:[%s14586_s30 + $0x1e8c] sm:$0xf]  ;;  %11378 = vst [vmem:[%s14591_s5 + $0xa1c] sm:$0xf] %v11377_v23  ;;  %11380 = vst [vmem:[%s14591_s5 + $0xa28] sm:$0xf] %v11379_v24 }
 0x124   : > { %11382 = vst [vmem:[%s14591_s5 + $0xa34] sm:$0xf] %v11381_v25  ;;  %v11383_v26 = vld [vmem:[%s14586_s30 + $0x1eb0] sm:$0xf]  ;;  %v11385_v27 = vld [vmem:[%s14586_s30 + $0x1ed4] sm:$0xf] }
 0x125   : > { %v11387_v28 = vld [vmem:[%s14586_s30 + $0x1ef8] sm:$0xf]  ;;  %11384 = vst [vmem:[%s14591_s5 + $0xa40] sm:$0xf] %v11383_v26  ;;  %11386 = vst [vmem:[%s14591_s5 + $0xa4c] sm:$0xf] %v11385_v27 }
 0x126   : > { %11388 = vst [vmem:[%s14591_s5 + $0xa58] sm:$0xf] %v11387_v28  ;;  %v11389_v29 = vld [vmem:[%s14586_s30 + $0x1f1c] sm:$0xf]  ;;  %v11391_v30 = vld [vmem:[%s14586_s30 + $0x1f40] sm:$0xf] }
 0x127   : > { %v11393_v31 = vld [vmem:[%s14586_s30 + $0x1f64] sm:$0xf]  ;;  %11390 = vst [vmem:[%s14591_s5 + $0xa64] sm:$0xf] %v11389_v29  ;;  %11392 = vst [vmem:[%s14591_s5 + $0xa70] sm:$0xf] %v11391_v30 }
 0x128   : > { %11394 = vst [vmem:[%s14591_s5 + $0xa7c] sm:$0xf] %v11393_v31  ;;  %v11395_v32 = vld [vmem:[%s14586_s30 + $0x1f88] sm:$0xf]  ;;  %v11397_v33 = vld [vmem:[%s14586_s30 + $0x1fac] sm:$0xf] }
 0x129   : > { %v11399_v34 = vld [vmem:[%s14586_s30 + $0x1fd0] sm:$0xf]  ;;  %11396 = vst [vmem:[%s14591_s5 + $0xa88] sm:$0xf] %v11395_v32  ;;  %11398 = vst [vmem:[%s14591_s5 + $0xa94] sm:$0xf] %v11397_v33 }
 0x12a   : > { %11400 = vst [vmem:[%s14591_s5 + $0xaa0] sm:$0xf] %v11399_v34  ;;  %v11401_v35 = vld [vmem:[%s14586_s30 + $0x1ff4] sm:$0xf]  ;;  %v11403_v36 = vld [vmem:[%s14586_s30 + $0x2018] sm:$0xf] }
 0x12b   : > { %v11405_v37 = vld [vmem:[%s14586_s30 + $0x203c] sm:$0xf]  ;;  %11402 = vst [vmem:[%s14591_s5 + $0xaac] sm:$0xf] %v11401_v35  ;;  %11404 = vst [vmem:[%s14591_s5 + $0xab8] sm:$0xf] %v11403_v36 }
 0x12c   : > { %11406 = vst [vmem:[%s14591_s5 + $0xac4] sm:$0xf] %v11405_v37  ;;  %v11407_v38 = vld [vmem:[%s14586_s30 + $0x2060] sm:$0xf]  ;;  %v11409_v39 = vld [vmem:[%s14586_s30 + $0x2084] sm:$0xf] }
 0x12d   : > { %v11411_v40 = vld [vmem:[%s14586_s30 + $0x20a8] sm:$0xf]  ;;  %11408 = vst [vmem:[%s14591_s5 + $0xad0] sm:$0xf] %v11407_v38  ;;  %11410 = vst [vmem:[%s14591_s5 + $0xadc] sm:$0xf] %v11409_v39 }
 0x12e   : > { %11412 = vst [vmem:[%s14591_s5 + $0xae8] sm:$0xf] %v11411_v40  ;;  %v11413_v41 = vld [vmem:[%s14586_s30 + $0x20cc] sm:$0xf]  ;;  %v11415_v42 = vld [vmem:[%s14586_s30 + $0x20f0] sm:$0xf] }
 0x12f   : > { %v11417_v43 = vld [vmem:[%s14586_s30 + $0x2114] sm:$0xf]  ;;  %11414 = vst [vmem:[%s14591_s5 + $0xaf4] sm:$0xf] %v11413_v41  ;;  %11416 = vst [vmem:[%s14591_s5 + $0xb00] sm:$0xf] %v11415_v42 }
 0x130   : > { %11418 = vst [vmem:[%s14591_s5 + $0xb0c] sm:$0xf] %v11417_v43  ;;  %v11419_v44 = vld [vmem:[%s14586_s30 + $0x2138] sm:$0xf]  ;;  %v11421_v45 = vld [vmem:[%s14586_s30 + $0x215c] sm:$0xf] }
 0x131   : > { %v11423_v46 = vld [vmem:[%s14586_s30 + $0x2180] sm:$0xf]  ;;  %11420 = vst [vmem:[%s14591_s5 + $0xb18] sm:$0xf] %v11419_v44  ;;  %11422 = vst [vmem:[%s14591_s5 + $0xb24] sm:$0xf] %v11421_v45 }
 0x132   : > { %11424 = vst [vmem:[%s14591_s5 + $0xb30] sm:$0xf] %v11423_v46  ;;  %v11425_v47 = vld [vmem:[%s14586_s30 + $0x21a4] sm:$0xf]  ;;  %v11427_v48 = vld [vmem:[%s14586_s30 + $0x21c8] sm:$0xf] }
 0x133   : > { %v11429_v49 = vld [vmem:[%s14586_s30 + $0x21ec] sm:$0xf]  ;;  %11426 = vst [vmem:[%s14591_s5 + $0xb3c] sm:$0xf] %v11425_v47  ;;  %11428 = vst [vmem:[%s14591_s5 + $0xb48] sm:$0xf] %v11427_v48 }
 0x134   : > { %11430 = vst [vmem:[%s14591_s5 + $0xb54] sm:$0xf] %v11429_v49  ;;  %v11431_v50 = vld [vmem:[%s14586_s30 + $0x2210] sm:$0xf]  ;;  %v11433_v51 = vld [vmem:[%s14586_s30 + $0x2234] sm:$0xf] }
 0x135   : > { %v11435_v52 = vld [vmem:[%s14586_s30 + $0x2258] sm:$0xf]  ;;  %11432 = vst [vmem:[%s14591_s5 + $0xb60] sm:$0xf] %v11431_v50  ;;  %11434 = vst [vmem:[%s14591_s5 + $0xb6c] sm:$0xf] %v11433_v51 }
 0x136   : > { %11436 = vst [vmem:[%s14591_s5 + $0xb78] sm:$0xf] %v11435_v52  ;;  %v11437_v53 = vld [vmem:[%s14586_s30 + $0x227c] sm:$0xf]  ;;  %v11439_v54 = vld [vmem:[%s14586_s30 + $0x22a0] sm:$0xf] }
 0x137   : > { %v11441_v55 = vld [vmem:[%s14586_s30 + $0x22c4] sm:$0xf]  ;;  %11438 = vst [vmem:[%s14591_s5 + $0xb84] sm:$0xf] %v11437_v53  ;;  %11440 = vst [vmem:[%s14591_s5 + $0xb90] sm:$0xf] %v11439_v54 }
 0x138   : > { %11442 = vst [vmem:[%s14591_s5 + $0xb9c] sm:$0xf] %v11441_v55  ;;  %v11443_v56 = vld [vmem:[%s14586_s30 + $0x22e8] sm:$0xf]  ;;  %v11445_v57 = vld [vmem:[%s14586_s30 + $0x230c] sm:$0xf] }
 0x139   : > { %v11447_v58 = vld [vmem:[%s14586_s30 + $0x2330] sm:$0xf]  ;;  %11444 = vst [vmem:[%s14591_s5 + $0xba8] sm:$0xf] %v11443_v56  ;;  %11446 = vst [vmem:[%s14591_s5 + $0xbb4] sm:$0xf] %v11445_v57 }
 0x13a   : > { %11448 = vst [vmem:[%s14591_s5 + $0xbc0] sm:$0xf] %v11447_v58  ;;  %v11449_v59 = vld [vmem:[%s14586_s30 + $0x2354] sm:$0xf]  ;;  %v11451_v60 = vld [vmem:[%s14586_s30 + $0x2378] sm:$0xf] }
 0x13b   : > { %v11453_v61 = vld [vmem:[%s14586_s30 + $0x239c] sm:$0xf]  ;;  %11450 = vst [vmem:[%s14591_s5 + $0xbcc] sm:$0xf] %v11449_v59  ;;  %11452 = vst [vmem:[%s14591_s5 + $0xbd8] sm:$0xf] %v11451_v60 }
 0x13c   : > { %11454 = vst [vmem:[%s14591_s5 + $0xbe4] sm:$0xf] %v11453_v61  ;;  %v11455_v62 = vld [vmem:[%s14586_s30 + $0x23c0] sm:$0xf]  ;;  %v11457_v63 = vld [vmem:[%s14586_s30 + $0x23e4] sm:$0xf] }
 0x13d   : > { %11456 = vst [vmem:[%s14591_s5 + $0xbf0] sm:$0xf] %v11455_v62  ;;  %11458 = vst [vmem:[%s14591_s5 + $0xbfc] sm:$0xf] %v11457_v63 }
 0x13e PF: > { %p11459_p6 = scmp.ge.s32.totalorder %s14510_s19, 1  ;;  %p1257_p7 = scmp.lt.s32.totalorder %s14510_s19, 4 }
 0x140   : > { %p1258_p8 = pnand %p11459_p6, %p1257_p7 }
 0x142   : > { %1261 = sbr.rel (%p1258_p8) target bundleno = 2432 (0x980), region = 58 }
 0x149   : > { %s1264_s6 = sand.u32 1, %s14494_s15   ;;  %s1299_s7 = smul.u32 48, %s14502_s17 }
 0x14a   : > { %s13596_s8 = smul.u32 3072, %s1264_s6  ;;  %p11461_p10 = scmp.ne.s32.totalorder %s14502_s17, 0 }
 0x14b   : > { %p1300_p9 = scmp.lt.s32.totalorder %s1299_s7, 143  ;;  %v14512_v0 = vmov (!%p11461_p10), 0.0  }
 0x14c   : > { %s15623_s13 = scalar_lea.vmem [#allocation3], %s13596_s8  ;;  %1318 = sbr.rel (%p11461_p10) target bundleno = 460 (0x1cc), region = 66  ;;  %1319 = vst [vmem:[#allocation2] sm:$0xff] (!%p11461_p10), %v14512_v0  ;;  %1320 = vst [vmem:[#allocation2 + $0x8] sm:$0xff] (!%p11461_p10), %v14512_v0 }
 0x14d   : > { %s17793_s7 = smov (!%p1300_p9, %s1299_s7), 143  ;;  %1321 = vst [vmem:[#allocation2 + $0x10] sm:$0xff] (!%p11461_p10), %v14512_v0  ;;  %1322 = vst [vmem:[#allocation2 + $0x18] sm:$0xff] (!%p11461_p10), %v14512_v0 }
 0x14e   : > { %s11460_s9 = sshll.u32 %s17793_s7, 2  ;;  %1323 = vst [vmem:[#allocation2 + $0x20] sm:$0xff] (!%p11461_p10), %v14512_v0  ;;  %1324 = vst [vmem:[#allocation2 + $0x28] sm:$0xff] (!%p11461_p10), %v14512_v0 }
 0x14f   : > { %s15621_s12 = scalar_lea.vmem %s17613_s1, %s11460_s9  ;;  %1325 = vst [vmem:[#allocation2 + $0x30] sm:$0xff] (!%p11461_p10), %v14512_v0  ;;  %1326 = vst [vmem:[#allocation2 + $0x38] sm:$0xff] (!%p11461_p10), %v14512_v0 }
 0x150   : > { %1327 = vst [vmem:[#allocation2 + $0x40] sm:$0xff] (!%p11461_p10), %v14512_v0  ;;  %1328 = vst [vmem:[#allocation2 + $0x48] sm:$0xff] (!%p11461_p10), %v14512_v0 }
 0x151   : > { %1329 = vst [vmem:[#allocation2 + $0x50] sm:$0xff] (!%p11461_p10), %v14512_v0  ;;  %1330 = vst [vmem:[#allocation2 + $0x58] sm:$0xff] (!%p11461_p10), %v14512_v0 }
 0x152   : > { %1331 = vst [vmem:[#allocation2 + $0x60] sm:$0xff] (!%p11461_p10), %v14512_v0  ;;  %1332 = vst [vmem:[#allocation2 + $0x68] sm:$0xff] (!%p11461_p10), %v14512_v0 }
 0x153   : > { %1333 = vst [vmem:[#allocation2 + $0x70] sm:$0xff] %v14512_v0  ;;  %1334 = vst [vmem:[#allocation2 + $0x78] sm:$0xff] %v14512_v0 }
 0x154   : > { %1335 = vst [vmem:[#allocation2 + $0x80] sm:$0xff] %v14512_v0  ;;  %1336 = vst [vmem:[#allocation2 + $0x88] sm:$0xff] %v14512_v0 }
 0x155   : > { %1337 = vst [vmem:[#allocation2 + $0x90] sm:$0xff] %v14512_v0  ;;  %1338 = vst [vmem:[#allocation2 + $0x98] sm:$0xff] %v14512_v0 }
 0x156   : > { %1339 = vst [vmem:[#allocation2 + $0xa0] sm:$0xff] %v14512_v0  ;;  %1340 = vst [vmem:[#allocation2 + $0xa8] sm:$0xff] %v14512_v0 }
 0x157   : > { %1341 = vst [vmem:[#allocation2 + $0xb0] sm:$0xff] %v14512_v0  ;;  %1342 = vst [vmem:[#allocation2 + $0xb8] sm:$0xff] %v14512_v0 }
 0x158   : > { %1343 = vst [vmem:[#allocation2 + $0xc0] sm:$0xff] %v14512_v0  ;;  %1344 = vst [vmem:[#allocation2 + $0xc8] sm:$0xff] %v14512_v0 }
 0x159   : > { %1345 = vst [vmem:[#allocation2 + $0xd0] sm:$0xff] %v14512_v0  ;;  %1346 = vst [vmem:[#allocation2 + $0xd8] sm:$0xff] %v14512_v0 }
 0x15a   : > { %1347 = vst [vmem:[#allocation2 + $0xe0] sm:$0xff] %v14512_v0  ;;  %1348 = vst [vmem:[#allocation2 + $0xe8] sm:$0xff] %v14512_v0 }
 0x15b   : > { %1349 = vst [vmem:[#allocation2 + $0xf0] sm:$0xff] %v14512_v0  ;;  %1350 = vst [vmem:[#allocation2 + $0xf8] sm:$0xff] %v14512_v0 }
 0x15c   : > { %1351 = vst [vmem:[#allocation2 + $0x100] sm:$0xff] %v14512_v0  ;;  %1352 = vst [vmem:[#allocation2 + $0x108] sm:$0xff] %v14512_v0 }
 0x15d   : > { %1353 = vst [vmem:[#allocation2 + $0x110] sm:$0xff] %v14512_v0  ;;  %1354 = vst [vmem:[#allocation2 + $0x118] sm:$0xff] %v14512_v0 }
 0x15e   : > { %1355 = vst [vmem:[#allocation2 + $0x120] sm:$0xff] %v14512_v0  ;;  %1356 = vst [vmem:[#allocation2 + $0x128] sm:$0xff] %v14512_v0 }
 0x15f   : > { %1357 = vst [vmem:[#allocation2 + $0x130] sm:$0xff] %v14512_v0  ;;  %1358 = vst [vmem:[#allocation2 + $0x138] sm:$0xff] %v14512_v0 }
 0x160   : > { %1359 = vst [vmem:[#allocation2 + $0x140] sm:$0xff] %v14512_v0  ;;  %1360 = vst [vmem:[#allocation2 + $0x148] sm:$0xff] %v14512_v0 }
 0x161   : > { %1361 = vst [vmem:[#allocation2 + $0x150] sm:$0xff] %v14512_v0  ;;  %1362 = vst [vmem:[#allocation2 + $0x158] sm:$0xff] %v14512_v0 }
 0x162   : > { %1363 = vst [vmem:[#allocation2 + $0x160] sm:$0xff] %v14512_v0  ;;  %1364 = vst [vmem:[#allocation2 + $0x168] sm:$0xff] %v14512_v0 }
 0x163   : > { %1365 = vst [vmem:[#allocation2 + $0x170] sm:$0xff] %v14512_v0  ;;  %1366 = vst [vmem:[#allocation2 + $0x178] sm:$0xff] %v14512_v0 }
 0x164   : > { %1367 = vst [vmem:[#allocation2 + $0x180] sm:$0xff] %v14512_v0  ;;  %1368 = vst [vmem:[#allocation2 + $0x188] sm:$0xff] %v14512_v0 }
 0x165   : > { %1369 = vst [vmem:[#allocation2 + $0x190] sm:$0xff] %v14512_v0  ;;  %1370 = vst [vmem:[#allocation2 + $0x198] sm:$0xff] %v14512_v0 }
 0x166   : > { %1371 = vst [vmem:[#allocation2 + $0x1a0] sm:$0xff] %v14512_v0  ;;  %1372 = vst [vmem:[#allocation2 + $0x1a8] sm:$0xff] %v14512_v0 }
 0x167   : > { %1373 = vst [vmem:[#allocation2 + $0x1b0] sm:$0xff] %v14512_v0  ;;  %1374 = vst [vmem:[#allocation2 + $0x1b8] sm:$0xff] %v14512_v0 }
 0x168   : > { %1375 = vst [vmem:[#allocation2 + $0x1c0] sm:$0xff] %v14512_v0  ;;  %1376 = vst [vmem:[#allocation2 + $0x1c8] sm:$0xff] %v14512_v0 }
 0x169   : > { %1377 = vst [vmem:[#allocation2 + $0x1d0] sm:$0xff] %v14512_v0  ;;  %1378 = vst [vmem:[#allocation2 + $0x1d8] sm:$0xff] %v14512_v0 }
 0x16a   : > { %1379 = vst [vmem:[#allocation2 + $0x1e0] sm:$0xff] %v14512_v0  ;;  %1380 = vst [vmem:[#allocation2 + $0x1e8] sm:$0xff] %v14512_v0 }
 0x16b   : > { %1381 = vst [vmem:[#allocation2 + $0x1f0] sm:$0xff] %v14512_v0  ;;  %1382 = vst [vmem:[#allocation2 + $0x1f8] sm:$0xff] %v14512_v0 }
 0x16c   : > { %1383 = vst [vmem:[#allocation2 + $0x200] sm:$0xff] %v14512_v0  ;;  %1384 = vst [vmem:[#allocation2 + $0x208] sm:$0xff] %v14512_v0 }
 0x16d   : > { %1385 = vst [vmem:[#allocation2 + $0x210] sm:$0xff] %v14512_v0  ;;  %1386 = vst [vmem:[#allocation2 + $0x218] sm:$0xff] %v14512_v0 }
 0x16e   : > { %1387 = vst [vmem:[#allocation2 + $0x220] sm:$0xff] %v14512_v0  ;;  %1388 = vst [vmem:[#allocation2 + $0x228] sm:$0xff] %v14512_v0 }
 0x16f   : > { %1389 = vst [vmem:[#allocation2 + $0x230] sm:$0xff] %v14512_v0  ;;  %1390 = vst [vmem:[#allocation2 + $0x238] sm:$0xff] %v14512_v0 }
 0x170   : > { %1391 = vst [vmem:[#allocation2 + $0x240] sm:$0xff] %v14512_v0  ;;  %1392 = vst [vmem:[#allocation2 + $0x248] sm:$0xff] %v14512_v0 }
 0x171   : > { %1393 = vst [vmem:[#allocation2 + $0x250] sm:$0xff] %v14512_v0  ;;  %1394 = vst [vmem:[#allocation2 + $0x258] sm:$0xff] %v14512_v0 }
 0x172   : > { %1395 = vst [vmem:[#allocation2 + $0x260] sm:$0xff] %v14512_v0  ;;  %1396 = vst [vmem:[#allocation2 + $0x268] sm:$0xff] %v14512_v0 }
 0x173   : > { %1397 = vst [vmem:[#allocation2 + $0x270] sm:$0xff] %v14512_v0  ;;  %1398 = vst [vmem:[#allocation2 + $0x278] sm:$0xff] %v14512_v0 }
 0x174   : > { %1399 = vst [vmem:[#allocation2 + $0x280] sm:$0xff] %v14512_v0  ;;  %1400 = vst [vmem:[#allocation2 + $0x288] sm:$0xff] %v14512_v0 }
 0x175   : > { %1401 = vst [vmem:[#allocation2 + $0x290] sm:$0xff] %v14512_v0  ;;  %1402 = vst [vmem:[#allocation2 + $0x298] sm:$0xff] %v14512_v0 }
 0x176   : > { %1403 = vst [vmem:[#allocation2 + $0x2a0] sm:$0xff] %v14512_v0  ;;  %1404 = vst [vmem:[#allocation2 + $0x2a8] sm:$0xff] %v14512_v0 }
 0x177   : > { %1405 = vst [vmem:[#allocation2 + $0x2b0] sm:$0xff] %v14512_v0  ;;  %1406 = vst [vmem:[#allocation2 + $0x2b8] sm:$0xff] %v14512_v0 }
 0x178   : > { %1407 = vst [vmem:[#allocation2 + $0x2c0] sm:$0xff] %v14512_v0  ;;  %1408 = vst [vmem:[#allocation2 + $0x2c8] sm:$0xff] %v14512_v0 }
 0x179   : > { %1409 = vst [vmem:[#allocation2 + $0x2d0] sm:$0xff] %v14512_v0  ;;  %1410 = vst [vmem:[#allocation2 + $0x2d8] sm:$0xff] %v14512_v0 }
 0x17a   : > { %1411 = vst [vmem:[#allocation2 + $0x2e0] sm:$0xff] %v14512_v0  ;;  %1412 = vst [vmem:[#allocation2 + $0x2e8] sm:$0xff] %v14512_v0 }
 0x17b   : > { %1413 = vst [vmem:[#allocation2 + $0x2f0] sm:$0xff] %v14512_v0  ;;  %1414 = vst [vmem:[#allocation2 + $0x2f8] sm:$0xff] %v14512_v0 }
 0x17c   : > { %1415 = vst [vmem:[#allocation2 + $0x300] sm:$0xff] %v14512_v0  ;;  %1416 = vst [vmem:[#allocation2 + $0x308] sm:$0xff] %v14512_v0 }
 0x17d   : > { %1417 = vst [vmem:[#allocation2 + $0x310] sm:$0xff] %v14512_v0  ;;  %1418 = vst [vmem:[#allocation2 + $0x318] sm:$0xff] %v14512_v0 }
 0x17e   : > { %1419 = vst [vmem:[#allocation2 + $0x320] sm:$0xff] %v14512_v0  ;;  %1420 = vst [vmem:[#allocation2 + $0x328] sm:$0xff] %v14512_v0 }
 0x17f   : > { %1421 = vst [vmem:[#allocation2 + $0x330] sm:$0xff] %v14512_v0  ;;  %1422 = vst [vmem:[#allocation2 + $0x338] sm:$0xff] %v14512_v0 }
 0x180   : > { %1423 = vst [vmem:[#allocation2 + $0x340] sm:$0xff] %v14512_v0  ;;  %1424 = vst [vmem:[#allocation2 + $0x348] sm:$0xff] %v14512_v0 }
 0x181   : > { %1425 = vst [vmem:[#allocation2 + $0x350] sm:$0xff] %v14512_v0  ;;  %1426 = vst [vmem:[#allocation2 + $0x358] sm:$0xff] %v14512_v0 }
 0x182   : > { %1427 = vst [vmem:[#allocation2 + $0x360] sm:$0xff] %v14512_v0  ;;  %1428 = vst [vmem:[#allocation2 + $0x368] sm:$0xff] %v14512_v0 }
 0x183   : > { %1429 = vst [vmem:[#allocation2 + $0x370] sm:$0xff] %v14512_v0  ;;  %1430 = vst [vmem:[#allocation2 + $0x378] sm:$0xff] %v14512_v0 }
 0x184   : > { %1431 = vst [vmem:[#allocation2 + $0x380] sm:$0xff] %v14512_v0  ;;  %1432 = vst [vmem:[#allocation2 + $0x388] sm:$0xff] %v14512_v0 }
 0x185   : > { %1433 = vst [vmem:[#allocation2 + $0x390] sm:$0xff] %v14512_v0  ;;  %1434 = vst [vmem:[#allocation2 + $0x398] sm:$0xff] %v14512_v0 }
 0x186   : > { %1435 = vst [vmem:[#allocation2 + $0x3a0] sm:$0xff] %v14512_v0  ;;  %1436 = vst [vmem:[#allocation2 + $0x3a8] sm:$0xff] %v14512_v0 }
 0x187   : > { %1437 = vst [vmem:[#allocation2 + $0x3b0] sm:$0xff] %v14512_v0  ;;  %1438 = vst [vmem:[#allocation2 + $0x3b8] sm:$0xff] %v14512_v0 }
 0x188   : > { %1439 = vst [vmem:[#allocation2 + $0x3c0] sm:$0xff] %v14512_v0  ;;  %1440 = vst [vmem:[#allocation2 + $0x3c8] sm:$0xff] %v14512_v0 }
 0x189   : > { %1441 = vst [vmem:[#allocation2 + $0x3d0] sm:$0xff] %v14512_v0  ;;  %1442 = vst [vmem:[#allocation2 + $0x3d8] sm:$0xff] %v14512_v0 }
 0x18a   : > { %1443 = vst [vmem:[#allocation2 + $0x3e0] sm:$0xff] %v14512_v0  ;;  %1444 = vst [vmem:[#allocation2 + $0x3e8] sm:$0xff] %v14512_v0 }
 0x18b   : > { %1445 = vst [vmem:[#allocation2 + $0x3f0] sm:$0xff] %v14512_v0  ;;  %1446 = vst [vmem:[#allocation2 + $0x3f8] sm:$0xff] %v14512_v0 }
 0x18c   : > { %1447 = vst [vmem:[#allocation2 + $0x400] sm:$0xff] %v14512_v0  ;;  %1448 = vst [vmem:[#allocation2 + $0x408] sm:$0xff] %v14512_v0 }
 0x18d   : > { %1449 = vst [vmem:[#allocation2 + $0x410] sm:$0xff] %v14512_v0  ;;  %1450 = vst [vmem:[#allocation2 + $0x418] sm:$0xff] %v14512_v0 }
 0x18e   : > { %1451 = vst [vmem:[#allocation2 + $0x420] sm:$0xff] %v14512_v0  ;;  %1452 = vst [vmem:[#allocation2 + $0x428] sm:$0xff] %v14512_v0 }
 0x18f   : > { %1453 = vst [vmem:[#allocation2 + $0x430] sm:$0xff] %v14512_v0  ;;  %1454 = vst [vmem:[#allocation2 + $0x438] sm:$0xff] %v14512_v0 }
 0x190   : > { %1455 = vst [vmem:[#allocation2 + $0x440] sm:$0xff] %v14512_v0  ;;  %1456 = vst [vmem:[#allocation2 + $0x448] sm:$0xff] %v14512_v0 }
 0x191   : > { %1457 = vst [vmem:[#allocation2 + $0x450] sm:$0xff] %v14512_v0  ;;  %1458 = vst [vmem:[#allocation2 + $0x458] sm:$0xff] %v14512_v0 }
 0x192   : > { %1459 = vst [vmem:[#allocation2 + $0x460] sm:$0xff] %v14512_v0  ;;  %1460 = vst [vmem:[#allocation2 + $0x468] sm:$0xff] %v14512_v0 }
 0x193   : > { %1461 = vst [vmem:[#allocation2 + $0x470] sm:$0xff] %v14512_v0  ;;  %1462 = vst [vmem:[#allocation2 + $0x478] sm:$0xff] %v14512_v0 }
 0x194   : > { %1463 = vst [vmem:[#allocation2 + $0x480] sm:$0xff] %v14512_v0  ;;  %1464 = vst [vmem:[#allocation2 + $0x488] sm:$0xff] %v14512_v0 }
 0x195   : > { %1465 = vst [vmem:[#allocation2 + $0x490] sm:$0xff] %v14512_v0  ;;  %1466 = vst [vmem:[#allocation2 + $0x498] sm:$0xff] %v14512_v0 }
 0x196   : > { %1467 = vst [vmem:[#allocation2 + $0x4a0] sm:$0xff] %v14512_v0  ;;  %1468 = vst [vmem:[#allocation2 + $0x4a8] sm:$0xff] %v14512_v0 }
 0x197   : > { %1469 = vst [vmem:[#allocation2 + $0x4b0] sm:$0xff] %v14512_v0  ;;  %1470 = vst [vmem:[#allocation2 + $0x4b8] sm:$0xff] %v14512_v0 }
 0x198   : > { %1471 = vst [vmem:[#allocation2 + $0x4c0] sm:$0xff] %v14512_v0  ;;  %1472 = vst [vmem:[#allocation2 + $0x4c8] sm:$0xff] %v14512_v0 }
 0x199   : > { %1473 = vst [vmem:[#allocation2 + $0x4d0] sm:$0xff] %v14512_v0  ;;  %1474 = vst [vmem:[#allocation2 + $0x4d8] sm:$0xff] %v14512_v0 }
 0x19a   : > { %1475 = vst [vmem:[#allocation2 + $0x4e0] sm:$0xff] %v14512_v0  ;;  %1476 = vst [vmem:[#allocation2 + $0x4e8] sm:$0xff] %v14512_v0 }
 0x19b   : > { %1477 = vst [vmem:[#allocation2 + $0x4f0] sm:$0xff] %v14512_v0  ;;  %1478 = vst [vmem:[#allocation2 + $0x4f8] sm:$0xff] %v14512_v0 }
 0x19c   : > { %1479 = vst [vmem:[#allocation2 + $0x500] sm:$0xff] %v14512_v0  ;;  %1480 = vst [vmem:[#allocation2 + $0x508] sm:$0xff] %v14512_v0 }
 0x19d   : > { %1481 = vst [vmem:[#allocation2 + $0x510] sm:$0xff] %v14512_v0  ;;  %1482 = vst [vmem:[#allocation2 + $0x518] sm:$0xff] %v14512_v0 }
 0x19e   : > { %1483 = vst [vmem:[#allocation2 + $0x520] sm:$0xff] %v14512_v0  ;;  %1484 = vst [vmem:[#allocation2 + $0x528] sm:$0xff] %v14512_v0 }
 0x19f   : > { %1485 = vst [vmem:[#allocation2 + $0x530] sm:$0xff] %v14512_v0  ;;  %1486 = vst [vmem:[#allocation2 + $0x538] sm:$0xff] %v14512_v0 }
 0x1a0   : > { %1487 = vst [vmem:[#allocation2 + $0x540] sm:$0xff] %v14512_v0  ;;  %1488 = vst [vmem:[#allocation2 + $0x548] sm:$0xff] %v14512_v0 }
 0x1a1   : > { %1489 = vst [vmem:[#allocation2 + $0x550] sm:$0xff] %v14512_v0  ;;  %1490 = vst [vmem:[#allocation2 + $0x558] sm:$0xff] %v14512_v0 }
 0x1a2   : > { %1491 = vst [vmem:[#allocation2 + $0x560] sm:$0xff] %v14512_v0  ;;  %1492 = vst [vmem:[#allocation2 + $0x568] sm:$0xff] %v14512_v0 }
 0x1a3   : > { %1493 = vst [vmem:[#allocation2 + $0x570] sm:$0xff] %v14512_v0  ;;  %1494 = vst [vmem:[#allocation2 + $0x578] sm:$0xff] %v14512_v0 }
 0x1a4   : > { %1495 = vst [vmem:[#allocation2 + $0x580] sm:$0xff] %v14512_v0  ;;  %1496 = vst [vmem:[#allocation2 + $0x588] sm:$0xff] %v14512_v0 }
 0x1a5   : > { %1497 = vst [vmem:[#allocation2 + $0x590] sm:$0xff] %v14512_v0  ;;  %1498 = vst [vmem:[#allocation2 + $0x598] sm:$0xff] %v14512_v0 }
 0x1a6   : > { %1499 = vst [vmem:[#allocation2 + $0x5a0] sm:$0xff] %v14512_v0  ;;  %1500 = vst [vmem:[#allocation2 + $0x5a8] sm:$0xff] %v14512_v0 }
 0x1a7   : > { %1501 = vst [vmem:[#allocation2 + $0x5b0] sm:$0xff] %v14512_v0  ;;  %1502 = vst [vmem:[#allocation2 + $0x5b8] sm:$0xff] %v14512_v0 }
 0x1a8   : > { %1503 = vst [vmem:[#allocation2 + $0x5c0] sm:$0xff] %v14512_v0  ;;  %1504 = vst [vmem:[#allocation2 + $0x5c8] sm:$0xff] %v14512_v0 }
 0x1a9   : > { %1505 = vst [vmem:[#allocation2 + $0x5d0] sm:$0xff] %v14512_v0  ;;  %1506 = vst [vmem:[#allocation2 + $0x5d8] sm:$0xff] %v14512_v0 }
 0x1aa   : > { %1507 = vst [vmem:[#allocation2 + $0x5e0] sm:$0xff] %v14512_v0  ;;  %1508 = vst [vmem:[#allocation2 + $0x5e8] sm:$0xff] %v14512_v0 }
 0x1ab   : > { %1509 = vst [vmem:[#allocation2 + $0x5f0] sm:$0xff] %v14512_v0  ;;  %1510 = vst [vmem:[#allocation2 + $0x5f8] sm:$0xff] %v14512_v0 }
 0x1ac   : > { %1511 = vst [vmem:[#allocation2 + $0x600] sm:$0xff] %v14512_v0  ;;  %1512 = vst [vmem:[#allocation2 + $0x608] sm:$0xff] %v14512_v0 }
 0x1ad   : > { %1513 = vst [vmem:[#allocation2 + $0x610] sm:$0xff] %v14512_v0  ;;  %1514 = vst [vmem:[#allocation2 + $0x618] sm:$0xff] %v14512_v0 }
 0x1ae   : > { %1515 = vst [vmem:[#allocation2 + $0x620] sm:$0xff] %v14512_v0  ;;  %1516 = vst [vmem:[#allocation2 + $0x628] sm:$0xff] %v14512_v0 }
 0x1af   : > { %1517 = vst [vmem:[#allocation2 + $0x630] sm:$0xff] %v14512_v0  ;;  %1518 = vst [vmem:[#allocation2 + $0x638] sm:$0xff] %v14512_v0 }
 0x1b0   : > { %1519 = vst [vmem:[#allocation2 + $0x640] sm:$0xff] %v14512_v0  ;;  %1520 = vst [vmem:[#allocation2 + $0x648] sm:$0xff] %v14512_v0 }
 0x1b1   : > { %1521 = vst [vmem:[#allocation2 + $0x650] sm:$0xff] %v14512_v0  ;;  %1522 = vst [vmem:[#allocation2 + $0x658] sm:$0xff] %v14512_v0 }
 0x1b2   : > { %1523 = vst [vmem:[#allocation2 + $0x660] sm:$0xff] %v14512_v0  ;;  %1524 = vst [vmem:[#allocation2 + $0x668] sm:$0xff] %v14512_v0 }
 0x1b3   : > { %1525 = vst [vmem:[#allocation2 + $0x670] sm:$0xff] %v14512_v0  ;;  %1526 = vst [vmem:[#allocation2 + $0x678] sm:$0xff] %v14512_v0 }
 0x1b4   : > { %1527 = vst [vmem:[#allocation2 + $0x680] sm:$0xff] %v14512_v0  ;;  %1528 = vst [vmem:[#allocation2 + $0x688] sm:$0xff] %v14512_v0 }
 0x1b5   : > { %1529 = vst [vmem:[#allocation2 + $0x690] sm:$0xff] %v14512_v0  ;;  %1530 = vst [vmem:[#allocation2 + $0x698] sm:$0xff] %v14512_v0 }
 0x1b6   : > { %1531 = vst [vmem:[#allocation2 + $0x6a0] sm:$0xff] %v14512_v0  ;;  %1532 = vst [vmem:[#allocation2 + $0x6a8] sm:$0xff] %v14512_v0 }
 0x1b7   : > { %1533 = vst [vmem:[#allocation2 + $0x6b0] sm:$0xff] %v14512_v0  ;;  %1534 = vst [vmem:[#allocation2 + $0x6b8] sm:$0xff] %v14512_v0 }
 0x1b8   : > { %1535 = vst [vmem:[#allocation2 + $0x6c0] sm:$0xff] %v14512_v0  ;;  %1536 = vst [vmem:[#allocation2 + $0x6c8] sm:$0xff] %v14512_v0 }
 0x1b9   : > { %1537 = vst [vmem:[#allocation2 + $0x6d0] sm:$0xff] %v14512_v0  ;;  %1538 = vst [vmem:[#allocation2 + $0x6d8] sm:$0xff] %v14512_v0 }
 0x1ba   : > { %1539 = vst [vmem:[#allocation2 + $0x6e0] sm:$0xff] %v14512_v0  ;;  %1540 = vst [vmem:[#allocation2 + $0x6e8] sm:$0xff] %v14512_v0 }
 0x1bb   : > { %1541 = vst [vmem:[#allocation2 + $0x6f0] sm:$0xff] %v14512_v0  ;;  %1542 = vst [vmem:[#allocation2 + $0x6f8] sm:$0xff] %v14512_v0 }
 0x1bc   : > { %1543 = vst [vmem:[#allocation2 + $0x700] sm:$0xff] %v14512_v0  ;;  %1544 = vst [vmem:[#allocation2 + $0x708] sm:$0xff] %v14512_v0 }
 0x1bd   : > { %1545 = vst [vmem:[#allocation2 + $0x710] sm:$0xff] %v14512_v0  ;;  %1546 = vst [vmem:[#allocation2 + $0x718] sm:$0xff] %v14512_v0 }
 0x1be   : > { %1547 = vst [vmem:[#allocation2 + $0x720] sm:$0xff] %v14512_v0  ;;  %1548 = vst [vmem:[#allocation2 + $0x728] sm:$0xff] %v14512_v0 }
 0x1bf   : > { %1549 = vst [vmem:[#allocation2 + $0x730] sm:$0xff] %v14512_v0  ;;  %1550 = vst [vmem:[#allocation2 + $0x738] sm:$0xff] %v14512_v0 }
 0x1c0   : > { %1551 = vst [vmem:[#allocation2 + $0x740] sm:$0xff] %v14512_v0  ;;  %1552 = vst [vmem:[#allocation2 + $0x748] sm:$0xff] %v14512_v0 }
 0x1c1   : > { %1553 = vst [vmem:[#allocation2 + $0x750] sm:$0xff] %v14512_v0  ;;  %1554 = vst [vmem:[#allocation2 + $0x758] sm:$0xff] %v14512_v0 }
 0x1c2   : > { %1555 = vst [vmem:[#allocation2 + $0x760] sm:$0xff] %v14512_v0  ;;  %1556 = vst [vmem:[#allocation2 + $0x768] sm:$0xff] %v14512_v0 }
 0x1c3   : > { %1557 = vst [vmem:[#allocation2 + $0x770] sm:$0xff] %v14512_v0  ;;  %1558 = vst [vmem:[#allocation2 + $0x778] sm:$0xff] %v14512_v0 }
 0x1c4   : > { %1559 = vst [vmem:[#allocation2 + $0x780] sm:$0xff] %v14512_v0  ;;  %1560 = vst [vmem:[#allocation2 + $0x788] sm:$0xff] %v14512_v0 }
 0x1c5   : > { %1561 = vst [vmem:[#allocation2 + $0x790] sm:$0xff] %v14512_v0  ;;  %1562 = vst [vmem:[#allocation2 + $0x798] sm:$0xff] %v14512_v0 }
 0x1c6   : > { %1563 = vst [vmem:[#allocation2 + $0x7a0] sm:$0xff] %v14512_v0  ;;  %1564 = vst [vmem:[#allocation2 + $0x7a8] sm:$0xff] %v14512_v0 }
 0x1c7   : > { %1565 = vst [vmem:[#allocation2 + $0x7b0] sm:$0xff] %v14512_v0  ;;  %1566 = vst [vmem:[#allocation2 + $0x7b8] sm:$0xff] %v14512_v0 }
 0x1c8   : > { %1567 = vst [vmem:[#allocation2 + $0x7c0] sm:$0xff] %v14512_v0  ;;  %1568 = vst [vmem:[#allocation2 + $0x7c8] sm:$0xff] %v14512_v0 }
 0x1c9   : > { %1569 = vst [vmem:[#allocation2 + $0x7d0] sm:$0xff] %v14512_v0  ;;  %1570 = vst [vmem:[#allocation2 + $0x7d8] sm:$0xff] %v14512_v0 }
 0x1ca   : > { %1571 = vst [vmem:[#allocation2 + $0x7e0] sm:$0xff] %v14512_v0  ;;  %1572 = vst [vmem:[#allocation2 + $0x7e8] sm:$0xff] %v14512_v0 }
 0x1cb   : > { %1573 = vst [vmem:[#allocation2 + $0x7f0] sm:$0xff] %v14512_v0  ;;  %1574 = vst [vmem:[#allocation2 + $0x7f8] sm:$0xff] %v14512_v0 }
 0x1cc PF: > { %v13648_v1 = vld [vmem:[%s15621_s12] sm:$0xff]   ;;  %v14513_v2 = vmov 0   ;;  %v13649_v3 = vld [vmem:[%s15621_s12 + $0x8] sm:$0xff]   ;;  %v13650_v4 = vld [vmem:[%s15621_s12 + $0x10] sm:$0xff]   ;;  %p11870_p11 = scmp.ne.s32.totalorder %s14502_s17, 2 }
 0x1cd   : > { %4583 = vmatprep.subr.bf16.mxu0 %v14513_v2  ;;  %13563 = vmatprep.subr.bf16.mxu1 %v14513_v2  ;;  %v13651_v5 = vld [vmem:[%s15621_s12 + $0x18] sm:$0xff]   ;;  %v13652_v6 = vld [vmem:[%s15621_s12 + $0x20] sm:$0xff]   ;;  %v13653_v8 = vld [vmem:[%s15621_s12 + $0x28] sm:$0xff]  }
 0x1ce   : > { %4584 = vmatpush1.bf16.msra.mxu0 %v13648_v1  ;;  %13579 = vmatpush1.bf16.msra.mxu1 %v13648_v1  ;;  %v13666_v7 = vld [vmem:[%s15623_s13 + $0x4] ss:$12 sps:$4 sm:$0xff]   ;;  %v13655_v11 = vld [vmem:[%s15621_s12 + $0x38] sm:$0xff]   ;;  %v13657_v13 = vld [vmem:[%s15621_s12 + $0x48] sm:$0xff]  }
 0x1cf   : > { %4585 = vmatprep.subr.bf16.mxu0 %v14513_v2  ;;  %13564 = vmatprep.subr.bf16.mxu1 %v14513_v2  ;;  %v13669_v9 = vld [vmem:[%s15623_s13 + $0x904] ss:$12 sps:$4 sm:$0xff]   ;;  %v13659_v15 = vld [vmem:[%s15621_s12 + $0x58] sm:$0xff]   ;;  %v13661_v17 = vld [vmem:[%s15621_s12 + $0x68] sm:$0xff]  }
 0x1d0   : > { %4615 = vmatprep.mubr.bf16.mxu0 %v13666_v7  ;;  %5383 = vmatprep.mubr.bf16.mxu1 %v13669_v9  ;;  %v13654_v10 = vld [vmem:[%s15621_s12 + $0x30] sm:$0xff]   ;;  %v13656_v12 = vld [vmem:[%s15621_s12 + $0x40] sm:$0xff]   ;;  %v13663_v19 = vld [vmem:[%s15621_s12 + $0x78] sm:$0xff]  }
 0x1d1   : > { %v13658_v14 = vld [vmem:[%s15621_s12 + $0x50] sm:$0xff]   ;;  %v13660_v16 = vld [vmem:[%s15621_s12 + $0x60] sm:$0xff]   ;;  %v13671_v23 = vld [vmem:[%s15623_s13 + $0x1c] ss:$12 sps:$4 sm:$0xff]  }
 0x1d2   : > { %4586 = vmatpush1.bf16.msra.mxu0 %v13649_v3  ;;  %13580 = vmatpush1.bf16.msra.mxu1 %v13649_v3  ;;  %v13662_v18 = vld [vmem:[%s15621_s12 + $0x70] sm:$0xff]   ;;  %v13670_v20 = vld [vmem:[%s15621_s12 + $0x80] sm:$0xff]   ;;  %v13673_v24 = vld [vmem:[%s15623_s13 + $0x91c] ss:$12 sps:$4 sm:$0xff]  }
 0x1d3   : > { %4587 = vmatprep.subr.bf16.mxu0 %v14513_v2  ;;  %13565 = vmatprep.subr.bf16.mxu1 %v14513_v2  ;;  %v13664_v21 = vld [vmem:[%s15623_s13] ss:$12 sps:$4 sm:$0xff]   ;;  %v13675_v26 = vld [vmem:[%s15623_s13 + $0x18] ss:$12 sps:$4 sm:$0xff]   ;;  %v13720_v28 = vld [vmem:[%s15621_s12 + $0x90] sm:$0xff]  }
 0x1d4   : > { %v13667_v22 = vld [vmem:[%s15623_s13 + $0x900] ss:$12 sps:$4 sm:$0xff]   ;;  %v13676_v27 = vld [vmem:[%s15623_s13 + $0x918] ss:$12 sps:$4 sm:$0xff]   ;;  %v13681_v33 = vld [vmem:[%s15623_s13 + $0x30] ss:$12 sps:$4 sm:$0xff]  }
 0x1d5   : > { %v13695_v25 = vld [vmem:[%s15621_s12 + $0x88] sm:$0xff]   ;;  %v13677_v29 = vld [vmem:[%s15623_s13 + $0x34] ss:$12 sps:$4 sm:$0xff]   ;;  %v13745_v31 = vld [vmem:[%s15621_s12 + $0x98] sm:$0xff]  }
 0x1d6   : > { %4588 = vmatpush1.bf16.msra.mxu0 %v13650_v4  ;;  %13581 = vmatpush1.bf16.msra.mxu1 %v13650_v4  ;;  %v13679_v30 = vld [vmem:[%s15623_s13 + $0x934] ss:$12 sps:$4 sm:$0xff]   ;;  %v13682_v34 = vld [vmem:[%s15623_s13 + $0x930] ss:$12 sps:$4 sm:$0xff]   ;;  %v13683_v35 = vld [vmem:[%s15623_s13 + $0x4c] ss:$12 sps:$4 sm:$0xff]  }
 0x1d7   : > { %4589 = vmatprep.subr.bf16.mxu0 %v14513_v2  ;;  %13566 = vmatprep.subr.bf16.mxu1 %v14513_v2  ;;  %v13770_v32 = vld [vmem:[%s15621_s12 + $0xa0] sm:$0xff]   ;;  %v13685_v36 = vld [vmem:[%s15623_s13 + $0x94c] ss:$12 sps:$4 sm:$0xff]   ;;  %v13687_v37 = vld [vmem:[%s15623_s13 + $0x48] ss:$12 sps:$4 sm:$0xff]  }
 0x1d8   : > { %v13688_v38 = vld [vmem:[%s15623_s13 + $0x948] ss:$12 sps:$4 sm:$0xff]   ;;  %v13689_v39 = vld [vmem:[%s15623_s13 + $0x64] ss:$12 sps:$4 sm:$0xff]   ;;  %v13693_v41 = vld [vmem:[%s15623_s13 + $0x60] ss:$12 sps:$4 sm:$0xff]  }
 0x1d9   : > { %v13691_v40 = vld [vmem:[%s15623_s13 + $0x964] ss:$12 sps:$4 sm:$0xff]   ;;  %v13694_v42 = vld [vmem:[%s15623_s13 + $0x960] ss:$12 sps:$4 sm:$0xff]   ;;  %v13696_v43 = vld [vmem:[%s15623_s13 + $0x7c] ss:$12 sps:$4 sm:$0xff]  }
 0x1da   : > { %4590 = vmatpush1.bf16.msra.mxu0 %v13651_v5  ;;  %13582 = vmatpush1.bf16.msra.mxu1 %v13651_v5  ;;  %v13698_v44 = vld [vmem:[%s15623_s13 + $0x97c] ss:$12 sps:$4 sm:$0xff]   ;;  %v13700_v46 = vld [vmem:[%s15623_s13 + $0x78] ss:$12 sps:$4 sm:$0xff]   ;;  %v13702_v48 = vld [vmem:[%s15623_s13 + $0x94] ss:$12 sps:$4 sm:$0xff]  }
 0x1db   : > { %4591 = vmatprep.subr.bf16.mxu0 %v14513_v2  ;;  %13567 = vmatprep.subr.bf16.mxu1 %v14513_v2  ;;  %v13795_v45 = vld [vmem:[%s15621_s12 + $0xa8] sm:$0xff]   ;;  %v13701_v47 = vld [vmem:[%s15623_s13 + $0x978] ss:$12 sps:$4 sm:$0xff]   ;;  %v13704_v49 = vld [vmem:[%s15623_s13 + $0x994] ss:$12 sps:$4 sm:$0xff]  }
 0x1dc   : > { %v13706_v50 = vld [vmem:[%s15623_s13 + $0x90] ss:$12 sps:$4 sm:$0xff]   ;;  %v13708_v52 = vld [vmem:[%s15623_s13 + $0xac] ss:$12 sps:$4 sm:$0xff]   ;;  %v13712_v54 = vld [vmem:[%s15623_s13 + $0xa8] ss:$12 sps:$4 sm:$0xff]  }
 0x1dd   : > { %v13707_v51 = vld [vmem:[%s15623_s13 + $0x990] ss:$12 sps:$4 sm:$0xff]   ;;  %v13710_v53 = vld [vmem:[%s15623_s13 + $0x9ac] ss:$12 sps:$4 sm:$0xff]   ;;  %v13713_v55 = vld [vmem:[%s15623_s13 + $0x9a8] ss:$12 sps:$4 sm:$0xff]  }
 0x1de   : > { %4592 = vmatpush1.bf16.msra.mxu0 %v13652_v6  ;;  %13583 = vmatpush1.bf16.msra.mxu1 %v13652_v6  ;;  %v13714_v56 = vld [vmem:[%s15623_s13 + $0xc4] ss:$12 sps:$4 sm:$0xff]   ;;  %v13718_v58 = vld [vmem:[%s15623_s13 + $0xc0] ss:$12 sps:$4 sm:$0xff]   ;;  %v13721_v60 = vld [vmem:[%s15623_s13 + $0xdc] ss:$12 sps:$4 sm:$0xff]  }
 0x1df   : > { %4593 = vmatprep.subr.bf16.mxu0 %v14513_v2  ;;  %13568 = vmatprep.subr.bf16.mxu1 %v14513_v2  ;;  %v13716_v57 = vld [vmem:[%s15623_s13 + $0x9c4] ss:$12 sps:$4 sm:$0xff]   ;;  %v13719_v59 = vld [vmem:[%s15623_s13 + $0x9c0] ss:$12 sps:$4 sm:$0xff]   ;;  %v13723_v61 = vld [vmem:[%s15623_s13 + $0x9dc] ss:$12 sps:$4 sm:$0xff]  }
 0x1e0   : > { %v13820_v62 = vld [vmem:[%s15621_s12 + $0xb0] sm:$0xff]   ;;  %v13725_v63 = vld [vmem:[%s15623_s13 + $0xd8] ss:$12 sps:$4 sm:$0xff]  }
 0x1e1   : > { %v13726_v0 = vld [vmem:[%s15623_s13 + $0x9d8] ss:$12 sps:$4 sm:$0xff]   ;;  %v13727_v1 = vld [vmem:[%s15623_s13 + $0xf4] ss:$12 sps:$4 sm:$0xff]   ;;  %v13731_v3 = vld [vmem:[%s15623_s13 + $0xf0] ss:$12 sps:$4 sm:$0xff]  }
 0x1e2   : > { %4594 = vmatpush1.bf16.msra.mxu0 %v13653_v8  ;;  %13584 = vmatpush1.bf16.msra.mxu1 %v13653_v8  ;;  %v13732_v4 = vld [vmem:[%s15623_s13 + $0x9f0] ss:$12 sps:$4 sm:$0xff]   ;;  %v13733_v5 = vld [vmem:[%s15623_s13 + $0x10c] ss:$12 sps:$4 sm:$0xff]   ;;  %v13737_v7 = vld [vmem:[%s15623_s13 + $0x108] ss:$12 sps:$4 sm:$0xff]  }
 0x1e3   : > { %4595 = vmatprep.subr.bf16.mxu0 %v14513_v2  ;;  %13569 = vmatprep.subr.bf16.mxu1 %v14513_v2  ;;  %v13735_v6 = vld [vmem:[%s15623_s13 + $0xa0c] ss:$12 sps:$4 sm:$0xff]   ;;  %v13738_v8 = vld [vmem:[%s15623_s13 + $0xa08] ss:$12 sps:$4 sm:$0xff]   ;;  %v13739_v9 = vld [vmem:[%s15623_s13 + $0x124] ss:$12 sps:$4 sm:$0xff]  }
 0x1e6   : > { %4596 = vmatpush1.bf16.msra.mxu0 %v13654_v10  ;;  %13585 = vmatpush1.bf16.msra.mxu1 %v13654_v10  ;;  %v13741_v10 = vld [vmem:[%s15623_s13 + $0xa24] ss:$12 sps:$4 sm:$0xff]  }
 0x1e7   : > { %4597 = vmatprep.subr.bf16.mxu0 %v14513_v2  ;;  %13570 = vmatprep.subr.bf16.mxu1 %v14513_v2 }
 0x1ea   : > { %4598 = vmatpush1.bf16.msra.mxu0 %v13655_v11  ;;  %13586 = vmatpush1.bf16.msra.mxu1 %v13655_v11  ;;  %v13743_v11 = vld [vmem:[%s15623_s13 + $0x120] ss:$12 sps:$4 sm:$0xff]  }
 0x1eb   : > { %4599 = vmatprep.subr.bf16.mxu0 %v14513_v2  ;;  %13571 = vmatprep.subr.bf16.mxu1 %v14513_v2 }
 0x1ee   : > { %4600 = vmatpush1.bf16.msra.mxu0 %v13656_v12  ;;  %13587 = vmatpush1.bf16.msra.mxu1 %v13656_v12  ;;  %v13744_v12 = vld [vmem:[%s15623_s13 + $0xa20] ss:$12 sps:$4 sm:$0xff]  }
 0x1ef   : > { %4601 = vmatprep.subr.bf16.mxu0 %v14513_v2  ;;  %13572 = vmatprep.subr.bf16.mxu1 %v14513_v2 }
 0x1f2   : > { %4602 = vmatpush1.bf16.msra.mxu0 %v13657_v13  ;;  %13588 = vmatpush1.bf16.msra.mxu1 %v13657_v13  ;;  %v13746_v13 = vld [vmem:[%s15623_s13 + $0x13c] ss:$12 sps:$4 sm:$0xff]  }
 0x1f3   : > { %4603 = vmatprep.subr.bf16.mxu0 %v14513_v2  ;;  %13573 = vmatprep.subr.bf16.mxu1 %v14513_v2 }
 0x1f6   : > { %4604 = vmatpush1.bf16.msra.mxu0 %v13658_v14  ;;  %13589 = vmatpush1.bf16.msra.mxu1 %v13658_v14  ;;  %v13748_v14 = vld [vmem:[%s15623_s13 + $0xa3c] ss:$12 sps:$4 sm:$0xff]  }
 0x1f7   : > { %4605 = vmatprep.subr.bf16.mxu0 %v14513_v2  ;;  %13574 = vmatprep.subr.bf16.mxu1 %v14513_v2 }
 0x1fa   : > { %4606 = vmatpush1.bf16.msra.mxu0 %v13659_v15  ;;  %13590 = vmatpush1.bf16.msra.mxu1 %v13659_v15  ;;  %v13845_v15 = vld [vmem:[%s15621_s12 + $0xb8] sm:$0xff]  }
 0x1fb   : > { %4607 = vmatprep.subr.bf16.mxu0 %v14513_v2  ;;  %13575 = vmatprep.subr.bf16.mxu1 %v14513_v2 }
 0x1fe   : > { %4608 = vmatpush1.bf16.msra.mxu0 %v13660_v16  ;;  %13591 = vmatpush1.bf16.msra.mxu1 %v13660_v16  ;;  %v13750_v16 = vld [vmem:[%s15623_s13 + $0x138] ss:$12 sps:$4 sm:$0xff]  }
 0x1ff   : > { %4609 = vmatprep.subr.bf16.mxu0 %v14513_v2  ;;  %13576 = vmatprep.subr.bf16.mxu1 %v14513_v2 }
 0x202   : > { %4610 = vmatpush1.bf16.msra.mxu0 %v13661_v17  ;;  %13592 = vmatpush1.bf16.msra.mxu1 %v13661_v17  ;;  %v13751_v17 = vld [vmem:[%s15623_s13 + $0xa38] ss:$12 sps:$4 sm:$0xff]  }
 0x203   : > { %4611 = vmatprep.subr.bf16.mxu0 %v14513_v2  ;;  %13577 = vmatprep.subr.bf16.mxu1 %v14513_v2 }
 0x206   : > { %4612 = vmatpush1.bf16.msra.mxu0 %v13662_v18  ;;  %13593 = vmatpush1.bf16.msra.mxu1 %v13662_v18  ;;  %v13752_v18 = vld [vmem:[%s15623_s13 + $0x154] ss:$12 sps:$4 sm:$0xff]  }
 0x207   : > { %4613 = vmatprep.subr.bf16.mxu0 %v14513_v2  ;;  %13578 = vmatprep.subr.bf16.mxu1 %v14513_v2  ;;  %v13729_v2 = vld [vmem:[%s15623_s13 + $0x9f4] ss:$12 sps:$4 sm:$0xff]  }
 0x20a   : > { %4614 = vmatpush1.bf16.msra.mxu0 %v13663_v19  ;;  %13594 = vmatpush1.bf16.msra.mxu1 %v13663_v19  ;;  %v13754_v19 = vld [vmem:[%s15623_s13 + $0xa54] ss:$12 sps:$4 sm:$0xff]  }
 0x20b   : > { %13291 = vmatprep.subr.bf16.mxu1 %v13670_v20 }
 0x20d   : > { %4616 = vmatmul.mubr.bf16.vlgmr.msra.gmra.mrb[0].mxu0 %v13664_v21  ;;  %5384 = vmatmul.mubr.bf16.vlgmr.msra.gmra.mrb[0].mxu1 %v13667_v22  ;;  %v13757_v21 = vld [vmem:[%s15623_s13 + $0xa50] ss:$12 sps:$4 sm:$0xff]   ;;  %v13758_v22 = vld [vmem:[%s15623_s13 + $0x16c] ss:$12 sps:$4 sm:$0xff]  }
 0x20e   : > { %13292 = vmatpush3.bf16.msra.mxu1 %v13670_v20  ;;  %4623 = vmatprep.mubr.bf16.mxu0 %v13671_v23  ;;  %v13756_v20 = vld [vmem:[%s15623_s13 + $0x150] ss:$12 sps:$4 sm:$0xff]   ;;  %v13760_v23 = vld [vmem:[%s15623_s13 + $0xa6c] ss:$12 sps:$4 sm:$0xff]  }
 0x20f   : > { %5391 = vmatprep.mubr.bf16.mxu1 %v13673_v24  ;;  %13293 = vmatprep.subr.bf16.mxu1 %v13695_v25  ;;  %v13762_v24 = vld [vmem:[%s15623_s13 + $0x168] ss:$12 sps:$4 sm:$0xff]  }
 0x212   : > { %13294 = vmatpush3.bf16.msra.mxu1 %v13695_v25  ;;  %v13763_v25 = vld [vmem:[%s15623_s13 + $0xa68] ss:$12 sps:$4 sm:$0xff]  }
 0x213   : > { %13295 = vmatprep.subr.bf16.mxu1 %v13720_v28 }
 0x215   : > { %4624 = vmatmul.mubr.bf16.gmra.mrb[4].mxu0 %v13675_v26  ;;  %5392 = vmatmul.mubr.bf16.gmra.mrb[4].mxu1 %v13676_v27  ;;  %v13764_v26 = vld [vmem:[%s15623_s13 + $0x184] ss:$12 sps:$4 sm:$0xff]  }
 0x216   : > { %4631 = vmatprep.mubr.bf16.mxu0 %v13677_v29  ;;  %5399 = vmatprep.mubr.bf16.mxu1 %v13679_v30  ;;  %v13766_v27 = vld [vmem:[%s15623_s13 + $0xa84] ss:$12 sps:$4 sm:$0xff]   ;;  %v13769_v29 = vld [vmem:[%s15623_s13 + $0xa80] ss:$12 sps:$4 sm:$0xff]   ;;  %v13771_v30 = vld [vmem:[%s15623_s13 + $0x19c] ss:$12 sps:$4 sm:$0xff]  }
 0x217   : > { %13296 = vmatpush3.bf16.msra.mxu1 %v13720_v28  ;;  %v13768_v28 = vld [vmem:[%s15623_s13 + $0x180] ss:$12 sps:$4 sm:$0xff]  }
 0x218   : > { %13297 = vmatprep.subr.bf16.mxu1 %v13745_v31 }
 0x21b   : > { %13298 = vmatpush3.bf16.msra.mxu1 %v13745_v31  ;;  %v13773_v31 = vld [vmem:[%s15623_s13 + $0xa9c] ss:$12 sps:$4 sm:$0xff]  }
 0x21c   : > { %13299 = vmatprep.subr.bf16.mxu1 %v13770_v32 }
 0x21d   : > { %4632 = vmatmul.mubr.bf16.gmra.mrb[8].mxu0 %v13681_v33  ;;  %5400 = vmatmul.mubr.bf16.gmra.mrb[8].mxu1 %v13682_v34  ;;  %v13776_v33 = vld [vmem:[%s15623_s13 + $0xa98] ss:$12 sps:$4 sm:$0xff]   ;;  %v13777_v34 = vld [vmem:[%s15623_s13 + $0x1b4] ss:$12 sps:$4 sm:$0xff]  }
 0x21e   : > { %4639 = vmatprep.mubr.bf16.mxu0 %v13683_v35  ;;  %5407 = vmatprep.mubr.bf16.mxu1 %v13685_v36  ;;  %v13779_v35 = vld [vmem:[%s15623_s13 + $0xab4] ss:$12 sps:$4 sm:$0xff]   ;;  %v13781_v36 = vld [vmem:[%s15623_s13 + $0x1b0] ss:$12 sps:$4 sm:$0xff]  }
 0x21f   : > { %13300 = vmatpush3.bf16.msra.mxu1 %v13770_v32  ;;  %v13775_v32 = vld [vmem:[%s15623_s13 + $0x198] ss:$12 sps:$4 sm:$0xff]  }
 0x220   : > { %13301 = vmatprep.subr.bf16.mxu1 %v13795_v45 }
 0x223   : > { %13302 = vmatpush3.bf16.msra.mxu1 %v13795_v45  ;;  %v13794_v45 = vld [vmem:[%s15623_s13 + $0xae0] ss:$12 sps:$4 sm:$0xff]  }
 0x224   : > { %13303 = vmatprep.subr.bf16.mxu1 %v13820_v62 }
 0x225   : > { %4640 = vmatmul.mubr.bf16.gmra.mrb[12].mxu0 %v13687_v37  ;;  %5408 = vmatmul.mubr.bf16.gmra.mrb[12].mxu1 %v13688_v38  ;;  %v13782_v37 = vld [vmem:[%s15623_s13 + $0xab0] ss:$12 sps:$4 sm:$0xff]   ;;  %v13783_v38 = vld [vmem:[%s15623_s13 + $0x1cc] ss:$12 sps:$4 sm:$0xff]  }
 0x226   : > { %4647 = vmatprep.mubr.bf16.mxu0 %v13689_v39  ;;  %5415 = vmatprep.mubr.bf16.mxu1 %v13691_v40  ;;  %v13785_v39 = vld [vmem:[%s15623_s13 + $0xacc] ss:$12 sps:$4 sm:$0xff]   ;;  %v13787_v40 = vld [vmem:[%s15623_s13 + $0x1c8] ss:$12 sps:$4 sm:$0xff]  }
 0x227   : > { %13304 = vmatpush3.bf16.msra.mxu1 %v13820_v62  ;;  %v13821_v62 = vld [vmem:[%s15623_s13 + $0x25c] ss:$12 sps:$4 sm:$0xff]  }
 0x228   : > { %13305 = vmatprep.subr.bf16.mxu1 %v13845_v15 }
 0x22b   : > { %13306 = vmatpush3.bf16.msra.mxu1 %v13845_v15 }
 0x22d   : > { %4648 = vmatmul.mubr.bf16.gmra.mrb[16].mxu0 %v13693_v41  ;;  %5416 = vmatmul.mubr.bf16.gmra.mrb[16].mxu1 %v13694_v42  ;;  %v13788_v41 = vld [vmem:[%s15623_s13 + $0xac8] ss:$12 sps:$4 sm:$0xff]   ;;  %v13789_v42 = vld [vmem:[%s15623_s13 + $0x1e4] ss:$12 sps:$4 sm:$0xff]  }
 0x22e   : > { %4655 = vmatprep.mubr.bf16.mxu0 %v13696_v43  ;;  %5423 = vmatprep.mubr.bf16.mxu1 %v13698_v44  ;;  %v13791_v43 = vld [vmem:[%s15623_s13 + $0xae4] ss:$12 sps:$4 sm:$0xff]   ;;  %v13793_v44 = vld [vmem:[%s15623_s13 + $0x1e0] ss:$12 sps:$4 sm:$0xff]  }
 0x235   : > { %4656 = vmatmul.mubr.bf16.gmra.mrb[20].mxu0 %v13700_v46  ;;  %5424 = vmatmul.mubr.bf16.gmra.mrb[20].mxu1 %v13701_v47  ;;  %v13796_v46 = vld [vmem:[%s15623_s13 + $0x1fc] ss:$12 sps:$4 sm:$0xff]  }
 0x236   : > { %4663 = vmatprep.mubr.bf16.mxu0 %v13702_v48  ;;  %5431 = vmatprep.mubr.bf16.mxu1 %v13704_v49  ;;  %v13798_v47 = vld [vmem:[%s15623_s13 + $0xafc] ss:$12 sps:$4 sm:$0xff]   ;;  %v13800_v48 = vld [vmem:[%s15623_s13 + $0x1f8] ss:$12 sps:$4 sm:$0xff]  }
 0x237   : > { %v13801_v49 = vld [vmem:[%s15623_s13 + $0xaf8] ss:$12 sps:$4 sm:$0xff]  }
 0x23d   : > { %4664 = vmatmul.mubr.bf16.gmra.mrb[24].mxu0 %v13706_v50  ;;  %5432 = vmatmul.mubr.bf16.gmra.mrb[24].mxu1 %v13707_v51  ;;  %v13802_v50 = vld [vmem:[%s15623_s13 + $0x214] ss:$12 sps:$4 sm:$0xff]  }
 0x23e   : > { %4671 = vmatprep.mubr.bf16.mxu0 %v13708_v52  ;;  %5439 = vmatprep.mubr.bf16.mxu1 %v13710_v53  ;;  %v13804_v51 = vld [vmem:[%s15623_s13 + $0xb14] ss:$12 sps:$4 sm:$0xff]   ;;  %v13806_v52 = vld [vmem:[%s15623_s13 + $0x210] ss:$12 sps:$4 sm:$0xff]  }
 0x23f   : > { %v13807_v53 = vld [vmem:[%s15623_s13 + $0xb10] ss:$12 sps:$4 sm:$0xff]  }
 0x245   : > { %4672 = vmatmul.mubr.bf16.gmra.mrb[28].mxu0 %v13712_v54  ;;  %5440 = vmatmul.mubr.bf16.gmra.mrb[28].mxu1 %v13713_v55  ;;  %v13808_v54 = vld [vmem:[%s15623_s13 + $0x22c] ss:$12 sps:$4 sm:$0xff]  }
 0x246   : > { %4679 = vmatprep.mubr.bf16.mxu0 %v13714_v56  ;;  %5447 = vmatprep.mubr.bf16.mxu1 %v13716_v57  ;;  %v13810_v55 = vld [vmem:[%s15623_s13 + $0xb2c] ss:$12 sps:$4 sm:$0xff]   ;;  %v13812_v56 = vld [vmem:[%s15623_s13 + $0x228] ss:$12 sps:$4 sm:$0xff]  }
 0x247   : > { %v13813_v57 = vld [vmem:[%s15623_s13 + $0xb28] ss:$12 sps:$4 sm:$0xff]  }
 0x24d   : > { %4680 = vmatmul.mubr.bf16.gmra.mrb[32].mxu0 %v13718_v58  ;;  %5448 = vmatmul.mubr.bf16.gmra.mrb[32].mxu1 %v13719_v59  ;;  %v13814_v58 = vld [vmem:[%s15623_s13 + $0x244] ss:$12 sps:$4 sm:$0xff]  }
 0x24e   : > { %4687 = vmatprep.mubr.bf16.mxu0 %v13721_v60  ;;  %5455 = vmatprep.mubr.bf16.mxu1 %v13723_v61  ;;  %v13816_v59 = vld [vmem:[%s15623_s13 + $0xb44] ss:$12 sps:$4 sm:$0xff]   ;;  %v13818_v60 = vld [vmem:[%s15623_s13 + $0x240] ss:$12 sps:$4 sm:$0xff]  }
 0x24f   : > { %v13819_v61 = vld [vmem:[%s15623_s13 + $0xb40] ss:$12 sps:$4 sm:$0xff]  }
 0x255   : > { %4688 = vmatmul.mubr.bf16.gmra.mrb[36].mxu0 %v13725_v63  ;;  %5456 = vmatmul.mubr.bf16.gmra.mrb[36].mxu1 %v13726_v0  ;;  %v13823_v63 = vld [vmem:[%s15623_s13 + $0xb5c] ss:$12 sps:$4 sm:$0xff]   ;;  %v13825_v0 = vld [vmem:[%s15623_s13 + $0x258] ss:$12 sps:$4 sm:$0xff]  }
 0x256   : > { %4695 = vmatprep.mubr.bf16.mxu0 %v13727_v1  ;;  %5463 = vmatprep.mubr.bf16.mxu1 %v13729_v2  ;;  %v13826_v1 = vld [vmem:[%s15623_s13 + $0xb58] ss:$12 sps:$4 sm:$0xff]   ;;  %v13827_v2 = vld [vmem:[%s15623_s13 + $0x274] ss:$12 sps:$4 sm:$0xff]  }
 0x25d   : > { %4696 = vmatmul.mubr.bf16.gmra.mrb[40].mxu0 %v13731_v3  ;;  %5464 = vmatmul.mubr.bf16.gmra.mrb[40].mxu1 %v13732_v4  ;;  %v13829_v3 = vld [vmem:[%s15623_s13 + $0xb74] ss:$12 sps:$4 sm:$0xff]   ;;  %v13831_v4 = vld [vmem:[%s15623_s13 + $0x270] ss:$12 sps:$4 sm:$0xff]  }
 0x25e   : > { %4703 = vmatprep.mubr.bf16.mxu0 %v13733_v5  ;;  %5471 = vmatprep.mubr.bf16.mxu1 %v13735_v6  ;;  %v13832_v5 = vld [vmem:[%s15623_s13 + $0xb70] ss:$12 sps:$4 sm:$0xff]   ;;  %v13833_v6 = vld [vmem:[%s15623_s13 + $0x28c] ss:$12 sps:$4 sm:$0xff]  }
 0x265   : > { %4704 = vmatmul.mubr.bf16.gmra.mrb[44].mxu0 %v13737_v7  ;;  %5472 = vmatmul.mubr.bf16.gmra.mrb[44].mxu1 %v13738_v8  ;;  %v13835_v7 = vld [vmem:[%s15623_s13 + $0xb8c] ss:$12 sps:$4 sm:$0xff]  }
 0x266   : > { %4711 = vmatprep.mubr.bf16.mxu0 %v13739_v9  ;;  %5479 = vmatprep.mubr.bf16.mxu1 %v13741_v10 }
 0x26d   : > { %4712 = vmatmul.mubr.bf16.gmra.mrb[48].mxu0 %v13743_v11  ;;  %5480 = vmatmul.mubr.bf16.gmra.mrb[48].mxu1 %v13744_v12  ;;  %v13837_v12 = vld [vmem:[%s15623_s13 + $0x288] ss:$12 sps:$4 sm:$0xff]  }
 0x26e   : > { %4719 = vmatprep.mubr.bf16.mxu0 %v13746_v13  ;;  %5487 = vmatprep.mubr.bf16.mxu1 %v13748_v14  ;;  %v13838_v13 = vld [vmem:[%s15623_s13 + $0xb88] ss:$12 sps:$4 sm:$0xff]  }
 0x275   : > { %4720 = vmatmul.mubr.bf16.gmra.mrb[52].mxu0 %v13750_v16  ;;  %5488 = vmatmul.mubr.bf16.gmra.mrb[52].mxu1 %v13751_v17  ;;  %v13839_v16 = vld [vmem:[%s15623_s13 + $0x2a4] ss:$12 sps:$4 sm:$0xff]  }
 0x276   : > { %4727 = vmatprep.mubr.bf16.mxu0 %v13752_v18  ;;  %5495 = vmatprep.mubr.bf16.mxu1 %v13754_v19  ;;  %v13841_v17 = vld [vmem:[%s15623_s13 + $0xba4] ss:$12 sps:$4 sm:$0xff]  }
 0x27d   : > { %4728 = vmatmul.mubr.bf16.gmra.mrb[56].mxu0 %v13756_v20  ;;  %5496 = vmatmul.mubr.bf16.gmra.mrb[56].mxu1 %v13757_v21 }
 0x27e   : > { %4735 = vmatprep.mubr.bf16.mxu0 %v13758_v22  ;;  %5503 = vmatprep.mubr.bf16.mxu1 %v13760_v23 }
 0x285   : > { %4736 = vmatmul.mubr.bf16.gmra.mrb[60].mxu0 %v13762_v24  ;;  %5504 = vmatmul.mubr.bf16.gmra.mrb[60].mxu1 %v13763_v25  ;;  %v13843_v24 = vld [vmem:[%s15623_s13 + $0x2a0] ss:$12 sps:$4 sm:$0xff]  }
 0x286   : > { %4743 = vmatprep.mubr.bf16.mxu0 %v13764_v26  ;;  %5511 = vmatprep.mubr.bf16.mxu1 %v13766_v27  ;;  %v13844_v25 = vld [vmem:[%s15623_s13 + $0xba0] ss:$12 sps:$4 sm:$0xff]  }
 0x28d   : > { %4744 = vmatmul.mubr.bf16.gmra.mrb[64].mxu0 %v13768_v28  ;;  %5512 = vmatmul.mubr.bf16.gmra.mrb[64].mxu1 %v13769_v29  ;;  %v13846_v28 = vld [vmem:[%s15623_s13 + $0x2bc] ss:$12 sps:$4 sm:$0xff]  }
 0x28e   : > { %4751 = vmatprep.mubr.bf16.mxu0 %v13771_v30  ;;  %5519 = vmatprep.mubr.bf16.mxu1 %v13773_v31  ;;  %v13848_v29 = vld [vmem:[%s15623_s13 + $0xbbc] ss:$12 sps:$4 sm:$0xff]  }
 0x295   : > { %4752 = vmatmul.mubr.bf16.gmra.mrb[68].mxu0 %v13775_v32  ;;  %5520 = vmatmul.mubr.bf16.gmra.mrb[68].mxu1 %v13776_v33 }
 0x296   : > { %4759 = vmatprep.mubr.bf16.mxu0 %v13777_v34  ;;  %5527 = vmatprep.mubr.bf16.mxu1 %v13779_v35 }
 0x29d   : > { %4760 = vmatmul.mubr.bf16.gmra.mrb[72].mxu0 %v13781_v36  ;;  %5528 = vmatmul.mubr.bf16.gmra.mrb[72].mxu1 %v13782_v37  ;;  %v13850_v36 = vld [vmem:[%s15623_s13 + $0x2b8] ss:$12 sps:$4 sm:$0xff]  }
 0x29e   : > { %4767 = vmatprep.mubr.bf16.mxu0 %v13783_v38  ;;  %5535 = vmatprep.mubr.bf16.mxu1 %v13785_v39  ;;  %v13851_v37 = vld [vmem:[%s15623_s13 + $0xbb8] ss:$12 sps:$4 sm:$0xff]  }
 0x2a5   : > { %4768 = vmatmul.mubr.bf16.gmra.mrb[76].mxu0 %v13787_v40  ;;  %5536 = vmatmul.mubr.bf16.gmra.mrb[76].mxu1 %v13788_v41  ;;  %v13852_v40 = vld [vmem:[%s15623_s13 + $0x2d4] ss:$12 sps:$4 sm:$0xff]  }
 0x2a6   : > { %4775 = vmatprep.mubr.bf16.mxu0 %v13789_v42  ;;  %5543 = vmatprep.mubr.bf16.mxu1 %v13791_v43  ;;  %v13854_v41 = vld [vmem:[%s15623_s13 + $0xbd4] ss:$12 sps:$4 sm:$0xff]  }
 0x2ad   : > { %4776 = vmatmul.mubr.bf16.gmra.mrb[80].mxu0 %v13793_v44  ;;  %5544 = vmatmul.mubr.bf16.gmra.mrb[80].mxu1 %v13794_v45 }
 0x2ae   : > { %4783 = vmatprep.mubr.bf16.mxu0 %v13796_v46  ;;  %5551 = vmatprep.mubr.bf16.mxu1 %v13798_v47 }
 0x2b5   : > { %4784 = vmatmul.mubr.bf16.gmra.mrb[84].mxu0 %v13800_v48  ;;  %5552 = vmatmul.mubr.bf16.gmra.mrb[84].mxu1 %v13801_v49  ;;  %v13856_v48 = vld [vmem:[%s15623_s13 + $0x2d0] ss:$12 sps:$4 sm:$0xff]  }
 0x2b6   : > { %4791 = vmatprep.mubr.bf16.mxu0 %v13802_v50  ;;  %5559 = vmatprep.mubr.bf16.mxu1 %v13804_v51  ;;  %v13857_v49 = vld [vmem:[%s15623_s13 + $0xbd0] ss:$12 sps:$4 sm:$0xff]  }
 0x2bd   : > { %4792 = vmatmul.mubr.bf16.gmra.mrb[88].mxu0 %v13806_v52  ;;  %5560 = vmatmul.mubr.bf16.gmra.mrb[88].mxu1 %v13807_v53  ;;  %v13858_v52 = vld [vmem:[%s15623_s13 + $0x2ec] ss:$12 sps:$4 sm:$0xff]  }
 0x2be   : > { %4799 = vmatprep.mubr.bf16.mxu0 %v13808_v54  ;;  %5567 = vmatprep.mubr.bf16.mxu1 %v13810_v55  ;;  %v13860_v53 = vld [vmem:[%s15623_s13 + $0xbec] ss:$12 sps:$4 sm:$0xff]  }
 0x2c5   : > { %4800 = vmatmul.mubr.bf16.gmra.mrb[92].mxu0 %v13812_v56  ;;  %5568 = vmatmul.mubr.bf16.gmra.mrb[92].mxu1 %v13813_v57 }
 0x2c6   : > { %4807 = vmatprep.mubr.bf16.mxu0 %v13814_v58  ;;  %5575 = vmatprep.mubr.bf16.mxu1 %v13816_v59 }
 0x2cd   : > { %4808 = vmatmul.mubr.bf16.gmra.mrb[96].mxu0 %v13818_v60  ;;  %5576 = vmatmul.mubr.bf16.gmra.mrb[96].mxu1 %v13819_v61  ;;  %v13862_v60 = vld [vmem:[%s15623_s13 + $0x2e8] ss:$12 sps:$4 sm:$0xff]  }
 0x2ce   : > { %4815 = vmatprep.mubr.bf16.mxu0 %v13821_v62  ;;  %5583 = vmatprep.mubr.bf16.mxu1 %v13823_v63  ;;  %v13863_v61 = vld [vmem:[%s15623_s13 + $0xbe8] ss:$12 sps:$4 sm:$0xff]  }
 0x2d5   : > { %4816 = vmatmul.mubr.bf16.gmra.mrb[100].mxu0 %v13825_v0  ;;  %5584 = vmatmul.mubr.bf16.gmra.mrb[100].mxu1 %v13826_v1  ;;  %v13864_v0 = vld [vmem:[%s15623_s13 + $0x304] ss:$12 sps:$4 sm:$0xff]   ;;  %v13866_v1 = vld [vmem:[%s15623_s13 + $0x8] ss:$12 sps:$4 sm:$0xff]  }
 0x2d6   : > { %4823 = vmatprep.mubr.bf16.mxu0 %v13827_v2  ;;  %5591 = vmatprep.mubr.bf16.mxu1 %v13829_v3 }
 0x2dd   : > { %4824 = vmatmul.mubr.bf16.gmra.mrb[104].mxu0 %v13831_v4  ;;  %5592 = vmatmul.mubr.bf16.gmra.mrb[104].mxu1 %v13832_v5 }
 0x2de   : > { %4831 = vmatprep.mubr.bf16.mxu0 %v13833_v6  ;;  %5599 = vmatprep.mubr.bf16.mxu1 %v13835_v7 }
 0x2e0   : > { %v16048_v8 = vpop.f32.mrb[0].mxu0  ;;  %v16050_v9 = vpop.f32.mrb[0].mxu1 }
 0x2e1   : > { %17617 = vst [vmem:[#allocation7_spill] sm:$0xff] %v16050_v9  ;;  %v4619_v10 = vpop.f32.mrb[1].mxu0  ;;  %v5387_v11 = vpop.f32.mrb[1].mxu1  ;;  %v13968_v9 = vld [vmem:[%s15623_s13 + $0x3e0] ss:$12 sps:$4 sm:$0xff]  }
 0x2e2   : > { %v16054_v14 = vpop.f32.mrb[2].mxu0  ;;  %v16056_v15 = vpop.f32.mrb[2].mxu1  ;;  %v13867_v10 = vld [vmem:[%s15623_s13 + $0x300] ss:$12 sps:$4 sm:$0xff]  }
 0x2e3   : > { %17618 = vst [vmem:[#allocation8_spill] sm:$0xff] %v16056_v15  ;;  %v4622_v18 = vpop.f32.mrb[3].mxu0  ;;  %v5390_v19 = vpop.f32.mrb[3].mxu1  ;;  %v13868_v11 = vld [vmem:[%s15623_s13 + $0x20] ss:$12 sps:$4 sm:$0xff]  }
 0x2e4   : > { %v13963_v15 = vld [vmem:[%s15623_s13 + $0x3b0] ss:$12 sps:$4 sm:$0xff]  }
 0x2e5   : > { %4832 = vmatmul.mubr.bf16.gmra.mrb[108].mxu0 %v13837_v12  ;;  %5600 = vmatmul.mubr.bf16.gmra.mrb[108].mxu1 %v13838_v13 }
 0x2e6   : > { %4839 = vmatprep.mubr.bf16.mxu0 %v13839_v16  ;;  %5607 = vmatprep.mubr.bf16.mxu1 %v13841_v17  ;;  %v13869_v16 = vld [vmem:[%s15623_s13 + $0x31c] ss:$12 sps:$4 sm:$0xff]   ;;  %v13871_v17 = vld [vmem:[%s15623_s13 + $0x38] ss:$12 sps:$4 sm:$0xff]  }
 0x2e8   : > { %v16060_v20 = vpop.f32.mrb[4].mxu0  ;;  %v16062_v21 = vpop.f32.mrb[4].mxu1 }
 0x2e9   : > { %17619 = vst [vmem:[#allocation9_spill] sm:$0xff] %v16062_v21  ;;  %v4627_v22 = vpop.f32.mrb[5].mxu0  ;;  %v5395_v23 = vpop.f32.mrb[5].mxu1 }
 0x2ea   : > { %v16066_v26 = vpop.f32.mrb[6].mxu0  ;;  %v16068_v27 = vpop.f32.mrb[6].mxu1 }
 0x2eb   : > { %17620 = vst [vmem:[#allocation10_spill] sm:$0xff] %v16068_v27  ;;  %v4630_v30 = vpop.f32.mrb[7].mxu0  ;;  %v5398_v31 = vpop.f32.mrb[7].mxu1 }
 0x2ed   : > { %4840 = vmatmul.mubr.bf16.gmra.mrb[112].mxu0 %v13843_v24  ;;  %5608 = vmatmul.mubr.bf16.gmra.mrb[112].mxu1 %v13844_v25 }
 0x2ee   : > { %4847 = vmatprep.mubr.bf16.mxu0 %v13846_v28  ;;  %5615 = vmatprep.mubr.bf16.mxu1 %v13848_v29  ;;  %v13872_v28 = vld [vmem:[%s15623_s13 + $0x318] ss:$12 sps:$4 sm:$0xff]   ;;  %v13873_v29 = vld [vmem:[%s15623_s13 + $0x50] ss:$12 sps:$4 sm:$0xff]  }
 0x2f0   : > { %v16072_v32 = vpop.f32.mrb[8].mxu0  ;;  %v16074_v33 = vpop.f32.mrb[8].mxu1 }
 0x2f1   : > { %17621 = vst [vmem:[#allocation11_spill] sm:$0xff] %v16074_v33  ;;  %v4635_v34 = vpop.f32.mrb[9].mxu0  ;;  %v5403_v35 = vpop.f32.mrb[9].mxu1  ;;  %v13958_v33 = vld [vmem:[%s15623_s13 + $0x380] ss:$12 sps:$4 sm:$0xff]  }
 0x2f2   : > { %v16078_v38 = vpop.f32.mrb[10].mxu0  ;;  %v16080_v39 = vpop.f32.mrb[10].mxu1  ;;  %v13874_v34 = vld [vmem:[%s15623_s13 + $0x334] ss:$12 sps:$4 sm:$0xff]  }
 0x2f3   : > { %17622 = vst [vmem:[#allocation12_spill] sm:$0xff] %v16080_v39  ;;  %v4638_v42 = vpop.f32.mrb[11].mxu0  ;;  %v5406_v43 = vpop.f32.mrb[11].mxu1  ;;  %v13876_v35 = vld [vmem:[%s15623_s13 + $0x68] ss:$12 sps:$4 sm:$0xff]  }
 0x2f4   : > { %v13953_v39 = vld [vmem:[%s15623_s13 + $0x350] ss:$12 sps:$4 sm:$0xff]  }
 0x2f5   : > { %4848 = vmatmul.mubr.bf16.gmra.mrb[116].mxu0 %v13850_v36  ;;  %5616 = vmatmul.mubr.bf16.gmra.mrb[116].mxu1 %v13851_v37 }
 0x2f6   : > { %4855 = vmatprep.mubr.bf16.mxu0 %v13852_v40  ;;  %5623 = vmatprep.mubr.bf16.mxu1 %v13854_v41 }
 0x2f8   : > { %v16084_v44 = vpop.f32.mrb[12].mxu0  ;;  %v16086_v45 = vpop.f32.mrb[12].mxu1 }
 0x2f9   : > { %17623 = vst [vmem:[#allocation13_spill] sm:$0xff] %v16086_v45  ;;  %v4643_v46 = vpop.f32.mrb[13].mxu0  ;;  %v5411_v47 = vpop.f32.mrb[13].mxu1 }
 0x2fa   : > { %v16090_v50 = vpop.f32.mrb[14].mxu0  ;;  %v16092_v51 = vpop.f32.mrb[14].mxu1  ;;  %v13877_v46 = vld [vmem:[%s15623_s13 + $0x330] ss:$12 sps:$4 sm:$0xff]   ;;  %v13878_v47 = vld [vmem:[%s15623_s13 + $0x80] ss:$12 sps:$4 sm:$0xff]  }
 0x2fb   : > { %17624 = vst [vmem:[#allocation14_spill] sm:$0xff] %v16092_v51  ;;  %v4646_v54 = vpop.f32.mrb[15].mxu0  ;;  %v5414_v55 = vpop.f32.mrb[15].mxu1 }
 0x2fd   : > { %4856 = vmatmul.mubr.bf16.gmra.mrb[120].mxu0 %v13856_v48  ;;  %5624 = vmatmul.mubr.bf16.gmra.mrb[120].mxu1 %v13857_v49 }
 0x2fe   : > { %4863 = vmatprep.mubr.bf16.mxu0 %v13858_v52  ;;  %5631 = vmatprep.mubr.bf16.mxu1 %v13860_v53  ;;  %v13879_v52 = vld [vmem:[%s15623_s13 + $0x34c] ss:$12 sps:$4 sm:$0xff]  }
 0x2ff   : > { %v13881_v53 = vld [vmem:[%s15623_s13 + $0x98] ss:$12 sps:$4 sm:$0xff]  }
 0x300   : > { %v16096_v56 = vpop.f32.mrb[16].mxu0  ;;  %v16098_v57 = vpop.f32.mrb[16].mxu1 }
 0x301   : > { %17625 = vst [vmem:[#allocation15_spill] sm:$0xff] %v16098_v57  ;;  %v4651_v58 = vpop.f32.mrb[17].mxu0  ;;  %v5419_v59 = vpop.f32.mrb[17].mxu1  ;;  %v13948_v57 = vld [vmem:[%s15623_s13 + $0x320] ss:$12 sps:$4 sm:$0xff]  }
 0x302   : > { %v16102_v62 = vpop.f32.mrb[18].mxu0  ;;  %v16104_v63 = vpop.f32.mrb[18].mxu1 }
 0x303   : > { %17626 = vst [vmem:[#allocation16_spill] sm:$0xff] %v16104_v63  ;;  %v4654_v2 = vpop.f32.mrb[19].mxu0  ;;  %v5422_v3 = vpop.f32.mrb[19].mxu1  ;;  %v13943_v63 = vld [vmem:[%s15623_s13 + $0x2f0] ss:$12 sps:$4 sm:$0xff]  }
 0x305   : > { %4864 = vmatmul.mubr.bf16.gmra.mrb[124].mxu0 %v13862_v60  ;;  %5632 = vmatmul.mubr.bf16.gmra.mrb[124].mxu1 %v13863_v61 }
 0x306   : > { %4871 = vmatprep.mubr.bf16.mxu0 %v13864_v0  ;;  %13307 = vmatprep.mubr.bf16.mxu1 %v13866_v1  ;;  %v13882_v0 = vld [vmem:[%s15623_s13 + $0x348] ss:$12 sps:$4 sm:$0xff]   ;;  %v13883_v1 = vld [vmem:[%s15623_s13 + $0xb0] ss:$12 sps:$4 sm:$0xff]  }
 0x308   : > { %v16108_v4 = vpop.f32.mrb[20].mxu0  ;;  %v16110_v5 = vpop.f32.mrb[20].mxu1 }
 0x309   : > { %17627 = vst [vmem:[#allocation17_spill] sm:$0xff] %v16110_v5  ;;  %v4659_v6 = vpop.f32.mrb[21].mxu0  ;;  %v5427_v7 = vpop.f32.mrb[21].mxu1 }
 0x30a   : > { %v16114_v12 = vpop.f32.mrb[22].mxu0  ;;  %v16116_v13 = vpop.f32.mrb[22].mxu1  ;;  %v13884_v6 = vld [vmem:[%s15623_s13 + $0x364] ss:$12 sps:$4 sm:$0xff]   ;;  %v13886_v7 = vld [vmem:[%s15623_s13 + $0xc8] ss:$12 sps:$4 sm:$0xff]  }
 0x30b   : > { %17628 = vst [vmem:[#allocation18_spill] sm:$0xff] %v16116_v13  ;;  %v4662_v18 = vpop.f32.mrb[23].mxu0  ;;  %v5430_v19 = vpop.f32.mrb[23].mxu1 }
 0x30d   : > { %4872 = vmatmul.mubr.bf16.gmra.mrb[128].mxu0 %v13867_v10  ;;  %13308 = vmatmul.mubr.bf16.vlgmr.msra.gmra.mrb[128].mxu1 %v13868_v11 }
 0x30e   : > { %4879 = vmatprep.mubr.bf16.mxu0 %v13869_v16  ;;  %13311 = vmatprep.mubr.bf16.mxu1 %v13871_v17 }
 0x310   : > { %v16120_v22 = vpop.f32.mrb[24].mxu0  ;;  %v16122_v23 = vpop.f32.mrb[24].mxu1 }
 0x311   : > { %17629 = vst [vmem:[#allocation19_spill] sm:$0xff] %v16122_v23  ;;  %v4667_v24 = vpop.f32.mrb[25].mxu0  ;;  %v5435_v25 = vpop.f32.mrb[25].mxu1  ;;  %v13938_v23 = vld [vmem:[%s15623_s13 + $0x2c0] ss:$12 sps:$4 sm:$0xff]  }
 0x312   : > { %v16126_v30 = vpop.f32.mrb[26].mxu0  ;;  %v16128_v31 = vpop.f32.mrb[26].mxu1  ;;  %v13887_v24 = vld [vmem:[%s15623_s13 + $0x360] ss:$12 sps:$4 sm:$0xff]  }
 0x313   : > { %17630 = vst [vmem:[#allocation20_spill] sm:$0xff] %v16128_v31  ;;  %v4670_v36 = vpop.f32.mrb[27].mxu0  ;;  %v5438_v37 = vpop.f32.mrb[27].mxu1  ;;  %v13888_v25 = vld [vmem:[%s15623_s13 + $0xe0] ss:$12 sps:$4 sm:$0xff]  }
 0x314   : > { %v13933_v31 = vld [vmem:[%s15623_s13 + $0x290] ss:$12 sps:$4 sm:$0xff]  }
 0x315   : > { %4880 = vmatmul.mubr.bf16.gmra.mrb[132].mxu0 %v13872_v28  ;;  %13312 = vmatmul.mubr.bf16.gmra.mrb[132].mxu1 %v13873_v29 }
 0x316   : > { %4887 = vmatprep.mubr.bf16.mxu0 %v13874_v34  ;;  %13315 = vmatprep.mubr.bf16.mxu1 %v13876_v35  ;;  %v13889_v34 = vld [vmem:[%s15623_s13 + $0x37c] ss:$12 sps:$4 sm:$0xff]   ;;  %v13891_v35 = vld [vmem:[%s15623_s13 + $0xf8] ss:$12 sps:$4 sm:$0xff]  }
 0x318   : > { %v16132_v40 = vpop.f32.mrb[28].mxu0  ;;  %v16134_v41 = vpop.f32.mrb[28].mxu1 }
 0x319   : > { %17631 = vst [vmem:[#allocation21_spill] sm:$0xff] %v16134_v41  ;;  %v4675_v42 = vpop.f32.mrb[29].mxu0  ;;  %v5443_v43 = vpop.f32.mrb[29].mxu1 }
 0x31a   : > { %v16138_v48 = vpop.f32.mrb[30].mxu0  ;;  %v16140_v49 = vpop.f32.mrb[30].mxu1 }
 0x31b   : > { %17632 = vst [vmem:[#allocation22_spill] sm:$0xff] %v16140_v49  ;;  %v4678_v54 = vpop.f32.mrb[31].mxu0  ;;  %v5446_v55 = vpop.f32.mrb[31].mxu1 }
 0x31d   : > { %4888 = vmatmul.mubr.bf16.gmra.mrb[136].mxu0 %v13877_v46  ;;  %13316 = vmatmul.mubr.bf16.gmra.mrb[136].mxu1 %v13878_v47 }
 0x31e   : > { %4895 = vmatprep.mubr.bf16.mxu0 %v13879_v52  ;;  %13319 = vmatprep.mubr.bf16.mxu1 %v13881_v53  ;;  %v13892_v52 = vld [vmem:[%s15623_s13 + $0x378] ss:$12 sps:$4 sm:$0xff]   ;;  %v13893_v53 = vld [vmem:[%s15623_s13 + $0x110] ss:$12 sps:$4 sm:$0xff]  }
 0x320   : > { %v16144_v58 = vpop.f32.mrb[32].mxu0  ;;  %v16146_v59 = vpop.f32.mrb[32].mxu1 }
 0x321   : > { %17633 = vst [vmem:[#allocation23_spill] sm:$0xff] %v16146_v59  ;;  %v4683_v60 = vpop.f32.mrb[33].mxu0  ;;  %v5451_v61 = vpop.f32.mrb[33].mxu1  ;;  %v13928_v59 = vld [vmem:[%s15623_s13 + $0x260] ss:$12 sps:$4 sm:$0xff]  }
 0x322   : > { %v16150_v2 = vpop.f32.mrb[34].mxu0  ;;  %v16152_v3 = vpop.f32.mrb[34].mxu1  ;;  %v13894_v60 = vld [vmem:[%s15623_s13 + $0x394] ss:$12 sps:$4 sm:$0xff]  }
 0x323   : > { %17634 = vst [vmem:[#allocation24_spill] sm:$0xff] %v16152_v3  ;;  %v4686_v10 = vpop.f32.mrb[35].mxu0  ;;  %v5454_v11 = vpop.f32.mrb[35].mxu1  ;;  %v13896_v61 = vld [vmem:[%s15623_s13 + $0x128] ss:$12 sps:$4 sm:$0xff]  }
 0x324   : > { %v13923_v3 = vld [vmem:[%s15623_s13 + $0x230] ss:$12 sps:$4 sm:$0xff]  }
 0x325   : > { %4896 = vmatmul.mubr.bf16.gmra.mrb[140].mxu0 %v13882_v0  ;;  %13320 = vmatmul.mubr.bf16.gmra.mrb[140].mxu1 %v13883_v1 }
 0x326   : > { %4903 = vmatprep.mubr.bf16.mxu0 %v13884_v6  ;;  %13323 = vmatprep.mubr.bf16.mxu1 %v13886_v7 }
 0x328   : > { %v16156_v16 = vpop.f32.mrb[36].mxu0  ;;  %v16158_v17 = vpop.f32.mrb[36].mxu1 }
 0x329   : > { %17635 = vst [vmem:[#allocation25_spill] sm:$0xff] %v16158_v17  ;;  %v4691_v18 = vpop.f32.mrb[37].mxu0  ;;  %v5459_v19 = vpop.f32.mrb[37].mxu1 }
 0x32a   : > { %v16162_v28 = vpop.f32.mrb[38].mxu0  ;;  %v16164_v29 = vpop.f32.mrb[38].mxu1  ;;  %v13897_v18 = vld [vmem:[%s15623_s13 + $0x390] ss:$12 sps:$4 sm:$0xff]   ;;  %v13898_v19 = vld [vmem:[%s15623_s13 + $0x140] ss:$12 sps:$4 sm:$0xff]  }
 0x32b   : > { %17636 = vst [vmem:[#allocation26_spill] sm:$0xff] %v16164_v29  ;;  %v4694_v36 = vpop.f32.mrb[39].mxu0  ;;  %v5462_v37 = vpop.f32.mrb[39].mxu1 }
 0x32d   : > { %4904 = vmatmul.mubr.bf16.gmra.mrb[144].mxu0 %v13887_v24  ;;  %13324 = vmatmul.mubr.bf16.gmra.mrb[144].mxu1 %v13888_v25 }
 0x32e   : > { %4911 = vmatprep.mubr.bf16.mxu0 %v13889_v34  ;;  %13327 = vmatprep.mubr.bf16.mxu1 %v13891_v35  ;;  %v13899_v34 = vld [vmem:[%s15623_s13 + $0x3ac] ss:$12 sps:$4 sm:$0xff]  }
 0x32f   : > { %v13901_v35 = vld [vmem:[%s15623_s13 + $0x158] ss:$12 sps:$4 sm:$0xff]  }
 0x330   : > { %v16168_v42 = vpop.f32.mrb[40].mxu0  ;;  %v16170_v43 = vpop.f32.mrb[40].mxu1 }
 0x331   : > { %17637 = vst [vmem:[#allocation27_spill] sm:$0xff] %v16170_v43  ;;  %v4699_v46 = vpop.f32.mrb[41].mxu0  ;;  %v5467_v47 = vpop.f32.mrb[41].mxu1  ;;  %v13918_v43 = vld [vmem:[%s15623_s13 + $0x200] ss:$12 sps:$4 sm:$0xff]  }
 0x332   : > { %v16174_v54 = vpop.f32.mrb[42].mxu0  ;;  %v16176_v55 = vpop.f32.mrb[42].mxu1 }
 0x333   : > { %17638 = vst [vmem:[#allocation28_spill] sm:$0xff] %v16176_v55  ;;  %v4702_v0 = vpop.f32.mrb[43].mxu0  ;;  %v5470_v1 = vpop.f32.mrb[43].mxu1  ;;  %v13913_v55 = vld [vmem:[%s15623_s13 + $0x1d0] ss:$12 sps:$4 sm:$0xff]  }
 0x335   : > { %4912 = vmatmul.mubr.bf16.gmra.mrb[148].mxu0 %v13892_v52  ;;  %13328 = vmatmul.mubr.bf16.gmra.mrb[148].mxu1 %v13893_v53 }
 0x336   : > { %4919 = vmatprep.mubr.bf16.mxu0 %v13894_v60  ;;  %13331 = vmatprep.mubr.bf16.mxu1 %v13896_v61  ;;  %v13902_v60 = vld [vmem:[%s15623_s13 + $0x3a8] ss:$12 sps:$4 sm:$0xff]   ;;  %v13903_v61 = vld [vmem:[%s15623_s13 + $0x170] ss:$12 sps:$4 sm:$0xff]  }
 0x338   : > { %v16180_v6 = vpop.f32.mrb[44].mxu0  ;;  %v16182_v7 = vpop.f32.mrb[44].mxu1 }
 0x339   : > { %17639 = vst [vmem:[#allocation29_spill] sm:$0xff] %v16182_v7  ;;  %v4707_v10 = vpop.f32.mrb[45].mxu0  ;;  %v5475_v11 = vpop.f32.mrb[45].mxu1 }
 0x33a   : > { %v16186_v24 = vpop.f32.mrb[46].mxu0  ;;  %v16188_v25 = vpop.f32.mrb[46].mxu1  ;;  %v13904_v10 = vld [vmem:[%s15623_s13 + $0x3c4] ss:$12 sps:$4 sm:$0xff]   ;;  %v13906_v11 = vld [vmem:[%s15623_s13 + $0x188] ss:$12 sps:$4 sm:$0xff]  }
 0x33b   : > { %17640 = vst [vmem:[#allocation30_spill] sm:$0xff] %v16188_v25  ;;  %v4710_v36 = vpop.f32.mrb[47].mxu0  ;;  %v5478_v37 = vpop.f32.mrb[47].mxu1 }
 0x33d   : > { %4920 = vmatmul.mubr.bf16.gmra.mrb[152].mxu0 %v13897_v18  ;;  %13332 = vmatmul.mubr.bf16.gmra.mrb[152].mxu1 %v13898_v19 }
 0x33e   : > { %4927 = vmatprep.mubr.bf16.mxu0 %v13899_v34  ;;  %13335 = vmatprep.mubr.bf16.mxu1 %v13901_v35 }
 0x340   : > { %v16192_v46 = vpop.f32.mrb[48].mxu0  ;;  %v16194_v47 = vpop.f32.mrb[48].mxu1 }
 0x341   : > { %17641 = vst [vmem:[#allocation31_spill] sm:$0xff] %v16194_v47  ;;  %v4715_v52 = vpop.f32.mrb[49].mxu0  ;;  %v5483_v53 = vpop.f32.mrb[49].mxu1 }
 0x342   : > { %v16198_v0 = vpop.f32.mrb[50].mxu0  ;;  %v16200_v1 = vpop.f32.mrb[50].mxu1  ;;  %v13907_v52 = vld [vmem:[%s15623_s13 + $0x3c0] ss:$12 sps:$4 sm:$0xff]  }
 0x343   : > { %17642 = vst [vmem:[#allocation32_spill] sm:$0xff] %v16200_v1  ;;  %v4718_v18 = vpop.f32.mrb[51].mxu0  ;;  %v5486_v19 = vpop.f32.mrb[51].mxu1  ;;  %v13908_v53 = vld [vmem:[%s15623_s13 + $0x1a0] ss:$12 sps:$4 sm:$0xff]  }
 0x344   : > { %v13909_v18 = vld [vmem:[%s15623_s13 + $0x3dc] ss:$12 sps:$4 sm:$0xff]  }
 0x345   : > { %4928 = vmatmul.mubr.bf16.gmra.mrb[156].mxu0 %v13902_v60  ;;  %13336 = vmatmul.mubr.bf16.gmra.mrb[156].mxu1 %v13903_v61  ;;  %v13911_v60 = vld [vmem:[%s15623_s13 + $0x1b8] ss:$12 sps:$4 sm:$0xff]  }
 0x346   : > { %4935 = vmatprep.mubr.bf16.mxu0 %v13904_v10  ;;  %13339 = vmatprep.mubr.bf16.mxu1 %v13906_v11 }
 0x348   : > { %v16204_v34 = vpop.f32.mrb[52].mxu0  ;;  %v16206_v35 = vpop.f32.mrb[52].mxu1 }
 0x349   : > { %17643 = vst [vmem:[#allocation33_spill] sm:$0xff] %v16206_v35  ;;  %v4723_v36 = vpop.f32.mrb[53].mxu0  ;;  %v5491_v37 = vpop.f32.mrb[53].mxu1  ;;  %v13912_v35 = vld [vmem:[%s15623_s13 + $0x3d8] ss:$12 sps:$4 sm:$0xff]  }
 0x34a   : > { %v16210_v1 = vpop.f32.mrb[54].mxu0  ;;  %v16212_v47 = vpop.f32.mrb[54].mxu1 }
 0x34b   : > { %17644 = vst [vmem:[#allocation34_spill] sm:$0xff] %v16212_v47  ;;  %v4726_v61 = vpop.f32.mrb[55].mxu0  ;;  %v5494_v10 = vpop.f32.mrb[55].mxu1 }
 0x34c   : > { %v13914_v61 = vld [vmem:[%s15623_s13 + $0x3f4] ss:$12 sps:$4 sm:$0xff]  }
 0x34d   : > { %4936 = vmatmul.mubr.bf16.gmra.mrb[160].mxu0 %v13907_v52  ;;  %13340 = vmatmul.mubr.bf16.gmra.mrb[160].mxu1 %v13908_v53  ;;  %v13916_v52 = vld [vmem:[%s15623_s13 + $0x1e8] ss:$12 sps:$4 sm:$0xff]  }
 0x34e   : > { %4943 = vmatprep.mubr.bf16.mxu0 %v13909_v18  ;;  %13343 = vmatprep.mubr.bf16.mxu1 %v13911_v60 }
 0x350   : > { %v16216_v11 = vpop.f32.mrb[56].mxu0  ;;  %v16218_v19 = vpop.f32.mrb[56].mxu1 }
 0x351   : > { %17645 = vst [vmem:[#allocation35_spill] sm:$0xff] %v16218_v19  ;;  %v4731_v36 = vpop.f32.mrb[57].mxu0  ;;  %v5499_v37 = vpop.f32.mrb[57].mxu1  ;;  %v13917_v19 = vld [vmem:[%s15623_s13 + $0x3f0] ss:$12 sps:$4 sm:$0xff]  }
 0x352   : > { %v16222_v47 = vpop.f32.mrb[58].mxu0  ;;  %v16224_v25 = vpop.f32.mrb[58].mxu1 }
 0x353   : > { %17646 = vst [vmem:[#allocation36_spill] sm:$0xff] %v16224_v25  ;;  %v4734_v53 = vpop.f32.mrb[59].mxu0  ;;  %v5502_v18 = vpop.f32.mrb[59].mxu1 }
 0x354   : > { %v13919_v53 = vld [vmem:[%s15623_s13 + $0x40c] ss:$12 sps:$4 sm:$0xff]  }
 0x355   : > { %4944 = vmatmul.mubr.bf16.gmra.mrb[164].mxu0 %v13912_v35  ;;  %13344 = vmatmul.mubr.bf16.gmra.mrb[164].mxu1 %v13913_v55  ;;  %v13921_v35 = vld [vmem:[%s15623_s13 + $0x218] ss:$12 sps:$4 sm:$0xff]  }
 0x356   : > { %4951 = vmatprep.mubr.bf16.mxu0 %v13914_v61  ;;  %13347 = vmatprep.mubr.bf16.mxu1 %v13916_v52 }
 0x358   : > { %v16228_v60 = vpop.f32.mrb[60].mxu0  ;;  %v16230_v10 = vpop.f32.mrb[60].mxu1 }
 0x359   : > { %17647 = vst [vmem:[#allocation37_spill] sm:$0xff] %v16230_v10  ;;  %v4739_v36 = vpop.f32.mrb[61].mxu0  ;;  %v5507_v37 = vpop.f32.mrb[61].mxu1  ;;  %v13922_v10 = vld [vmem:[%s15623_s13 + $0x408] ss:$12 sps:$4 sm:$0xff]  }
 0x35a   : > { %v16234_v25 = vpop.f32.mrb[62].mxu0  ;;  %v16236_v7 = vpop.f32.mrb[62].mxu1 }
 0x35b   : > { %17648 = vst [vmem:[#allocation38_spill] sm:$0xff] %v16236_v7  ;;  %v4742_v55 = vpop.f32.mrb[63].mxu0  ;;  %v5510_v61 = vpop.f32.mrb[63].mxu1 }
 0x35c   : > { %v13924_v55 = vld [vmem:[%s15623_s13 + $0x424] ss:$12 sps:$4 sm:$0xff]  }
 0x35d   : > { %4952 = vmatmul.mubr.bf16.gmra.mrb[168].mxu0 %v13917_v19  ;;  %13348 = vmatmul.mubr.bf16.gmra.mrb[168].mxu1 %v13918_v43  ;;  %v13926_v19 = vld [vmem:[%s15623_s13 + $0x248] ss:$12 sps:$4 sm:$0xff]  }
 0x35e   : > { %4959 = vmatprep.mubr.bf16.mxu0 %v13919_v53  ;;  %13351 = vmatprep.mubr.bf16.mxu1 %v13921_v35 }
 0x360   : > { %v16240_v52 = vpop.f32.mrb[64].mxu0  ;;  %v16242_v18 = vpop.f32.mrb[64].mxu1 }
 0x361   : > { %17649 = vst [vmem:[#allocation39_spill] sm:$0xff] %v16242_v18  ;;  %v4747_v36 = vpop.f32.mrb[65].mxu0  ;;  %v5515_v37 = vpop.f32.mrb[65].mxu1  ;;  %v13927_v18 = vld [vmem:[%s15623_s13 + $0x420] ss:$12 sps:$4 sm:$0xff]  }
 0x362   : > { %v16246_v7 = vpop.f32.mrb[66].mxu0  ;;  %v16248_v29 = vpop.f32.mrb[66].mxu1 }
 0x363   : > { %17650 = vst [vmem:[#allocation40_spill] sm:$0xff] %v16248_v29  ;;  %v4750_v43 = vpop.f32.mrb[67].mxu0  ;;  %v5518_v53 = vpop.f32.mrb[67].mxu1 }
 0x364   : > { %v13929_v43 = vld [vmem:[%s15623_s13 + $0x43c] ss:$12 sps:$4 sm:$0xff]  }
 0x365   : > { %4960 = vmatmul.mubr.bf16.gmra.mrb[172].mxu0 %v13922_v10  ;;  %13352 = vmatmul.mubr.bf16.gmra.mrb[172].mxu1 %v13923_v3  ;;  %v13931_v10 = vld [vmem:[%s15623_s13 + $0x278] ss:$12 sps:$4 sm:$0xff]  }
 0x366   : > { %4967 = vmatprep.mubr.bf16.mxu0 %v13924_v55  ;;  %13355 = vmatprep.mubr.bf16.mxu1 %v13926_v19 }
 0x368   : > { %v16252_v35 = vpop.f32.mrb[68].mxu0  ;;  %v16254_v61 = vpop.f32.mrb[68].mxu1 }
 0x369   : > { %17651 = vst [vmem:[#allocation41_spill] sm:$0xff] %v16254_v61  ;;  %v4755_v36 = vpop.f32.mrb[69].mxu0  ;;  %v5523_v37 = vpop.f32.mrb[69].mxu1  ;;  %v13932_v61 = vld [vmem:[%s15623_s13 + $0x438] ss:$12 sps:$4 sm:$0xff]  }
 0x36a   : > { %v16258_v29 = vpop.f32.mrb[70].mxu0  ;;  %v16260_v17 = vpop.f32.mrb[70].mxu1 }
 0x36b   : > { %17652 = vst [vmem:[#allocation42_spill] sm:$0xff] %v16260_v17  ;;  %v4758_v3 = vpop.f32.mrb[71].mxu0  ;;  %v5526_v55 = vpop.f32.mrb[71].mxu1 }
 0x36c   : > { %v13934_v3 = vld [vmem:[%s15623_s13 + $0x454] ss:$12 sps:$4 sm:$0xff]  }
 0x36d   : > { %4968 = vmatmul.mubr.bf16.gmra.mrb[176].mxu0 %v13927_v18  ;;  %13356 = vmatmul.mubr.bf16.gmra.mrb[176].mxu1 %v13928_v59  ;;  %v13936_v18 = vld [vmem:[%s15623_s13 + $0x2a8] ss:$12 sps:$4 sm:$0xff]  }
 0x36e   : > { %4975 = vmatprep.mubr.bf16.mxu0 %v13929_v43  ;;  %13359 = vmatprep.mubr.bf16.mxu1 %v13931_v10 }
 0x370   : > { %v16264_v19 = vpop.f32.mrb[72].mxu0  ;;  %v16266_v53 = vpop.f32.mrb[72].mxu1 }
 0x371   : > { %17653 = vst [vmem:[#allocation43_spill] sm:$0xff] %v16266_v53  ;;  %v4763_v36 = vpop.f32.mrb[73].mxu0  ;;  %v5531_v37 = vpop.f32.mrb[73].mxu1  ;;  %v13937_v53 = vld [vmem:[%s15623_s13 + $0x450] ss:$12 sps:$4 sm:$0xff]  }
 0x372   : > { %v16270_v17 = vpop.f32.mrb[74].mxu0  ;;  %v16272_v49 = vpop.f32.mrb[74].mxu1 }
 0x373   : > { %17654 = vst [vmem:[#allocation44_spill] sm:$0xff] %v16272_v49  ;;  %v4766_v59 = vpop.f32.mrb[75].mxu0  ;;  %v5534_v43 = vpop.f32.mrb[75].mxu1 }
 0x374   : > { %v13939_v59 = vld [vmem:[%s15623_s13 + $0x46c] ss:$12 sps:$4 sm:$0xff]  }
 0x375   : > { %4976 = vmatmul.mubr.bf16.gmra.mrb[180].mxu0 %v13932_v61  ;;  %13360 = vmatmul.mubr.bf16.gmra.mrb[180].mxu1 %v13933_v31  ;;  %v13941_v61 = vld [vmem:[%s15623_s13 + $0x2d8] ss:$12 sps:$4 sm:$0xff]  }
 0x376   : > { %4983 = vmatprep.mubr.bf16.mxu0 %v13934_v3  ;;  %13363 = vmatprep.mubr.bf16.mxu1 %v13936_v18 }
 0x378   : > { %v16276_v10 = vpop.f32.mrb[76].mxu0  ;;  %v16278_v55 = vpop.f32.mrb[76].mxu1 }
 0x379   : > { %17655 = vst [vmem:[#allocation45_spill] sm:$0xff] %v16278_v55  ;;  %v4771_v36 = vpop.f32.mrb[77].mxu0  ;;  %v5539_v37 = vpop.f32.mrb[77].mxu1  ;;  %v13942_v55 = vld [vmem:[%s15623_s13 + $0x468] ss:$12 sps:$4 sm:$0xff]  }
 0x37a   : > { %v16282_v49 = vpop.f32.mrb[78].mxu0  ;;  %v16284_v41 = vpop.f32.mrb[78].mxu1 }
 0x37b   : > { %17656 = vst [vmem:[#allocation46_spill] sm:$0xff] %v16284_v41  ;;  %v4774_v31 = vpop.f32.mrb[79].mxu0  ;;  %v5542_v3 = vpop.f32.mrb[79].mxu1 }
 0x37c   : > { %v13944_v31 = vld [vmem:[%s15623_s13 + $0x484] ss:$12 sps:$4 sm:$0xff]  }
 0x37d   : > { %4984 = vmatmul.mubr.bf16.gmra.mrb[184].mxu0 %v13937_v53  ;;  %13364 = vmatmul.mubr.bf16.gmra.mrb[184].mxu1 %v13938_v23  ;;  %v13946_v53 = vld [vmem:[%s15623_s13 + $0x308] ss:$12 sps:$4 sm:$0xff]  }
 0x37e   : > { %4991 = vmatprep.mubr.bf16.mxu0 %v13939_v59  ;;  %13367 = vmatprep.mubr.bf16.mxu1 %v13941_v61 }
 0x380   : > { %v16288_v18 = vpop.f32.mrb[80].mxu0  ;;  %v16290_v43 = vpop.f32.mrb[80].mxu1 }
 0x381   : > { %17657 = vst [vmem:[#allocation47_spill] sm:$0xff] %v16290_v43  ;;  %v4779_v36 = vpop.f32.mrb[81].mxu0  ;;  %v5547_v37 = vpop.f32.mrb[81].mxu1  ;;  %v13947_v43 = vld [vmem:[%s15623_s13 + $0x480] ss:$12 sps:$4 sm:$0xff]  }
 0x382   : > { %v16294_v41 = vpop.f32.mrb[82].mxu0  ;;  %v16296_v13 = vpop.f32.mrb[82].mxu1 }
 0x383   : > { %17658 = vst [vmem:[#allocation48_spill] sm:$0xff] %v16296_v13  ;;  %v4782_v23 = vpop.f32.mrb[83].mxu0  ;;  %v5550_v59 = vpop.f32.mrb[83].mxu1 }
 0x384   : > { %v13949_v23 = vld [vmem:[%s15623_s13 + $0x49c] ss:$12 sps:$4 sm:$0xff]  }
 0x385   : > { %4992 = vmatmul.mubr.bf16.gmra.mrb[188].mxu0 %v13942_v55  ;;  %13368 = vmatmul.mubr.bf16.gmra.mrb[188].mxu1 %v13943_v63  ;;  %v13951_v55 = vld [vmem:[%s15623_s13 + $0x338] ss:$12 sps:$4 sm:$0xff]  }
 0x386   : > { %4999 = vmatprep.mubr.bf16.mxu0 %v13944_v31  ;;  %13371 = vmatprep.mubr.bf16.mxu1 %v13946_v53 }
 0x388   : > { %v16300_v61 = vpop.f32.mrb[84].mxu0  ;;  %v16302_v3 = vpop.f32.mrb[84].mxu1 }
 0x389   : > { %17659 = vst [vmem:[#allocation49_spill] sm:$0xff] %v16302_v3  ;;  %v4787_v36 = vpop.f32.mrb[85].mxu0  ;;  %v5555_v37 = vpop.f32.mrb[85].mxu1  ;;  %v13952_v3 = vld [vmem:[%s15623_s13 + $0x498] ss:$12 sps:$4 sm:$0xff]  }
 0x38a   : > { %v16306_v13 = vpop.f32.mrb[86].mxu0  ;;  %v16308_v5 = vpop.f32.mrb[86].mxu1 }
 0x38b   : > { %17660 = vst [vmem:[#allocation50_spill] sm:$0xff] %v16308_v5  ;;  %v4790_v63 = vpop.f32.mrb[87].mxu0  ;;  %v5558_v31 = vpop.f32.mrb[87].mxu1 }
 0x38c   : > { %v13954_v63 = vld [vmem:[%s15623_s13 + $0x4b4] ss:$12 sps:$4 sm:$0xff]  }
 0x38d   : > { %5000 = vmatmul.mubr.bf16.gmra.mrb[192].mxu0 %v13947_v43  ;;  %13372 = vmatmul.mubr.bf16.gmra.mrb[192].mxu1 %v13948_v57  ;;  %v13956_v43 = vld [vmem:[%s15623_s13 + $0x368] ss:$12 sps:$4 sm:$0xff]  }
 0x38e   : > { %5007 = vmatprep.mubr.bf16.mxu0 %v13949_v23  ;;  %13375 = vmatprep.mubr.bf16.mxu1 %v13951_v55 }
 0x390   : > { %v16312_v53 = vpop.f32.mrb[88].mxu0  ;;  %v16314_v59 = vpop.f32.mrb[88].mxu1 }
 0x391   : > { %17661 = vst [vmem:[#allocation51_spill] sm:$0xff] %v16312_v53  ;;  %17662 = vst [vmem:[#allocation52_spill] sm:$0xff] %v16314_v59  ;;  %v4795_v36 = vpop.f32.mrb[89].mxu0  ;;  %v5563_v37 = vpop.f32.mrb[89].mxu1  ;;  %v13957_v59 = vld [vmem:[%s15623_s13 + $0x4b0] ss:$12 sps:$4 sm:$0xff]  }
 0x392   : > { %v16318_v5 = vpop.f32.mrb[90].mxu0  ;;  %v16320_v51 = vpop.f32.mrb[90].mxu1 }
 0x393   : > { %17663 = vst [vmem:[#allocation53_spill] sm:$0xff] %v16318_v5  ;;  %17664 = vst [vmem:[#allocation54_spill] sm:$0xff] %v16320_v51  ;;  %v4798_v57 = vpop.f32.mrb[91].mxu0  ;;  %v5566_v23 = vpop.f32.mrb[91].mxu1 }
 0x394   : > { %v13959_v57 = vld [vmem:[%s15623_s13 + $0x4cc] ss:$12 sps:$4 sm:$0xff]  }
 0x395   : > { %5008 = vmatmul.mubr.bf16.gmra.mrb[196].mxu0 %v13952_v3  ;;  %13376 = vmatmul.mubr.bf16.gmra.mrb[196].mxu1 %v13953_v39  ;;  %v13961_v3 = vld [vmem:[%s15623_s13 + $0x398] ss:$12 sps:$4 sm:$0xff]  }
 0x396   : > { %5015 = vmatprep.mubr.bf16.mxu0 %v13954_v63  ;;  %13379 = vmatprep.mubr.bf16.mxu1 %v13956_v43 }
 0x398   : > { %v16324_v55 = vpop.f32.mrb[92].mxu0  ;;  %v16326_v31 = vpop.f32.mrb[92].mxu1 }
 0x399   : > { %17665 = vst [vmem:[#allocation55_spill] sm:$0xff] %v16326_v31  ;;  %v4803_v36 = vpop.f32.mrb[93].mxu0  ;;  %v5571_v37 = vpop.f32.mrb[93].mxu1  ;;  %v13962_v31 = vld [vmem:[%s15623_s13 + $0x4c8] ss:$12 sps:$4 sm:$0xff]  }
 0x39a   : > { %v16330_v51 = vpop.f32.mrb[94].mxu0  ;;  %v16332_v45 = vpop.f32.mrb[94].mxu1 }
 0x39b   : > { %17666 = vst [vmem:[#allocation56_spill] sm:$0xff] %v16330_v51  ;;  %17667 = vst [vmem:[#allocation57_spill] sm:$0xff] %v16332_v45  ;;  %v4806_v39 = vpop.f32.mrb[95].mxu0  ;;  %v5574_v63 = vpop.f32.mrb[95].mxu1  ;;  %v1576_v51 = vld [vmem:[#allocation2 + $0x8] sm:$0xff] }
 0x39c   : > { %v13964_v39 = vld [vmem:[%s15623_s13 + $0x4e4] ss:$12 sps:$4 sm:$0xff]  }
 0x39d   : > { %5016 = vmatmul.mubr.bf16.gmra.mrb[200].mxu0 %v13957_v59  ;;  %13380 = vmatmul.mubr.bf16.gmra.mrb[200].mxu1 %v13958_v33  ;;  %v13966_v59 = vld [vmem:[%s15623_s13 + $0x3c8] ss:$12 sps:$4 sm:$0xff]  }
 0x39e   : > { %5023 = vmatprep.mubr.bf16.mxu0 %v13959_v57  ;;  %13383 = vmatprep.mubr.bf16.mxu1 %v13961_v3 }
 0x3a0   : > { %v16336_v43 = vpop.f32.mrb[96].mxu0  ;;  %v16338_v23 = vpop.f32.mrb[96].mxu1 }
 0x3a1   : > { %17668 = vst [vmem:[#allocation58_spill] sm:$0xff] %v16336_v43  ;;  %17669 = vst [vmem:[#allocation59_spill] sm:$0xff] %v16338_v23  ;;  %v4811_v36 = vpop.f32.mrb[97].mxu0  ;;  %v5579_v37 = vpop.f32.mrb[97].mxu1  ;;  %v13967_v23 = vld [vmem:[%s15623_s13 + $0x4e0] ss:$12 sps:$4 sm:$0xff]  }
 0x3a2   : > { %v16342_v45 = vpop.f32.mrb[98].mxu0  ;;  %v16344_v27 = vpop.f32.mrb[98].mxu1  ;;  %v13999_v43 = vld [vmem:[%s15623_s13 + $0x58c] ss:$12 sps:$4 sm:$0xff]  }
 0x3a3   : > { %17670 = vst [vmem:[#allocation60_spill] sm:$0xff] %v16342_v45  ;;  %17671 = vst [vmem:[#allocation61_spill] sm:$0xff] %v16344_v27  ;;  %v4814_v33 = vpop.f32.mrb[99].mxu0  ;;  %v5582_v57 = vpop.f32.mrb[99].mxu1  ;;  %v13973_v45 = vld [vmem:[%s15623_s13 + $0x410] ss:$12 sps:$4 sm:$0xff]  }
 0x3a4   : > { %v13969_v33 = vld [vmem:[%s15623_s13 + $0x4fc] ss:$12 sps:$4 sm:$0xff]  }
 0x3a5   : > { %5024 = vmatmul.mubr.bf16.gmra.mrb[204].mxu0 %v13962_v31  ;;  %13384 = vmatmul.mubr.bf16.gmra.mrb[204].mxu1 %v13963_v15  ;;  %v13971_v31 = vld [vmem:[%s15623_s13 + $0x3f8] ss:$12 sps:$4 sm:$0xff]  }
 0x3a6   : > { %5031 = vmatprep.mubr.bf16.mxu0 %v13964_v39  ;;  %13387 = vmatprep.mubr.bf16.mxu1 %v13966_v59 }
 0x3a8   : > { %v16348_v3 = vpop.f32.mrb[100].mxu0  ;;  %v16350_v63 = vpop.f32.mrb[100].mxu1 }
 0x3a9   : > { %17672 = vst [vmem:[#allocation62_spill] sm:$0xff] %v16348_v3  ;;  %17673 = vst [vmem:[#allocation63_spill] sm:$0xff] %v16350_v63  ;;  %v4819_v36 = vpop.f32.mrb[101].mxu0  ;;  %v5587_v37 = vpop.f32.mrb[101].mxu1  ;;  %v13972_v63 = vld [vmem:[%s15623_s13 + $0x4f8] ss:$12 sps:$4 sm:$0xff]  }
 0x3aa   : > { %v16354_v27 = vpop.f32.mrb[102].mxu0  ;;  %v16356_v21 = vpop.f32.mrb[102].mxu1  ;;  %v14003_v3 = vld [vmem:[%s15623_s13 + $0x530] ss:$12 sps:$4 sm:$0xff]  }
 0x3ab   : > { %17674 = vst [vmem:[#allocation64_spill] sm:$0xff] %v16354_v27  ;;  %17675 = vst [vmem:[#allocation65_spill] sm:$0xff] %v16356_v21  ;;  %v4822_v15 = vpop.f32.mrb[103].mxu0  ;;  %v5590_v39 = vpop.f32.mrb[103].mxu1 }
 0x3ac   : > { %v13974_v15 = vld [vmem:[%s15623_s13 + $0x514] ss:$12 sps:$4 sm:$0xff]  }
 0x3ad   : > { %5032 = vmatmul.mubr.bf16.gmra.mrb[208].mxu0 %v13967_v23  ;;  %13388 = vmatmul.mubr.bf16.gmra.mrb[208].mxu1 %v13968_v9  ;;  %v13976_v23 = vld [vmem:[%s15623_s13 + $0x428] ss:$12 sps:$4 sm:$0xff]  }
 0x3ae   : > { %5039 = vmatprep.mubr.bf16.mxu0 %v13969_v33  ;;  %13391 = vmatprep.mubr.bf16.mxu1 %v13971_v31 }
 0x3b0   : > { %v16360_v59 = vpop.f32.mrb[104].mxu0  ;;  %v16362_v57 = vpop.f32.mrb[104].mxu1 }
 0x3b1   : > { %17676 = vst [vmem:[#allocation66_spill] sm:$0xff] %v16360_v59  ;;  %17677 = vst [vmem:[#allocation67_spill] sm:$0xff] %v16362_v57  ;;  %v4827_v36 = vpop.f32.mrb[105].mxu0  ;;  %v5595_v37 = vpop.f32.mrb[105].mxu1  ;;  %v13977_v57 = vld [vmem:[%s15623_s13 + $0x510] ss:$12 sps:$4 sm:$0xff]  }
 0x3b2   : > { %v16366_v21 = vpop.f32.mrb[106].mxu0  ;;  %v16368_v27 = vpop.f32.mrb[106].mxu1 }
 0x3b3   : > { %17678 = vst [vmem:[#allocation68_spill] sm:$0xff] %v16366_v21  ;;  %17679 = vst [vmem:[#allocation69_spill] sm:$0xff] %v16368_v27  ;;  %v4830_v9 = vpop.f32.mrb[107].mxu0  ;;  %v5598_v33 = vpop.f32.mrb[107].mxu1  ;;  %v13978_v21 = vld [vmem:[%s15623_s13 + $0x440] ss:$12 sps:$4 sm:$0xff]  }
 0x3b4   : > { %v13979_v9 = vld [vmem:[%s15623_s13 + $0x52c] ss:$12 sps:$4 sm:$0xff]  }
 0x3b5   : > { %5040 = vmatmul.mubr.bf16.gmra.mrb[212].mxu0 %v13972_v63  ;;  %13392 = vmatmul.mubr.bf16.gmra.mrb[212].mxu1 %v13973_v45  ;;  %v13981_v63 = vld [vmem:[%s15623_s13 + $0x458] ss:$12 sps:$4 sm:$0xff]  }
 0x3b6   : > { %5047 = vmatprep.mubr.bf16.mxu0 %v13974_v15  ;;  %13395 = vmatprep.mubr.bf16.mxu1 %v13976_v23 }
 0x3b8   : > { %v16372_v31 = vpop.f32.mrb[108].mxu0  ;;  %v16374_v39 = vpop.f32.mrb[108].mxu1 }
 0x3b9   : > { %17680 = vst [vmem:[#allocation70_spill] sm:$0xff] %v16372_v31  ;;  %17681 = vst [vmem:[#allocation71_spill] sm:$0xff] %v16374_v39  ;;  %v4835_v36 = vpop.f32.mrb[109].mxu0  ;;  %v5603_v37 = vpop.f32.mrb[109].mxu1  ;;  %v13982_v39 = vld [vmem:[%s15623_s13 + $0x528] ss:$12 sps:$4 sm:$0xff]  }
 0x3ba   : > { %v16378_v27 = vpop.f32.mrb[110].mxu0  ;;  %v16380_v59 = vpop.f32.mrb[110].mxu1 }
 0x3bb   : > { %17682 = vst [vmem:[#allocation72_spill] sm:$0xff] %v16378_v27  ;;  %17683 = vst [vmem:[#allocation73_spill] sm:$0xff] %v16380_v59  ;;  %v4838_v45 = vpop.f32.mrb[111].mxu0  ;;  %v5606_v15 = vpop.f32.mrb[111].mxu1  ;;  %v13983_v27 = vld [vmem:[%s15623_s13 + $0x470] ss:$12 sps:$4 sm:$0xff]  }
 0x3bc   : > { %v13984_v45 = vld [vmem:[%s15623_s13 + $0x544] ss:$12 sps:$4 sm:$0xff]  }
 0x3bd   : > { %5048 = vmatmul.mubr.bf16.gmra.mrb[216].mxu0 %v13977_v57  ;;  %13396 = vmatmul.mubr.bf16.gmra.mrb[216].mxu1 %v13978_v21  ;;  %v13986_v57 = vld [vmem:[%s15623_s13 + $0x488] ss:$12 sps:$4 sm:$0xff]  }
 0x3be   : > { %5055 = vmatprep.mubr.bf16.mxu0 %v13979_v9  ;;  %13399 = vmatprep.mubr.bf16.mxu1 %v13981_v63 }
 0x3c0   : > { %v16384_v23 = vpop.f32.mrb[112].mxu0  ;;  %v16386_v33 = vpop.f32.mrb[112].mxu1 }
 0x3c1   : > { %17684 = vst [vmem:[#allocation74_spill] sm:$0xff] %v16384_v23  ;;  %17685 = vst [vmem:[#allocation75_spill] sm:$0xff] %v16386_v33  ;;  %v4843_v36 = vpop.f32.mrb[113].mxu0  ;;  %v5611_v37 = vpop.f32.mrb[113].mxu1  ;;  %v13987_v33 = vld [vmem:[%s15623_s13 + $0x540] ss:$12 sps:$4 sm:$0xff]  }
 0x3c2   : > { %v16390_v59 = vpop.f32.mrb[114].mxu0  ;;  %v16392_v31 = vpop.f32.mrb[114].mxu1 }
 0x3c3   : > { %17686 = vst [vmem:[#allocation76_spill] sm:$0xff] %v16390_v59  ;;  %17687 = vst [vmem:[#allocation77_spill] sm:$0xff] %v16392_v31  ;;  %v4846_v21 = vpop.f32.mrb[115].mxu0  ;;  %v5614_v9 = vpop.f32.mrb[115].mxu1  ;;  %v13988_v59 = vld [vmem:[%s15623_s13 + $0x4a0] ss:$12 sps:$4 sm:$0xff]  }
 0x3c4   : > { %v13989_v21 = vld [vmem:[%s15623_s13 + $0x55c] ss:$12 sps:$4 sm:$0xff]  }
 0x3c5   : > { %5056 = vmatmul.mubr.bf16.gmra.mrb[220].mxu0 %v13982_v39  ;;  %13400 = vmatmul.mubr.bf16.gmra.mrb[220].mxu1 %v13983_v27  ;;  %v13991_v39 = vld [vmem:[%s15623_s13 + $0x4b8] ss:$12 sps:$4 sm:$0xff]  }
 0x3c6   : > { %5063 = vmatprep.mubr.bf16.mxu0 %v13984_v45  ;;  %13403 = vmatprep.mubr.bf16.mxu1 %v13986_v57 }
 0x3c8   : > { %v16396_v63 = vpop.f32.mrb[116].mxu0  ;;  %v16398_v15 = vpop.f32.mrb[116].mxu1 }
 0x3c9   : > { %17688 = vst [vmem:[#allocation78_spill] sm:$0xff] %v16396_v63  ;;  %17689 = vst [vmem:[#allocation79_spill] sm:$0xff] %v16398_v15  ;;  %v4851_v36 = vpop.f32.mrb[117].mxu0  ;;  %v5619_v37 = vpop.f32.mrb[117].mxu1  ;;  %v13992_v15 = vld [vmem:[%s15623_s13 + $0x558] ss:$12 sps:$4 sm:$0xff]  }
 0x3ca   : > { %v16402_v31 = vpop.f32.mrb[118].mxu0  ;;  %v16404_v23 = vpop.f32.mrb[118].mxu1 }
 0x3cb   : > { %17690 = vst [vmem:[#allocation80_spill] sm:$0xff] %v16402_v31  ;;  %17691 = vst [vmem:[#allocation81_spill] sm:$0xff] %v16404_v23  ;;  %v4854_v27 = vpop.f32.mrb[119].mxu0  ;;  %v5622_v45 = vpop.f32.mrb[119].mxu1  ;;  %v13993_v31 = vld [vmem:[%s15623_s13 + $0x4d0] ss:$12 sps:$4 sm:$0xff]  }
 0x3cc   : > { %v13994_v27 = vld [vmem:[%s15623_s13 + $0x574] ss:$12 sps:$4 sm:$0xff]  }
 0x3cd   : > { %5064 = vmatmul.mubr.bf16.gmra.mrb[224].mxu0 %v13987_v33  ;;  %13404 = vmatmul.mubr.bf16.gmra.mrb[224].mxu1 %v13988_v59  ;;  %v13996_v33 = vld [vmem:[%s15623_s13 + $0x4e8] ss:$12 sps:$4 sm:$0xff]  }
 0x3ce   : > { %5071 = vmatprep.mubr.bf16.mxu0 %v13989_v21  ;;  %13407 = vmatprep.mubr.bf16.mxu1 %v13991_v39 }
 0x3d0   : > { %v16408_v57 = vpop.f32.mrb[120].mxu0  ;;  %v16410_v9 = vpop.f32.mrb[120].mxu1 }
 0x3d1   : > { %17692 = vst [vmem:[#allocation82_spill] sm:$0xff] %v16408_v57  ;;  %17693 = vst [vmem:[#allocation83_spill] sm:$0xff] %v16410_v9  ;;  %v4859_v36 = vpop.f32.mrb[121].mxu0  ;;  %v5627_v37 = vpop.f32.mrb[121].mxu1  ;;  %v13997_v9 = vld [vmem:[%s15623_s13 + $0x570] ss:$12 sps:$4 sm:$0xff]  }
 0x3d2   : > { %v16414_v23 = vpop.f32.mrb[122].mxu0  ;;  %v16416_v63 = vpop.f32.mrb[122].mxu1 }
 0x3d3   : > { %17694 = vst [vmem:[#allocation84_spill] sm:$0xff] %v16414_v23  ;;  %17695 = vst [vmem:[#allocation85_spill] sm:$0xff] %v16416_v63  ;;  %v4862_v59 = vpop.f32.mrb[123].mxu0  ;;  %v5630_v21 = vpop.f32.mrb[123].mxu1  ;;  %v13998_v23 = vld [vmem:[%s15623_s13 + $0x500] ss:$12 sps:$4 sm:$0xff]  }
 0x3d4   : > { %v14001_v59 = vld [vmem:[%s15623_s13 + $0x518] ss:$12 sps:$4 sm:$0xff]  }
 0x3d5   : > { %5072 = vmatmul.mubr.bf16.gmra.mrb[228].mxu0 %v13992_v15  ;;  %13408 = vmatmul.mubr.bf16.gmra.mrb[228].mxu1 %v13993_v31 }
 0x3d6   : > { %5079 = vmatprep.mubr.bf16.mxu0 %v13994_v27  ;;  %13411 = vmatprep.mubr.bf16.mxu1 %v13996_v33  ;;  %v1577_v33 = vld [vmem:[#allocation2 + $0x10] sm:$0xff] }
 0x3d8   : > { %v16420_v39 = vpop.f32.mrb[124].mxu0  ;;  %v16422_v45 = vpop.f32.mrb[124].mxu1 }
 0x3d9   : > { %17696 = vst [vmem:[#allocation86_spill] sm:$0xff] %v16420_v39  ;;  %17697 = vst [vmem:[#allocation87_spill] sm:$0xff] %v16422_v45  ;;  %v4867_v36 = vpop.f32.mrb[125].mxu0  ;;  %v5635_v37 = vpop.f32.mrb[125].mxu1  ;;  %v1578_v39 = vld [vmem:[#allocation2 + $0x18] sm:$0xff] }
 0x3da   : > { %v16426_v63 = vpop.f32.mrb[126].mxu0  ;;  %v16428_v57 = vpop.f32.mrb[126].mxu1  ;;  %v14002_v36 = vld [vmem:[%s15623_s13 + $0x588] ss:$12 sps:$4 sm:$0xff]  }
 0x3db   : > { %17698 = vst [vmem:[#allocation88_spill] sm:$0xff] %v16426_v63  ;;  %17699 = vst [vmem:[#allocation89_spill] sm:$0xff] %v16428_v57  ;;  %v4870_v15 = vpop.f32.mrb[127].mxu0  ;;  %v5638_v31 = vpop.f32.mrb[127].mxu1  ;;  %v1575_v57 = vld [vmem:[#allocation2] sm:$0xff] }
 0x3dc   : > { %v14006_v31 = vld [vmem:[%s15623_s13 + $0x548] ss:$12 sps:$4 sm:$0xff]  }
 0x3dd   : > { %5080 = vmatmul.mubr.bf16.gmra.mrb[232].mxu0 %v13997_v9  ;;  %13412 = vmatmul.mubr.bf16.gmra.mrb[232].mxu1 %v13998_v23 }
 0x3de   : > { %5087 = vmatprep.mubr.bf16.mxu0 %v13999_v43  ;;  %13415 = vmatprep.mubr.bf16.mxu1 %v14001_v59  ;;  %v14004_v43 = vld [vmem:[%s15623_s13 + $0x5a4] ss:$12 sps:$4 sm:$0xff]  }
 0x3e0   : > { %v16432_v27 = vpop.f32.mrb[128].mxu0  ;;  %v13309_v21 = vpop.f32.mrb[128].mxu1 }
 0x3e1   : > { %17700 = vst [vmem:[#allocation90_spill] sm:$0xff] %v16432_v27  ;;  %v5683_v37 = vadd.f32 %v13309_v21, %v16060_v20  ;;  %v4875_v45 = vpop.f32.mrb[129].mxu0  ;;  %v5674_v63 = vpop.f32.mrb[129].mxu1 }
 0x3e2   : > { %v5675_v15 = vadd.f32 %v5674_v63, %v16048_v8  ;;  %v16438_v9 = vpop.f32.mrb[130].mxu0  ;;  %v13310_v23 = vpop.f32.mrb[130].mxu1 }
 0x3e3   : > { %v6699_v59 = vadd.f32 %v5683_v37, %v1577_v33  ;;  %v5686_v27 = vadd.f32 %v13310_v23, %v16066_v26  ;;  %v4878_v5 = vpop.f32.mrb[131].mxu0  ;;  %v5677_v53 = vpop.f32.mrb[131].mxu1  ;;  %v14008_v33 = vld [vmem:[%s15623_s13 + $0x560] ss:$12 sps:$4 sm:$0xff]   ;;  %v14011_v23 = vld [vmem:[%s15623_s13 + $0x578] ss:$12 sps:$4 sm:$0xff]  }
 0x3e4   : > { %v6697_v20 = vadd.f32 %v5675_v15, %v1575_v57  ;;  %v5678_v45 = vadd.f32 %v5677_v53, %v16054_v14  ;;  %v1581_v5 = vld [vmem:[#allocation2 + $0x30] sm:$0xff]  ;;  %v14007_v57 = vld [vmem:[%s15623_s13 + $0x5a0] ss:$12 sps:$4 sm:$0xff]   ;;  %v14009_v15 = vld [vmem:[%s15623_s13 + $0x5bc] ss:$12 sps:$4 sm:$0xff]  }
 0x3e5   : > { %6955 = vst [vmem:[#allocation2 + $0x10] sm:$0xff] %v6699_v59  ;;  %v6700_v21 = vadd.f32 %v5686_v27, %v1578_v39  ;;  %5088 = vmatmul.mubr.bf16.gmra.mrb[236].mxu0 %v14002_v36  ;;  %13416 = vmatmul.mubr.bf16.gmra.mrb[236].mxu1 %v14003_v3  ;;  %v1579_v39 = vld [vmem:[#allocation2 + $0x20] sm:$0xff]  ;;  %v1582_v3 = vld [vmem:[#allocation2 + $0x38] sm:$0xff] }
 0x3e6   : > { %6953 = vst [vmem:[#allocation2] sm:$0xff] %v6697_v20  ;;  %v6698_v8 = vadd.f32 %v5678_v45, %v1576_v51  ;;  %5095 = vmatprep.mubr.bf16.mxu0 %v14004_v43  ;;  %13419 = vmatprep.mubr.bf16.mxu1 %v14006_v31  ;;  %v1580_v20 = vld [vmem:[#allocation2 + $0x28] sm:$0xff] }
 0x3e7   : > { %6956 = vst [vmem:[#allocation2 + $0x18] sm:$0xff] %v6700_v21 }
 0x3e8   : > { %6954 = vst [vmem:[#allocation2 + $0x8] sm:$0xff] %v6698_v8  ;;  %v16444_v26 = vpop.f32.mrb[132].mxu0  ;;  %v13313_v63 = vpop.f32.mrb[132].mxu1 }
 0x3e9   : > { %v5699_v14 = vadd.f32 %v13313_v63, %v16084_v44  ;;  %v4883_v53 = vpop.f32.mrb[133].mxu0  ;;  %v5690_v27 = vpop.f32.mrb[133].mxu1 }
 0x3ea   : > { %v5691_v51 = vadd.f32 %v5690_v27, %v16072_v32  ;;  %v16450_v36 = vpop.f32.mrb[134].mxu0  ;;  %v13314_v37 = vpop.f32.mrb[134].mxu1  ;;  %v1586_v27 = vld [vmem:[#allocation2 + $0x58] sm:$0xff] }
 0x3eb   : > { %v6703_v43 = vadd.f32 %v5699_v14, %v1581_v5  ;;  %v5702_v31 = vadd.f32 %v13314_v37, %v16090_v50  ;;  %v4886_v59 = vpop.f32.mrb[135].mxu0  ;;  %v5693_v45 = vpop.f32.mrb[135].mxu1  ;;  %v1585_v5 = vld [vmem:[#allocation2 + $0x50] sm:$0xff]  ;;  %v14012_v14 = vld [vmem:[%s15623_s13 + $0x5b8] ss:$12 sps:$4 sm:$0xff]  }
 0x3ec   : > { %v6701_v44 = vadd.f32 %v5691_v51, %v1579_v39  ;;  %v5694_v21 = vadd.f32 %v5693_v45, %v16078_v38  ;;  %v1583_v39 = vld [vmem:[#allocation2 + $0x40] sm:$0xff] }
 0x3ed   : > { %6959 = vst [vmem:[#allocation2 + $0x30] sm:$0xff] %v6703_v43  ;;  %v6704_v8 = vadd.f32 %v5702_v31, %v1582_v3  ;;  %5096 = vmatmul.mubr.bf16.gmra.mrb[240].mxu0 %v14007_v57  ;;  %13420 = vmatmul.mubr.bf16.gmra.mrb[240].mxu1 %v14008_v33  ;;  %v14013_v3 = vld [vmem:[%s15623_s13 + $0x590] ss:$12 sps:$4 sm:$0xff]  }
 0x3ee   : > { %6957 = vst [vmem:[#allocation2 + $0x20] sm:$0xff] %v6701_v44  ;;  %v6702_v32 = vadd.f32 %v5694_v21, %v1580_v20  ;;  %5103 = vmatprep.mubr.bf16.mxu0 %v14009_v15  ;;  %13423 = vmatprep.mubr.bf16.mxu1 %v14011_v23  ;;  %v14014_v15 = vld [vmem:[%s15623_s13 + $0x5d4] ss:$12 sps:$4 sm:$0xff]   ;;  %v1584_v20 = vld [vmem:[#allocation2 + $0x48] sm:$0xff] }
 0x3ef   : > { %6960 = vst [vmem:[#allocation2 + $0x38] sm:$0xff] %v6704_v8  ;;  %v14016_v23 = vld [vmem:[%s15623_s13 + $0x5a8] ss:$12 sps:$4 sm:$0xff]  }
 0x3f0   : > { %6958 = vst [vmem:[#allocation2 + $0x28] sm:$0xff] %v6702_v32  ;;  %v16456_v50 = vpop.f32.mrb[136].mxu0  ;;  %v13317_v63 = vpop.f32.mrb[136].mxu1  ;;  %v1589_v8 = vld [vmem:[#allocation2 + $0x70] sm:$0xff] }
 0x3f1   : > { %v5715_v38 = vadd.f32 %v13317_v63, %v16108_v4  ;;  %v4891_v53 = vpop.f32.mrb[137].mxu0  ;;  %v5706_v57 = vpop.f32.mrb[137].mxu1 }
 0x3f2   : > { %v5707_v33 = vadd.f32 %v5706_v57, %v16096_v56  ;;  %v16462_v51 = vpop.f32.mrb[138].mxu0  ;;  %v13318_v37 = vpop.f32.mrb[138].mxu1  ;;  %v1590_v53 = vld [vmem:[#allocation2 + $0x78] sm:$0xff] }
 0x3f3   : > { %v6707_v43 = vadd.f32 %v5715_v38, %v1585_v5  ;;  %v5718_v31 = vadd.f32 %v13318_v37, %v16114_v12  ;;  %v4894_v59 = vpop.f32.mrb[139].mxu0  ;;  %v5709_v45 = vpop.f32.mrb[139].mxu1  ;;  %v14017_v5 = vld [vmem:[%s15623_s13 + $0x5d0] ss:$12 sps:$4 sm:$0xff]   ;;  %v1587_v38 = vld [vmem:[#allocation2 + $0x60] sm:$0xff] }
 0x3f4   : > { %v6705_v4 = vadd.f32 %v5707_v33, %v1583_v39  ;;  %v5710_v44 = vadd.f32 %v5709_v45, %v16102_v62  ;;  %v14018_v39 = vld [vmem:[%s15623_s13 + $0x5c0] ss:$12 sps:$4 sm:$0xff]   ;;  %v14021_v37 = vld [vmem:[%s15623_s13 + $0x5d8] ss:$12 sps:$4 sm:$0xff]  }
 0x3f5   : > { %6963 = vst [vmem:[#allocation2 + $0x50] sm:$0xff] %v6707_v43  ;;  %v6708_v21 = vadd.f32 %v5718_v31, %v1586_v27  ;;  %5104 = vmatmul.mubr.bf16.gmra.mrb[244].mxu0 %v14012_v14  ;;  %13424 = vmatmul.mubr.bf16.gmra.mrb[244].mxu1 %v14013_v3  ;;  %v14019_v33 = vld [vmem:[%s15623_s13 + $0x5ec] ss:$12 sps:$4 sm:$0xff]  }
 0x3f6   : > { %6961 = vst [vmem:[#allocation2 + $0x40] sm:$0xff] %v6705_v4  ;;  %v6706_v56 = vadd.f32 %v5710_v44, %v1584_v20  ;;  %5111 = vmatprep.mubr.bf16.mxu0 %v14014_v15  ;;  %13427 = vmatprep.mubr.bf16.mxu1 %v14016_v23  ;;  %v1588_v31 = vld [vmem:[#allocation2 + $0x68] sm:$0xff]  ;;  %v1593_v4 = vld [vmem:[#allocation2 + $0x90] sm:$0xff] }
 0x3f7   : > { %6964 = vst [vmem:[#allocation2 + $0x58] sm:$0xff] %v6708_v21  ;;  %v14022_v21 = vld [vmem:[%s15623_s13 + $0x5e8] ss:$12 sps:$4 sm:$0xff]  }
 0x3f8   : > { %6962 = vst [vmem:[#allocation2 + $0x48] sm:$0xff] %v6706_v56  ;;  %v16468_v12 = vpop.f32.mrb[140].mxu0  ;;  %v13321_v32 = vpop.f32.mrb[140].mxu1 }
 0x3f9   : > { %v5731_v62 = vadd.f32 %v13321_v32, %v16132_v40  ;;  %v4899_v63 = vpop.f32.mrb[141].mxu0  ;;  %v5722_v14 = vpop.f32.mrb[141].mxu1 }
 0x3fa   : > { %v5723_v57 = vadd.f32 %v5722_v14, %v16120_v22  ;;  %v16474_v27 = vpop.f32.mrb[142].mxu0  ;;  %v13322_v3 = vpop.f32.mrb[142].mxu1 }
 0x3fb   : > { %v6711_v15 = vadd.f32 %v5731_v62, %v1589_v8  ;;  %v5734_v23 = vadd.f32 %v13322_v3, %v16138_v48  ;;  %v4902_v43 = vpop.f32.mrb[143].mxu0  ;;  %v5725_v59 = vpop.f32.mrb[143].mxu1  ;;  %v1591_v8 = vld [vmem:[#allocation2 + $0x80] sm:$0xff]  ;;  %v14023_v62 = vld [vmem:[%s15623_s13 + $0x5f0] ss:$12 sps:$4 sm:$0xff]  }
 0x3fc   : > { %v6709_v40 = vadd.f32 %v5723_v57, %v1587_v38  ;;  %v5726_v20 = vadd.f32 %v5725_v59, %v16126_v30 }
 0x3fd   : > { %6967 = vst [vmem:[#allocation2 + $0x70] sm:$0xff] %v6711_v15  ;;  %v6712_v45 = vadd.f32 %v5734_v23, %v1590_v53  ;;  %5112 = vmatmul.mubr.bf16.gmra.mrb[248].mxu0 %v14017_v5  ;;  %13428 = vmatmul.mubr.bf16.gmra.mrb[248].mxu1 %v14018_v39  ;;  %v1594_v5 = vld [vmem:[#allocation2 + $0x98] sm:$0xff]  ;;  %v14026_v53 = vld [vmem:[%s15623_s13 + $0x604] ss:$12 sps:$4 sm:$0xff]   ;;  %v14027_v39 = vld [vmem:[%s15623_s13 + $0x608] ss:$12 sps:$4 sm:$0xff]  }
 0x3fe   : > { %6965 = vst [vmem:[#allocation2 + $0x60] sm:$0xff] %v6709_v40  ;;  %v6710_v22 = vadd.f32 %v5726_v20, %v1588_v31  ;;  %5119 = vmatprep.mubr.bf16.mxu0 %v14019_v33  ;;  %13431 = vmatprep.mubr.bf16.mxu1 %v14021_v37  ;;  %v1592_v37 = vld [vmem:[#allocation2 + $0x88] sm:$0xff]  ;;  %v1597_v31 = vld [vmem:[#allocation2 + $0xb0] sm:$0xff] }
 0x3ff   : > { %6968 = vst [vmem:[#allocation2 + $0x78] sm:$0xff] %v6712_v45  ;;  %v14024_v40 = vld [vmem:[%s15623_s13 + $0x600] ss:$12 sps:$4 sm:$0xff]  }
 0x400   : > { %6966 = vst [vmem:[#allocation2 + $0x68] sm:$0xff] %v6710_v22  ;;  %v16480_v48 = vpop.f32.mrb[144].mxu0  ;;  %v13325_v44 = vpop.f32.mrb[144].mxu1  ;;  %v1595_v45 = vld [vmem:[#allocation2 + $0xa0] sm:$0xff] }
 0x401   : > { %v5747_v30 = vadd.f32 %v13325_v44, %v16156_v16  ;;  %v4907_v56 = vpop.f32.mrb[145].mxu0  ;;  %v5738_v32 = vpop.f32.mrb[145].mxu1  ;;  %v14028_v44 = vld [vmem:[%s15623_s13 + $0x620] ss:$12 sps:$4 sm:$0xff]  }
 0x402   : > { %v5739_v63 = vadd.f32 %v5738_v32, %v16144_v58  ;;  %v16486_v38 = vpop.f32.mrb[146].mxu0  ;;  %v13326_v14 = vpop.f32.mrb[146].mxu1  ;;  %v14032_v32 = vld [vmem:[%s15623_s13 + $0x638] ss:$12 sps:$4 sm:$0xff]  }
 0x403   : > { %v6715_v57 = vadd.f32 %v5747_v30, %v1593_v4  ;;  %v5750_v3 = vadd.f32 %v13326_v14, %v16162_v28  ;;  %v4910_v33 = vpop.f32.mrb[147].mxu0  ;;  %v5741_v15 = vpop.f32.mrb[147].mxu1  ;;  %v1598_v4 = vld [vmem:[#allocation2 + $0xb8] sm:$0xff]  ;;  %v1596_v14 = vld [vmem:[#allocation2 + $0xa8] sm:$0xff] }
 0x404   : > { %v6713_v16 = vadd.f32 %v5739_v63, %v1591_v8  ;;  %v5742_v23 = vadd.f32 %v5741_v15, %v16150_v2  ;;  %v14031_v8 = vld [vmem:[%s15623_s13 + $0x61c] ss:$12 sps:$4 sm:$0xff]  }
 0x405   : > { %6971 = vst [vmem:[#allocation2 + $0x90] sm:$0xff] %v6715_v57  ;;  %v6716_v43 = vadd.f32 %v5750_v3, %v1594_v5  ;;  %5120 = vmatmul.mubr.bf16.gmra.mrb[252].mxu0 %v14022_v21  ;;  %13432 = vmatmul.mubr.bf16.gmra.mrb[252].mxu1 %v14023_v62  ;;  %v1601_v3 = vld [vmem:[#allocation2 + $0xd0] sm:$0xff] }
 0x406   : > { %6969 = vst [vmem:[#allocation2 + $0x80] sm:$0xff] %v6713_v16  ;;  %v6714_v58 = vadd.f32 %v5742_v23, %v1592_v37  ;;  %5127 = vmatprep.mubr.bf16.mxu0 %v14026_v53  ;;  %13435 = vmatprep.mubr.bf16.mxu1 %v14027_v39  ;;  %v14029_v37 = vld [vmem:[%s15623_s13 + $0x618] ss:$12 sps:$4 sm:$0xff]  }
 0x407   : > { %6972 = vst [vmem:[#allocation2 + $0x98] sm:$0xff] %v6716_v43  ;;  %v1599_v16 = vld [vmem:[#allocation2 + $0xc0] sm:$0xff]  ;;  %v1602_v43 = vld [vmem:[#allocation2 + $0xd8] sm:$0xff] }
 0x408   : > { %6970 = vst [vmem:[#allocation2 + $0x88] sm:$0xff] %v6714_v58  ;;  %v16492_v28 = vpop.f32.mrb[148].mxu0  ;;  %v13329_v59 = vpop.f32.mrb[148].mxu1  ;;  %v14033_v58 = vld [vmem:[%s15623_s13 + $0x650] ss:$12 sps:$4 sm:$0xff]  }
 0x409   : > { %v5763_v2 = vadd.f32 %v13329_v59, %v16180_v6  ;;  %v4915_v20 = vpop.f32.mrb[149].mxu0  ;;  %v5754_v22 = vpop.f32.mrb[149].mxu1 }
 0x40a   : > { %v5755_v21 = vadd.f32 %v5754_v22, %v16168_v42  ;;  %v16498_v30 = vpop.f32.mrb[150].mxu0  ;;  %v13330_v56 = vpop.f32.mrb[150].mxu1  ;;  %v14037_v20 = vld [vmem:[%s15623_s13 + $0x668] ss:$12 sps:$4 sm:$0xff]  }
 0x40b   : > { %v6719_v5 = vadd.f32 %v5763_v2, %v1597_v31  ;;  %v5766_v62 = vadd.f32 %v13330_v56, %v16186_v24  ;;  %v4918_v63 = vpop.f32.mrb[151].mxu0  ;;  %v5757_v53 = vpop.f32.mrb[151].mxu1  ;;  %v14036_v2 = vld [vmem:[%s15623_s13 + $0x634] ss:$12 sps:$4 sm:$0xff]  }
 0x40c   : > { %v6717_v6 = vadd.f32 %v5755_v21, %v1595_v45  ;;  %v5758_v39 = vadd.f32 %v5757_v53, %v16174_v54 }
 0x40d   : > { %6975 = vst [vmem:[#allocation2 + $0xb0] sm:$0xff] %v6719_v5  ;;  %v6720_v57 = vadd.f32 %v5766_v62, %v1598_v4  ;;  %5128 = vmatmul.mubr.bf16.gmra.mrb[0].mxu0 %v14024_v40  ;;  %13436 = vmatmul.mubr.bf16.gmra.mrb[0].mxu1 %v14028_v44  ;;  %v1600_v44 = vld [vmem:[#allocation2 + $0xc8] sm:$0xff]  ;;  %v14034_v62 = vld [vmem:[%s15623_s13 + $0x630] ss:$12 sps:$4 sm:$0xff]  }
 0x40e   : > { %6973 = vst [vmem:[#allocation2 + $0xa0] sm:$0xff] %v6717_v6  ;;  %v6718_v42 = vadd.f32 %v5758_v39, %v1596_v14  ;;  %5135 = vmatprep.mubr.bf16.mxu0 %v14031_v8  ;;  %13439 = vmatprep.mubr.bf16.mxu1 %v14032_v32  ;;  %v1605_v32 = vld [vmem:[#allocation2 + $0xf0] sm:$0xff]  ;;  %v1603_v14 = vld [vmem:[#allocation2 + $0xe0] sm:$0xff]  ;;  %v1606_v6 = vld [vmem:[#allocation2 + $0xf8] sm:$0xff] }
 0x40f   : > { %6976 = vst [vmem:[#allocation2 + $0xb8] sm:$0xff] %v6720_v57  ;;  %v14038_v39 = vld [vmem:[%s15623_s13 + $0x680] ss:$12 sps:$4 sm:$0xff]  }
 0x410   : > { %6974 = vst [vmem:[#allocation2 + $0xa8] sm:$0xff] %v6718_v42  ;;  %v16504_v24 = vpop.f32.mrb[152].mxu0  ;;  %v13333_v33 = vpop.f32.mrb[152].mxu1 }
 0x411   : > { %v5779_v54 = vadd.f32 %v13333_v33, %v16204_v34  ;;  %v4923_v15 = vpop.f32.mrb[153].mxu0  ;;  %v5770_v23 = vpop.f32.mrb[153].mxu1  ;;  %v14041_v33 = vld [vmem:[%s15623_s13 + $0x64c] ss:$12 sps:$4 sm:$0xff]  }
 0x412   : > { %v5771_v31 = vadd.f32 %v5770_v23, %v16192_v46  ;;  %v16510_v59 = vpop.f32.mrb[154].mxu0  ;;  %v13334_v40 = vpop.f32.mrb[154].mxu1  ;;  %v1604_v23 = vld [vmem:[#allocation2 + $0xe8] sm:$0xff] }
 0x413   : > { %v6723_v45 = vadd.f32 %v5779_v54, %v1601_v3  ;;  %v5782_v22 = vadd.f32 %v13334_v40, %v16210_v1  ;;  %v4926_v4 = vpop.f32.mrb[155].mxu0  ;;  %v5773_v21 = vpop.f32.mrb[155].mxu1  ;;  %v1609_v40 = vld [vmem:[#allocation2 + $0x110] sm:$0xff] }
 0x414   : > { %v6721_v34 = vadd.f32 %v5771_v31, %v1599_v16  ;;  %v5774_v56 = vadd.f32 %v5773_v21, %v16198_v0  ;;  %v14043_v21 = vld [vmem:[%s15623_s13 + $0x6b0] ss:$12 sps:$4 sm:$0xff]  }
 0x415   : > { %6979 = vst [vmem:[#allocation2 + $0xd0] sm:$0xff] %v6723_v45  ;;  %v6724_v8 = vadd.f32 %v5782_v22, %v1602_v43  ;;  %5136 = vmatmul.mubr.bf16.gmra.mrb[4].mxu0 %v14029_v37  ;;  %13440 = vmatmul.mubr.bf16.gmra.mrb[4].mxu1 %v14033_v58  ;;  %v14042_v37 = vld [vmem:[%s15623_s13 + $0x698] ss:$12 sps:$4 sm:$0xff]  }
 0x416   : > { %6977 = vst [vmem:[#allocation2 + $0xc0] sm:$0xff] %v6721_v34  ;;  %v6722_v46 = vadd.f32 %v5774_v56, %v1600_v44  ;;  %5143 = vmatprep.mubr.bf16.mxu0 %v14036_v2  ;;  %13443 = vmatprep.mubr.bf16.mxu1 %v14037_v20  ;;  %v14039_v20 = vld [vmem:[%s15623_s13 + $0x648] ss:$12 sps:$4 sm:$0xff]   ;;  %v1607_v22 = vld [vmem:[#allocation2 + $0x100] sm:$0xff]  ;;  %v1610_v44 = vld [vmem:[#allocation2 + $0x118] sm:$0xff] }
 0x417   : > { %6980 = vst [vmem:[#allocation2 + $0xd8] sm:$0xff] %v6724_v8 }
 0x418   : > { %6978 = vst [vmem:[#allocation2 + $0xc8] sm:$0xff] %v6722_v46  ;;  %v16516_v1 = vpop.f32.mrb[156].mxu0  ;;  %v13337_v5 = vpop.f32.mrb[156].mxu1  ;;  %v14046_v46 = vld [vmem:[%s15623_s13 + $0x664] ss:$12 sps:$4 sm:$0xff]  }
 0x419   : > { %v5795_v0 = vadd.f32 %v13337_v5, %v16228_v60  ;;  %v4931_v63 = vpop.f32.mrb[157].mxu0  ;;  %v5786_v53 = vpop.f32.mrb[157].mxu1 }
 0x41a   : > { %v5787_v57 = vadd.f32 %v5786_v53, %v16216_v11  ;;  %v16522_v42 = vpop.f32.mrb[158].mxu0  ;;  %v13338_v3 = vpop.f32.mrb[158].mxu1  ;;  %v1608_v63 = vld [vmem:[#allocation2 + $0x108] sm:$0xff] }
 0x41b   : > { %v6727_v54 = vadd.f32 %v5795_v0, %v1605_v32  ;;  %v5798_v15 = vadd.f32 %v13338_v3, %v16234_v25  ;;  %v4934_v16 = vpop.f32.mrb[159].mxu0  ;;  %v5789_v43 = vpop.f32.mrb[159].mxu1  ;;  %v14047_v32 = vld [vmem:[%s15623_s13 + $0x6c8] ss:$12 sps:$4 sm:$0xff]   ;;  %v14044_v3 = vld [vmem:[%s15623_s13 + $0x660] ss:$12 sps:$4 sm:$0xff]  }
 0x41c   : > { %v6725_v60 = vadd.f32 %v5787_v57, %v1603_v14  ;;  %v5790_v58 = vadd.f32 %v5789_v43, %v16222_v47  ;;  %v14048_v16 = vld [vmem:[%s15623_s13 + $0x6e0] ss:$12 sps:$4 sm:$0xff]  }
 0x41d   : > { %6983 = vst [vmem:[#allocation2 + $0xf0] sm:$0xff] %v6727_v54  ;;  %v6728_v31 = vadd.f32 %v5798_v15, %v1606_v6  ;;  %5144 = vmatmul.mubr.bf16.gmra.mrb[8].mxu0 %v14034_v62  ;;  %13444 = vmatmul.mubr.bf16.gmra.mrb[8].mxu1 %v14038_v39  ;;  %v1613_v39 = vld [vmem:[#allocation2 + $0x130] sm:$0xff]  ;;  %v1614_v15 = vld [vmem:[#allocation2 + $0x138] sm:$0xff] }
 0x41e   : > { %6981 = vst [vmem:[#allocation2 + $0xe0] sm:$0xff] %v6725_v60  ;;  %v6726_v11 = vadd.f32 %v5790_v58, %v1604_v23  ;;  %5151 = vmatprep.mubr.bf16.mxu0 %v14041_v33  ;;  %13447 = vmatprep.mubr.bf16.mxu1 %v14042_v37  ;;  %v1611_v37 = vld [vmem:[#allocation2 + $0x120] sm:$0xff]  ;;  %v14051_v58 = vld [vmem:[%s15623_s13 + $0x67c] ss:$12 sps:$4 sm:$0xff]  }
 0x41f   : > { %6984 = vst [vmem:[#allocation2 + $0xf8] sm:$0xff] %v6728_v31  ;;  %v14052_v31 = vld [vmem:[%s15623_s13 + $0x6f8] ss:$12 sps:$4 sm:$0xff]  }
 0x420   : > { %6982 = vst [vmem:[#allocation2 + $0xe8] sm:$0xff] %v6726_v11  ;;  %v16528_v25 = vpop.f32.mrb[160].mxu0  ;;  %v13341_v2 = vpop.f32.mrb[160].mxu1 }
 0x421   : > { %v5811_v47 = vadd.f32 %v13341_v2, %v16252_v35  ;;  %v4939_v45 = vpop.f32.mrb[161].mxu0  ;;  %v5802_v4 = vpop.f32.mrb[161].mxu1 }
 0x422   : > { %v5803_v34 = vadd.f32 %v5802_v4, %v16240_v52  ;;  %v16534_v56 = vpop.f32.mrb[162].mxu0  ;;  %v13342_v8 = vpop.f32.mrb[162].mxu1  ;;  %v1617_v4 = vld [vmem:[#allocation2 + $0x150] sm:$0xff] }
 0x423   : > { %v6731_v5 = vadd.f32 %v5811_v47, %v1609_v40  ;;  %v5814_v62 = vadd.f32 %v13342_v8, %v16258_v29  ;;  %v4942_v0 = vpop.f32.mrb[163].mxu0  ;;  %v5805_v14 = vpop.f32.mrb[163].mxu1  ;;  %v1615_v8 = vld [vmem:[#allocation2 + $0x140] sm:$0xff] }
 0x424   : > { %v6729_v35 = vadd.f32 %v5803_v34, %v1607_v22  ;;  %v5806_v53 = vadd.f32 %v5805_v14, %v16246_v7  ;;  %v14056_v14 = vld [vmem:[%s15623_s13 + $0x694] ss:$12 sps:$4 sm:$0xff]  }
 0x425   : > { %6987 = vst [vmem:[#allocation2 + $0x110] sm:$0xff] %v6731_v5  ;;  %v6732_v6 = vadd.f32 %v5814_v62, %v1610_v44  ;;  %5152 = vmatmul.mubr.bf16.gmra.mrb[12].mxu0 %v14039_v20  ;;  %13448 = vmatmul.mubr.bf16.gmra.mrb[12].mxu1 %v14043_v21  ;;  %v1612_v20 = vld [vmem:[#allocation2 + $0x128] sm:$0xff]  ;;  %v14049_v21 = vld [vmem:[%s15623_s13 + $0x678] ss:$12 sps:$4 sm:$0xff]   ;;  %v14053_v5 = vld [vmem:[%s15623_s13 + $0x710] ss:$12 sps:$4 sm:$0xff]  }
 0x426   : > { %6985 = vst [vmem:[#allocation2 + $0x100] sm:$0xff] %v6729_v35  ;;  %v6730_v52 = vadd.f32 %v5806_v53, %v1608_v63  ;;  %5159 = vmatprep.mubr.bf16.mxu0 %v14046_v46  ;;  %13451 = vmatprep.mubr.bf16.mxu1 %v14047_v32  ;;  %v1618_v32 = vld [vmem:[#allocation2 + $0x158] sm:$0xff]  ;;  %v14057_v35 = vld [vmem:[%s15623_s13 + $0x728] ss:$12 sps:$4 sm:$0xff]  }
 0x427   : > { %6988 = vst [vmem:[#allocation2 + $0x118] sm:$0xff] %v6732_v6 }
 0x428   : > { %6986 = vst [vmem:[#allocation2 + $0x108] sm:$0xff] %v6730_v52  ;;  %v16540_v29 = vpop.f32.mrb[164].mxu0  ;;  %v13345_v57 = vpop.f32.mrb[164].mxu1 }
 0x429   : > { %v5827_v7 = vadd.f32 %v13345_v57, %v16276_v10  ;;  %v4947_v33 = vpop.f32.mrb[165].mxu0  ;;  %v5818_v54 = vpop.f32.mrb[165].mxu1 }
 0x42a   : > { %v5819_v23 = vadd.f32 %v5818_v54, %v16264_v19  ;;  %v16546_v43 = vpop.f32.mrb[166].mxu0  ;;  %v13346_v60 = vpop.f32.mrb[166].mxu1  ;;  %v1621_v33 = vld [vmem:[#allocation2 + $0x170] sm:$0xff] }
 0x42b   : > { %v6735_v11 = vadd.f32 %v5827_v7, %v1613_v39  ;;  %v5830_v40 = vadd.f32 %v13346_v60, %v16282_v49  ;;  %v4950_v2 = vpop.f32.mrb[167].mxu0  ;;  %v5821_v47 = vpop.f32.mrb[167].mxu1  ;;  %v1616_v39 = vld [vmem:[#allocation2 + $0x148] sm:$0xff]  ;;  %v14054_v54 = vld [vmem:[%s15623_s13 + $0x690] ss:$12 sps:$4 sm:$0xff]  }
 0x42c   : > { %v6733_v10 = vadd.f32 %v5819_v23, %v1611_v37  ;;  %v5822_v45 = vadd.f32 %v5821_v47, %v16270_v17  ;;  %v1622_v60 = vld [vmem:[#allocation2 + $0x178] sm:$0xff] }
 0x42d   : > { %6991 = vst [vmem:[#allocation2 + $0x130] sm:$0xff] %v6735_v11  ;;  %v6736_v22 = vadd.f32 %v5830_v40, %v1614_v15  ;;  %5160 = vmatmul.mubr.bf16.gmra.mrb[16].mxu0 %v14044_v3  ;;  %13452 = vmatmul.mubr.bf16.gmra.mrb[16].mxu1 %v14048_v16  ;;  %v1619_v16 = vld [vmem:[#allocation2 + $0x160] sm:$0xff] }
 0x42e   : > { %6989 = vst [vmem:[#allocation2 + $0x120] sm:$0xff] %v6733_v10  ;;  %v6734_v19 = vadd.f32 %v5822_v45, %v1612_v20  ;;  %5167 = vmatprep.mubr.bf16.mxu0 %v14051_v58  ;;  %13455 = vmatprep.mubr.bf16.mxu1 %v14052_v31  ;;  %v14058_v58 = vld [vmem:[%s15623_s13 + $0x740] ss:$12 sps:$4 sm:$0xff]   ;;  %v14062_v47 = vld [vmem:[%s15623_s13 + $0x758] ss:$12 sps:$4 sm:$0xff]  }
 0x42f   : > { %6992 = vst [vmem:[#allocation2 + $0x138] sm:$0xff] %v6736_v22  ;;  %v17701_v31 = vld [vmem:[#allocation51_spill] sm:$0xff]  ;;  %v14061_v20 = vld [vmem:[%s15623_s13 + $0x6ac] ss:$12 sps:$4 sm:$0xff]  }
 0x430   : > { %6990 = vst [vmem:[#allocation2 + $0x128] sm:$0xff] %v6734_v19  ;;  %v16552_v49 = vpop.f32.mrb[168].mxu0  ;;  %v13349_v44 = vpop.f32.mrb[168].mxu1  ;;  %v17702_v45 = vld [vmem:[#allocation56_spill] sm:$0xff] }
 0x431   : > { %v5843_v17 = vadd.f32 %v13349_v44, %v16300_v61  ;;  %v4955_v34 = vpop.f32.mrb[169].mxu0  ;;  %v5834_v46 = vpop.f32.mrb[169].mxu1 }
 0x432   : > { %v5835_v62 = vadd.f32 %v5834_v46, %v16288_v18  ;;  %v16558_v0 = vpop.f32.mrb[170].mxu0  ;;  %v13350_v63 = vpop.f32.mrb[170].mxu1 }
 0x433   : > { %v6739_v53 = vadd.f32 %v5843_v17, %v1617_v4  ;;  %v5846_v6 = vadd.f32 %v13350_v63, %v16306_v13  ;;  %v4958_v52 = vpop.f32.mrb[171].mxu0  ;;  %v5837_v57 = vpop.f32.mrb[171].mxu1  ;;  %v1620_v4 = vld [vmem:[#allocation2 + $0x168] sm:$0xff]  ;;  %v17704_v63 = vld [vmem:[#allocation62_spill] sm:$0xff] }
 0x434   : > { %v6737_v61 = vadd.f32 %v5835_v62, %v1615_v8  ;;  %v5838_v3 = vadd.f32 %v5837_v57, %v16294_v41  ;;  %v14059_v62 = vld [vmem:[%s15623_s13 + $0x6a8] ss:$12 sps:$4 sm:$0xff]   ;;  %v1626_v52 = vld [vmem:[#allocation2 + $0x198] sm:$0xff] }
 0x435   : > { %6995 = vst [vmem:[#allocation2 + $0x150] sm:$0xff] %v6739_v53  ;;  %v6740_v7 = vadd.f32 %v5846_v6, %v1618_v32  ;;  %5168 = vmatmul.mubr.bf16.gmra.mrb[20].mxu0 %v14049_v21  ;;  %13456 = vmatmul.mubr.bf16.gmra.mrb[20].mxu1 %v14053_v5  ;;  %v17703_v21 = vld [vmem:[#allocation53_spill] sm:$0xff]  ;;  %v1623_v53 = vld [vmem:[#allocation2 + $0x180] sm:$0xff]  ;;  %v17705_v57 = vld [vmem:[#allocation58_spill] sm:$0xff] }
 0x436   : > { %6993 = vst [vmem:[#allocation2 + $0x140] sm:$0xff] %v6737_v61  ;;  %v6738_v18 = vadd.f32 %v5838_v3, %v1616_v39  ;;  %5175 = vmatprep.mubr.bf16.mxu0 %v14056_v14  ;;  %13459 = vmatprep.mubr.bf16.mxu1 %v14057_v35  ;;  %v1625_v32 = vld [vmem:[#allocation2 + $0x190] sm:$0xff] }
 0x437   : > { %6996 = vst [vmem:[#allocation2 + $0x158] sm:$0xff] %v6740_v7  ;;  %v14063_v39 = vld [vmem:[%s15623_s13 + $0x770] ss:$12 sps:$4 sm:$0xff]  }
 0x438   : > { %6994 = vst [vmem:[#allocation2 + $0x148] sm:$0xff] %v6738_v18  ;;  %v16564_v13 = vpop.f32.mrb[172].mxu0  ;;  %v13353_v37 = vpop.f32.mrb[172].mxu1  ;;  %v14066_v18 = vld [vmem:[%s15623_s13 + $0x6c4] ss:$12 sps:$4 sm:$0xff]  }
 0x439   : > { %v5859_v41 = vadd.f32 %v13353_v37, %v16324_v55  ;;  %v4963_v15 = vpop.f32.mrb[173].mxu0  ;;  %v5850_v23 = vpop.f32.mrb[173].mxu1 }
 0x43a   : > { %v5851_v11 = vadd.f32 %v5850_v23, %v17701_v31  ;;  %v16570_v40 = vpop.f32.mrb[174].mxu0  ;;  %v13354_v2 = vpop.f32.mrb[174].mxu1 }
 0x43b   : > { %v6743_v10 = vadd.f32 %v5859_v41, %v1621_v33  ;;  %v5862_v22 = vadd.f32 %v13354_v2, %v17702_v45  ;;  %v4966_v19 = vpop.f32.mrb[175].mxu0  ;;  %v5853_v44 = vpop.f32.mrb[175].mxu1  ;;  %v14067_v33 = vld [vmem:[%s15623_s13 + $0x788] ss:$12 sps:$4 sm:$0xff]   ;;  %v14064_v45 = vld [vmem:[%s15623_s13 + $0x6c0] ss:$12 sps:$4 sm:$0xff]  }
 0x43c   : > { %v6741_v55 = vadd.f32 %v5851_v11, %v1619_v16  ;;  %v5854_v17 = vadd.f32 %v5853_v44, %v17703_v21  ;;  %v1624_v16 = vld [vmem:[#allocation2 + $0x188] sm:$0xff]  ;;  %v1627_v44 = vld [vmem:[#allocation2 + $0x1a0] sm:$0xff]  ;;  %v1630_v21 = vld [vmem:[#allocation2 + $0x1b8] sm:$0xff] }
 0x43d   : > { %6999 = vst [vmem:[#allocation2 + $0x170] sm:$0xff] %v6743_v10  ;;  %v6744_v34 = vadd.f32 %v5862_v22, %v1622_v60  ;;  %5176 = vmatmul.mubr.bf16.gmra.mrb[24].mxu0 %v14054_v54  ;;  %13460 = vmatmul.mubr.bf16.gmra.mrb[24].mxu1 %v14058_v58  ;;  %v17706_v54 = vld [vmem:[#allocation64_spill] sm:$0xff]  ;;  %v17708_v22 = vld [vmem:[#allocation70_spill] sm:$0xff] }
 0x43e   : > { %6997 = vst [vmem:[#allocation2 + $0x160] sm:$0xff] %v6741_v55  ;;  %v6742_v8 = vadd.f32 %v5854_v17, %v1620_v4  ;;  %5183 = vmatprep.mubr.bf16.mxu0 %v14061_v20  ;;  %13463 = vmatprep.mubr.bf16.mxu1 %v14062_v47  ;;  %v17707_v58 = vld [vmem:[#allocation60_spill] sm:$0xff]  ;;  %v1629_v47 = vld [vmem:[#allocation2 + $0x1b0] sm:$0xff] }
 0x43f   : > { %7000 = vst [vmem:[#allocation2 + $0x178] sm:$0xff] %v6744_v34  ;;  %v14068_v17 = vld [vmem:[%s15623_s13 + $0x7a0] ss:$12 sps:$4 sm:$0xff]   ;;  %v17709_v34 = vld [vmem:[#allocation66_spill] sm:$0xff] }
 0x440   : > { %6998 = vst [vmem:[#allocation2 + $0x168] sm:$0xff] %v6742_v8  ;;  %v16576_v46 = vpop.f32.mrb[176].mxu0  ;;  %v13357_v5 = vpop.f32.mrb[176].mxu1 }
 0x441   : > { %v5875_v14 = vadd.f32 %v13357_v5, %v17704_v63  ;;  %v4971_v35 = vpop.f32.mrb[177].mxu0  ;;  %v5866_v6 = vpop.f32.mrb[177].mxu1  ;;  %v14072_v63 = vld [vmem:[%s15623_s13 + $0x7b8] ss:$12 sps:$4 sm:$0xff]  }
 0x442   : > { %v5867_v61 = vadd.f32 %v5866_v6, %v17705_v57  ;;  %v16582_v3 = vpop.f32.mrb[178].mxu0  ;;  %v13358_v7 = vpop.f32.mrb[178].mxu1  ;;  %v17710_v35 = vld [vmem:[#allocation72_spill] sm:$0xff] }
 0x443   : > { %v6747_v37 = vadd.f32 %v5875_v14, %v1625_v32  ;;  %v5878_v41 = vadd.f32 %v13358_v7, %v17706_v54  ;;  %v4974_v15 = vpop.f32.mrb[179].mxu0  ;;  %v5869_v23 = vpop.f32.mrb[179].mxu1  ;;  %v1633_v54 = vld [vmem:[#allocation2 + $0x1d0] sm:$0xff] }
 0x444   : > { %v6745_v60 = vadd.f32 %v5867_v61, %v1623_v53  ;;  %v5870_v31 = vadd.f32 %v5869_v23, %v17707_v58  ;;  %v17711_v61 = vld [vmem:[#allocation68_spill] sm:$0xff]  ;;  %v14069_v15 = vld [vmem:[%s15623_s13 + $0x6d8] ss:$12 sps:$4 sm:$0xff]  }
 0x445   : > { %7003 = vst [vmem:[#allocation2 + $0x190] sm:$0xff] %v6747_v37  ;;  %v6748_v11 = vadd.f32 %v5878_v41, %v1626_v52  ;;  %5184 = vmatmul.mubr.bf16.gmra.mrb[28].mxu0 %v14059_v62  ;;  %13464 = vmatmul.mubr.bf16.gmra.mrb[28].mxu1 %v14063_v39  ;;  %v14071_v62 = vld [vmem:[%s15623_s13 + $0x6dc] ss:$12 sps:$4 sm:$0xff]   ;;  %v1631_v58 = vld [vmem:[#allocation2 + $0x1c0] sm:$0xff] }
 0x446   : > { %7001 = vst [vmem:[#allocation2 + $0x180] sm:$0xff] %v6745_v60  ;;  %v6746_v2 = vadd.f32 %v5870_v31, %v1624_v16  ;;  %5191 = vmatprep.mubr.bf16.mxu0 %v14066_v18  ;;  %13467 = vmatprep.mubr.bf16.mxu1 %v14067_v33  ;;  %v1628_v52 = vld [vmem:[#allocation2 + $0x1a8] sm:$0xff]  ;;  %v17712_v16 = vld [vmem:[#allocation78_spill] sm:$0xff] }
 0x447   : > { %7004 = vst [vmem:[#allocation2 + $0x198] sm:$0xff] %v6748_v11  ;;  %v1634_v11 = vld [vmem:[#allocation2 + $0x1d8] sm:$0xff] }
 0x448   : > { %7002 = vst [vmem:[#allocation2 + $0x188] sm:$0xff] %v6746_v2  ;;  %v16588_v20 = vpop.f32.mrb[180].mxu0  ;;  %v13361_v10 = vpop.f32.mrb[180].mxu1  ;;  %v14073_v2 = vld [vmem:[%s15623_s13 + $0x7d0] ss:$12 sps:$4 sm:$0xff]  }
 0x449   : > { %v5891_v19 = vadd.f32 %v13361_v10, %v17708_v22  ;;  %v4979_v4 = vpop.f32.mrb[181].mxu0  ;;  %v5882_v55 = vpop.f32.mrb[181].mxu1 }
 0x44a   : > { %v5883_v8 = vadd.f32 %v5882_v55, %v17709_v34  ;;  %v16594_v32 = vpop.f32.mrb[182].mxu0  ;;  %v13362_v5 = vpop.f32.mrb[182].mxu1  ;;  %v14077_v4 = vld [vmem:[%s15623_s13 + $0x7e8] ss:$12 sps:$4 sm:$0xff]  }
 0x44b   : > { %v6751_v14 = vadd.f32 %v5891_v19, %v1629_v47  ;;  %v5894_v53 = vadd.f32 %v13362_v5, %v17710_v35  ;;  %v4982_v6 = vpop.f32.mrb[183].mxu0  ;;  %v5885_v39 = vpop.f32.mrb[183].mxu1  ;;  %v17713_v47 = vld [vmem:[#allocation74_spill] sm:$0xff]  ;;  %v14076_v19 = vld [vmem:[%s15623_s13 + $0x6f4] ss:$12 sps:$4 sm:$0xff]   ;;  %v17714_v55 = vld [vmem:[#allocation80_spill] sm:$0xff] }
 0x44c   : > { %v6749_v57 = vadd.f32 %v5883_v8, %v1627_v44  ;;  %v5886_v7 = vadd.f32 %v5885_v39, %v17711_v61  ;;  %v1632_v34 = vld [vmem:[#allocation2 + $0x1c8] sm:$0xff]  ;;  %v1637_v6 = vld [vmem:[#allocation2 + $0x1f0] sm:$0xff] }
 0x44d   : > { %7007 = vst [vmem:[#allocation2 + $0x1b0] sm:$0xff] %v6751_v14  ;;  %v6752_v18 = vadd.f32 %v5894_v53, %v1630_v21  ;;  %5192 = vmatmul.mubr.bf16.gmra.mrb[32].mxu0 %v14064_v45  ;;  %13468 = vmatmul.mubr.bf16.gmra.mrb[32].mxu1 %v14068_v17  ;;  %v14074_v39 = vld [vmem:[%s15623_s13 + $0x6f0] ss:$12 sps:$4 sm:$0xff]  }
 0x44e   : > { %7005 = vst [vmem:[#allocation2 + $0x1a0] sm:$0xff] %v6749_v57  ;;  %v6750_v33 = vadd.f32 %v5886_v7, %v1628_v52  ;;  %5199 = vmatprep.mubr.bf16.mxu0 %v14071_v62  ;;  %13471 = vmatprep.mubr.bf16.mxu1 %v14072_v63  ;;  %v17715_v62 = vld [vmem:[#allocation76_spill] sm:$0xff]  ;;  %v17716_v57 = vld [vmem:[#allocation86_spill] sm:$0xff] }
 0x44f   : > { %7008 = vst [vmem:[#allocation2 + $0x1b8] sm:$0xff] %v6752_v18  ;;  %v1635_v18 = vld [vmem:[#allocation2 + $0x1e0] sm:$0xff] }
 0x450   : > { %7006 = vst [vmem:[#allocation2 + $0x1a8] sm:$0xff] %v6750_v33  ;;  %v16600_v37 = vpop.f32.mrb[184].mxu0  ;;  %v13365_v41 = vpop.f32.mrb[184].mxu1 }
 0x451   : > { %v5907_v23 = vadd.f32 %v13365_v41, %v17712_v16  ;;  %v4987_v60 = vpop.f32.mrb[185].mxu0  ;;  %v5898_v31 = vpop.f32.mrb[185].mxu1  ;;  %v14078_v41 = vld [vmem:[%s15623_s13 + $0x800] ss:$12 sps:$4 sm:$0xff]  }
 0x452   : > { %v5899_v10 = vadd.f32 %v5898_v31, %v17713_v47  ;;  %v16606_v45 = vpop.f32.mrb[186].mxu0  ;;  %v13366_v22 = vpop.f32.mrb[186].mxu1  ;;  %v14082_v31 = vld [vmem:[%s15623_s13 + $0x818] ss:$12 sps:$4 sm:$0xff]  }
 0x453   : > { %v6755_v44 = vadd.f32 %v5907_v23, %v1633_v54  ;;  %v5910_v21 = vadd.f32 %v13366_v22, %v17714_v55  ;;  %v4990_v17 = vpop.f32.mrb[187].mxu0  ;;  %v5901_v8 = vpop.f32.mrb[187].mxu1  ;;  %v1638_v54 = vld [vmem:[#allocation2 + $0x1f8] sm:$0xff]  ;;  %v1636_v22 = vld [vmem:[#allocation2 + $0x1e8] sm:$0xff] }
 0x454   : > { %v6753_v5 = vadd.f32 %v5899_v10, %v1631_v58  ;;  %v5902_v63 = vadd.f32 %v5901_v8, %v17715_v62  ;;  %v14081_v58 = vld [vmem:[%s15623_s13 + $0x70c] ss:$12 sps:$4 sm:$0xff]   ;;  %v1641_v8 = vld [vmem:[#allocation2 + $0x210] sm:$0xff] }
 0x455   : > { %7011 = vst [vmem:[#allocation2 + $0x1d0] sm:$0xff] %v6755_v44  ;;  %v6756_v14 = vadd.f32 %v5910_v21, %v1634_v11  ;;  %5200 = vmatmul.mubr.bf16.gmra.mrb[36].mxu0 %v14069_v15  ;;  %13472 = vmatmul.mubr.bf16.gmra.mrb[36].mxu1 %v14073_v2  ;;  %v17717_v15 = vld [vmem:[#allocation82_spill] sm:$0xff]  ;;  %v17718_v2 = vld [vmem:[#allocation88_spill] sm:$0xff] }
 0x456   : > { %7009 = vst [vmem:[#allocation2 + $0x1c0] sm:$0xff] %v6753_v5  ;;  %v6754_v35 = vadd.f32 %v5902_v63, %v1632_v34  ;;  %5207 = vmatprep.mubr.bf16.mxu0 %v14076_v19  ;;  %13475 = vmatprep.mubr.bf16.mxu1 %v14077_v4  ;;  %v17719_v44 = vld [vmem:[#allocation84_spill] sm:$0xff] }
 0x457   : > { %7012 = vst [vmem:[#allocation2 + $0x1d8] sm:$0xff] %v6756_v14  ;;  %v14079_v62 = vld [vmem:[%s15623_s13 + $0x708] ss:$12 sps:$4 sm:$0xff]  }
 0x458   : > { %7010 = vst [vmem:[#allocation2 + $0x1c8] sm:$0xff] %v6754_v35  ;;  %v16612_v53 = vpop.f32.mrb[188].mxu0  ;;  %v13369_v52 = vpop.f32.mrb[188].mxu1  ;;  %v1639_v35 = vld [vmem:[#allocation2 + $0x200] sm:$0xff] }
 0x459   : > { %v5923_v61 = vadd.f32 %v13369_v52, %v17716_v57  ;;  %v4995_v7 = vpop.f32.mrb[189].mxu0  ;;  %v5914_v33 = vpop.f32.mrb[189].mxu1  ;;  %v1642_v52 = vld [vmem:[#allocation2 + $0x218] sm:$0xff] }
 0x45a   : > { %v5915_v16 = vadd.f32 %v5914_v33, %v17717_v15  ;;  %v16618_v23 = vpop.f32.mrb[190].mxu0  ;;  %v13370_v60 = vpop.f32.mrb[190].mxu1  ;;  %v17720_v57 = vld [vmem:[#allocation90_spill] sm:$0xff]  ;;  %v14086_v33 = vld [vmem:[%s15623_s13 + $0x724] ss:$12 sps:$4 sm:$0xff]  }
 0x45b   : > { %v6759_v11 = vadd.f32 %v5923_v61, %v1637_v6  ;;  %v5926_v47 = vadd.f32 %v13370_v60, %v17718_v2  ;;  %v4998_v10 = vpop.f32.mrb[191].mxu0  ;;  %v5917_v19 = vpop.f32.mrb[191].mxu1  ;;  %v1640_v60 = vld [vmem:[#allocation2 + $0x208] sm:$0xff] }
 0x45c   : > { %v6757_v4 = vadd.f32 %v5915_v16, %v1635_v18  ;;  %v5918_v55 = vadd.f32 %v5917_v19, %v17719_v44 }
 0x45d   : > { %7015 = vst [vmem:[#allocation2 + $0x1f0] sm:$0xff] %v6759_v11  ;;  %v6760_v21 = vadd.f32 %v5926_v47, %v1638_v54  ;;  %5208 = vmatmul.mubr.bf16.gmra.mrb[40].mxu0 %v14074_v39  ;;  %13476 = vmatmul.mubr.bf16.gmra.mrb[40].mxu1 %v14078_v41  ;;  %v14083_v39 = vld [vmem:[%s15623_s13 + $0x830] ss:$12 sps:$4 sm:$0xff]   ;;  %v14087_v54 = vld [vmem:[%s15623_s13 + $0x848] ss:$12 sps:$4 sm:$0xff]  }
 0x45e   : > { %7013 = vst [vmem:[#allocation2 + $0x1e0] sm:$0xff] %v6757_v4  ;;  %v6758_v17 = vadd.f32 %v5918_v55, %v1636_v22  ;;  %5215 = vmatprep.mubr.bf16.mxu0 %v14081_v58  ;;  %13479 = vmatprep.mubr.bf16.mxu1 %v14082_v31  ;;  %v1645_v47 = vld [vmem:[#allocation2 + $0x230] sm:$0xff]  ;;  %v14084_v22 = vld [vmem:[%s15623_s13 + $0x720] ss:$12 sps:$4 sm:$0xff]   ;;  %v1646_v55 = vld [vmem:[#allocation2 + $0x238] sm:$0xff] }
 0x45f   : > { %7016 = vst [vmem:[#allocation2 + $0x1f8] sm:$0xff] %v6760_v21  ;;  %v1643_v4 = vld [vmem:[#allocation2 + $0x220] sm:$0xff] }
 0x460   : > { %7014 = vst [vmem:[#allocation2 + $0x1e8] sm:$0xff] %v6758_v17  ;;  %v16624_v34 = vpop.f32.mrb[192].mxu0  ;;  %v13373_v5 = vpop.f32.mrb[192].mxu1  ;;  %v14088_v21 = vld [vmem:[%s15623_s13 + $0x860] ss:$12 sps:$4 sm:$0xff]  }
 0x461   : > { %v5939_v63 = vadd.f32 %v13373_v5, %v16444_v26  ;;  %v5003_v14 = vpop.f32.mrb[193].mxu0  ;;  %v5930_v6 = vpop.f32.mrb[193].mxu1 }
 0x462   : > { %v5931_v61 = vadd.f32 %v5930_v6, %v17720_v57  ;;  %v16630_v7 = vpop.f32.mrb[194].mxu0  ;;  %v13374_v18 = vpop.f32.mrb[194].mxu1 }
 0x463   : > { %v6763_v41 = vadd.f32 %v5939_v63, %v1641_v8  ;;  %v5942_v15 = vadd.f32 %v13374_v18, %v16450_v36  ;;  %v5006_v16 = vpop.f32.mrb[195].mxu0  ;;  %v5933_v58 = vpop.f32.mrb[195].mxu1  ;;  %v14092_v63 = vld [vmem:[%s15623_s13 + $0x878] ss:$12 sps:$4 sm:$0xff]   ;;  %v1649_v18 = vld [vmem:[#allocation2 + $0x250] sm:$0xff] }
 0x464   : > { %v6761_v26 = vadd.f32 %v5931_v61, %v1639_v35  ;;  %v5934_v31 = vadd.f32 %v5933_v58, %v16438_v9  ;;  %v14093_v58 = vld [vmem:[%s15623_s13 + $0x890] ss:$12 sps:$4 sm:$0xff]  }
 0x465   : > { %7019 = vst [vmem:[#allocation2 + $0x210] sm:$0xff] %v6763_v41  ;;  %v6764_v11 = vadd.f32 %v5942_v15, %v1642_v52  ;;  %5216 = vmatmul.mubr.bf16.gmra.mrb[44].mxu0 %v14079_v62  ;;  %13480 = vmatmul.mubr.bf16.gmra.mrb[44].mxu1 %v14083_v39  ;;  %v14091_v62 = vld [vmem:[%s15623_s13 + $0x73c] ss:$12 sps:$4 sm:$0xff]   ;;  %v1647_v15 = vld [vmem:[#allocation2 + $0x240] sm:$0xff] }
 0x466   : > { %7017 = vst [vmem:[#allocation2 + $0x200] sm:$0xff] %v6761_v26  ;;  %v6762_v2 = vadd.f32 %v5934_v31, %v1640_v60  ;;  %5223 = vmatprep.mubr.bf16.mxu0 %v14086_v33  ;;  %13483 = vmatprep.mubr.bf16.mxu1 %v14087_v54  ;;  %v1644_v52 = vld [vmem:[#allocation2 + $0x228] sm:$0xff]  ;;  %v14089_v54 = vld [vmem:[%s15623_s13 + $0x738] ss:$12 sps:$4 sm:$0xff]  }
 0x467   : > { %7020 = vst [vmem:[#allocation2 + $0x218] sm:$0xff] %v6764_v11  ;;  %v1650_v60 = vld [vmem:[#allocation2 + $0x258] sm:$0xff] }
 0x468   : > { %7018 = vst [vmem:[#allocation2 + $0x208] sm:$0xff] %v6762_v2  ;;  %v16636_v36 = vpop.f32.mrb[196].mxu0  ;;  %v13377_v10 = vpop.f32.mrb[196].mxu1  ;;  %v14096_v2 = vld [vmem:[%s15623_s13 + $0x754] ss:$12 sps:$4 sm:$0xff]  }
 0x469   : > { %v5955_v9 = vadd.f32 %v13377_v10, %v16468_v12  ;;  %v5011_v19 = vpop.f32.mrb[197].mxu0  ;;  %v5946_v44 = vpop.f32.mrb[197].mxu1 }
 0x46a   : > { %v5947_v17 = vadd.f32 %v5946_v44, %v16456_v50  ;;  %v16642_v8 = vpop.f32.mrb[198].mxu0  ;;  %v13378_v5 = vpop.f32.mrb[198].mxu1  ;;  %v1648_v19 = vld [vmem:[#allocation2 + $0x248] sm:$0xff] }
 0x46b   : > { %v6767_v14 = vadd.f32 %v5955_v9, %v1645_v47  ;;  %v5958_v35 = vadd.f32 %v13378_v5, %v16474_v27  ;;  %v5014_v6 = vpop.f32.mrb[199].mxu0  ;;  %v5949_v39 = vpop.f32.mrb[199].mxu1  ;;  %v14097_v47 = vld [vmem:[%s15623_s13 + $0x8a8] ss:$12 sps:$4 sm:$0xff]   ;;  %v14094_v5 = vld [vmem:[%s15623_s13 + $0x750] ss:$12 sps:$4 sm:$0xff]  }
 0x46c   : > { %v6765_v12 = vadd.f32 %v5947_v17, %v1643_v4  ;;  %v5950_v57 = vadd.f32 %v5949_v39, %v16462_v51  ;;  %v14098_v6 = vld [vmem:[%s15623_s13 + $0x8c0] ss:$12 sps:$4 sm:$0xff]  }
 0x46d   : > { %7023 = vst [vmem:[#allocation2 + $0x230] sm:$0xff] %v6767_v14  ;;  %v6768_v61 = vadd.f32 %v5958_v35, %v1646_v55  ;;  %5224 = vmatmul.mubr.bf16.gmra.mrb[48].mxu0 %v14084_v22  ;;  %13484 = vmatmul.mubr.bf16.gmra.mrb[48].mxu1 %v14088_v21  ;;  %v1653_v21 = vld [vmem:[#allocation2 + $0x270] sm:$0xff]  ;;  %v1654_v35 = vld [vmem:[#allocation2 + $0x278] sm:$0xff] }
 0x46e   : > { %7021 = vst [vmem:[#allocation2 + $0x220] sm:$0xff] %v6765_v12  ;;  %v6766_v50 = vadd.f32 %v5950_v57, %v1644_v52  ;;  %5231 = vmatprep.mubr.bf16.mxu0 %v14091_v62  ;;  %13487 = vmatprep.mubr.bf16.mxu1 %v14092_v63  ;;  %v1651_v63 = vld [vmem:[#allocation2 + $0x260] sm:$0xff]  ;;  %v14101_v57 = vld [vmem:[%s15623_s13 + $0x76c] ss:$12 sps:$4 sm:$0xff]  }
 0x46f   : > { %7024 = vst [vmem:[#allocation2 + $0x238] sm:$0xff] %v6768_v61  ;;  %v14102_v61 = vld [vmem:[%s15623_s13 + $0x8d8] ss:$12 sps:$4 sm:$0xff]  }
 0x470   : > { %7022 = vst [vmem:[#allocation2 + $0x228] sm:$0xff] %v6766_v50  ;;  %v16648_v27 = vpop.f32.mrb[200].mxu0  ;;  %v13381_v33 = vpop.f32.mrb[200].mxu1 }
 0x471   : > { %v5971_v51 = vadd.f32 %v13381_v33, %v16492_v28  ;;  %v5019_v41 = vpop.f32.mrb[201].mxu0  ;;  %v5962_v16 = vpop.f32.mrb[201].mxu1 }
 0x472   : > { %v5963_v26 = vadd.f32 %v5962_v16, %v16480_v48  ;;  %v16654_v31 = vpop.f32.mrb[202].mxu0  ;;  %v13382_v11 = vpop.f32.mrb[202].mxu1  ;;  %v1657_v16 = vld [vmem:[#allocation2 + $0x290] sm:$0xff] }
 0x473   : > { %v6771_v10 = vadd.f32 %v5971_v51, %v1649_v18  ;;  %v5974_v22 = vadd.f32 %v13382_v11, %v16498_v30  ;;  %v5022_v9 = vpop.f32.mrb[203].mxu0  ;;  %v5965_v4 = vpop.f32.mrb[203].mxu1  ;;  %v1655_v11 = vld [vmem:[#allocation2 + $0x280] sm:$0xff] }
 0x474   : > { %v6769_v28 = vadd.f32 %v5963_v26, %v1647_v15  ;;  %v5966_v44 = vadd.f32 %v5965_v4, %v16486_v38  ;;  %v14106_v4 = vld [vmem:[%s15623_s13 + $0x784] ss:$12 sps:$4 sm:$0xff]  }
 0x475   : > { %7027 = vst [vmem:[#allocation2 + $0x250] sm:$0xff] %v6771_v10  ;;  %v6772_v55 = vadd.f32 %v5974_v22, %v1650_v60  ;;  %5232 = vmatmul.mubr.bf16.gmra.mrb[52].mxu0 %v14089_v54  ;;  %13488 = vmatmul.mubr.bf16.gmra.mrb[52].mxu1 %v14093_v58  ;;  %v1652_v54 = vld [vmem:[#allocation2 + $0x268] sm:$0xff]  ;;  %v14103_v10 = vld [vmem:[%s15623_s13 + $0x8f0] ss:$12 sps:$4 sm:$0xff]  }
 0x476   : > { %7025 = vst [vmem:[#allocation2 + $0x240] sm:$0xff] %v6769_v28  ;;  %v6770_v48 = vadd.f32 %v5966_v44, %v1648_v19  ;;  %5239 = vmatprep.mubr.bf16.mxu0 %v14096_v2  ;;  %13491 = vmatprep.mubr.bf16.mxu1 %v14097_v47  ;;  %v14099_v58 = vld [vmem:[%s15623_s13 + $0x768] ss:$12 sps:$4 sm:$0xff]   ;;  %v1658_v47 = vld [vmem:[#allocation2 + $0x298] sm:$0xff] }
 0x477   : > { %7028 = vst [vmem:[#allocation2 + $0x258] sm:$0xff] %v6772_v55  ;;  %v14107_v28 = vld [vmem:[%s15623_s13 + $0x908] ss:$12 sps:$4 sm:$0xff]  }
 0x478   : > { %7026 = vst [vmem:[#allocation2 + $0x248] sm:$0xff] %v6770_v48  ;;  %v16660_v30 = vpop.f32.mrb[204].mxu0  ;;  %v13385_v17 = vpop.f32.mrb[204].mxu1 }
 0x479   : > { %v5987_v38 = vadd.f32 %v13385_v17, %v16516_v1  ;;  %v5027_v62 = vpop.f32.mrb[205].mxu0  ;;  %v5978_v14 = vpop.f32.mrb[205].mxu1 }
 0x47a   : > { %v5979_v52 = vadd.f32 %v5978_v14, %v16504_v24  ;;  %v16666_v39 = vpop.f32.mrb[206].mxu0  ;;  %v13386_v12 = vpop.f32.mrb[206].mxu1  ;;  %v1661_v62 = vld [vmem:[#allocation2 + $0x2b0] sm:$0xff]  ;;  %v14104_v14 = vld [vmem:[%s15623_s13 + $0x780] ss:$12 sps:$4 sm:$0xff]  }
 0x47b   : > { %v6775_v50 = vadd.f32 %v5987_v38, %v1653_v21  ;;  %v5990_v18 = vadd.f32 %v13386_v12, %v16522_v42  ;;  %v5030_v33 = vpop.f32.mrb[207].mxu0  ;;  %v5981_v51 = vpop.f32.mrb[207].mxu1  ;;  %v1656_v21 = vld [vmem:[#allocation2 + $0x288] sm:$0xff]  ;;  %v1662_v12 = vld [vmem:[#allocation2 + $0x2b8] sm:$0xff] }
 0x47c   : > { %v6773_v1 = vadd.f32 %v5979_v52, %v1651_v63  ;;  %v5982_v41 = vadd.f32 %v5981_v51, %v16510_v59  ;;  %v14111_v33 = vld [vmem:[%s15623_s13 + $0x79c] ss:$12 sps:$4 sm:$0xff]  }
 0x47d   : > { %7031 = vst [vmem:[#allocation2 + $0x270] sm:$0xff] %v6775_v50  ;;  %v6776_v15 = vadd.f32 %v5990_v18, %v1654_v35  ;;  %5240 = vmatmul.mubr.bf16.gmra.mrb[56].mxu0 %v14094_v5  ;;  %13492 = vmatmul.mubr.bf16.gmra.mrb[56].mxu1 %v14098_v6  ;;  %v1659_v6 = vld [vmem:[#allocation2 + $0x2a0] sm:$0xff] }
 0x47e   : > { %7029 = vst [vmem:[#allocation2 + $0x260] sm:$0xff] %v6773_v1  ;;  %v6774_v24 = vadd.f32 %v5982_v41, %v1652_v54  ;;  %5247 = vmatprep.mubr.bf16.mxu0 %v14101_v57  ;;  %13495 = vmatprep.mubr.bf16.mxu1 %v14102_v61  ;;  %v14108_v57 = vld [vmem:[%s15623_s13 + $0x920] ss:$12 sps:$4 sm:$0xff]   ;;  %v14112_v54 = vld [vmem:[%s15623_s13 + $0x938] ss:$12 sps:$4 sm:$0xff]  }
 0x47f   : > { %7032 = vst [vmem:[#allocation2 + $0x278] sm:$0xff] %v6776_v15  ;;  %v1660_v15 = vld [vmem:[#allocation2 + $0x2a8] sm:$0xff] }
 0x480   : > { %7030 = vst [vmem:[#allocation2 + $0x268] sm:$0xff] %v6774_v24  ;;  %v16672_v42 = vpop.f32.mrb[208].mxu0  ;;  %v13389_v60 = vpop.f32.mrb[208].mxu1 }
 0x481   : > { %v6003_v59 = vadd.f32 %v13389_v60, %v16540_v29  ;;  %v5035_v26 = vpop.f32.mrb[209].mxu0  ;;  %v5994_v2 = vpop.f32.mrb[209].mxu1 }
 0x482   : > { %v5995_v22 = vadd.f32 %v5994_v2, %v16528_v25  ;;  %v16678_v9 = vpop.f32.mrb[210].mxu0  ;;  %v13390_v19 = vpop.f32.mrb[210].mxu1  ;;  %v14109_v26 = vld [vmem:[%s15623_s13 + $0x798] ss:$12 sps:$4 sm:$0xff]  }
 0x483   : > { %v6779_v44 = vadd.f32 %v6003_v59, %v1657_v16  ;;  %v6006_v55 = vadd.f32 %v13390_v19, %v16546_v43  ;;  %v5038_v48 = vpop.f32.mrb[211].mxu0  ;;  %v5997_v17 = vpop.f32.mrb[211].mxu1  ;;  %v1663_v2 = vld [vmem:[#allocation2 + $0x2c0] sm:$0xff] }
 0x484   : > { %v6777_v29 = vadd.f32 %v5995_v22, %v1655_v11  ;;  %v5998_v5 = vadd.f32 %v5997_v17, %v16534_v56  ;;  %v14113_v22 = vld [vmem:[%s15623_s13 + $0x950] ss:$12 sps:$4 sm:$0xff]  }
 0x485   : > { %7035 = vst [vmem:[#allocation2 + $0x290] sm:$0xff] %v6779_v44  ;;  %v6780_v38 = vadd.f32 %v6006_v55, %v1658_v47  ;;  %5248 = vmatmul.mubr.bf16.gmra.mrb[60].mxu0 %v14099_v58  ;;  %13496 = vmatmul.mubr.bf16.gmra.mrb[60].mxu1 %v14103_v10  ;;  %v1665_v58 = vld [vmem:[#allocation2 + $0x2d0] sm:$0xff]  ;;  %v1666_v10 = vld [vmem:[#allocation2 + $0x2d8] sm:$0xff] }
 0x486   : > { %7033 = vst [vmem:[#allocation2 + $0x280] sm:$0xff] %v6777_v29  ;;  %v6778_v25 = vadd.f32 %v5998_v5, %v1656_v21  ;;  %5255 = vmatprep.mubr.bf16.mxu0 %v14106_v4  ;;  %13499 = vmatprep.mubr.bf16.mxu1 %v14107_v28  ;;  %v14116_v44 = vld [vmem:[%s15623_s13 + $0x7b4] ss:$12 sps:$4 sm:$0xff]   ;;  %v1664_v29 = vld [vmem:[#allocation2 + $0x2c8] sm:$0xff] }
 0x487   : > { %7036 = vst [vmem:[#allocation2 + $0x298] sm:$0xff] %v6780_v38  ;;  %v14117_v55 = vld [vmem:[%s15623_s13 + $0x968] ss:$12 sps:$4 sm:$0xff]  }
 0x488   : > { %7034 = vst [vmem:[#allocation2 + $0x288] sm:$0xff] %v6778_v25  ;;  %v16684_v43 = vpop.f32.mrb[212].mxu0  ;;  %v13393_v63 = vpop.f32.mrb[212].mxu1 }
 0x489   : > { %v6019_v56 = vadd.f32 %v13393_v63, %v16564_v13  ;;  %v5043_v35 = vpop.f32.mrb[213].mxu0  ;;  %v6010_v52 = vpop.f32.mrb[213].mxu1 }
 0x48a   : > { %v6011_v61 = vadd.f32 %v6010_v52, %v16552_v49  ;;  %v16690_v50 = vpop.f32.mrb[214].mxu0  ;;  %v13394_v18 = vpop.f32.mrb[214].mxu1  ;;  %v1667_v35 = vld [vmem:[#allocation2 + $0x2e0] sm:$0xff]  ;;  %v1670_v52 = vld [vmem:[#allocation2 + $0x2f8] sm:$0xff] }
 0x48b   : > { %v6783_v51 = vadd.f32 %v6019_v56, %v1661_v62  ;;  %v6022_v1 = vadd.f32 %v13394_v18, %v16570_v40  ;;  %v5046_v41 = vpop.f32.mrb[215].mxu0  ;;  %v6013_v24 = vpop.f32.mrb[215].mxu1  ;;  %v1669_v62 = vld [vmem:[#allocation2 + $0x2f0] sm:$0xff] }
 0x48c   : > { %v6781_v13 = vadd.f32 %v6011_v61, %v1659_v6  ;;  %v6014_v16 = vadd.f32 %v6013_v24, %v16558_v0 }
 0x48d   : > { %7039 = vst [vmem:[#allocation2 + $0x2b0] sm:$0xff] %v6783_v51  ;;  %v6784_v60 = vadd.f32 %v6022_v1, %v1662_v12  ;;  %5256 = vmatmul.mubr.bf16.gmra.mrb[64].mxu0 %v14104_v14  ;;  %13500 = vmatmul.mubr.bf16.gmra.mrb[64].mxu1 %v14108_v57  ;;  %v14114_v14 = vld [vmem:[%s15623_s13 + $0x7b0] ss:$12 sps:$4 sm:$0xff]   ;;  %v14118_v12 = vld [vmem:[%s15623_s13 + $0x980] ss:$12 sps:$4 sm:$0xff]  }
 0x48e   : > { %7037 = vst [vmem:[#allocation2 + $0x2a0] sm:$0xff] %v6781_v13  ;;  %v6782_v49 = vadd.f32 %v6014_v16, %v1660_v15  ;;  %5263 = vmatprep.mubr.bf16.mxu0 %v14111_v33  ;;  %13503 = vmatprep.mubr.bf16.mxu1 %v14112_v54  ;;  %v14121_v33 = vld [vmem:[%s15623_s13 + $0x7cc] ss:$12 sps:$4 sm:$0xff]  }
 0x48f   : > { %7040 = vst [vmem:[#allocation2 + $0x2b8] sm:$0xff] %v6784_v60  ;;  %v14122_v54 = vld [vmem:[%s15623_s13 + $0x998] ss:$12 sps:$4 sm:$0xff]   ;;  %v1668_v15 = vld [vmem:[#allocation2 + $0x2e8] sm:$0xff]  ;;  %v1673_v60 = vld [vmem:[#allocation2 + $0x310] sm:$0xff] }
 0x490   : > { %7038 = vst [vmem:[#allocation2 + $0x2a8] sm:$0xff] %v6782_v49  ;;  %v16696_v40 = vpop.f32.mrb[216].mxu0  ;;  %v13397_v59 = vpop.f32.mrb[216].mxu1 }
 0x491   : > { %v6035_v0 = vadd.f32 %v13397_v59, %v16588_v20  ;;  %v5051_v11 = vpop.f32.mrb[217].mxu0  ;;  %v6026_v47 = vpop.f32.mrb[217].mxu1 }
 0x492   : > { %v6027_v19 = vadd.f32 %v6026_v47, %v16576_v46  ;;  %v16702_v4 = vpop.f32.mrb[218].mxu0  ;;  %v13398_v28 = vpop.f32.mrb[218].mxu1  ;;  %v1674_v11 = vld [vmem:[#allocation2 + $0x318] sm:$0xff] }
 0x493   : > { %v6787_v48 = vadd.f32 %v6035_v0, %v1665_v58  ;;  %v6038_v21 = vadd.f32 %v13398_v28, %v16594_v32  ;;  %v5054_v17 = vpop.f32.mrb[219].mxu0  ;;  %v6029_v5 = vpop.f32.mrb[219].mxu1  ;;  %v14119_v58 = vld [vmem:[%s15623_s13 + $0x7c8] ss:$12 sps:$4 sm:$0xff]  }
 0x494   : > { %v6785_v20 = vadd.f32 %v6027_v19, %v1663_v2  ;;  %v6030_v38 = vadd.f32 %v6029_v5, %v16582_v3  ;;  %v14123_v2 = vld [vmem:[%s15623_s13 + $0x9b0] ss:$12 sps:$4 sm:$0xff]   ;;  %v14127_v28 = vld [vmem:[%s15623_s13 + $0x9c8] ss:$12 sps:$4 sm:$0xff]  }
 0x495   : > { %7043 = vst [vmem:[#allocation2 + $0x2d0] sm:$0xff] %v6787_v48  ;;  %v6788_v25 = vadd.f32 %v6038_v21, %v1666_v10  ;;  %5264 = vmatmul.mubr.bf16.gmra.mrb[68].mxu0 %v14109_v26  ;;  %13504 = vmatmul.mubr.bf16.gmra.mrb[68].mxu1 %v14113_v22  ;;  %v1671_v26 = vld [vmem:[#allocation2 + $0x300] sm:$0xff]  ;;  %v1672_v21 = vld [vmem:[#allocation2 + $0x308] sm:$0xff] }
 0x496   : > { %7041 = vst [vmem:[#allocation2 + $0x2c0] sm:$0xff] %v6785_v20  ;;  %v6786_v46 = vadd.f32 %v6030_v38, %v1664_v29  ;;  %5271 = vmatprep.mubr.bf16.mxu0 %v14116_v44  ;;  %13507 = vmatprep.mubr.bf16.mxu1 %v14117_v55  ;;  %v14126_v19 = vld [vmem:[%s15623_s13 + $0x7e4] ss:$12 sps:$4 sm:$0xff]  }
 0x497   : > { %7044 = vst [vmem:[#allocation2 + $0x2d8] sm:$0xff] %v6788_v25  ;;  %v1677_v20 = vld [vmem:[#allocation2 + $0x330] sm:$0xff]  ;;  %v14124_v25 = vld [vmem:[%s15623_s13 + $0x7e0] ss:$12 sps:$4 sm:$0xff]  }
 0x498   : > { %7042 = vst [vmem:[#allocation2 + $0x2c8] sm:$0xff] %v6786_v46  ;;  %v16708_v32 = vpop.f32.mrb[220].mxu0  ;;  %v13401_v63 = vpop.f32.mrb[220].mxu1 }
 0x499   : > { %v6051_v3 = vadd.f32 %v13401_v63, %v16612_v53  ;;  %v5059_v56 = vpop.f32.mrb[221].mxu0  ;;  %v6042_v6 = vpop.f32.mrb[221].mxu1 }
 0x49a   : > { %v6043_v57 = vadd.f32 %v6042_v6, %v16600_v37  ;;  %v16714_v61 = vpop.f32.mrb[222].mxu0  ;;  %v13402_v18 = vpop.f32.mrb[222].mxu1 }
 0x49b   : > { %v6791_v51 = vadd.f32 %v6051_v3, %v1669_v62  ;;  %v6054_v1 = vadd.f32 %v13402_v18, %v16618_v23  ;;  %v5062_v41 = vpop.f32.mrb[223].mxu0  ;;  %v6045_v24 = vpop.f32.mrb[223].mxu1  ;;  %v1675_v62 = vld [vmem:[#allocation2 + $0x320] sm:$0xff] }
 0x49c   : > { %v6789_v53 = vadd.f32 %v6043_v57, %v1667_v35  ;;  %v6046_v13 = vadd.f32 %v6045_v24, %v16606_v45  ;;  %v14128_v3 = vld [vmem:[%s15623_s13 + $0x9e0] ss:$12 sps:$4 sm:$0xff]  }
 0x49d   : > { %7047 = vst [vmem:[#allocation2 + $0x2f0] sm:$0xff] %v6791_v51  ;;  %v6792_v16 = vadd.f32 %v6054_v1, %v1670_v52  ;;  %5272 = vmatmul.mubr.bf16.gmra.mrb[72].mxu0 %v14114_v14  ;;  %13508 = vmatmul.mubr.bf16.gmra.mrb[72].mxu1 %v14118_v12  ;;  %v1678_v14 = vld [vmem:[#allocation2 + $0x338] sm:$0xff] }
 0x49e   : > { %7045 = vst [vmem:[#allocation2 + $0x2e0] sm:$0xff] %v6789_v53  ;;  %v6790_v37 = vadd.f32 %v6046_v13, %v1668_v15  ;;  %5279 = vmatprep.mubr.bf16.mxu0 %v14121_v33  ;;  %13511 = vmatprep.mubr.bf16.mxu1 %v14122_v54  ;;  %v14131_v52 = vld [vmem:[%s15623_s13 + $0x7fc] ss:$12 sps:$4 sm:$0xff]   ;;  %v14132_v12 = vld [vmem:[%s15623_s13 + $0x9f8] ss:$12 sps:$4 sm:$0xff]   ;;  %v1681_v15 = vld [vmem:[#allocation2 + $0x350] sm:$0xff] }
 0x49f   : > { %7048 = vst [vmem:[#allocation2 + $0x2f8] sm:$0xff] %v6792_v16  ;;  %v1676_v54 = vld [vmem:[#allocation2 + $0x328] sm:$0xff]  ;;  %v14129_v53 = vld [vmem:[%s15623_s13 + $0x7f8] ss:$12 sps:$4 sm:$0xff]  }
 0x4a0   : > { %7046 = vst [vmem:[#allocation2 + $0x2e8] sm:$0xff] %v6790_v37  ;;  %v16720_v23 = vpop.f32.mrb[224].mxu0  ;;  %v13405_v49 = vpop.f32.mrb[224].mxu1  ;;  %v1679_v16 = vld [vmem:[#allocation2 + $0x340] sm:$0xff] }
 0x4a1   : > { %v6067_v45 = vadd.f32 %v13405_v49, %v16636_v36  ;;  %v5067_v59 = vpop.f32.mrb[225].mxu0  ;;  %v6058_v0 = vpop.f32.mrb[225].mxu1  ;;  %v14133_v49 = vld [vmem:[%s15623_s13 + $0xa10] ss:$12 sps:$4 sm:$0xff]  }
 0x4a2   : > { %v6059_v47 = vadd.f32 %v6058_v0, %v16624_v34  ;;  %v16726_v10 = vpop.f32.mrb[226].mxu0  ;;  %v13406_v22 = vpop.f32.mrb[226].mxu1  ;;  %v14137_v0 = vld [vmem:[%s15623_s13 + $0xa28] ss:$12 sps:$4 sm:$0xff]  }
 0x4a3   : > { %v6795_v44 = vadd.f32 %v6067_v45, %v1673_v60  ;;  %v6070_v55 = vadd.f32 %v13406_v22, %v16642_v8  ;;  %v5070_v48 = vpop.f32.mrb[227].mxu0  ;;  %v6061_v17 = vpop.f32.mrb[227].mxu1  ;;  %v1682_v60 = vld [vmem:[#allocation2 + $0x358] sm:$0xff]  ;;  %v1680_v22 = vld [vmem:[#allocation2 + $0x348] sm:$0xff] }
 0x4a4   : > { %v6793_v36 = vadd.f32 %v6059_v47, %v1671_v26  ;;  %v6062_v29 = vadd.f32 %v6061_v17, %v16630_v7  ;;  %v14136_v26 = vld [vmem:[%s15623_s13 + $0x814] ss:$12 sps:$4 sm:$0xff]  }
 0x4a5   : > { %7051 = vst [vmem:[#allocation2 + $0x310] sm:$0xff] %v6795_v44  ;;  %v6796_v5 = vadd.f32 %v6070_v55, %v1674_v11  ;;  %5280 = vmatmul.mubr.bf16.gmra.mrb[76].mxu0 %v14119_v58  ;;  %13512 = vmatmul.mubr.bf16.gmra.mrb[76].mxu1 %v14123_v2  ;;  %v1685_v55 = vld [vmem:[#allocation2 + $0x370] sm:$0xff] }
 0x4a6   : > { %7049 = vst [vmem:[#allocation2 + $0x300] sm:$0xff] %v6793_v36  ;;  %v6794_v34 = vadd.f32 %v6062_v29, %v1672_v21  ;;  %5287 = vmatprep.mubr.bf16.mxu0 %v14126_v19  ;;  %13515 = vmatprep.mubr.bf16.mxu1 %v14127_v28  ;;  %v14134_v21 = vld [vmem:[%s15623_s13 + $0x810] ss:$12 sps:$4 sm:$0xff]   ;;  %v1683_v36 = vld [vmem:[#allocation2 + $0x360] sm:$0xff] }
 0x4a7   : > { %7052 = vst [vmem:[#allocation2 + $0x318] sm:$0xff] %v6796_v5  ;;  %v1686_v5 = vld [vmem:[#allocation2 + $0x378] sm:$0xff] }
 0x4a8   : > { %7050 = vst [vmem:[#allocation2 + $0x308] sm:$0xff] %v6794_v34  ;;  %v16732_v8 = vpop.f32.mrb[228].mxu0  ;;  %v13409_v38 = vpop.f32.mrb[228].mxu1  ;;  %v14138_v34 = vld [vmem:[%s15623_s13 + $0xa40] ss:$12 sps:$4 sm:$0xff]  }
 0x4a9   : > { %v6083_v7 = vadd.f32 %v13409_v38, %v16660_v30  ;;  %v5075_v46 = vpop.f32.mrb[229].mxu0  ;;  %v6074_v63 = vpop.f32.mrb[229].mxu1 }
 0x4aa   : > { %v6075_v56 = vadd.f32 %v6074_v63, %v16648_v27  ;;  %v16738_v35 = vpop.f32.mrb[230].mxu0  ;;  %v13410_v6 = vpop.f32.mrb[230].mxu1  ;;  %v14142_v46 = vld [vmem:[%s15623_s13 + $0xa58] ss:$12 sps:$4 sm:$0xff]  }
 0x4ab   : > { %v6799_v57 = vadd.f32 %v6083_v7, %v1677_v20  ;;  %v6086_v18 = vadd.f32 %v13410_v6, %v16666_v39  ;;  %v5078_v33 = vpop.f32.mrb[231].mxu0  ;;  %v6077_v51 = vpop.f32.mrb[231].mxu1  ;;  %v14141_v7 = vld [vmem:[%s15623_s13 + $0x82c] ss:$12 sps:$4 sm:$0xff]  }
 0x4ac   : > { %v6797_v30 = vadd.f32 %v6075_v56, %v1675_v62  ;;  %v6078_v1 = vadd.f32 %v6077_v51, %v16654_v31 }
 0x4ad   : > { %7055 = vst [vmem:[#allocation2 + $0x330] sm:$0xff] %v6799_v57  ;;  %v6800_v41 = vadd.f32 %v6086_v18, %v1678_v14  ;;  %5288 = vmatmul.mubr.bf16.gmra.mrb[80].mxu0 %v14124_v25  ;;  %13516 = vmatmul.mubr.bf16.gmra.mrb[80].mxu1 %v14128_v3  ;;  %v1684_v3 = vld [vmem:[#allocation2 + $0x368] sm:$0xff] }
 0x4ae   : > { %7053 = vst [vmem:[#allocation2 + $0x320] sm:$0xff] %v6797_v30  ;;  %v6798_v27 = vadd.f32 %v6078_v1, %v1676_v54  ;;  %5295 = vmatprep.mubr.bf16.mxu0 %v14131_v52  ;;  %13519 = vmatprep.mubr.bf16.mxu1 %v14132_v12  ;;  %v1689_v12 = vld [vmem:[#allocation2 + $0x390] sm:$0xff]  ;;  %v1687_v54 = vld [vmem:[#allocation2 + $0x380] sm:$0xff]  ;;  %v1690_v30 = vld [vmem:[#allocation2 + $0x398] sm:$0xff] }
 0x4af   : > { %7056 = vst [vmem:[#allocation2 + $0x338] sm:$0xff] %v6800_v41  ;;  %v14139_v18 = vld [vmem:[%s15623_s13 + $0x828] ss:$12 sps:$4 sm:$0xff]   ;;  %v14143_v1 = vld [vmem:[%s15623_s13 + $0xa70] ss:$12 sps:$4 sm:$0xff]  }
 0x4b0   : > { %7054 = vst [vmem:[#allocation2 + $0x328] sm:$0xff] %v6798_v27  ;;  %v16744_v39 = vpop.f32.mrb[232].mxu0  ;;  %v13413_v24 = vpop.f32.mrb[232].mxu1 }
 0x4b1   : > { %v6099_v31 = vadd.f32 %v13413_v24, %v16684_v43  ;;  %v5083_v13 = vpop.f32.mrb[233].mxu0  ;;  %v6090_v37 = vpop.f32.mrb[233].mxu1  ;;  %v14146_v24 = vld [vmem:[%s15623_s13 + $0x844] ss:$12 sps:$4 sm:$0xff]  }
 0x4b2   : > { %v6091_v58 = vadd.f32 %v6090_v37, %v16672_v42  ;;  %v16750_v45 = vpop.f32.mrb[234].mxu0  ;;  %v13414_v59 = vpop.f32.mrb[234].mxu1  ;;  %v1688_v37 = vld [vmem:[#allocation2 + $0x388] sm:$0xff] }
 0x4b3   : > { %v6803_v11 = vadd.f32 %v6099_v31, %v1681_v15  ;;  %v6102_v2 = vadd.f32 %v13414_v59, %v16690_v50  ;;  %v5086_v47 = vpop.f32.mrb[235].mxu0  ;;  %v6093_v19 = vpop.f32.mrb[235].mxu1  ;;  %v1693_v59 = vld [vmem:[#allocation2 + $0x3b0] sm:$0xff] }
 0x4b4   : > { %v6801_v43 = vadd.f32 %v6091_v58, %v1679_v16  ;;  %v6094_v28 = vadd.f32 %v6093_v19, %v16678_v9  ;;  %v14148_v19 = vld [vmem:[%s15623_s13 + $0xaa0] ss:$12 sps:$4 sm:$0xff]  }
 0x4b5   : > { %7059 = vst [vmem:[#allocation2 + $0x350] sm:$0xff] %v6803_v11  ;;  %v6804_v44 = vadd.f32 %v6102_v2, %v1682_v60  ;;  %5296 = vmatmul.mubr.bf16.gmra.mrb[84].mxu0 %v14129_v53  ;;  %13520 = vmatmul.mubr.bf16.gmra.mrb[84].mxu1 %v14133_v49  ;;  %v14147_v53 = vld [vmem:[%s15623_s13 + $0xa88] ss:$12 sps:$4 sm:$0xff]   ;;  %v1691_v2 = vld [vmem:[#allocation2 + $0x3a0] sm:$0xff] }
 0x4b6   : > { %7057 = vst [vmem:[#allocation2 + $0x340] sm:$0xff] %v6801_v43  ;;  %v6802_v42 = vadd.f32 %v6094_v28, %v1680_v22  ;;  %5303 = vmatprep.mubr.bf16.mxu0 %v14136_v26  ;;  %13523 = vmatprep.mubr.bf16.mxu1 %v14137_v0  ;;  %v14144_v0 = vld [vmem:[%s15623_s13 + $0x840] ss:$12 sps:$4 sm:$0xff]   ;;  %v1694_v22 = vld [vmem:[#allocation2 + $0x3b8] sm:$0xff] }
 0x4b7   : > { %7060 = vst [vmem:[#allocation2 + $0x358] sm:$0xff] %v6804_v44 }
 0x4b8   : > { %7058 = vst [vmem:[#allocation2 + $0x348] sm:$0xff] %v6802_v42  ;;  %v16756_v50 = vpop.f32.mrb[236].mxu0  ;;  %v13417_v48 = vpop.f32.mrb[236].mxu1  ;;  %v14151_v42 = vld [vmem:[%s15623_s13 + $0x85c] ss:$12 sps:$4 sm:$0xff]  }
 0x4b9   : > { %v6115_v9 = vadd.f32 %v13417_v48, %v16708_v32  ;;  %v5091_v17 = vpop.f32.mrb[237].mxu0  ;;  %v6106_v29 = vpop.f32.mrb[237].mxu1 }
 0x4ba   : > { %v6107_v20 = vadd.f32 %v6106_v29, %v16696_v40  ;;  %v16762_v38 = vpop.f32.mrb[238].mxu0  ;;  %v13418_v25 = vpop.f32.mrb[238].mxu1  ;;  %v1692_v17 = vld [vmem:[#allocation2 + $0x3a8] sm:$0xff] }
 0x4bb   : > { %v6807_v62 = vadd.f32 %v6115_v9, %v1685_v55  ;;  %v6118_v63 = vadd.f32 %v13418_v25, %v16714_v61  ;;  %v5094_v14 = vpop.f32.mrb[239].mxu0  ;;  %v6109_v56 = vpop.f32.mrb[239].mxu1  ;;  %v14152_v55 = vld [vmem:[%s15623_s13 + $0xab8] ss:$12 sps:$4 sm:$0xff]  }
 0x4bc   : > { %v6805_v32 = vadd.f32 %v6107_v20, %v1683_v36  ;;  %v6110_v6 = vadd.f32 %v6109_v56, %v16702_v4  ;;  %v1697_v20 = vld [vmem:[#allocation2 + $0x3d0] sm:$0xff]  ;;  %v14149_v25 = vld [vmem:[%s15623_s13 + $0x858] ss:$12 sps:$4 sm:$0xff]  }
 0x4bd   : > { %7063 = vst [vmem:[#allocation2 + $0x370] sm:$0xff] %v6807_v62  ;;  %v6808_v52 = vadd.f32 %v6118_v63, %v1686_v5  ;;  %5304 = vmatmul.mubr.bf16.gmra.mrb[88].mxu0 %v14134_v21  ;;  %13524 = vmatmul.mubr.bf16.gmra.mrb[88].mxu1 %v14138_v34  ;;  %v1698_v63 = vld [vmem:[#allocation2 + $0x3d8] sm:$0xff] }
 0x4be   : > { %7061 = vst [vmem:[#allocation2 + $0x360] sm:$0xff] %v6805_v32  ;;  %v6806_v40 = vadd.f32 %v6110_v6, %v1684_v3  ;;  %5311 = vmatprep.mubr.bf16.mxu0 %v14141_v7  ;;  %13527 = vmatprep.mubr.bf16.mxu1 %v14142_v46  ;;  %v14153_v14 = vld [vmem:[%s15623_s13 + $0xad0] ss:$12 sps:$4 sm:$0xff]   ;;  %v14156_v6 = vld [vmem:[%s15623_s13 + $0x874] ss:$12 sps:$4 sm:$0xff]  }
 0x4bf   : > { %7064 = vst [vmem:[#allocation2 + $0x378] sm:$0xff] %v6808_v52  ;;  %v14157_v52 = vld [vmem:[%s15623_s13 + $0xae8] ss:$12 sps:$4 sm:$0xff]  }
 0x4c0   : > { %7062 = vst [vmem:[#allocation2 + $0x368] sm:$0xff] %v6806_v40  ;;  %v16768_v61 = vpop.f32.mrb[240].mxu0  ;;  %v13421_v57 = vpop.f32.mrb[240].mxu1 }
 0x4c1   : > { %v6131_v4 = vadd.f32 %v13421_v57, %v16732_v8  ;;  %v5099_v33 = vpop.f32.mrb[241].mxu0  ;;  %v6122_v51 = vpop.f32.mrb[241].mxu1 }
 0x4c2   : > { %v6123_v41 = vadd.f32 %v6122_v51, %v16720_v23  ;;  %v16774_v27 = vpop.f32.mrb[242].mxu0  ;;  %v13422_v15 = vpop.f32.mrb[242].mxu1 }
 0x4c3   : > { %v6811_v31 = vadd.f32 %v6131_v4, %v1689_v12  ;;  %v6134_v13 = vadd.f32 %v13422_v15, %v16738_v35  ;;  %v5102_v16 = vpop.f32.mrb[243].mxu0  ;;  %v6125_v60 = vpop.f32.mrb[243].mxu1  ;;  %v14154_v15 = vld [vmem:[%s15623_s13 + $0x870] ss:$12 sps:$4 sm:$0xff]  }
 0x4c4   : > { %v6809_v8 = vadd.f32 %v6123_v41, %v1687_v54  ;;  %v6126_v49 = vadd.f32 %v6125_v60, %v16726_v10  ;;  %v14158_v16 = vld [vmem:[%s15623_s13 + $0xb00] ss:$12 sps:$4 sm:$0xff]  }
 0x4c5   : > { %7067 = vst [vmem:[#allocation2 + $0x390] sm:$0xff] %v6811_v31  ;;  %v6812_v58 = vadd.f32 %v6134_v13, %v1690_v30  ;;  %5312 = vmatmul.mubr.bf16.gmra.mrb[92].mxu0 %v14139_v18  ;;  %13528 = vmatmul.mubr.bf16.gmra.mrb[92].mxu1 %v14143_v1  ;;  %v1696_v18 = vld [vmem:[#allocation2 + $0x3c8] sm:$0xff]  ;;  %v1701_v1 = vld [vmem:[#allocation2 + $0x3f0] sm:$0xff]  ;;  %v1702_v13 = vld [vmem:[#allocation2 + $0x3f8] sm:$0xff] }
 0x4c6   : > { %7065 = vst [vmem:[#allocation2 + $0x380] sm:$0xff] %v6809_v8  ;;  %v6810_v23 = vadd.f32 %v6126_v49, %v1688_v37  ;;  %5319 = vmatprep.mubr.bf16.mxu0 %v14146_v24  ;;  %13531 = vmatprep.mubr.bf16.mxu1 %v14147_v53  ;;  %v14161_v49 = vld [vmem:[%s15623_s13 + $0x88c] ss:$12 sps:$4 sm:$0xff]  }
 0x4c7   : > { %7068 = vst [vmem:[#allocation2 + $0x398] sm:$0xff] %v6812_v58  ;;  %v14162_v58 = vld [vmem:[%s15623_s13 + $0xb18] ss:$12 sps:$4 sm:$0xff]  }
 0x4c8   : > { %7066 = vst [vmem:[#allocation2 + $0x388] sm:$0xff] %v6810_v23  ;;  %v5105_v35 = vpop.f32.mrb[244].mxu0  ;;  %v13425_v26 = vpop.f32.mrb[244].mxu1 }
 0x4c9   : > { %v6147_v11 = vadd.f32 %v13425_v26, %v16756_v50  ;;  %v5107_v10 = vpop.f32.mrb[245].mxu0  ;;  %v6138_v47 = vpop.f32.mrb[245].mxu1  ;;  %v1700_v26 = vld [vmem:[#allocation2 + $0x3e8] sm:$0xff] }
 0x4ca   : > { %v6139_v43 = vadd.f32 %v6138_v47, %v16744_v39  ;;  %v5108_v28 = vpop.f32.mrb[246].mxu0  ;;  %v13426_v44 = vpop.f32.mrb[246].mxu1 }
 0x4cb   : > { %v6815_v48 = vadd.f32 %v6147_v11, %v1693_v59  ;;  %v6150_v21 = vadd.f32 %v13426_v44, %v16762_v38  ;;  %v5110_v9 = vpop.f32.mrb[247].mxu0  ;;  %v6141_v36 = vpop.f32.mrb[247].mxu1 }
 0x4cc   : > { %v6813_v29 = vadd.f32 %v6139_v43, %v1691_v2  ;;  %v6142_v50 = vadd.f32 %v6141_v36, %v16750_v45  ;;  %v1695_v45 = vld [vmem:[#allocation2 + $0x3c0] sm:$0xff]  ;;  %v14167_v36 = vld [vmem:[%s15623_s13 + $0xb48] ss:$12 sps:$4 sm:$0xff]  }
 0x4cd   : > { %7071 = vst [vmem:[#allocation2 + $0x3b0] sm:$0xff] %v6815_v48  ;;  %v6816_v5 = vadd.f32 %v6150_v21, %v1694_v22  ;;  %5320 = vmatmul.mubr.bf16.gmra.mrb[96].mxu0 %v14144_v0  ;;  %13532 = vmatmul.mubr.bf16.gmra.mrb[96].mxu1 %v14148_v19  ;;  %v1703_v43 = vld [vmem:[#allocation2 + $0x400] sm:$0xff] }
 0x4ce   : > { %7069 = vst [vmem:[#allocation2 + $0x3a0] sm:$0xff] %v6813_v29  ;;  %v6814_v39 = vadd.f32 %v6142_v50, %v1692_v17  ;;  %5327 = vmatprep.mubr.bf16.mxu0 %v14151_v42  ;;  %13535 = vmatprep.mubr.bf16.mxu1 %v14152_v55  ;;  %v14159_v42 = vld [vmem:[%s15623_s13 + $0x888] ss:$12 sps:$4 sm:$0xff]   ;;  %v14163_v55 = vld [vmem:[%s15623_s13 + $0xb30] ss:$12 sps:$4 sm:$0xff]  }
 0x4cf   : > { %7072 = vst [vmem:[#allocation2 + $0x3b8] sm:$0xff] %v6816_v5  ;;  %v14166_v17 = vld [vmem:[%s15623_s13 + $0x8a4] ss:$12 sps:$4 sm:$0xff]   ;;  %v1704_v50 = vld [vmem:[#allocation2 + $0x408] sm:$0xff] }
 0x4d0   : > { %7070 = vst [vmem:[#allocation2 + $0x3a8] sm:$0xff] %v6814_v39  ;;  %v5113_v34 = vpop.f32.mrb[248].mxu0  ;;  %v13429_v38 = vpop.f32.mrb[248].mxu1 }
 0x4d1   : > { %v6163_v7 = vadd.f32 %v13429_v38, %v5105_v35  ;;  %v5115_v46 = vpop.f32.mrb[249].mxu0  ;;  %v6154_v62 = vpop.f32.mrb[249].mxu1  ;;  %v1705_v38 = vld [vmem:[#allocation2 + $0x410] sm:$0xff] }
 0x4d2   : > { %v6155_v3 = vadd.f32 %v6154_v62, %v16768_v61  ;;  %v5116_v56 = vpop.f32.mrb[250].mxu0  ;;  %v13430_v32 = vpop.f32.mrb[250].mxu1  ;;  %v14164_v46 = vld [vmem:[%s15623_s13 + $0x8a0] ss:$12 sps:$4 sm:$0xff]  }
 0x4d3   : > { %v6819_v40 = vadd.f32 %v6163_v7, %v1697_v20  ;;  %v6166_v12 = vadd.f32 %v13430_v32, %v5108_v28  ;;  %v5118_v57 = vpop.f32.mrb[251].mxu0  ;;  %v6157_v4 = vpop.f32.mrb[251].mxu1 }
 0x4d4   : > { %v6817_v33 = vadd.f32 %v6155_v3, %v1695_v45  ;;  %v6158_v54 = vadd.f32 %v6157_v4, %v16774_v27  ;;  %v1699_v27 = vld [vmem:[#allocation2 + $0x3e0] sm:$0xff] }
 0x4d5   : > { %7075 = vst [vmem:[#allocation2 + $0x3d0] sm:$0xff] %v6819_v40  ;;  %v6820_v51 = vadd.f32 %v6166_v12, %v1698_v63  ;;  %5328 = vmatmul.mubr.bf16.gmra.mrb[100].mxu0 %v14149_v25  ;;  %13536 = vmatmul.mubr.bf16.gmra.mrb[100].mxu1 %v14153_v14  ;;  %v1706_v14 = vld [vmem:[#allocation2 + $0x418] sm:$0xff]  ;;  %v14168_v3 = vld [vmem:[%s15623_s13 + $0xb60] ss:$12 sps:$4 sm:$0xff]  }
 0x4d6   : > { %7073 = vst [vmem:[#allocation2 + $0x3c0] sm:$0xff] %v6817_v33  ;;  %v6818_v61 = vadd.f32 %v6158_v54, %v1696_v18  ;;  %5335 = vmatprep.mubr.bf16.mxu0 %v14156_v6  ;;  %13539 = vmatprep.mubr.bf16.mxu1 %v14157_v52  ;;  %v14171_v6 = vld [vmem:[%s15623_s13 + $0x8bc] ss:$12 sps:$4 sm:$0xff]   ;;  %v14172_v52 = vld [vmem:[%s15623_s13 + $0xb78] ss:$12 sps:$4 sm:$0xff]  }
 0x4d7   : > { %7076 = vst [vmem:[#allocation2 + $0x3d8] sm:$0xff] %v6820_v51  ;;  %v1707_v33 = vld [vmem:[#allocation2 + $0x420] sm:$0xff] }
 0x4d8   : > { %7074 = vst [vmem:[#allocation2 + $0x3c8] sm:$0xff] %v6818_v61  ;;  %v5121_v30 = vpop.f32.mrb[252].mxu0  ;;  %v13433_v41 = vpop.f32.mrb[252].mxu1  ;;  %v14169_v61 = vld [vmem:[%s15623_s13 + $0x8b8] ss:$12 sps:$4 sm:$0xff]  }
 0x4d9   : > { %v6179_v24 = vadd.f32 %v13433_v41, %v5121_v30  ;;  %v5123_v53 = vpop.f32.mrb[253].mxu0  ;;  %v6170_v31 = vpop.f32.mrb[253].mxu1 }
 0x4da   : > { %v6171_v37 = vadd.f32 %v6170_v31, %v5113_v34  ;;  %v5124_v60 = vpop.f32.mrb[254].mxu0  ;;  %v13434_v8 = vpop.f32.mrb[254].mxu1  ;;  %v14176_v31 = vld [vmem:[%s15623_s13 + $0x8d4] ss:$12 sps:$4 sm:$0xff]  }
 0x4db   : > { %v6823_v23 = vadd.f32 %v6179_v24, %v1701_v1  ;;  %v6182_v35 = vadd.f32 %v13434_v8, %v5124_v60  ;;  %v5126_v59 = vpop.f32.mrb[255].mxu0  ;;  %v6173_v0 = vpop.f32.mrb[255].mxu1  ;;  %v14173_v24 = vld [vmem:[%s15623_s13 + $0xb90] ss:$12 sps:$4 sm:$0xff]  }
 0x4dc   : > { %v6821_v11 = vadd.f32 %v6171_v37, %v1699_v27  ;;  %v6174_v10 = vadd.f32 %v6173_v0, %v5116_v56  ;;  %v14174_v59 = vld [vmem:[%s15623_s13 + $0x8d0] ss:$12 sps:$4 sm:$0xff]  }
 0x4dd   : > { %7079 = vst [vmem:[#allocation2 + $0x3f0] sm:$0xff] %v6823_v23  ;;  %v6824_v2 = vadd.f32 %v6182_v35, %v1702_v13  ;;  %5336 = vmatmul.mubr.bf16.gmra.mrb[104].mxu0 %v14154_v15  ;;  %13540 = vmatmul.mubr.bf16.gmra.mrb[104].mxu1 %v14158_v16  ;;  %v1708_v15 = vld [vmem:[#allocation2 + $0x428] sm:$0xff] }
 0x4de   : > { %7077 = vst [vmem:[#allocation2 + $0x3e0] sm:$0xff] %v6821_v11  ;;  %v6822_v47 = vadd.f32 %v6174_v10, %v1700_v26  ;;  %5343 = vmatprep.mubr.bf16.mxu0 %v14161_v49  ;;  %13543 = vmatprep.mubr.bf16.mxu1 %v14162_v58  ;;  %v14177_v13 = vld [vmem:[%s15623_s13 + $0xba8] ss:$12 sps:$4 sm:$0xff]   ;;  %v1710_v10 = vld [vmem:[#allocation2 + $0x438] sm:$0xff] }
 0x4df   : > { %7080 = vst [vmem:[#allocation2 + $0x3f8] sm:$0xff] %v6824_v2  ;;  %v1709_v58 = vld [vmem:[#allocation2 + $0x430] sm:$0xff]  ;;  %v14178_v2 = vld [vmem:[%s15623_s13 + $0xbc0] ss:$12 sps:$4 sm:$0xff]  }
 0x4e0   : > { %7078 = vst [vmem:[#allocation2 + $0x3e8] sm:$0xff] %v6822_v47  ;;  %v5129_v22 = vpop.f32.mrb[0].mxu0  ;;  %v13437_v19 = vpop.f32.mrb[0].mxu1 }
 0x4e1   : > { %v5131_v28 = vpop.f32.mrb[1].mxu0  ;;  %v6186_v44 = vpop.f32.mrb[1].mxu1 }
 0x4e2   : > { %v6187_v48 = vadd.f32 %v6186_v44, %v5129_v22  ;;  %v5132_v21 = vpop.f32.mrb[2].mxu0  ;;  %v13438_v9 = vpop.f32.mrb[2].mxu1 }
 0x4e3   : > { %v5134_v29 = vpop.f32.mrb[3].mxu0  ;;  %v6189_v5 = vpop.f32.mrb[3].mxu1 }
 0x4e4   : > { %v6825_v39 = vadd.f32 %v6187_v48, %v1703_v43  ;;  %v6190_v34 = vadd.f32 %v6189_v5, %v5132_v21  ;;  %v14182_v43 = vld [vmem:[%s15623_s13 + $0xbd8] ss:$12 sps:$4 sm:$0xff]   ;;  %v14179_v5 = vld [vmem:[%s15623_s13 + $0x8e8] ss:$12 sps:$4 sm:$0xff]  }
 0x4e5   : > { %5344 = vmatmul.mubr.bf16.gmra.mrb[108].mxu0 %v14159_v42  ;;  %13544 = vmatmul.mubr.bf16.gmra.mrb[108].mxu1 %v14163_v55  ;;  %v1711_v21 = vld [vmem:[#allocation2 + $0x440] sm:$0xff] }
 0x4e6   : > { %7081 = vst [vmem:[#allocation2 + $0x400] sm:$0xff] %v6825_v39  ;;  %v6826_v20 = vadd.f32 %v6190_v34, %v1704_v50  ;;  %5351 = vmatprep.mubr.bf16.mxu0 %v14166_v17  ;;  %13547 = vmatprep.mubr.bf16.mxu1 %v14167_v36  ;;  %v14183_v39 = vld [vmem:[%s15623_s13 + $0xbf0] ss:$12 sps:$4 sm:$0xff]   ;;  %v1712_v34 = vld [vmem:[#allocation2 + $0x448] sm:$0xff] }
 0x4e8   : > { %7082 = vst [vmem:[#allocation2 + $0x408] sm:$0xff] %v6826_v20  ;;  %v5137_v25 = vpop.f32.mrb[4].mxu0  ;;  %v13441_v7 = vpop.f32.mrb[4].mxu1 }
 0x4e9   : > { %v6195_v45 = vadd.f32 %v13437_v19, %v5137_v25  ;;  %v5139_v62 = vpop.f32.mrb[5].mxu0  ;;  %v6202_v63 = vpop.f32.mrb[5].mxu1  ;;  %v14181_v19 = vld [vmem:[%s15623_s13 + $0x8ec] ss:$12 sps:$4 sm:$0xff]  }
 0x4ea   : > { %v5140_v56 = vpop.f32.mrb[6].mxu0  ;;  %v13442_v32 = vpop.f32.mrb[6].mxu1 }
 0x4eb   : > { %v6827_v40 = vadd.f32 %v6195_v45, %v1705_v38  ;;  %v6198_v12 = vadd.f32 %v13438_v9, %v5140_v56  ;;  %v5142_v57 = vpop.f32.mrb[7].mxu0  ;;  %v6205_v18 = vpop.f32.mrb[7].mxu1 }
 0x4ed   : > { %7083 = vst [vmem:[#allocation2 + $0x410] sm:$0xff] %v6827_v40  ;;  %v6828_v4 = vadd.f32 %v6198_v12, %v1706_v14  ;;  %5352 = vmatmul.mubr.bf16.gmra.mrb[112].mxu0 %v14164_v46  ;;  %13548 = vmatmul.mubr.bf16.gmra.mrb[112].mxu1 %v14168_v3 }
 0x4ee   : > { %5359 = vmatprep.mubr.bf16.mxu0 %v14171_v6  ;;  %13551 = vmatprep.mubr.bf16.mxu1 %v14172_v52  ;;  %v1714_v52 = vld [vmem:[#allocation2 + $0x458] sm:$0xff] }
 0x4ef   : > { %7084 = vst [vmem:[#allocation2 + $0x418] sm:$0xff] %v6828_v4 }
 0x4f0   : > { %v5145_v54 = vpop.f32.mrb[8].mxu0  ;;  %v16806_v51 = vpop.f32.mrb[8].mxu1 }
 0x4f1   : > { %v6203_v30 = vadd.f32 %v6202_v63, %v5145_v54  ;;  %v5147_v1 = vpop.f32.mrb[9].mxu0  ;;  %v6218_v41 = vpop.f32.mrb[9].mxu1  ;;  %v1713_v63 = vld [vmem:[#allocation2 + $0x450] sm:$0xff] }
 0x4f2   : > { %v5148_v53 = vpop.f32.mrb[10].mxu0  ;;  %v16810_v27 = vpop.f32.mrb[10].mxu1 }
 0x4f3   : > { %v6829_v16 = vadd.f32 %v6203_v30, %v1707_v33  ;;  %v6206_v37 = vadd.f32 %v6205_v18, %v5148_v53  ;;  %v5150_v60 = vpop.f32.mrb[11].mxu0  ;;  %v6221_v8 = vpop.f32.mrb[11].mxu1 }
 0x4f5   : > { %7085 = vst [vmem:[#allocation2 + $0x420] sm:$0xff] %v6829_v16  ;;  %v6830_v49 = vadd.f32 %v6206_v37, %v1708_v15  ;;  %5360 = vmatmul.mubr.bf16.gmra.mrb[116].mxu0 %v14169_v61  ;;  %13552 = vmatmul.mubr.bf16.gmra.mrb[116].mxu1 %v14173_v24  ;;  %v1715_v61 = vld [vmem:[#allocation2 + $0x460] sm:$0xff]  ;;  %v1716_v24 = vld [vmem:[#allocation2 + $0x468] sm:$0xff] }
 0x4f6   : > { %5367 = vmatprep.mubr.bf16.mxu0 %v14176_v31  ;;  %13555 = vmatprep.mubr.bf16.mxu1 %v14177_v13 }
 0x4f7   : > { %7086 = vst [vmem:[#allocation2 + $0x428] sm:$0xff] %v6830_v49 }
 0x4f8   : > { %v5153_v23 = vpop.f32.mrb[12].mxu0  ;;  %v16814_v35 = vpop.f32.mrb[12].mxu1 }
 0x4f9   : > { %v6211_v26 = vadd.f32 %v13441_v7, %v5153_v23  ;;  %v5155_v0 = vpop.f32.mrb[13].mxu0  ;;  %v6234_v11 = vpop.f32.mrb[13].mxu1 }
 0x4fa   : > { %v5156_v47 = vpop.f32.mrb[14].mxu0  ;;  %v16818_v22 = vpop.f32.mrb[14].mxu1  ;;  %v1718_v0 = vld [vmem:[#allocation2 + $0x478] sm:$0xff] }
 0x4fb   : > { %v6831_v28 = vadd.f32 %v6211_v26, %v1709_v58  ;;  %v6214_v44 = vadd.f32 %v13442_v32, %v5156_v47  ;;  %v5158_v42 = vpop.f32.mrb[15].mxu0  ;;  %v6237_v55 = vpop.f32.mrb[15].mxu1 }
 0x4fd   : > { %7087 = vst [vmem:[#allocation2 + $0x430] sm:$0xff] %v6831_v28  ;;  %v6832_v48 = vadd.f32 %v6214_v44, %v1710_v10  ;;  %5368 = vmatmul.mubr.bf16.gmra.mrb[120].mxu0 %v14174_v59  ;;  %13556 = vmatmul.mubr.bf16.gmra.mrb[120].mxu1 %v14178_v2  ;;  %v1719_v44 = vld [vmem:[#allocation2 + $0x480] sm:$0xff] }
 0x4fe   : > { %5375 = vmatprep.mubr.bf16.mxu0 %v14181_v19  ;;  %13559 = vmatprep.mubr.bf16.mxu1 %v14182_v43 }
 0x4ff   : > { %7088 = vst [vmem:[#allocation2 + $0x438] sm:$0xff] %v6832_v48 }
 0x500   : > { %v5161_v9 = vpop.f32.mrb[16].mxu0  ;;  %v16822_v17 = vpop.f32.mrb[16].mxu1 }
 0x501   : > { %v6219_v36 = vadd.f32 %v6218_v41, %v5161_v9  ;;  %v5163_v29 = vpop.f32.mrb[17].mxu0  ;;  %v16824_v50 = vpop.f32.mrb[17].mxu1  ;;  %v1720_v9 = vld [vmem:[#allocation2 + $0x488] sm:$0xff] }
 0x502   : > { %v5164_v20 = vpop.f32.mrb[18].mxu0  ;;  %v16828_v38 = vpop.f32.mrb[18].mxu1 }
 0x503   : > { %v6833_v25 = vadd.f32 %v6219_v36, %v1711_v21  ;;  %v6222_v7 = vadd.f32 %v6221_v8, %v5164_v20  ;;  %v5166_v46 = vpop.f32.mrb[19].mxu0  ;;  %v16830_v45 = vpop.f32.mrb[19].mxu1  ;;  %v1717_v8 = vld [vmem:[#allocation2 + $0x470] sm:$0xff] }
 0x505   : > { %7089 = vst [vmem:[#allocation2 + $0x440] sm:$0xff] %v6833_v25  ;;  %v6834_v62 = vadd.f32 %v6222_v7, %v1712_v34  ;;  %5376 = vmatmul.mubr.bf16.gmra.mrb[124].mxu0 %v14179_v5  ;;  %13560 = vmatmul.mubr.bf16.gmra.mrb[124].mxu1 %v14183_v39  ;;  %v1721_v25 = vld [vmem:[#allocation2 + $0x490] sm:$0xff] }
 0x507   : > { %7090 = vst [vmem:[#allocation2 + $0x448] sm:$0xff] %v6834_v62 }
 0x508   : > { %v5169_v14 = vpop.f32.mrb[20].mxu0  ;;  %v16832_v3 = vpop.f32.mrb[20].mxu1 }
 0x509   : > { %v6227_v56 = vadd.f32 %v16806_v51, %v5169_v14  ;;  %v5171_v32 = vpop.f32.mrb[21].mxu0  ;;  %v16835_v6 = vpop.f32.mrb[21].mxu1  ;;  %v1722_v14 = vld [vmem:[#allocation2 + $0x498] sm:$0xff] }
 0x50a   : > { %v5172_v40 = vpop.f32.mrb[22].mxu0  ;;  %v16837_v12 = vpop.f32.mrb[22].mxu1 }
 0x50b   : > { %v6835_v57 = vadd.f32 %v6227_v56, %v1713_v63  ;;  %v6230_v18 = vadd.f32 %v16810_v27, %v5172_v40  ;;  %v5174_v4 = vpop.f32.mrb[23].mxu0  ;;  %v16840_v33 = vpop.f32.mrb[23].mxu1 }
 0x50c   : > { %v1723_v4 = vld [vmem:[#allocation2 + $0x4a0] sm:$0xff] }
 0x50d   : > { %7091 = vst [vmem:[#allocation2 + $0x450] sm:$0xff] %v6835_v57  ;;  %v6836_v54 = vadd.f32 %v6230_v18, %v1714_v52 }
 0x50f   : > { %7092 = vst [vmem:[#allocation2 + $0x458] sm:$0xff] %v6836_v54 }
 0x510   : > { %v5177_v30 = vpop.f32.mrb[24].mxu0  ;;  %v16842_v1 = vpop.f32.mrb[24].mxu1 }
 0x511   : > { %v6235_v51 = vadd.f32 %v6234_v11, %v5177_v30  ;;  %v5179_v41 = vpop.f32.mrb[25].mxu0  ;;  %v16844_v15 = vpop.f32.mrb[25].mxu1 }
 0x512   : > { %v5180_v53 = vpop.f32.mrb[26].mxu0  ;;  %v16846_v31 = vpop.f32.mrb[26].mxu1  ;;  %v1724_v41 = vld [vmem:[#allocation2 + $0x4a8] sm:$0xff] }
 0x513   : > { %v6837_v13 = vadd.f32 %v6235_v51, %v1715_v61  ;;  %v6238_v27 = vadd.f32 %v6237_v55, %v5180_v53  ;;  %v5182_v16 = vpop.f32.mrb[27].mxu0  ;;  %v16848_v37 = vpop.f32.mrb[27].mxu1 }
 0x515   : > { %7093 = vst [vmem:[#allocation2 + $0x460] sm:$0xff] %v6837_v13  ;;  %v6838_v60 = vadd.f32 %v6238_v27, %v1716_v24 }
 0x517   : > { %7094 = vst [vmem:[#allocation2 + $0x468] sm:$0xff] %v6838_v60 }
 0x518   : > { %v5185_v49 = vpop.f32.mrb[28].mxu0  ;;  %v16850_v58 = vpop.f32.mrb[28].mxu1 }
 0x519   : > { %v6243_v23 = vadd.f32 %v16814_v35, %v5185_v49  ;;  %v5187_v59 = vpop.f32.mrb[29].mxu0  ;;  %v16853_v26 = vpop.f32.mrb[29].mxu1 }
 0x51a   : > { %v5188_v11 = vpop.f32.mrb[30].mxu0  ;;  %v16855_v10 = vpop.f32.mrb[30].mxu1 }
 0x51b   : > { %v6839_v2 = vadd.f32 %v6243_v23, %v1717_v8  ;;  %v6246_v47 = vadd.f32 %v16818_v22, %v5188_v11  ;;  %v5190_v19 = vpop.f32.mrb[31].mxu0  ;;  %v16858_v43 = vpop.f32.mrb[31].mxu1  ;;  %v1725_v8 = vld [vmem:[#allocation2 + $0x4b0] sm:$0xff]  ;;  %v1726_v11 = vld [vmem:[#allocation2 + $0x4b8] sm:$0xff] }
 0x51d   : > { %7095 = vst [vmem:[#allocation2 + $0x470] sm:$0xff] %v6839_v2  ;;  %v6840_v28 = vadd.f32 %v6246_v47, %v1718_v0 }
 0x51f   : > { %7096 = vst [vmem:[#allocation2 + $0x478] sm:$0xff] %v6840_v28 }
 0x520   : > { %v5193_v42 = vpop.f32.mrb[32].mxu0  ;;  %v16860_v55 = vpop.f32.mrb[32].mxu1 }
 0x521   : > { %v6251_v35 = vadd.f32 %v16824_v50, %v5193_v42  ;;  %v5195_v48 = vpop.f32.mrb[33].mxu0  ;;  %v16863_v21 = vpop.f32.mrb[33].mxu1 }
 0x522   : > { %v5196_v36 = vpop.f32.mrb[34].mxu0  ;;  %v16865_v29 = vpop.f32.mrb[34].mxu1 }
 0x523   : > { %v6841_v22 = vadd.f32 %v6251_v35, %v1719_v44  ;;  %v6254_v5 = vadd.f32 %v16830_v45, %v5196_v36  ;;  %v5198_v39 = vpop.f32.mrb[35].mxu0  ;;  %v16868_v34 = vpop.f32.mrb[35].mxu1  ;;  %v1727_v35 = vld [vmem:[#allocation2 + $0x4c0] sm:$0xff] }
 0x525   : > { %7097 = vst [vmem:[#allocation2 + $0x480] sm:$0xff] %v6841_v22  ;;  %v6842_v20 = vadd.f32 %v6254_v5, %v1720_v9  ;;  %v1728_v5 = vld [vmem:[#allocation2 + $0x4c8] sm:$0xff] }
 0x527   : > { %7098 = vst [vmem:[#allocation2 + $0x488] sm:$0xff] %v6842_v20 }
 0x528   : > { %v5201_v7 = vpop.f32.mrb[36].mxu0  ;;  %v16870_v46 = vpop.f32.mrb[36].mxu1 }
 0x529   : > { %v6259_v50 = vadd.f32 %v16822_v17, %v5201_v7  ;;  %v5203_v62 = vpop.f32.mrb[37].mxu0  ;;  %v16873_v63 = vpop.f32.mrb[37].mxu1 }
 0x52a   : > { %v5204_v56 = vpop.f32.mrb[38].mxu0  ;;  %v16875_v32 = vpop.f32.mrb[38].mxu1 }
 0x52b   : > { %v6843_v45 = vadd.f32 %v6259_v50, %v1721_v25  ;;  %v6262_v52 = vadd.f32 %v16828_v38, %v5204_v56  ;;  %v5206_v40 = vpop.f32.mrb[39].mxu0  ;;  %v16878_v57 = vpop.f32.mrb[39].mxu1 }
 0x52d   : > { %7099 = vst [vmem:[#allocation2 + $0x490] sm:$0xff] %v6843_v45  ;;  %v6844_v18 = vadd.f32 %v6262_v52, %v1722_v14  ;;  %v1729_v14 = vld [vmem:[#allocation2 + $0x4d0] sm:$0xff] }
 0x52f   : > { %7100 = vst [vmem:[#allocation2 + $0x498] sm:$0xff] %v6844_v18  ;;  %v1730_v18 = vld [vmem:[#allocation2 + $0x4d8] sm:$0xff] }
 0x530   : > { %v5209_v54 = vpop.f32.mrb[40].mxu0  ;;  %v16880_v61 = vpop.f32.mrb[40].mxu1 }
 0x531   : > { %v6267_v17 = vadd.f32 %v16835_v6, %v5209_v54  ;;  %v5211_v30 = vpop.f32.mrb[41].mxu0  ;;  %v16883_v51 = vpop.f32.mrb[41].mxu1 }
 0x532   : > { %v5212_v24 = vpop.f32.mrb[42].mxu0  ;;  %v16885_v53 = vpop.f32.mrb[42].mxu1 }
 0x533   : > { %v6845_v38 = vadd.f32 %v6267_v17, %v1723_v4  ;;  %v6270_v13 = vadd.f32 %v16840_v33, %v5212_v24  ;;  %v5214_v27 = vpop.f32.mrb[43].mxu0  ;;  %v16888_v16 = vpop.f32.mrb[43].mxu1 }
 0x535   : > { %7101 = vst [vmem:[#allocation2 + $0x4a0] sm:$0xff] %v6845_v38  ;;  %v6846_v60 = vadd.f32 %v6270_v13, %v1724_v41  ;;  %v1731_v38 = vld [vmem:[#allocation2 + $0x4e0] sm:$0xff] }
 0x537   : > { %7102 = vst [vmem:[#allocation2 + $0x4a8] sm:$0xff] %v6846_v60 }
 0x538   : > { %v5217_v49 = vpop.f32.mrb[44].mxu0  ;;  %v16890_v23 = vpop.f32.mrb[44].mxu1 }
 0x539   : > { %v6275_v6 = vadd.f32 %v16832_v3, %v5217_v49  ;;  %v5219_v59 = vpop.f32.mrb[45].mxu0  ;;  %v16893_v0 = vpop.f32.mrb[45].mxu1  ;;  %v1732_v49 = vld [vmem:[#allocation2 + $0x4e8] sm:$0xff] }
 0x53a   : > { %v5220_v2 = vpop.f32.mrb[46].mxu0  ;;  %v16895_v47 = vpop.f32.mrb[46].mxu1 }
 0x53b   : > { %v6847_v33 = vadd.f32 %v6275_v6, %v1725_v8  ;;  %v6278_v19 = vadd.f32 %v16837_v12, %v5220_v2  ;;  %v5222_v28 = vpop.f32.mrb[47].mxu0  ;;  %v16898_v44 = vpop.f32.mrb[47].mxu1 }
 0x53c   : > { %v1733_v28 = vld [vmem:[#allocation2 + $0x4f0] sm:$0xff] }
 0x53d   : > { %7103 = vst [vmem:[#allocation2 + $0x4b0] sm:$0xff] %v6847_v33  ;;  %v6848_v42 = vadd.f32 %v6278_v19, %v1726_v11 }
 0x53f   : > { %7104 = vst [vmem:[#allocation2 + $0x4b8] sm:$0xff] %v6848_v42 }
 0x540   : > { %v5225_v48 = vpop.f32.mrb[48].mxu0  ;;  %v16900_v9 = vpop.f32.mrb[48].mxu1 }
 0x541   : > { %v6283_v3 = vadd.f32 %v16844_v15, %v5225_v48  ;;  %v5227_v36 = vpop.f32.mrb[49].mxu0  ;;  %v16903_v22 = vpop.f32.mrb[49].mxu1 }
 0x542   : > { %v5228_v39 = vpop.f32.mrb[50].mxu0  ;;  %v16905_v20 = vpop.f32.mrb[50].mxu1  ;;  %v1734_v36 = vld [vmem:[#allocation2 + $0x4f8] sm:$0xff] }
 0x543   : > { %v6849_v12 = vadd.f32 %v6283_v3, %v1727_v35  ;;  %v6286_v25 = vadd.f32 %v16848_v37, %v5228_v39  ;;  %v5230_v7 = vpop.f32.mrb[51].mxu0  ;;  %v16908_v50 = vpop.f32.mrb[51].mxu1 }
 0x545   : > { %7105 = vst [vmem:[#allocation2 + $0x4c0] sm:$0xff] %v6849_v12  ;;  %v6850_v62 = vadd.f32 %v6286_v25, %v1728_v5 }
 0x547   : > { %7106 = vst [vmem:[#allocation2 + $0x4c8] sm:$0xff] %v6850_v62 }
 0x548   : > { %v5233_v56 = vpop.f32.mrb[52].mxu0  ;;  %v16910_v45 = vpop.f32.mrb[52].mxu1 }
 0x549   : > { %v6291_v15 = vadd.f32 %v16842_v1, %v5233_v56  ;;  %v5235_v52 = vpop.f32.mrb[53].mxu0  ;;  %v16913_v40 = vpop.f32.mrb[53].mxu1 }
 0x54a   : > { %v5236_v4 = vpop.f32.mrb[54].mxu0  ;;  %v16915_v54 = vpop.f32.mrb[54].mxu1 }
 0x54b   : > { %v6851_v37 = vadd.f32 %v6291_v15, %v1729_v14  ;;  %v6294_v17 = vadd.f32 %v16846_v31, %v5236_v4  ;;  %v5238_v30 = vpop.f32.mrb[55].mxu0  ;;  %v16918_v41 = vpop.f32.mrb[55].mxu1  ;;  %v1735_v14 = vld [vmem:[#allocation2 + $0x500] sm:$0xff]  ;;  %v1769_v15 = vld [vmem:[#allocation2 + $0x610] sm:$0xff] }
 0x54d   : > { %7107 = vst [vmem:[#allocation2 + $0x4d0] sm:$0xff] %v6851_v37  ;;  %v6852_v24 = vadd.f32 %v6294_v17, %v1730_v18  ;;  %v17721_v18 = vld [vmem:[#allocation9_spill] sm:$0xff]  ;;  %v1767_v17 = vld [vmem:[#allocation2 + $0x600] sm:$0xff] }
 0x54f   : > { %7108 = vst [vmem:[#allocation2 + $0x4d8] sm:$0xff] %v6852_v24  ;;  %v17722_v24 = vld [vmem:[#allocation7_spill] sm:$0xff] }
 0x550   : > { %v5241_v13 = vpop.f32.mrb[56].mxu0  ;;  %v16920_v27 = vpop.f32.mrb[56].mxu1 }
 0x551   : > { %v6299_v1 = vadd.f32 %v16853_v26, %v5241_v13  ;;  %v5243_v60 = vpop.f32.mrb[57].mxu0  ;;  %v16923_v8 = vpop.f32.mrb[57].mxu1 }
 0x552   : > { %v5244_v6 = vpop.f32.mrb[58].mxu0  ;;  %v16925_v59 = vpop.f32.mrb[58].mxu1 }
 0x553   : > { %v6853_v31 = vadd.f32 %v6299_v1, %v1731_v38  ;;  %v6302_v11 = vadd.f32 %v16858_v43, %v5244_v6  ;;  %v5246_v2 = vpop.f32.mrb[59].mxu0  ;;  %v16928_v33 = vpop.f32.mrb[59].mxu1  ;;  %v1770_v1 = vld [vmem:[#allocation2 + $0x618] sm:$0xff] }
 0x555   : > { %7109 = vst [vmem:[#allocation2 + $0x4e0] sm:$0xff] %v6853_v31  ;;  %v6854_v19 = vadd.f32 %v6302_v11, %v1732_v49  ;;  %v17723_v11 = vld [vmem:[#allocation10_spill] sm:$0xff] }
 0x557   : > { %7110 = vst [vmem:[#allocation2 + $0x4e8] sm:$0xff] %v6854_v19 }
 0x558   : > { %v5249_v42 = vpop.f32.mrb[60].mxu0  ;;  %v16930_v35 = vpop.f32.mrb[60].mxu1 }
 0x559   : > { %v6307_v26 = vadd.f32 %v16850_v58, %v5249_v42  ;;  %v5251_v48 = vpop.f32.mrb[61].mxu0  ;;  %v16933_v3 = vpop.f32.mrb[61].mxu1 }
 0x55a   : > { %v5252_v5 = vpop.f32.mrb[62].mxu0  ;;  %v16935_v39 = vpop.f32.mrb[62].mxu1 }
 0x55b   : > { %v6855_v43 = vadd.f32 %v6307_v26, %v1733_v28  ;;  %v6310_v12 = vadd.f32 %v16855_v10, %v5252_v5  ;;  %v5254_v25 = vpop.f32.mrb[63].mxu0  ;;  %v16938_v7 = vpop.f32.mrb[63].mxu1  ;;  %v1736_v10 = vld [vmem:[#allocation2 + $0x508] sm:$0xff] }
 0x55c   : > { %v1768_v28 = vld [vmem:[#allocation2 + $0x608] sm:$0xff] }
 0x55d   : > { %7111 = vst [vmem:[#allocation2 + $0x4f0] sm:$0xff] %v6855_v43  ;;  %v6856_v62 = vadd.f32 %v6310_v12, %v1734_v36  ;;  %v17724_v26 = vld [vmem:[#allocation8_spill] sm:$0xff]  ;;  %v1737_v12 = vld [vmem:[#allocation2 + $0x510] sm:$0xff] }
 0x55f   : > { %7112 = vst [vmem:[#allocation2 + $0x4f8] sm:$0xff] %v6856_v62 }
 0x560   : > { %v5257_v56 = vpop.f32.mrb[64].mxu0  ;;  %v13501_v58 = vpop.f32.mrb[64].mxu1 }
 0x561   : > { %v6315_v52 = vadd.f32 %v16863_v21, %v5257_v56  ;;  %v6451_v4 = vadd.f32 %v13501_v58, %v17721_v18  ;;  %v5259_v37 = vpop.f32.mrb[65].mxu0  ;;  %v6442_v30 = vpop.f32.mrb[65].mxu1  ;;  %v17725_v56 = vld [vmem:[#allocation13_spill] sm:$0xff] }
 0x562   : > { %v6443_v38 = vadd.f32 %v6442_v30, %v17722_v24  ;;  %v5260_v13 = vpop.f32.mrb[66].mxu0  ;;  %v13502_v60 = vpop.f32.mrb[66].mxu1  ;;  %v1774_v24 = vld [vmem:[#allocation2 + $0x638] sm:$0xff] }
 0x563   : > { %v6857_v49 = vadd.f32 %v6315_v52, %v1735_v14  ;;  %v6891_v6 = vadd.f32 %v6451_v4, %v1769_v15  ;;  %v6318_v31 = vadd.f32 %v16868_v34, %v5260_v13  ;;  %v6454_v2 = vadd.f32 %v13502_v60, %v17723_v11  ;;  %v5262_v19 = vpop.f32.mrb[67].mxu0  ;;  %v6445_v21 = vpop.f32.mrb[67].mxu1  ;;  %v1773_v34 = vld [vmem:[#allocation2 + $0x630] sm:$0xff]  ;;  %v1771_v52 = vld [vmem:[#allocation2 + $0x620] sm:$0xff]  ;;  %v17727_v60 = vld [vmem:[#allocation14_spill] sm:$0xff] }
 0x564   : > { %v6889_v42 = vadd.f32 %v6443_v38, %v1767_v17  ;;  %v6446_v48 = vadd.f32 %v6445_v21, %v17724_v26  ;;  %v17726_v4 = vld [vmem:[#allocation11_spill] sm:$0xff]  ;;  %v1738_v17 = vld [vmem:[#allocation2 + $0x518] sm:$0xff] }
 0x565   : > { %7113 = vst [vmem:[#allocation2 + $0x500] sm:$0xff] %v6857_v49  ;;  %7147 = vst [vmem:[#allocation2 + $0x610] sm:$0xff] %v6891_v6  ;;  %v6858_v36 = vadd.f32 %v6318_v31, %v1736_v10  ;;  %v6892_v5 = vadd.f32 %v6454_v2, %v1770_v1  ;;  %v1772_v31 = vld [vmem:[#allocation2 + $0x628] sm:$0xff]  ;;  %v1739_v26 = vld [vmem:[#allocation2 + $0x520] sm:$0xff] }
 0x566   : > { %7145 = vst [vmem:[#allocation2 + $0x600] sm:$0xff] %v6889_v42  ;;  %v6890_v43 = vadd.f32 %v6446_v48, %v1768_v28  ;;  %v17728_v2 = vld [vmem:[#allocation12_spill] sm:$0xff] }
 0x567   : > { %7114 = vst [vmem:[#allocation2 + $0x508] sm:$0xff] %v6858_v36  ;;  %7148 = vst [vmem:[#allocation2 + $0x618] sm:$0xff] %v6892_v5 }
 0x568   : > { %7146 = vst [vmem:[#allocation2 + $0x608] sm:$0xff] %v6890_v43  ;;  %v5265_v25 = vpop.f32.mrb[68].mxu0  ;;  %v13505_v62 = vpop.f32.mrb[68].mxu1  ;;  %v17729_v43 = vld [vmem:[#allocation17_spill] sm:$0xff] }
 0x569   : > { %v6323_v14 = vadd.f32 %v16860_v55, %v5265_v25  ;;  %v6467_v15 = vadd.f32 %v13505_v62, %v17725_v56  ;;  %v5267_v58 = vpop.f32.mrb[69].mxu0  ;;  %v6458_v18 = vpop.f32.mrb[69].mxu1 }
 0x56a   : > { %v6459_v37 = vadd.f32 %v6458_v18, %v17726_v4  ;;  %v5268_v30 = vpop.f32.mrb[70].mxu0  ;;  %v13506_v38 = vpop.f32.mrb[70].mxu1 }
 0x56b   : > { %v6859_v10 = vadd.f32 %v6323_v14, %v1737_v12  ;;  %v6895_v13 = vadd.f32 %v6467_v15, %v1773_v34  ;;  %v6326_v1 = vadd.f32 %v16865_v29, %v5268_v30  ;;  %v6470_v49 = vadd.f32 %v13506_v38, %v17727_v60  ;;  %v5270_v6 = vpop.f32.mrb[71].mxu0  ;;  %v6461_v55 = vpop.f32.mrb[71].mxu1  ;;  %v1777_v29 = vld [vmem:[#allocation2 + $0x650] sm:$0xff]  ;;  %v1775_v34 = vld [vmem:[#allocation2 + $0x640] sm:$0xff]  ;;  %v1740_v15 = vld [vmem:[#allocation2 + $0x528] sm:$0xff] }
 0x56c   : > { %v6893_v11 = vadd.f32 %v6459_v37, %v1771_v52  ;;  %v6462_v19 = vadd.f32 %v6461_v55, %v17728_v2  ;;  %v17730_v14 = vld [vmem:[#allocation15_spill] sm:$0xff]  ;;  %v1778_v52 = vld [vmem:[#allocation2 + $0x658] sm:$0xff]  ;;  %v1741_v55 = vld [vmem:[#allocation2 + $0x530] sm:$0xff] }
 0x56d   : > { %7115 = vst [vmem:[#allocation2 + $0x510] sm:$0xff] %v6859_v10  ;;  %7151 = vst [vmem:[#allocation2 + $0x630] sm:$0xff] %v6895_v13  ;;  %v6860_v28 = vadd.f32 %v6326_v1, %v1738_v17  ;;  %v6896_v21 = vadd.f32 %v6470_v49, %v1774_v24  ;;  %v17731_v30 = vld [vmem:[#allocation18_spill] sm:$0xff]  ;;  %v1776_v10 = vld [vmem:[#allocation2 + $0x648] sm:$0xff] }
 0x56e   : > { %7149 = vst [vmem:[#allocation2 + $0x620] sm:$0xff] %v6893_v11  ;;  %v6894_v42 = vadd.f32 %v6462_v19, %v1772_v31  ;;  %v17732_v1 = vld [vmem:[#allocation16_spill] sm:$0xff] }
 0x56f   : > { %7116 = vst [vmem:[#allocation2 + $0x518] sm:$0xff] %v6860_v28  ;;  %7152 = vst [vmem:[#allocation2 + $0x638] sm:$0xff] %v6896_v21  ;;  %v17733_v28 = vld [vmem:[#allocation21_spill] sm:$0xff] }
 0x570   : > { %7150 = vst [vmem:[#allocation2 + $0x628] sm:$0xff] %v6894_v42  ;;  %v5273_v48 = vpop.f32.mrb[72].mxu0  ;;  %v13509_v36 = vpop.f32.mrb[72].mxu1 }
 0x571   : > { %v6331_v5 = vadd.f32 %v16873_v63, %v5273_v48  ;;  %v6483_v12 = vadd.f32 %v13509_v36, %v17729_v43  ;;  %v5275_v25 = vpop.f32.mrb[73].mxu0  ;;  %v6474_v62 = vpop.f32.mrb[73].mxu1 }
 0x572   : > { %v6475_v56 = vadd.f32 %v6474_v62, %v17730_v14  ;;  %v5276_v58 = vpop.f32.mrb[74].mxu0  ;;  %v13510_v18 = vpop.f32.mrb[74].mxu1 }
 0x573   : > { %v6861_v4 = vadd.f32 %v6331_v5, %v1739_v26  ;;  %v6899_v37 = vadd.f32 %v6483_v12, %v1777_v29  ;;  %v6334_v17 = vadd.f32 %v16878_v57, %v5276_v58  ;;  %v6486_v24 = vadd.f32 %v13510_v18, %v17731_v30  ;;  %v5278_v38 = vpop.f32.mrb[75].mxu0  ;;  %v6477_v63 = vpop.f32.mrb[75].mxu1  ;;  %v1781_v57 = vld [vmem:[#allocation2 + $0x670] sm:$0xff]  ;;  %v1779_v26 = vld [vmem:[#allocation2 + $0x660] sm:$0xff]  ;;  %v1742_v5 = vld [vmem:[#allocation2 + $0x538] sm:$0xff] }
 0x574   : > { %v6897_v13 = vadd.f32 %v6475_v56, %v1775_v34  ;;  %v6478_v60 = vadd.f32 %v6477_v63, %v17732_v1  ;;  %v17734_v29 = vld [vmem:[#allocation19_spill] sm:$0xff]  ;;  %v1782_v12 = vld [vmem:[#allocation2 + $0x678] sm:$0xff]  ;;  %v17737_v1 = vld [vmem:[#allocation25_spill] sm:$0xff] }
 0x575   : > { %7117 = vst [vmem:[#allocation2 + $0x520] sm:$0xff] %v6861_v4  ;;  %7155 = vst [vmem:[#allocation2 + $0x650] sm:$0xff] %v6899_v37  ;;  %v6862_v49 = vadd.f32 %v6334_v17, %v1740_v15  ;;  %v6900_v6 = vadd.f32 %v6486_v24, %v1778_v52  ;;  %v17735_v56 = vld [vmem:[#allocation22_spill] sm:$0xff]  ;;  %v1780_v52 = vld [vmem:[#allocation2 + $0x668] sm:$0xff] }
 0x576   : > { %7153 = vst [vmem:[#allocation2 + $0x640] sm:$0xff] %v6897_v13  ;;  %v6898_v31 = vadd.f32 %v6478_v60, %v1776_v10  ;;  %v17736_v4 = vld [vmem:[#allocation20_spill] sm:$0xff]  ;;  %v1743_v38 = vld [vmem:[#allocation2 + $0x540] sm:$0xff] }
 0x577   : > { %7118 = vst [vmem:[#allocation2 + $0x528] sm:$0xff] %v6862_v49  ;;  %7156 = vst [vmem:[#allocation2 + $0x658] sm:$0xff] %v6900_v6  ;;  %v1783_v6 = vld [vmem:[#allocation2 + $0x680] sm:$0xff] }
 0x578   : > { %7154 = vst [vmem:[#allocation2 + $0x648] sm:$0xff] %v6898_v31  ;;  %v5281_v11 = vpop.f32.mrb[76].mxu0  ;;  %v13513_v2 = vpop.f32.mrb[76].mxu1 }
 0x579   : > { %v6339_v19 = vadd.f32 %v16870_v46, %v5281_v11  ;;  %v6499_v21 = vadd.f32 %v13513_v2, %v17733_v28  ;;  %v5283_v42 = vpop.f32.mrb[77].mxu0  ;;  %v6490_v48 = vpop.f32.mrb[77].mxu1 }
 0x57a   : > { %v6491_v36 = vadd.f32 %v6490_v48, %v17734_v29  ;;  %v5284_v43 = vpop.f32.mrb[78].mxu0  ;;  %v13514_v25 = vpop.f32.mrb[78].mxu1  ;;  %v17739_v48 = vld [vmem:[#allocation26_spill] sm:$0xff] }
 0x57b   : > { %v6863_v34 = vadd.f32 %v6339_v19, %v1741_v55  ;;  %v6903_v62 = vadd.f32 %v6499_v21, %v1781_v57  ;;  %v6342_v14 = vadd.f32 %v16875_v32, %v5284_v43  ;;  %v6502_v15 = vadd.f32 %v13514_v25, %v17735_v56  ;;  %v5286_v58 = vpop.f32.mrb[79].mxu0  ;;  %v6493_v46 = vpop.f32.mrb[79].mxu1  ;;  %v1785_v32 = vld [vmem:[#allocation2 + $0x690] sm:$0xff]  ;;  %v17738_v55 = vld [vmem:[#allocation23_spill] sm:$0xff]  ;;  %v1744_v57 = vld [vmem:[#allocation2 + $0x548] sm:$0xff] }
 0x57c   : > { %v6901_v18 = vadd.f32 %v6491_v36, %v1779_v26  ;;  %v6494_v37 = vadd.f32 %v6493_v46, %v17736_v4  ;;  %v1786_v19 = vld [vmem:[#allocation2 + $0x698] sm:$0xff]  ;;  %v1745_v56 = vld [vmem:[#allocation2 + $0x550] sm:$0xff] }
 0x57d   : > { %7119 = vst [vmem:[#allocation2 + $0x530] sm:$0xff] %v6863_v34  ;;  %7159 = vst [vmem:[#allocation2 + $0x670] sm:$0xff] %v6903_v62  ;;  %v6864_v17 = vadd.f32 %v6342_v14, %v1742_v5  ;;  %v6904_v30 = vadd.f32 %v6502_v15, %v1782_v12  ;;  %v1784_v5 = vld [vmem:[#allocation2 + $0x688] sm:$0xff]  ;;  %v17741_v46 = vld [vmem:[#allocation29_spill] sm:$0xff] }
 0x57e   : > { %7157 = vst [vmem:[#allocation2 + $0x660] sm:$0xff] %v6901_v18  ;;  %v6902_v24 = vadd.f32 %v6494_v37, %v1780_v52  ;;  %v17740_v12 = vld [vmem:[#allocation24_spill] sm:$0xff]  ;;  %v1787_v37 = vld [vmem:[#allocation2 + $0x6a0] sm:$0xff] }
 0x57f   : > { %7120 = vst [vmem:[#allocation2 + $0x538] sm:$0xff] %v6864_v17  ;;  %7160 = vst [vmem:[#allocation2 + $0x678] sm:$0xff] %v6904_v30  ;;  %v17742_v30 = vld [vmem:[#allocation27_spill] sm:$0xff] }
 0x580   : > { %7158 = vst [vmem:[#allocation2 + $0x668] sm:$0xff] %v6902_v24  ;;  %v5289_v10 = vpop.f32.mrb[80].mxu0  ;;  %v13517_v63 = vpop.f32.mrb[80].mxu1 }
 0x581   : > { %v6347_v13 = vadd.f32 %v16883_v51, %v5289_v10  ;;  %v6515_v60 = vadd.f32 %v13517_v63, %v17737_v1  ;;  %v5291_v49 = vpop.f32.mrb[81].mxu0  ;;  %v6506_v31 = vpop.f32.mrb[81].mxu1 }
 0x582   : > { %v6507_v11 = vadd.f32 %v6506_v31, %v17738_v55  ;;  %v5292_v2 = vpop.f32.mrb[82].mxu0  ;;  %v13518_v28 = vpop.f32.mrb[82].mxu1  ;;  %v17743_v49 = vld [vmem:[#allocation30_spill] sm:$0xff]  ;;  %v1788_v55 = vld [vmem:[#allocation2 + $0x6a8] sm:$0xff] }
 0x583   : > { %v6865_v21 = vadd.f32 %v6347_v13, %v1743_v38  ;;  %v6907_v42 = vadd.f32 %v6515_v60, %v1785_v32  ;;  %v6350_v26 = vadd.f32 %v16888_v16, %v5292_v2  ;;  %v6518_v29 = vadd.f32 %v13518_v28, %v17739_v48  ;;  %v5294_v36 = vpop.f32.mrb[83].mxu0  ;;  %v6509_v51 = vpop.f32.mrb[83].mxu1  ;;  %v1789_v16 = vld [vmem:[#allocation2 + $0x6b0] sm:$0xff]  ;;  %v1746_v38 = vld [vmem:[#allocation2 + $0x558] sm:$0xff] }
 0x584   : > { %v6905_v43 = vadd.f32 %v6507_v11, %v1783_v6  ;;  %v6510_v25 = vadd.f32 %v6509_v51, %v17740_v12  ;;  %v1790_v32 = vld [vmem:[#allocation2 + $0x6b8] sm:$0xff]  ;;  %v17745_v36 = vld [vmem:[#allocation33_spill] sm:$0xff] }
 0x585   : > { %7121 = vst [vmem:[#allocation2 + $0x540] sm:$0xff] %v6865_v21  ;;  %7163 = vst [vmem:[#allocation2 + $0x690] sm:$0xff] %v6907_v42  ;;  %v6866_v34 = vadd.f32 %v6350_v26, %v1744_v57  ;;  %v6908_v62 = vadd.f32 %v6518_v29, %v1786_v19  ;;  %v17744_v57 = vld [vmem:[#allocation28_spill] sm:$0xff]  ;;  %v1747_v42 = vld [vmem:[#allocation2 + $0x560] sm:$0xff] }
 0x586   : > { %7161 = vst [vmem:[#allocation2 + $0x680] sm:$0xff] %v6905_v43  ;;  %v6906_v14 = vadd.f32 %v6510_v25, %v1784_v5  ;;  %v1791_v43 = vld [vmem:[#allocation2 + $0x6c0] sm:$0xff] }
 0x587   : > { %7122 = vst [vmem:[#allocation2 + $0x548] sm:$0xff] %v6866_v34  ;;  %7164 = vst [vmem:[#allocation2 + $0x698] sm:$0xff] %v6908_v62  ;;  %v17746_v25 = vld [vmem:[#allocation31_spill] sm:$0xff]  ;;  %v1748_v62 = vld [vmem:[#allocation2 + $0x568] sm:$0xff] }
 0x588   : > { %7162 = vst [vmem:[#allocation2 + $0x688] sm:$0xff] %v6906_v14  ;;  %v5297_v15 = vpop.f32.mrb[84].mxu0  ;;  %v13521_v58 = vpop.f32.mrb[84].mxu1 }
 0x589   : > { %v6355_v52 = vadd.f32 %v16880_v61, %v5297_v15  ;;  %v6531_v18 = vadd.f32 %v13521_v58, %v17741_v46  ;;  %v5299_v4 = vpop.f32.mrb[85].mxu0  ;;  %v6522_v17 = vpop.f32.mrb[85].mxu1  ;;  %v17747_v46 = vld [vmem:[#allocation34_spill] sm:$0xff] }
 0x58a   : > { %v6523_v24 = vadd.f32 %v6522_v17, %v17742_v30  ;;  %v5300_v10 = vpop.f32.mrb[86].mxu0  ;;  %v13522_v63 = vpop.f32.mrb[86].mxu1  ;;  %v17748_v30 = vld [vmem:[#allocation32_spill] sm:$0xff] }
 0x58b   : > { %v6867_v13 = vadd.f32 %v6355_v52, %v1745_v56  ;;  %v6911_v1 = vadd.f32 %v6531_v18, %v1789_v16  ;;  %v6358_v60 = vadd.f32 %v16885_v53, %v5300_v10  ;;  %v6534_v6 = vadd.f32 %v13522_v63, %v17743_v49  ;;  %v5302_v31 = vpop.f32.mrb[87].mxu0  ;;  %v6525_v61 = vpop.f32.mrb[87].mxu1  ;;  %v1793_v53 = vld [vmem:[#allocation2 + $0x6d0] sm:$0xff]  ;;  %v1794_v56 = vld [vmem:[#allocation2 + $0x6d8] sm:$0xff] }
 0x58c   : > { %v6909_v11 = vadd.f32 %v6523_v24, %v1787_v37  ;;  %v6526_v2 = vadd.f32 %v6525_v61, %v17744_v57  ;;  %v1792_v37 = vld [vmem:[#allocation2 + $0x6c8] sm:$0xff]  ;;  %v1749_v63 = vld [vmem:[#allocation2 + $0x570] sm:$0xff] }
 0x58d   : > { %7123 = vst [vmem:[#allocation2 + $0x550] sm:$0xff] %v6867_v13  ;;  %7167 = vst [vmem:[#allocation2 + $0x6b0] sm:$0xff] %v6911_v1  ;;  %v6868_v19 = vadd.f32 %v6358_v60, %v1746_v38  ;;  %v6912_v28 = vadd.f32 %v6534_v6, %v1790_v32  ;;  %v17749_v49 = vld [vmem:[#allocation37_spill] sm:$0xff] }
 0x58e   : > { %7165 = vst [vmem:[#allocation2 + $0x6a0] sm:$0xff] %v6909_v11  ;;  %v6910_v21 = vadd.f32 %v6526_v2, %v1788_v55  ;;  %v1795_v55 = vld [vmem:[#allocation2 + $0x6e0] sm:$0xff]  ;;  %v1750_v2 = vld [vmem:[#allocation2 + $0x578] sm:$0xff] }
 0x58f   : > { %7124 = vst [vmem:[#allocation2 + $0x558] sm:$0xff] %v6868_v19  ;;  %7168 = vst [vmem:[#allocation2 + $0x6b8] sm:$0xff] %v6912_v28  ;;  %v17750_v11 = vld [vmem:[#allocation35_spill] sm:$0xff]  ;;  %v1798_v28 = vld [vmem:[#allocation2 + $0x6f8] sm:$0xff] }
 0x590   : > { %7166 = vst [vmem:[#allocation2 + $0x6a8] sm:$0xff] %v6910_v21  ;;  %v5305_v26 = vpop.f32.mrb[88].mxu0  ;;  %v13525_v48 = vpop.f32.mrb[88].mxu1 }
 0x591   : > { %v6363_v29 = vadd.f32 %v16893_v0, %v5305_v26  ;;  %v6547_v5 = vadd.f32 %v13525_v48, %v17745_v36  ;;  %v5307_v51 = vpop.f32.mrb[89].mxu0  ;;  %v6538_v12 = vpop.f32.mrb[89].mxu1  ;;  %v17751_v48 = vld [vmem:[#allocation38_spill] sm:$0xff] }
 0x592   : > { %v6539_v34 = vadd.f32 %v6538_v12, %v17746_v25  ;;  %v5308_v14 = vpop.f32.mrb[90].mxu0  ;;  %v13526_v15 = vpop.f32.mrb[90].mxu1 }
 0x593   : > { %v6869_v16 = vadd.f32 %v6363_v29, %v1747_v42  ;;  %v6915_v58 = vadd.f32 %v6547_v5, %v1793_v53  ;;  %v6366_v52 = vadd.f32 %v16898_v44, %v5308_v14  ;;  %v6550_v18 = vadd.f32 %v13526_v15, %v17747_v46  ;;  %v5310_v4 = vpop.f32.mrb[91].mxu0  ;;  %v6541_v0 = vpop.f32.mrb[91].mxu1  ;;  %v1797_v44 = vld [vmem:[#allocation2 + $0x6f0] sm:$0xff]  ;;  %v1796_v5 = vld [vmem:[#allocation2 + $0x6e8] sm:$0xff]  ;;  %v1751_v14 = vld [vmem:[#allocation2 + $0x580] sm:$0xff] }
 0x594   : > { %v6913_v17 = vadd.f32 %v6539_v34, %v1791_v43  ;;  %v6542_v24 = vadd.f32 %v6541_v0, %v17748_v30  ;;  %v17752_v43 = vld [vmem:[#allocation36_spill] sm:$0xff] }
 0x595   : > { %7125 = vst [vmem:[#allocation2 + $0x560] sm:$0xff] %v6869_v16  ;;  %7171 = vst [vmem:[#allocation2 + $0x6d0] sm:$0xff] %v6915_v58  ;;  %v6870_v38 = vadd.f32 %v6366_v52, %v1748_v62  ;;  %v6916_v10 = vadd.f32 %v6550_v18, %v1794_v56  ;;  %v17753_v58 = vld [vmem:[#allocation41_spill] sm:$0xff]  ;;  %v1799_v18 = vld [vmem:[#allocation2 + $0x700] sm:$0xff] }
 0x596   : > { %7169 = vst [vmem:[#allocation2 + $0x6c0] sm:$0xff] %v6913_v17  ;;  %v6914_v32 = vadd.f32 %v6542_v24, %v1792_v37  ;;  %v17754_v37 = vld [vmem:[#allocation39_spill] sm:$0xff]  ;;  %v1752_v17 = vld [vmem:[#allocation2 + $0x588] sm:$0xff]  ;;  %v1802_v24 = vld [vmem:[#allocation2 + $0x718] sm:$0xff] }
 0x597   : > { %7126 = vst [vmem:[#allocation2 + $0x568] sm:$0xff] %v6870_v38  ;;  %7172 = vst [vmem:[#allocation2 + $0x6d8] sm:$0xff] %v6916_v10 }
 0x598   : > { %7170 = vst [vmem:[#allocation2 + $0x6c8] sm:$0xff] %v6914_v32  ;;  %v5313_v13 = vpop.f32.mrb[92].mxu0  ;;  %v13529_v1 = vpop.f32.mrb[92].mxu1 }
 0x599   : > { %v6371_v60 = vadd.f32 %v16890_v23, %v5313_v13  ;;  %v6563_v6 = vadd.f32 %v13529_v1, %v17749_v49  ;;  %v5315_v31 = vpop.f32.mrb[93].mxu0  ;;  %v6554_v61 = vpop.f32.mrb[93].mxu1  ;;  %v17755_v13 = vld [vmem:[#allocation42_spill] sm:$0xff] }
 0x59a   : > { %v6555_v57 = vadd.f32 %v6554_v61, %v17750_v11  ;;  %v5316_v19 = vpop.f32.mrb[94].mxu0  ;;  %v13530_v21 = vpop.f32.mrb[94].mxu1 }
 0x59b   : > { %v6871_v42 = vadd.f32 %v6371_v60, %v1749_v63  ;;  %v6919_v26 = vadd.f32 %v6563_v6, %v1797_v44  ;;  %v6374_v53 = vadd.f32 %v16895_v47, %v5316_v19  ;;  %v6566_v29 = vadd.f32 %v13530_v21, %v17751_v48  ;;  %v5318_v36 = vpop.f32.mrb[95].mxu0  ;;  %v6557_v23 = vpop.f32.mrb[95].mxu1  ;;  %v1801_v47 = vld [vmem:[#allocation2 + $0x710] sm:$0xff]  ;;  %v1800_v60 = vld [vmem:[#allocation2 + $0x708] sm:$0xff] }
 0x59c   : > { %v6917_v51 = vadd.f32 %v6555_v57, %v1795_v55  ;;  %v6558_v12 = vadd.f32 %v6557_v23, %v17752_v43  ;;  %v17756_v6 = vld [vmem:[#allocation40_spill] sm:$0xff]  ;;  %v1753_v57 = vld [vmem:[#allocation2 + $0x590] sm:$0xff] }
 0x59d   : > { %7127 = vst [vmem:[#allocation2 + $0x570] sm:$0xff] %v6871_v42  ;;  %7175 = vst [vmem:[#allocation2 + $0x6f0] sm:$0xff] %v6919_v26  ;;  %v6872_v25 = vadd.f32 %v6374_v53, %v1750_v2  ;;  %v6920_v34 = vadd.f32 %v6566_v29, %v1798_v28  ;;  %v17757_v21 = vld [vmem:[#allocation45_spill] sm:$0xff]  ;;  %v1803_v53 = vld [vmem:[#allocation2 + $0x720] sm:$0xff] }
 0x59e   : > { %7173 = vst [vmem:[#allocation2 + $0x6e0] sm:$0xff] %v6917_v51  ;;  %v6918_v62 = vadd.f32 %v6558_v12, %v1796_v5  ;;  %v17758_v29 = vld [vmem:[#allocation43_spill] sm:$0xff]  ;;  %v1754_v5 = vld [vmem:[#allocation2 + $0x598] sm:$0xff] }
 0x59f   : > { %7128 = vst [vmem:[#allocation2 + $0x578] sm:$0xff] %v6872_v25  ;;  %7176 = vst [vmem:[#allocation2 + $0x6f8] sm:$0xff] %v6920_v34  ;;  %v1806_v51 = vld [vmem:[#allocation2 + $0x738] sm:$0xff] }
 0x5a0   : > { %7174 = vst [vmem:[#allocation2 + $0x6e8] sm:$0xff] %v6918_v62  ;;  %v5321_v56 = vpop.f32.mrb[96].mxu0  ;;  %v13533_v15 = vpop.f32.mrb[96].mxu1  ;;  %v17759_v62 = vld [vmem:[#allocation46_spill] sm:$0xff] }
 0x5a1   : > { %v6379_v16 = vadd.f32 %v16903_v22, %v5321_v56  ;;  %v6579_v52 = vadd.f32 %v13533_v15, %v17753_v58  ;;  %v5323_v46 = vpop.f32.mrb[97].mxu0  ;;  %v6570_v4 = vpop.f32.mrb[97].mxu1 }
 0x5a2   : > { %v6571_v0 = vadd.f32 %v6570_v4, %v17754_v37  ;;  %v5324_v30 = vpop.f32.mrb[98].mxu0  ;;  %v13534_v38 = vpop.f32.mrb[98].mxu1  ;;  %v1755_v4 = vld [vmem:[#allocation2 + $0x5a0] sm:$0xff] }
 0x5a3   : > { %v6873_v10 = vadd.f32 %v6379_v16, %v1751_v14  ;;  %v6923_v32 = vadd.f32 %v6579_v52, %v1801_v47  ;;  %v6382_v63 = vadd.f32 %v16908_v50, %v5324_v30  ;;  %v6582_v44 = vadd.f32 %v13534_v38, %v17755_v13  ;;  %v5326_v1 = vpop.f32.mrb[99].mxu0  ;;  %v6573_v22 = vpop.f32.mrb[99].mxu1  ;;  %v1805_v50 = vld [vmem:[#allocation2 + $0x730] sm:$0xff]  ;;  %v1804_v47 = vld [vmem:[#allocation2 + $0x728] sm:$0xff] }
 0x5a4   : > { %v6921_v49 = vadd.f32 %v6571_v0, %v1799_v18  ;;  %v6574_v31 = vadd.f32 %v6573_v22, %v17756_v6  ;;  %v17760_v16 = vld [vmem:[#allocation44_spill] sm:$0xff]  ;;  %v17761_v30 = vld [vmem:[#allocation49_spill] sm:$0xff] }
 0x5a5   : > { %7129 = vst [vmem:[#allocation2 + $0x580] sm:$0xff] %v6873_v10  ;;  %7179 = vst [vmem:[#allocation2 + $0x710] sm:$0xff] %v6923_v32  ;;  %v6874_v55 = vadd.f32 %v6382_v63, %v1752_v17  ;;  %v6924_v61 = vadd.f32 %v6582_v44, %v1802_v24  ;;  %v1807_v10 = vld [vmem:[#allocation2 + $0x740] sm:$0xff]  ;;  %v1756_v44 = vld [vmem:[#allocation2 + $0x5a8] sm:$0xff] }
 0x5a6   : > { %7177 = vst [vmem:[#allocation2 + $0x700] sm:$0xff] %v6921_v49  ;;  %v6922_v11 = vadd.f32 %v6574_v31, %v1800_v60  ;;  %v17762_v63 = vld [vmem:[#allocation47_spill] sm:$0xff]  ;;  %v1810_v60 = vld [vmem:[#allocation2 + $0x758] sm:$0xff] }
 0x5a7   : > { %7130 = vst [vmem:[#allocation2 + $0x588] sm:$0xff] %v6874_v55  ;;  %7180 = vst [vmem:[#allocation2 + $0x718] sm:$0xff] %v6924_v61  ;;  %v17763_v55 = vld [vmem:[#allocation50_spill] sm:$0xff] }
 0x5a8   : > { %7178 = vst [vmem:[#allocation2 + $0x708] sm:$0xff] %v6922_v11  ;;  %v5329_v2 = vpop.f32.mrb[100].mxu0  ;;  %v13537_v19 = vpop.f32.mrb[100].mxu1 }
 0x5a9   : > { %v6387_v28 = vadd.f32 %v16900_v9, %v5329_v2  ;;  %v6595_v42 = vadd.f32 %v13537_v19, %v17757_v21  ;;  %v5331_v26 = vpop.f32.mrb[101].mxu0  ;;  %v6586_v48 = vpop.f32.mrb[101].mxu1 }
 0x5aa   : > { %v6587_v36 = vadd.f32 %v6586_v48, %v17758_v29  ;;  %v5332_v23 = vpop.f32.mrb[102].mxu0  ;;  %v13538_v43 = vpop.f32.mrb[102].mxu1  ;;  %v1757_v26 = vld [vmem:[#allocation2 + $0x5b0] sm:$0xff] }
 0x5ab   : > { %v6875_v12 = vadd.f32 %v6387_v28, %v1753_v57  ;;  %v6927_v25 = vadd.f32 %v6595_v42, %v1805_v50  ;;  %v6390_v34 = vadd.f32 %v16905_v20, %v5332_v23  ;;  %v6598_v14 = vadd.f32 %v13538_v43, %v17759_v62  ;;  %v5334_v56 = vpop.f32.mrb[103].mxu0  ;;  %v6589_v9 = vpop.f32.mrb[103].mxu1  ;;  %v1809_v20 = vld [vmem:[#allocation2 + $0x750] sm:$0xff]  ;;  %v1808_v57 = vld [vmem:[#allocation2 + $0x748] sm:$0xff] }
 0x5ac   : > { %v6925_v15 = vadd.f32 %v6587_v36, %v1803_v53  ;;  %v6590_v58 = vadd.f32 %v6589_v9, %v17760_v16  ;;  %v17764_v50 = vld [vmem:[#allocation48_spill] sm:$0xff]  ;;  %v17765_v36 = vld [vmem:[#allocation55_spill] sm:$0xff]  ;;  %v17767_v16 = vld [vmem:[#allocation57_spill] sm:$0xff] }
 0x5ad   : > { %7131 = vst [vmem:[#allocation2 + $0x590] sm:$0xff] %v6875_v12  ;;  %7183 = vst [vmem:[#allocation2 + $0x730] sm:$0xff] %v6927_v25  ;;  %v6876_v52 = vadd.f32 %v6390_v34, %v1754_v5  ;;  %v6928_v46 = vadd.f32 %v6598_v14, %v1806_v51  ;;  %v1811_v51 = vld [vmem:[#allocation2 + $0x760] sm:$0xff]  ;;  %v17766_v12 = vld [vmem:[#allocation52_spill] sm:$0xff] }
 0x5ae   : > { %7181 = vst [vmem:[#allocation2 + $0x720] sm:$0xff] %v6925_v15  ;;  %v6926_v18 = vadd.f32 %v6590_v58, %v1804_v47  ;;  %v1758_v34 = vld [vmem:[#allocation2 + $0x5b8] sm:$0xff] }
 0x5af   : > { %7132 = vst [vmem:[#allocation2 + $0x598] sm:$0xff] %v6876_v52  ;;  %7184 = vst [vmem:[#allocation2 + $0x738] sm:$0xff] %v6928_v46  ;;  %v1814_v14 = vld [vmem:[#allocation2 + $0x778] sm:$0xff]  ;;  %v1812_v46 = vld [vmem:[#allocation2 + $0x768] sm:$0xff] }
 0x5b0   : > { %7182 = vst [vmem:[#allocation2 + $0x728] sm:$0xff] %v6926_v18  ;;  %v5337_v37 = vpop.f32.mrb[104].mxu0  ;;  %v13541_v0 = vpop.f32.mrb[104].mxu1 }
 0x5b1   : > { %v6395_v17 = vadd.f32 %v16913_v40, %v5337_v37  ;;  %v6611_v24 = vadd.f32 %v13541_v0, %v17761_v30  ;;  %v5339_v38 = vpop.f32.mrb[105].mxu0  ;;  %v6602_v32 = vpop.f32.mrb[105].mxu1  ;;  %v1759_v30 = vld [vmem:[#allocation2 + $0x5c0] sm:$0xff] }
 0x5b2   : > { %v6603_v13 = vadd.f32 %v6602_v32, %v17762_v63  ;;  %v5340_v1 = vpop.f32.mrb[106].mxu0  ;;  %v13542_v22 = vpop.f32.mrb[106].mxu1  ;;  %v17769_v32 = vld [vmem:[#allocation63_spill] sm:$0xff] }
 0x5b3   : > { %v6877_v49 = vadd.f32 %v6395_v17, %v1755_v4  ;;  %v6931_v6 = vadd.f32 %v6611_v24, %v1809_v20  ;;  %v6398_v31 = vadd.f32 %v16918_v41, %v5340_v1  ;;  %v6614_v61 = vadd.f32 %v13542_v22, %v17763_v55  ;;  %v5342_v11 = vpop.f32.mrb[107].mxu0  ;;  %v6605_v40 = vpop.f32.mrb[107].mxu1  ;;  %v1813_v41 = vld [vmem:[#allocation2 + $0x770] sm:$0xff]  ;;  %v17768_v4 = vld [vmem:[#allocation54_spill] sm:$0xff] }
 0x5b4   : > { %v6929_v2 = vadd.f32 %v6603_v13, %v1807_v10  ;;  %v6606_v19 = vadd.f32 %v6605_v40, %v17764_v50  ;;  %v17771_v40 = vld [vmem:[#allocation65_spill] sm:$0xff] }
 0x5b5   : > { %7133 = vst [vmem:[#allocation2 + $0x5a0] sm:$0xff] %v6877_v49  ;;  %7187 = vst [vmem:[#allocation2 + $0x750] sm:$0xff] %v6931_v6  ;;  %v6878_v28 = vadd.f32 %v6398_v31, %v1756_v44  ;;  %v6932_v21 = vadd.f32 %v6614_v61, %v1810_v60  ;;  %v1815_v44 = vld [vmem:[#allocation2 + $0x780] sm:$0xff]  ;;  %v1760_v49 = vld [vmem:[#allocation2 + $0x5c8] sm:$0xff] }
 0x5b6   : > { %7185 = vst [vmem:[#allocation2 + $0x740] sm:$0xff] %v6929_v2  ;;  %v6930_v42 = vadd.f32 %v6606_v19, %v1808_v57  ;;  %v17770_v60 = vld [vmem:[#allocation59_spill] sm:$0xff]  ;;  %v1818_v31 = vld [vmem:[#allocation2 + $0x798] sm:$0xff]  ;;  %v1816_v19 = vld [vmem:[#allocation2 + $0x788] sm:$0xff] }
 0x5b7   : > { %7134 = vst [vmem:[#allocation2 + $0x5a8] sm:$0xff] %v6878_v28  ;;  %7188 = vst [vmem:[#allocation2 + $0x758] sm:$0xff] %v6932_v21  ;;  %v17772_v21 = vld [vmem:[#allocation61_spill] sm:$0xff] }
 0x5b8   : > { %7186 = vst [vmem:[#allocation2 + $0x748] sm:$0xff] %v6930_v42  ;;  %v5345_v53 = vpop.f32.mrb[108].mxu0  ;;  %v13545_v48 = vpop.f32.mrb[108].mxu1 }
 0x5b9   : > { %v6403_v29 = vadd.f32 %v16910_v45, %v5345_v53  ;;  %v6627_v5 = vadd.f32 %v13545_v48, %v17765_v36  ;;  %v5347_v23 = vpop.f32.mrb[109].mxu0  ;;  %v6618_v43 = vpop.f32.mrb[109].mxu1  ;;  %v1761_v48 = vld [vmem:[#allocation2 + $0x5d0] sm:$0xff] }
 0x5ba   : > { %v6619_v25 = vadd.f32 %v6618_v43, %v17766_v12  ;;  %v5348_v62 = vpop.f32.mrb[110].mxu0  ;;  %v13546_v56 = vpop.f32.mrb[110].mxu1  ;;  %v17773_v23 = vld [vmem:[#allocation71_spill] sm:$0xff] }
 0x5bb   : > { %v6879_v47 = vadd.f32 %v6403_v29, %v1757_v26  ;;  %v6935_v9 = vadd.f32 %v6627_v5, %v1813_v41  ;;  %v6406_v15 = vadd.f32 %v16915_v54, %v5348_v62  ;;  %v6630_v58 = vadd.f32 %v13546_v56, %v17767_v16  ;;  %v5350_v52 = vpop.f32.mrb[111].mxu0  ;;  %v6621_v45 = vpop.f32.mrb[111].mxu1  ;;  %v1817_v54 = vld [vmem:[#allocation2 + $0x790] sm:$0xff]  ;;  %v1819_v12 = vld [vmem:[#allocation2 + $0x7a0] sm:$0xff] }
 0x5bc   : > { %v6933_v18 = vadd.f32 %v6619_v25, %v1811_v51  ;;  %v6622_v37 = vadd.f32 %v6621_v45, %v17768_v4  ;;  %v17775_v52 = vld [vmem:[#allocation73_spill] sm:$0xff] }
 0x5bd   : > { %7135 = vst [vmem:[#allocation2 + $0x5b0] sm:$0xff] %v6879_v47  ;;  %7191 = vst [vmem:[#allocation2 + $0x770] sm:$0xff] %v6935_v9  ;;  %v6880_v20 = vadd.f32 %v6406_v15, %v1758_v34  ;;  %v6936_v0 = vadd.f32 %v6630_v58, %v1814_v14  ;;  %v17774_v34 = vld [vmem:[#allocation67_spill] sm:$0xff]  ;;  %v1762_v14 = vld [vmem:[#allocation2 + $0x5d8] sm:$0xff] }
 0x5be   : > { %7189 = vst [vmem:[#allocation2 + $0x760] sm:$0xff] %v6933_v18  ;;  %v6934_v17 = vadd.f32 %v6622_v37, %v1812_v46  ;;  %v1822_v47 = vld [vmem:[#allocation2 + $0x7b8] sm:$0xff]  ;;  %v1820_v18 = vld [vmem:[#allocation2 + $0x7a8] sm:$0xff]  ;;  %v17776_v37 = vld [vmem:[#allocation69_spill] sm:$0xff] }
 0x5bf   : > { %7136 = vst [vmem:[#allocation2 + $0x5b8] sm:$0xff] %v6880_v20  ;;  %7192 = vst [vmem:[#allocation2 + $0x778] sm:$0xff] %v6936_v0 }
 0x5c0   : > { %7190 = vst [vmem:[#allocation2 + $0x768] sm:$0xff] %v6934_v17  ;;  %v5353_v24 = vpop.f32.mrb[112].mxu0  ;;  %v13549_v38 = vpop.f32.mrb[112].mxu1 }
 0x5c1   : > { %v6411_v10 = vadd.f32 %v16923_v8, %v5353_v24  ;;  %v6643_v63 = vadd.f32 %v13549_v38, %v17769_v32  ;;  %v5355_v13 = vpop.f32.mrb[113].mxu0  ;;  %v6634_v1 = vpop.f32.mrb[113].mxu1  ;;  %v1763_v24 = vld [vmem:[#allocation2 + $0x5e0] sm:$0xff] }
 0x5c2   : > { %v6635_v22 = vadd.f32 %v6634_v1, %v17770_v60  ;;  %v5356_v6 = vpop.f32.mrb[114].mxu0  ;;  %v13550_v55 = vpop.f32.mrb[114].mxu1  ;;  %v17777_v32 = vld [vmem:[#allocation79_spill] sm:$0xff] }
 0x5c3   : > { %v6881_v61 = vadd.f32 %v6411_v10, %v1759_v30  ;;  %v6939_v11 = vadd.f32 %v6643_v63, %v1817_v54  ;;  %v6414_v57 = vadd.f32 %v16928_v33, %v5356_v6  ;;  %v6646_v2 = vadd.f32 %v13550_v55, %v17771_v40  ;;  %v5358_v50 = vpop.f32.mrb[115].mxu0  ;;  %v6637_v8 = vpop.f32.mrb[115].mxu1  ;;  %v1821_v33 = vld [vmem:[#allocation2 + $0x7b0] sm:$0xff]  ;;  %v17778_v60 = vld [vmem:[#allocation75_spill] sm:$0xff] }
 0x5c4   : > { %v6937_v28 = vadd.f32 %v6635_v22, %v1815_v44  ;;  %v6638_v42 = vadd.f32 %v6637_v8, %v17772_v21  ;;  %v1823_v44 = vld [vmem:[#allocation2 + $0x7c0] sm:$0xff]  ;;  %v17779_v40 = vld [vmem:[#allocation81_spill] sm:$0xff] }
 0x5c5   : > { %7137 = vst [vmem:[#allocation2 + $0x5c0] sm:$0xff] %v6881_v61  ;;  %7195 = vst [vmem:[#allocation2 + $0x790] sm:$0xff] %v6939_v11  ;;  %v6882_v26 = vadd.f32 %v6414_v57, %v1760_v49  ;;  %v6940_v53 = vadd.f32 %v6646_v2, %v1818_v31  ;;  %v1764_v49 = vld [vmem:[#allocation2 + $0x5e8] sm:$0xff]  ;;  %v1826_v31 = vld [vmem:[#allocation2 + $0x7d8] sm:$0xff] }
 0x5c6   : > { %7193 = vst [vmem:[#allocation2 + $0x780] sm:$0xff] %v6937_v28  ;;  %v6938_v41 = vadd.f32 %v6638_v42, %v1816_v19  ;;  %v1824_v19 = vld [vmem:[#allocation2 + $0x7c8] sm:$0xff]  ;;  %v17780_v28 = vld [vmem:[#allocation77_spill] sm:$0xff] }
 0x5c7   : > { %7138 = vst [vmem:[#allocation2 + $0x5c8] sm:$0xff] %v6882_v26  ;;  %7196 = vst [vmem:[#allocation2 + $0x798] sm:$0xff] %v6940_v53 }
 0x5c8   : > { %7194 = vst [vmem:[#allocation2 + $0x788] sm:$0xff] %v6938_v41  ;;  %v5361_v29 = vpop.f32.mrb[116].mxu0  ;;  %v13553_v36 = vpop.f32.mrb[116].mxu1  ;;  %v1765_v41 = vld [vmem:[#allocation2 + $0x5f0] sm:$0xff] }
 0x5c9   : > { %v6419_v5 = vadd.f32 %v16920_v27, %v5361_v29  ;;  %v6659_v51 = vadd.f32 %v13553_v36, %v17773_v23  ;;  %v5363_v43 = vpop.f32.mrb[117].mxu0  ;;  %v6650_v25 = vpop.f32.mrb[117].mxu1  ;;  %v17781_v36 = vld [vmem:[#allocation87_spill] sm:$0xff] }
 0x5ca   : > { %v6651_v62 = vadd.f32 %v6650_v25, %v17774_v34  ;;  %v5364_v56 = vpop.f32.mrb[118].mxu0  ;;  %v13554_v9 = vpop.f32.mrb[118].mxu1  ;;  %v1766_v34 = vld [vmem:[#allocation2 + $0x5f8] sm:$0xff] }
 0x5cb   : > { %v6883_v15 = vadd.f32 %v6419_v5, %v1761_v48  ;;  %v6943_v16 = vadd.f32 %v6659_v51, %v1821_v33  ;;  %v6422_v58 = vadd.f32 %v16925_v59, %v5364_v56  ;;  %v6662_v46 = vadd.f32 %v13554_v9, %v17775_v52  ;;  %v5366_v45 = vpop.f32.mrb[119].mxu0  ;;  %v6653_v27 = vpop.f32.mrb[119].mxu1  ;;  %v1825_v59 = vld [vmem:[#allocation2 + $0x7d0] sm:$0xff]  ;;  %v1827_v51 = vld [vmem:[#allocation2 + $0x7e0] sm:$0xff] }
 0x5cc   : > { %v6941_v4 = vadd.f32 %v6651_v62, %v1819_v12  ;;  %v6654_v20 = vadd.f32 %v6653_v27, %v17776_v37  ;;  %v17782_v12 = vld [vmem:[#allocation83_spill] sm:$0xff] }
 0x5cd   : > { %7139 = vst [vmem:[#allocation2 + $0x5d0] sm:$0xff] %v6883_v15  ;;  %7199 = vst [vmem:[#allocation2 + $0x7b0] sm:$0xff] %v6943_v16  ;;  %v6884_v0 = vadd.f32 %v6422_v58, %v1762_v14  ;;  %v6944_v17 = vadd.f32 %v6662_v46, %v1822_v47  ;;  %v1830_v14 = vld [vmem:[#allocation2 + $0x7f8] sm:$0xff]  ;;  %v17783_v16 = vld [vmem:[#allocation89_spill] sm:$0xff] }
 0x5ce   : > { %7197 = vst [vmem:[#allocation2 + $0x7a0] sm:$0xff] %v6941_v4  ;;  %v6942_v30 = vadd.f32 %v6654_v20, %v1820_v18  ;;  %v1828_v46 = vld [vmem:[#allocation2 + $0x7e8] sm:$0xff]  ;;  %v17784_v18 = vld [vmem:[#allocation85_spill] sm:$0xff] }
 0x5cf   : > { %7140 = vst [vmem:[#allocation2 + $0x5d8] sm:$0xff] %v6884_v0  ;;  %7200 = vst [vmem:[#allocation2 + $0x7b8] sm:$0xff] %v6944_v17  ;;  %v7214_v0 = vld [vmem:[#allocation2 + $0x8] sm:$0xff] (!%p11870_p11)  ;;  %v7215_v17 = vld [vmem:[#allocation2 + $0x10] sm:$0xff] (!%p11870_p11) }
 0x5d0   : > { %7198 = vst [vmem:[#allocation2 + $0x7a8] sm:$0xff] %v6942_v30  ;;  %v5369_v54 = vpop.f32.mrb[120].mxu0  ;;  %v13557_v38 = vpop.f32.mrb[120].mxu1  ;;  %v7216_v30 = vld [vmem:[#allocation2 + $0x18] sm:$0xff] (!%p11870_p11) }
 0x5d1   : > { %v6427_v10 = vadd.f32 %v16933_v3, %v5369_v54  ;;  %v6675_v63 = vadd.f32 %v13557_v38, %v17777_v32  ;;  %v5371_v13 = vpop.f32.mrb[121].mxu0  ;;  %v6666_v1 = vpop.f32.mrb[121].mxu1  ;;  %v7733_v38 = vmul.f32 (!%p11870_p11), %v7215_v17, %v7215_v17 }
 0x5d2   : > { %v6667_v22 = vadd.f32 %v6666_v1, %v17778_v60  ;;  %v5372_v6 = vpop.f32.mrb[122].mxu0  ;;  %v13558_v55 = vpop.f32.mrb[122].mxu1 }
 0x5d3   : > { %v6885_v61 = vadd.f32 %v6427_v10, %v1763_v24  ;;  %v6947_v11 = vadd.f32 %v6675_v63, %v1825_v59  ;;  %v6430_v57 = vadd.f32 %v16938_v7, %v5372_v6  ;;  %v6678_v2 = vadd.f32 %v13558_v55, %v17779_v40  ;;  %v5374_v50 = vpop.f32.mrb[123].mxu0  ;;  %v6669_v3 = vpop.f32.mrb[123].mxu1  ;;  %v1829_v7 = vld [vmem:[#allocation2 + $0x7f0] sm:$0xff]  ;;  %v7217_v10 = vld [vmem:[#allocation2 + $0x20] sm:$0xff] (!%p11870_p11) }
 0x5d4   : > { %v6945_v8 = vadd.f32 %v6667_v22, %v1823_v44  ;;  %v6670_v21 = vadd.f32 %v6669_v3, %v17780_v28  ;;  %v7732_v59 = vmul.f32 (!%p11870_p11), %v7214_v0, %v7214_v0  ;;  %v7734_v63 = vmul.f32 (!%p11870_p11), %v7216_v30, %v7216_v30  ;;  %v7218_v44 = vld [vmem:[#allocation2 + $0x28] sm:$0xff] (!%p11870_p11) }
 0x5d5   : > { %7141 = vst [vmem:[#allocation2 + $0x5e0] sm:$0xff] %v6885_v61  ;;  %7203 = vst [vmem:[#allocation2 + $0x7d0] sm:$0xff] %v6947_v11  ;;  %v6886_v42 = vadd.f32 %v6430_v57, %v1764_v49  ;;  %v6948_v26 = vadd.f32 %v6678_v2, %v1826_v31  ;;  %v7735_v60 = vmul.f32 (!%p11870_p11), %v7217_v10, %v7217_v10  ;;  %v7219_v49 = vld [vmem:[#allocation2 + $0x30] sm:$0xff] (!%p11870_p11)  ;;  %v7220_v61 = vld [vmem:[#allocation2 + $0x38] sm:$0xff] (!%p11870_p11) }
 0x5d6   : > { %7201 = vst [vmem:[#allocation2 + $0x7c0] sm:$0xff] %v6945_v8  ;;  %v6946_v53 = vadd.f32 %v6670_v21, %v1824_v19  ;;  %v7736_v31 = vmul.f32 (!%p11870_p11), %v7218_v44, %v7218_v44  ;;  %v7737_v57 = vmul.f32 (!%p11870_p11), %v7219_v49, %v7219_v49  ;;  %v7221_v2 = vld [vmem:[#allocation2 + $0x40] sm:$0xff] (!%p11870_p11)  ;;  %v7738_v19 = vmul.f32 (!%p11870_p11), %v7220_v61, %v7220_v61  ;;  %v7222_v8 = vld [vmem:[#allocation2 + $0x48] sm:$0xff] (!%p11870_p11) }
 0x5d7   : > { %7142 = vst [vmem:[#allocation2 + $0x5e8] sm:$0xff] %v6886_v42  ;;  %7204 = vst [vmem:[#allocation2 + $0x7d8] sm:$0xff] %v6948_v26  ;;  %v7739_v21 = vmul.f32 (!%p11870_p11), %v7221_v2, %v7221_v2  ;;  %v7223_v26 = vld [vmem:[#allocation2 + $0x50] sm:$0xff] (!%p11870_p11) }
 0x5d8   : > { %7202 = vst [vmem:[#allocation2 + $0x7c8] sm:$0xff] %v6946_v53  ;;  %v5377_v48 = vpop.f32.mrb[124].mxu0  ;;  %v13561_v29 = vpop.f32.mrb[124].mxu1 }
 0x5d9   : > { %v6435_v33 = vadd.f32 %v16930_v35, %v5377_v48  ;;  %v6691_v5 = vadd.f32 %v13561_v29, %v17781_v36  ;;  %v5379_v23 = vpop.f32.mrb[125].mxu0  ;;  %v6682_v43 = vpop.f32.mrb[125].mxu1 }
 0x5da   : > { %v6683_v25 = vadd.f32 %v6682_v43, %v17782_v12  ;;  %v5380_v62 = vpop.f32.mrb[126].mxu0  ;;  %v13562_v56 = vpop.f32.mrb[126].mxu1  ;;  %7212 = sbr.rel (%p11870_p11) target bundleno = 2406 (0x966), region = 70  ;;  %v7226_v12 = vld [vmem:[#allocation2 + $0x68] sm:$0xff] (!%p11870_p11) }
 0x5db   : > { %v6887_v47 = vadd.f32 %v6435_v33, %v1765_v41  ;;  %v6951_v9 = vadd.f32 %v6691_v5, %v1829_v7  ;;  %v6438_v15 = vadd.f32 %v16935_v39, %v5380_v62  ;;  %v6694_v58 = vadd.f32 %v13562_v56, %v17783_v16  ;;  %v5382_v52 = vpop.f32.mrb[127].mxu0  ;;  %v6685_v35 = vpop.f32.mrb[127].mxu1  ;;  %v7213_v39 = vld [vmem:[#allocation2] sm:$0xff] (!%p11870_p11)  ;;  %v7224_v7 = vld [vmem:[#allocation2 + $0x58] sm:$0xff] (!%p11870_p11) }
 0x5dc   : > { %v6949_v45 = vadd.f32 %v6683_v25, %v1827_v51  ;;  %v6686_v27 = vadd.f32 %v6685_v35, %v17784_v18  ;;  %v7469_v24 = vadd.f32 (!%p11870_p11), %v7214_v0, %v7213_v39  ;;  %v7731_v54 = vmul.f32 (!%p11870_p11), %v7213_v39, %v7213_v39  ;;  %v7225_v5 = vld [vmem:[#allocation2 + $0x60] sm:$0xff] (!%p11870_p11)  ;;  %v7231_v39 = vld [vmem:[#allocation2 + $0x90] sm:$0xff] (!%p11870_p11) }
 0x5dd   : > { %7143 = vst [vmem:[#allocation2 + $0x5f0] sm:$0xff] %v6887_v47  ;;  %7207 = vst [vmem:[#allocation2 + $0x7f0] sm:$0xff] %v6951_v9  ;;  %v6888_v4 = vadd.f32 %v6438_v15, %v1766_v34  ;;  %v6952_v37 = vadd.f32 %v6694_v58, %v1830_v14  ;;  %v7740_v41 = vmul.f32 (!%p11870_p11), %v7222_v8, %v7222_v8  ;;  %v7227_v14 = vld [vmem:[#allocation2 + $0x70] sm:$0xff] (!%p11870_p11)  ;;  %v7228_v15 = vld [vmem:[#allocation2 + $0x78] sm:$0xff] (!%p11870_p11) }
 0x5de   : > { %7205 = vst [vmem:[#allocation2 + $0x7e0] sm:$0xff] %v6949_v45  ;;  %v6950_v20 = vadd.f32 %v6686_v27, %v1828_v46  ;;  %v7470_v32 = vadd.f32 (!%p11870_p11), %v7469_v24, %v7215_v17  ;;  %v7987_v13 = vadd.f32 (!%p11870_p11), %v7732_v59, %v7731_v54  ;;  %v7741_v33 = vmul.f32 (!%p11870_p11), %v7223_v26, %v7223_v26  ;;  %v7229_v46 = vld [vmem:[#allocation2 + $0x80] sm:$0xff] (!%p11870_p11)  ;;  %v7230_v27 = vld [vmem:[#allocation2 + $0x88] sm:$0xff] (!%p11870_p11)  ;;  %v7232_v24 = vld [vmem:[#allocation2 + $0x98] sm:$0xff] (!%p11870_p11) }
 0x5df   : > { %7144 = vst [vmem:[#allocation2 + $0x5f8] sm:$0xff] %v6888_v4  ;;  %7208 = vst [vmem:[#allocation2 + $0x7f8] sm:$0xff] %v6952_v37  ;;  %v7742_v51 = vmul.f32 (!%p11870_p11), %v7224_v7, %v7224_v7  ;;  %v7743_v34 = vmul.f32 (!%p11870_p11), %v7225_v5, %v7225_v5  ;;  %v7744_v47 = vmul.f32 (!%p11870_p11), %v7226_v12, %v7226_v12 }
 0x5e0   : > { %7206 = vst [vmem:[#allocation2 + $0x7e8] sm:$0xff] %v6950_v20  ;;  %v7471_v1 = vadd.f32 (!%p11870_p11), %v7470_v32, %v7216_v30  ;;  %v7988_v22 = vadd.f32 (!%p11870_p11), %v7987_v13, %v7733_v38  ;;  %v7745_v58 = vmul.f32 (!%p11870_p11), %v7227_v14, %v7227_v14  ;;  %v7746_v45 = vmul.f32 (!%p11870_p11), %v7228_v15, %v7228_v15 }
 0x5e1   : > { %v7747_v37 = vmul.f32 %v7229_v46, %v7229_v46  ;;  %v7748_v17 = vmul.f32 %v7230_v27, %v7230_v27  ;;  %v7749_v59 = vmul.f32 %v7231_v39, %v7231_v39 }
 0x5e2   : > { %v7472_v6 = vadd.f32 %v7471_v1, %v7217_v10  ;;  %v7989_v55 = vadd.f32 %v7988_v22, %v7734_v63  ;;  %v7233_v10 = vld [vmem:[#allocation2 + $0xa0] sm:$0xff]  ;;  %v7750_v63 = vmul.f32 %v7232_v24, %v7232_v24 }
 0x5e4   : > { %v7473_v11 = vadd.f32 %v7472_v6, %v7218_v44  ;;  %v7990_v40 = vadd.f32 %v7989_v55, %v7735_v60  ;;  %v7234_v44 = vld [vmem:[#allocation2 + $0xa8] sm:$0xff]  ;;  %v7751_v60 = vmul.f32 %v7233_v10, %v7233_v10 }
 0x5e6   : > { %v7474_v50 = vadd.f32 %v7473_v11, %v7219_v49  ;;  %v7991_v3 = vadd.f32 %v7990_v40, %v7736_v31  ;;  %v7235_v49 = vld [vmem:[#allocation2 + $0xb0] sm:$0xff]  ;;  %v7752_v31 = vmul.f32 %v7234_v44, %v7234_v44 }
 0x5e8   : > { %v7475_v28 = vadd.f32 %v7474_v50, %v7220_v61  ;;  %v7992_v42 = vadd.f32 %v7991_v3, %v7737_v57  ;;  %v7236_v61 = vld [vmem:[#allocation2 + $0xb8] sm:$0xff]  ;;  %v7753_v57 = vmul.f32 %v7235_v49, %v7235_v49 }
 0x5ea   : > { %v7476_v53 = vadd.f32 %v7475_v28, %v7221_v2  ;;  %v7993_v48 = vadd.f32 %v7992_v42, %v7738_v19  ;;  %v7237_v2 = vld [vmem:[#allocation2 + $0xc0] sm:$0xff]  ;;  %v7754_v19 = vmul.f32 %v7236_v61, %v7236_v61 }
 0x5ec   : > { %v7477_v29 = vadd.f32 %v7476_v53, %v7222_v8  ;;  %v7994_v36 = vadd.f32 %v7993_v48, %v7739_v21  ;;  %v7238_v8 = vld [vmem:[#allocation2 + $0xc8] sm:$0xff]  ;;  %v7755_v21 = vmul.f32 %v7237_v2, %v7237_v2 }
 0x5ee   : > { %v7478_v23 = vadd.f32 %v7477_v29, %v7223_v26  ;;  %v7995_v43 = vadd.f32 %v7994_v36, %v7740_v41  ;;  %v7239_v26 = vld [vmem:[#allocation2 + $0xd0] sm:$0xff]  ;;  %v7756_v41 = vmul.f32 %v7238_v8, %v7238_v8 }
 0x5f0   : > { %v7479_v25 = vadd.f32 %v7478_v23, %v7224_v7  ;;  %v7996_v62 = vadd.f32 %v7995_v43, %v7741_v33  ;;  %v7240_v7 = vld [vmem:[#allocation2 + $0xd8] sm:$0xff]  ;;  %v7757_v33 = vmul.f32 %v7239_v26, %v7239_v26 }
 0x5f2   : > { %v7480_v56 = vadd.f32 %v7479_v25, %v7225_v5  ;;  %v7997_v9 = vadd.f32 %v7996_v62, %v7742_v51  ;;  %v7241_v5 = vld [vmem:[#allocation2 + $0xe0] sm:$0xff]  ;;  %v7758_v51 = vmul.f32 %v7240_v7, %v7240_v7 }
 0x5f4   : > { %v7481_v16 = vadd.f32 %v7480_v56, %v7226_v12  ;;  %v7998_v52 = vadd.f32 %v7997_v9, %v7743_v34  ;;  %v7242_v12 = vld [vmem:[#allocation2 + $0xe8] sm:$0xff]  ;;  %v7759_v34 = vmul.f32 %v7241_v5, %v7241_v5 }
 0x5f6   : > { %v7482_v35 = vadd.f32 %v7481_v16, %v7227_v14  ;;  %v7999_v18 = vadd.f32 %v7998_v52, %v7744_v47  ;;  %v7243_v14 = vld [vmem:[#allocation2 + $0xf0] sm:$0xff]  ;;  %v7760_v47 = vmul.f32 %v7242_v12, %v7242_v12 }
 0x5f8   : > { %v7483_v4 = vadd.f32 %v7482_v35, %v7228_v15  ;;  %v8000_v20 = vadd.f32 %v7999_v18, %v7745_v58  ;;  %v7244_v15 = vld [vmem:[#allocation2 + $0xf8] sm:$0xff]  ;;  %v7761_v58 = vmul.f32 %v7243_v14, %v7243_v14 }
 0x5fa   : > { %v7484_v0 = vadd.f32 %v7483_v4, %v7229_v46  ;;  %v8001_v30 = vadd.f32 %v8000_v20, %v7746_v45  ;;  %v7245_v46 = vld [vmem:[#allocation2 + $0x100] sm:$0xff]  ;;  %v7762_v45 = vmul.f32 %v7244_v15, %v7244_v15 }
 0x5fc   : > { %v7485_v54 = vadd.f32 %v7484_v0, %v7230_v27  ;;  %v8002_v38 = vadd.f32 %v8001_v30, %v7747_v37  ;;  %v7246_v27 = vld [vmem:[#allocation2 + $0x108] sm:$0xff]  ;;  %v7763_v37 = vmul.f32 %v7245_v46, %v7245_v46 }
 0x5fe   : > { %v7486_v32 = vadd.f32 %v7485_v54, %v7231_v39  ;;  %v8003_v13 = vadd.f32 %v8002_v38, %v7748_v17  ;;  %v7247_v39 = vld [vmem:[#allocation2 + $0x110] sm:$0xff]  ;;  %v7764_v17 = vmul.f32 %v7246_v27, %v7246_v27 }
 0x600   : > { %v7487_v1 = vadd.f32 %v7486_v32, %v7232_v24  ;;  %v8004_v22 = vadd.f32 %v8003_v13, %v7749_v59  ;;  %v7248_v24 = vld [vmem:[#allocation2 + $0x118] sm:$0xff]  ;;  %v7765_v59 = vmul.f32 %v7247_v39, %v7247_v39 }
 0x602   : > { %v7488_v6 = vadd.f32 %v7487_v1, %v7233_v10  ;;  %v8005_v55 = vadd.f32 %v8004_v22, %v7750_v63  ;;  %v7249_v10 = vld [vmem:[#allocation2 + $0x120] sm:$0xff]  ;;  %v7766_v63 = vmul.f32 %v7248_v24, %v7248_v24 }
 0x604   : > { %v7489_v11 = vadd.f32 %v7488_v6, %v7234_v44  ;;  %v8006_v40 = vadd.f32 %v8005_v55, %v7751_v60  ;;  %v7250_v44 = vld [vmem:[#allocation2 + $0x128] sm:$0xff]  ;;  %v7767_v60 = vmul.f32 %v7249_v10, %v7249_v10 }
 0x606   : > { %v7490_v50 = vadd.f32 %v7489_v11, %v7235_v49  ;;  %v8007_v3 = vadd.f32 %v8006_v40, %v7752_v31  ;;  %v7251_v49 = vld [vmem:[#allocation2 + $0x130] sm:$0xff]  ;;  %v7768_v31 = vmul.f32 %v7250_v44, %v7250_v44 }
 0x608   : > { %v7491_v28 = vadd.f32 %v7490_v50, %v7236_v61  ;;  %v8008_v42 = vadd.f32 %v8007_v3, %v7753_v57  ;;  %v7252_v61 = vld [vmem:[#allocation2 + $0x138] sm:$0xff]  ;;  %v7769_v57 = vmul.f32 %v7251_v49, %v7251_v49 }
 0x60a   : > { %v7492_v53 = vadd.f32 %v7491_v28, %v7237_v2  ;;  %v8009_v48 = vadd.f32 %v8008_v42, %v7754_v19  ;;  %v7253_v2 = vld [vmem:[#allocation2 + $0x140] sm:$0xff]  ;;  %v7770_v19 = vmul.f32 %v7252_v61, %v7252_v61 }
 0x60c   : > { %v7493_v29 = vadd.f32 %v7492_v53, %v7238_v8  ;;  %v8010_v36 = vadd.f32 %v8009_v48, %v7755_v21  ;;  %v7254_v8 = vld [vmem:[#allocation2 + $0x148] sm:$0xff]  ;;  %v7771_v21 = vmul.f32 %v7253_v2, %v7253_v2 }
 0x60e   : > { %v7494_v23 = vadd.f32 %v7493_v29, %v7239_v26  ;;  %v8011_v43 = vadd.f32 %v8010_v36, %v7756_v41  ;;  %v7255_v26 = vld [vmem:[#allocation2 + $0x150] sm:$0xff]  ;;  %v7772_v41 = vmul.f32 %v7254_v8, %v7254_v8 }
 0x610   : > { %v7495_v25 = vadd.f32 %v7494_v23, %v7240_v7  ;;  %v8012_v62 = vadd.f32 %v8011_v43, %v7757_v33  ;;  %v7256_v7 = vld [vmem:[#allocation2 + $0x158] sm:$0xff]  ;;  %v7773_v33 = vmul.f32 %v7255_v26, %v7255_v26 }
 0x612   : > { %v7496_v56 = vadd.f32 %v7495_v25, %v7241_v5  ;;  %v8013_v9 = vadd.f32 %v8012_v62, %v7758_v51  ;;  %v7257_v5 = vld [vmem:[#allocation2 + $0x160] sm:$0xff]  ;;  %v7774_v51 = vmul.f32 %v7256_v7, %v7256_v7 }
 0x614   : > { %v7497_v16 = vadd.f32 %v7496_v56, %v7242_v12  ;;  %v8014_v52 = vadd.f32 %v8013_v9, %v7759_v34  ;;  %v7258_v12 = vld [vmem:[#allocation2 + $0x168] sm:$0xff]  ;;  %v7775_v34 = vmul.f32 %v7257_v5, %v7257_v5 }
 0x616   : > { %v7498_v35 = vadd.f32 %v7497_v16, %v7243_v14  ;;  %v8015_v18 = vadd.f32 %v8014_v52, %v7760_v47  ;;  %v7259_v14 = vld [vmem:[#allocation2 + $0x170] sm:$0xff]  ;;  %v7776_v47 = vmul.f32 %v7258_v12, %v7258_v12 }
 0x618   : > { %v7499_v4 = vadd.f32 %v7498_v35, %v7244_v15  ;;  %v8016_v20 = vadd.f32 %v8015_v18, %v7761_v58  ;;  %v7260_v15 = vld [vmem:[#allocation2 + $0x178] sm:$0xff]  ;;  %v7777_v58 = vmul.f32 %v7259_v14, %v7259_v14 }
 0x61a   : > { %v7500_v0 = vadd.f32 %v7499_v4, %v7245_v46  ;;  %v8017_v30 = vadd.f32 %v8016_v20, %v7762_v45  ;;  %v7261_v46 = vld [vmem:[#allocation2 + $0x180] sm:$0xff]  ;;  %v7778_v45 = vmul.f32 %v7260_v15, %v7260_v15 }
 0x61c   : > { %v7501_v54 = vadd.f32 %v7500_v0, %v7246_v27  ;;  %v8018_v38 = vadd.f32 %v8017_v30, %v7763_v37  ;;  %v7262_v27 = vld [vmem:[#allocation2 + $0x188] sm:$0xff]  ;;  %v7779_v37 = vmul.f32 %v7261_v46, %v7261_v46 }
 0x61e   : > { %v7502_v32 = vadd.f32 %v7501_v54, %v7247_v39  ;;  %v8019_v13 = vadd.f32 %v8018_v38, %v7764_v17  ;;  %v7263_v39 = vld [vmem:[#allocation2 + $0x190] sm:$0xff]  ;;  %v7780_v17 = vmul.f32 %v7262_v27, %v7262_v27 }
 0x620   : > { %v7503_v1 = vadd.f32 %v7502_v32, %v7248_v24  ;;  %v8020_v22 = vadd.f32 %v8019_v13, %v7765_v59  ;;  %v7264_v24 = vld [vmem:[#allocation2 + $0x198] sm:$0xff]  ;;  %v7781_v59 = vmul.f32 %v7263_v39, %v7263_v39 }
 0x622   : > { %v7504_v6 = vadd.f32 %v7503_v1, %v7249_v10  ;;  %v8021_v55 = vadd.f32 %v8020_v22, %v7766_v63  ;;  %v7265_v10 = vld [vmem:[#allocation2 + $0x1a0] sm:$0xff]  ;;  %v7782_v63 = vmul.f32 %v7264_v24, %v7264_v24 }
 0x624   : > { %v7505_v11 = vadd.f32 %v7504_v6, %v7250_v44  ;;  %v8022_v40 = vadd.f32 %v8021_v55, %v7767_v60  ;;  %v7266_v44 = vld [vmem:[#allocation2 + $0x1a8] sm:$0xff]  ;;  %v7783_v60 = vmul.f32 %v7265_v10, %v7265_v10 }
 0x626   : > { %v7506_v50 = vadd.f32 %v7505_v11, %v7251_v49  ;;  %v8023_v3 = vadd.f32 %v8022_v40, %v7768_v31  ;;  %v7267_v49 = vld [vmem:[#allocation2 + $0x1b0] sm:$0xff]  ;;  %v7784_v31 = vmul.f32 %v7266_v44, %v7266_v44 }
 0x628   : > { %v7507_v28 = vadd.f32 %v7506_v50, %v7252_v61  ;;  %v8024_v42 = vadd.f32 %v8023_v3, %v7769_v57  ;;  %v7268_v61 = vld [vmem:[#allocation2 + $0x1b8] sm:$0xff]  ;;  %v7785_v57 = vmul.f32 %v7267_v49, %v7267_v49 }
 0x62a   : > { %v7508_v53 = vadd.f32 %v7507_v28, %v7253_v2  ;;  %v8025_v48 = vadd.f32 %v8024_v42, %v7770_v19  ;;  %v7269_v2 = vld [vmem:[#allocation2 + $0x1c0] sm:$0xff]  ;;  %v7786_v19 = vmul.f32 %v7268_v61, %v7268_v61 }
 0x62c   : > { %v7509_v29 = vadd.f32 %v7508_v53, %v7254_v8  ;;  %v8026_v36 = vadd.f32 %v8025_v48, %v7771_v21  ;;  %v7270_v8 = vld [vmem:[#allocation2 + $0x1c8] sm:$0xff]  ;;  %v7787_v21 = vmul.f32 %v7269_v2, %v7269_v2 }
 0x62e   : > { %v7510_v23 = vadd.f32 %v7509_v29, %v7255_v26  ;;  %v8027_v43 = vadd.f32 %v8026_v36, %v7772_v41  ;;  %v7271_v26 = vld [vmem:[#allocation2 + $0x1d0] sm:$0xff]  ;;  %v7788_v41 = vmul.f32 %v7270_v8, %v7270_v8 }
 0x630   : > { %v7511_v25 = vadd.f32 %v7510_v23, %v7256_v7  ;;  %v8028_v62 = vadd.f32 %v8027_v43, %v7773_v33  ;;  %v7272_v7 = vld [vmem:[#allocation2 + $0x1d8] sm:$0xff]  ;;  %v7789_v33 = vmul.f32 %v7271_v26, %v7271_v26 }
 0x632   : > { %v7512_v56 = vadd.f32 %v7511_v25, %v7257_v5  ;;  %v8029_v9 = vadd.f32 %v8028_v62, %v7774_v51  ;;  %v7273_v5 = vld [vmem:[#allocation2 + $0x1e0] sm:$0xff]  ;;  %v7790_v51 = vmul.f32 %v7272_v7, %v7272_v7 }
 0x634   : > { %v7513_v16 = vadd.f32 %v7512_v56, %v7258_v12  ;;  %v8030_v52 = vadd.f32 %v8029_v9, %v7775_v34  ;;  %v7274_v12 = vld [vmem:[#allocation2 + $0x1e8] sm:$0xff]  ;;  %v7791_v34 = vmul.f32 %v7273_v5, %v7273_v5 }
 0x636   : > { %v7514_v35 = vadd.f32 %v7513_v16, %v7259_v14  ;;  %v8031_v18 = vadd.f32 %v8030_v52, %v7776_v47  ;;  %v7275_v14 = vld [vmem:[#allocation2 + $0x1f0] sm:$0xff]  ;;  %v7792_v47 = vmul.f32 %v7274_v12, %v7274_v12 }
 0x638   : > { %v7515_v4 = vadd.f32 %v7514_v35, %v7260_v15  ;;  %v8032_v20 = vadd.f32 %v8031_v18, %v7777_v58  ;;  %v7276_v15 = vld [vmem:[#allocation2 + $0x1f8] sm:$0xff]  ;;  %v7793_v58 = vmul.f32 %v7275_v14, %v7275_v14 }
 0x63a   : > { %v7516_v0 = vadd.f32 %v7515_v4, %v7261_v46  ;;  %v8033_v30 = vadd.f32 %v8032_v20, %v7778_v45  ;;  %v7277_v46 = vld [vmem:[#allocation2 + $0x200] sm:$0xff]  ;;  %v7794_v45 = vmul.f32 %v7276_v15, %v7276_v15 }
 0x63c   : > { %v7517_v54 = vadd.f32 %v7516_v0, %v7262_v27  ;;  %v8034_v38 = vadd.f32 %v8033_v30, %v7779_v37  ;;  %v7278_v27 = vld [vmem:[#allocation2 + $0x208] sm:$0xff]  ;;  %v7795_v37 = vmul.f32 %v7277_v46, %v7277_v46 }
 0x63e   : > { %v7518_v32 = vadd.f32 %v7517_v54, %v7263_v39  ;;  %v8035_v13 = vadd.f32 %v8034_v38, %v7780_v17  ;;  %v7279_v39 = vld [vmem:[#allocation2 + $0x210] sm:$0xff]  ;;  %v7796_v17 = vmul.f32 %v7278_v27, %v7278_v27 }
 0x640   : > { %v7519_v1 = vadd.f32 %v7518_v32, %v7264_v24  ;;  %v8036_v22 = vadd.f32 %v8035_v13, %v7781_v59  ;;  %v7280_v24 = vld [vmem:[#allocation2 + $0x218] sm:$0xff]  ;;  %v7797_v59 = vmul.f32 %v7279_v39, %v7279_v39 }
 0x642   : > { %v7520_v6 = vadd.f32 %v7519_v1, %v7265_v10  ;;  %v8037_v55 = vadd.f32 %v8036_v22, %v7782_v63  ;;  %v7281_v10 = vld [vmem:[#allocation2 + $0x220] sm:$0xff]  ;;  %v7798_v63 = vmul.f32 %v7280_v24, %v7280_v24 }
 0x644   : > { %v7521_v11 = vadd.f32 %v7520_v6, %v7266_v44  ;;  %v8038_v40 = vadd.f32 %v8037_v55, %v7783_v60  ;;  %v7282_v44 = vld [vmem:[#allocation2 + $0x228] sm:$0xff]  ;;  %v7799_v60 = vmul.f32 %v7281_v10, %v7281_v10 }
 0x646   : > { %v7522_v50 = vadd.f32 %v7521_v11, %v7267_v49  ;;  %v8039_v3 = vadd.f32 %v8038_v40, %v7784_v31  ;;  %v7283_v49 = vld [vmem:[#allocation2 + $0x230] sm:$0xff]  ;;  %v7800_v31 = vmul.f32 %v7282_v44, %v7282_v44 }
 0x648   : > { %v7523_v28 = vadd.f32 %v7522_v50, %v7268_v61  ;;  %v8040_v42 = vadd.f32 %v8039_v3, %v7785_v57  ;;  %v7284_v61 = vld [vmem:[#allocation2 + $0x238] sm:$0xff]  ;;  %v7801_v57 = vmul.f32 %v7283_v49, %v7283_v49 }
 0x64a   : > { %v7524_v53 = vadd.f32 %v7523_v28, %v7269_v2  ;;  %v8041_v48 = vadd.f32 %v8040_v42, %v7786_v19  ;;  %v7285_v2 = vld [vmem:[#allocation2 + $0x240] sm:$0xff]  ;;  %v7802_v19 = vmul.f32 %v7284_v61, %v7284_v61 }
 0x64c   : > { %v7525_v29 = vadd.f32 %v7524_v53, %v7270_v8  ;;  %v8042_v36 = vadd.f32 %v8041_v48, %v7787_v21  ;;  %v7286_v8 = vld [vmem:[#allocation2 + $0x248] sm:$0xff]  ;;  %v7803_v21 = vmul.f32 %v7285_v2, %v7285_v2 }
 0x64e   : > { %v7526_v23 = vadd.f32 %v7525_v29, %v7271_v26  ;;  %v8043_v43 = vadd.f32 %v8042_v36, %v7788_v41  ;;  %v7287_v26 = vld [vmem:[#allocation2 + $0x250] sm:$0xff]  ;;  %v7804_v41 = vmul.f32 %v7286_v8, %v7286_v8 }
 0x650   : > { %v7527_v25 = vadd.f32 %v7526_v23, %v7272_v7  ;;  %v8044_v62 = vadd.f32 %v8043_v43, %v7789_v33  ;;  %v7288_v7 = vld [vmem:[#allocation2 + $0x258] sm:$0xff]  ;;  %v7805_v33 = vmul.f32 %v7287_v26, %v7287_v26 }
 0x652   : > { %v7528_v56 = vadd.f32 %v7527_v25, %v7273_v5  ;;  %v8045_v9 = vadd.f32 %v8044_v62, %v7790_v51  ;;  %v7289_v5 = vld [vmem:[#allocation2 + $0x260] sm:$0xff]  ;;  %v7806_v51 = vmul.f32 %v7288_v7, %v7288_v7 }
 0x654   : > { %v7529_v16 = vadd.f32 %v7528_v56, %v7274_v12  ;;  %v8046_v52 = vadd.f32 %v8045_v9, %v7791_v34  ;;  %v7290_v12 = vld [vmem:[#allocation2 + $0x268] sm:$0xff]  ;;  %v7807_v34 = vmul.f32 %v7289_v5, %v7289_v5 }
 0x656   : > { %v7530_v35 = vadd.f32 %v7529_v16, %v7275_v14  ;;  %v8047_v18 = vadd.f32 %v8046_v52, %v7792_v47  ;;  %v7291_v14 = vld [vmem:[#allocation2 + $0x270] sm:$0xff]  ;;  %v7808_v47 = vmul.f32 %v7290_v12, %v7290_v12 }
 0x658   : > { %v7531_v4 = vadd.f32 %v7530_v35, %v7276_v15  ;;  %v8048_v20 = vadd.f32 %v8047_v18, %v7793_v58  ;;  %v7292_v15 = vld [vmem:[#allocation2 + $0x278] sm:$0xff]  ;;  %v7809_v58 = vmul.f32 %v7291_v14, %v7291_v14 }
 0x65a   : > { %v7532_v0 = vadd.f32 %v7531_v4, %v7277_v46  ;;  %v8049_v30 = vadd.f32 %v8048_v20, %v7794_v45  ;;  %v7293_v46 = vld [vmem:[#allocation2 + $0x280] sm:$0xff]  ;;  %v7810_v45 = vmul.f32 %v7292_v15, %v7292_v15 }
 0x65c   : > { %v7533_v54 = vadd.f32 %v7532_v0, %v7278_v27  ;;  %v8050_v38 = vadd.f32 %v8049_v30, %v7795_v37  ;;  %v7294_v27 = vld [vmem:[#allocation2 + $0x288] sm:$0xff]  ;;  %v7811_v37 = vmul.f32 %v7293_v46, %v7293_v46 }
 0x65e   : > { %v7534_v32 = vadd.f32 %v7533_v54, %v7279_v39  ;;  %v8051_v13 = vadd.f32 %v8050_v38, %v7796_v17  ;;  %v7295_v39 = vld [vmem:[#allocation2 + $0x290] sm:$0xff]  ;;  %v7812_v17 = vmul.f32 %v7294_v27, %v7294_v27 }
 0x660   : > { %v7535_v1 = vadd.f32 %v7534_v32, %v7280_v24  ;;  %v8052_v22 = vadd.f32 %v8051_v13, %v7797_v59  ;;  %v7296_v24 = vld [vmem:[#allocation2 + $0x298] sm:$0xff]  ;;  %v7813_v59 = vmul.f32 %v7295_v39, %v7295_v39 }
 0x662   : > { %v7536_v6 = vadd.f32 %v7535_v1, %v7281_v10  ;;  %v8053_v55 = vadd.f32 %v8052_v22, %v7798_v63  ;;  %v7297_v10 = vld [vmem:[#allocation2 + $0x2a0] sm:$0xff]  ;;  %v7814_v63 = vmul.f32 %v7296_v24, %v7296_v24 }
 0x664   : > { %v7537_v11 = vadd.f32 %v7536_v6, %v7282_v44  ;;  %v8054_v40 = vadd.f32 %v8053_v55, %v7799_v60  ;;  %v7298_v44 = vld [vmem:[#allocation2 + $0x2a8] sm:$0xff]  ;;  %v7815_v60 = vmul.f32 %v7297_v10, %v7297_v10 }
 0x666   : > { %v7538_v50 = vadd.f32 %v7537_v11, %v7283_v49  ;;  %v8055_v3 = vadd.f32 %v8054_v40, %v7800_v31  ;;  %v7299_v49 = vld [vmem:[#allocation2 + $0x2b0] sm:$0xff]  ;;  %v7816_v31 = vmul.f32 %v7298_v44, %v7298_v44 }
 0x668   : > { %v7539_v28 = vadd.f32 %v7538_v50, %v7284_v61  ;;  %v8056_v42 = vadd.f32 %v8055_v3, %v7801_v57  ;;  %v7300_v61 = vld [vmem:[#allocation2 + $0x2b8] sm:$0xff]  ;;  %v7817_v57 = vmul.f32 %v7299_v49, %v7299_v49 }
 0x66a   : > { %v7540_v53 = vadd.f32 %v7539_v28, %v7285_v2  ;;  %v8057_v48 = vadd.f32 %v8056_v42, %v7802_v19  ;;  %v7301_v2 = vld [vmem:[#allocation2 + $0x2c0] sm:$0xff]  ;;  %v7818_v19 = vmul.f32 %v7300_v61, %v7300_v61 }
 0x66c   : > { %v7541_v29 = vadd.f32 %v7540_v53, %v7286_v8  ;;  %v8058_v36 = vadd.f32 %v8057_v48, %v7803_v21  ;;  %v7302_v8 = vld [vmem:[#allocation2 + $0x2c8] sm:$0xff]  ;;  %v7819_v21 = vmul.f32 %v7301_v2, %v7301_v2 }
 0x66e   : > { %v7542_v23 = vadd.f32 %v7541_v29, %v7287_v26  ;;  %v8059_v43 = vadd.f32 %v8058_v36, %v7804_v41  ;;  %v7303_v26 = vld [vmem:[#allocation2 + $0x2d0] sm:$0xff]  ;;  %v7820_v41 = vmul.f32 %v7302_v8, %v7302_v8 }
 0x670   : > { %v7543_v25 = vadd.f32 %v7542_v23, %v7288_v7  ;;  %v8060_v62 = vadd.f32 %v8059_v43, %v7805_v33  ;;  %v7304_v7 = vld [vmem:[#allocation2 + $0x2d8] sm:$0xff]  ;;  %v7821_v33 = vmul.f32 %v7303_v26, %v7303_v26 }
 0x672   : > { %v7544_v56 = vadd.f32 %v7543_v25, %v7289_v5  ;;  %v8061_v9 = vadd.f32 %v8060_v62, %v7806_v51  ;;  %v7305_v5 = vld [vmem:[#allocation2 + $0x2e0] sm:$0xff]  ;;  %v7822_v51 = vmul.f32 %v7304_v7, %v7304_v7 }
 0x674   : > { %v7545_v16 = vadd.f32 %v7544_v56, %v7290_v12  ;;  %v8062_v52 = vadd.f32 %v8061_v9, %v7807_v34  ;;  %v7306_v12 = vld [vmem:[#allocation2 + $0x2e8] sm:$0xff]  ;;  %v7823_v34 = vmul.f32 %v7305_v5, %v7305_v5 }
 0x676   : > { %v7546_v35 = vadd.f32 %v7545_v16, %v7291_v14  ;;  %v8063_v18 = vadd.f32 %v8062_v52, %v7808_v47  ;;  %v7307_v14 = vld [vmem:[#allocation2 + $0x2f0] sm:$0xff]  ;;  %v7824_v47 = vmul.f32 %v7306_v12, %v7306_v12 }
 0x678   : > { %v7547_v4 = vadd.f32 %v7546_v35, %v7292_v15  ;;  %v8064_v20 = vadd.f32 %v8063_v18, %v7809_v58  ;;  %v7308_v15 = vld [vmem:[#allocation2 + $0x2f8] sm:$0xff]  ;;  %v7825_v58 = vmul.f32 %v7307_v14, %v7307_v14 }
 0x67a   : > { %v7548_v0 = vadd.f32 %v7547_v4, %v7293_v46  ;;  %v8065_v30 = vadd.f32 %v8064_v20, %v7810_v45  ;;  %v7309_v46 = vld [vmem:[#allocation2 + $0x300] sm:$0xff]  ;;  %v7826_v45 = vmul.f32 %v7308_v15, %v7308_v15 }
 0x67c   : > { %v7549_v54 = vadd.f32 %v7548_v0, %v7294_v27  ;;  %v8066_v38 = vadd.f32 %v8065_v30, %v7811_v37  ;;  %v7310_v27 = vld [vmem:[#allocation2 + $0x308] sm:$0xff]  ;;  %v7827_v37 = vmul.f32 %v7309_v46, %v7309_v46 }
 0x67e   : > { %v7550_v32 = vadd.f32 %v7549_v54, %v7295_v39  ;;  %v8067_v13 = vadd.f32 %v8066_v38, %v7812_v17  ;;  %v7311_v39 = vld [vmem:[#allocation2 + $0x310] sm:$0xff]  ;;  %v7828_v17 = vmul.f32 %v7310_v27, %v7310_v27 }
 0x680   : > { %v7551_v1 = vadd.f32 %v7550_v32, %v7296_v24  ;;  %v8068_v22 = vadd.f32 %v8067_v13, %v7813_v59  ;;  %v7312_v24 = vld [vmem:[#allocation2 + $0x318] sm:$0xff]  ;;  %v7829_v59 = vmul.f32 %v7311_v39, %v7311_v39 }
 0x682   : > { %v7552_v6 = vadd.f32 %v7551_v1, %v7297_v10  ;;  %v8069_v55 = vadd.f32 %v8068_v22, %v7814_v63  ;;  %v7313_v10 = vld [vmem:[#allocation2 + $0x320] sm:$0xff]  ;;  %v7830_v63 = vmul.f32 %v7312_v24, %v7312_v24 }
 0x684   : > { %v7553_v11 = vadd.f32 %v7552_v6, %v7298_v44  ;;  %v8070_v40 = vadd.f32 %v8069_v55, %v7815_v60  ;;  %v7314_v44 = vld [vmem:[#allocation2 + $0x328] sm:$0xff]  ;;  %v7831_v60 = vmul.f32 %v7313_v10, %v7313_v10 }
 0x686   : > { %v7554_v50 = vadd.f32 %v7553_v11, %v7299_v49  ;;  %v8071_v3 = vadd.f32 %v8070_v40, %v7816_v31  ;;  %v7315_v49 = vld [vmem:[#allocation2 + $0x330] sm:$0xff]  ;;  %v7832_v31 = vmul.f32 %v7314_v44, %v7314_v44 }
 0x688   : > { %v7555_v28 = vadd.f32 %v7554_v50, %v7300_v61  ;;  %v8072_v42 = vadd.f32 %v8071_v3, %v7817_v57  ;;  %v7316_v61 = vld [vmem:[#allocation2 + $0x338] sm:$0xff]  ;;  %v7833_v57 = vmul.f32 %v7315_v49, %v7315_v49 }
 0x68a   : > { %v7556_v53 = vadd.f32 %v7555_v28, %v7301_v2  ;;  %v8073_v48 = vadd.f32 %v8072_v42, %v7818_v19  ;;  %v7317_v2 = vld [vmem:[#allocation2 + $0x340] sm:$0xff]  ;;  %v7834_v19 = vmul.f32 %v7316_v61, %v7316_v61 }
 0x68c   : > { %v7557_v29 = vadd.f32 %v7556_v53, %v7302_v8  ;;  %v8074_v36 = vadd.f32 %v8073_v48, %v7819_v21  ;;  %v7318_v8 = vld [vmem:[#allocation2 + $0x348] sm:$0xff]  ;;  %v7835_v21 = vmul.f32 %v7317_v2, %v7317_v2 }
 0x68e   : > { %v7558_v23 = vadd.f32 %v7557_v29, %v7303_v26  ;;  %v8075_v43 = vadd.f32 %v8074_v36, %v7820_v41  ;;  %v7319_v26 = vld [vmem:[#allocation2 + $0x350] sm:$0xff]  ;;  %v7836_v41 = vmul.f32 %v7318_v8, %v7318_v8 }
 0x690   : > { %v7559_v25 = vadd.f32 %v7558_v23, %v7304_v7  ;;  %v8076_v62 = vadd.f32 %v8075_v43, %v7821_v33  ;;  %v7320_v7 = vld [vmem:[#allocation2 + $0x358] sm:$0xff]  ;;  %v7837_v33 = vmul.f32 %v7319_v26, %v7319_v26 }
 0x692   : > { %v7560_v56 = vadd.f32 %v7559_v25, %v7305_v5  ;;  %v8077_v9 = vadd.f32 %v8076_v62, %v7822_v51  ;;  %v7321_v5 = vld [vmem:[#allocation2 + $0x360] sm:$0xff]  ;;  %v7838_v51 = vmul.f32 %v7320_v7, %v7320_v7 }
 0x694   : > { %v7561_v16 = vadd.f32 %v7560_v56, %v7306_v12  ;;  %v8078_v52 = vadd.f32 %v8077_v9, %v7823_v34  ;;  %v7322_v12 = vld [vmem:[#allocation2 + $0x368] sm:$0xff]  ;;  %v7839_v34 = vmul.f32 %v7321_v5, %v7321_v5 }
 0x696   : > { %v7562_v35 = vadd.f32 %v7561_v16, %v7307_v14  ;;  %v8079_v18 = vadd.f32 %v8078_v52, %v7824_v47  ;;  %v7323_v14 = vld [vmem:[#allocation2 + $0x370] sm:$0xff]  ;;  %v7840_v47 = vmul.f32 %v7322_v12, %v7322_v12 }
 0x698   : > { %v7563_v4 = vadd.f32 %v7562_v35, %v7308_v15  ;;  %v8080_v20 = vadd.f32 %v8079_v18, %v7825_v58  ;;  %v7324_v15 = vld [vmem:[#allocation2 + $0x378] sm:$0xff]  ;;  %v7841_v58 = vmul.f32 %v7323_v14, %v7323_v14 }
 0x69a   : > { %v7564_v0 = vadd.f32 %v7563_v4, %v7309_v46  ;;  %v8081_v30 = vadd.f32 %v8080_v20, %v7826_v45  ;;  %v7325_v46 = vld [vmem:[#allocation2 + $0x380] sm:$0xff]  ;;  %v7842_v45 = vmul.f32 %v7324_v15, %v7324_v15 }
 0x69c   : > { %v7565_v54 = vadd.f32 %v7564_v0, %v7310_v27  ;;  %v8082_v38 = vadd.f32 %v8081_v30, %v7827_v37  ;;  %v7326_v27 = vld [vmem:[#allocation2 + $0x388] sm:$0xff]  ;;  %v7843_v37 = vmul.f32 %v7325_v46, %v7325_v46 }
 0x69e   : > { %v7566_v32 = vadd.f32 %v7565_v54, %v7311_v39  ;;  %v8083_v13 = vadd.f32 %v8082_v38, %v7828_v17  ;;  %v7327_v39 = vld [vmem:[#allocation2 + $0x390] sm:$0xff]  ;;  %v7844_v17 = vmul.f32 %v7326_v27, %v7326_v27 }
 0x6a0   : > { %v7567_v1 = vadd.f32 %v7566_v32, %v7312_v24  ;;  %v8084_v22 = vadd.f32 %v8083_v13, %v7829_v59  ;;  %v7328_v24 = vld [vmem:[#allocation2 + $0x398] sm:$0xff]  ;;  %v7845_v59 = vmul.f32 %v7327_v39, %v7327_v39 }
 0x6a2   : > { %v7568_v6 = vadd.f32 %v7567_v1, %v7313_v10  ;;  %v8085_v55 = vadd.f32 %v8084_v22, %v7830_v63  ;;  %v7329_v10 = vld [vmem:[#allocation2 + $0x3a0] sm:$0xff]  ;;  %v7846_v63 = vmul.f32 %v7328_v24, %v7328_v24 }
 0x6a4   : > { %v7569_v11 = vadd.f32 %v7568_v6, %v7314_v44  ;;  %v8086_v40 = vadd.f32 %v8085_v55, %v7831_v60  ;;  %v7330_v44 = vld [vmem:[#allocation2 + $0x3a8] sm:$0xff]  ;;  %v7847_v60 = vmul.f32 %v7329_v10, %v7329_v10 }
 0x6a6   : > { %v7570_v50 = vadd.f32 %v7569_v11, %v7315_v49  ;;  %v8087_v3 = vadd.f32 %v8086_v40, %v7832_v31  ;;  %v7331_v49 = vld [vmem:[#allocation2 + $0x3b0] sm:$0xff]  ;;  %v7848_v31 = vmul.f32 %v7330_v44, %v7330_v44 }
 0x6a8   : > { %v7571_v28 = vadd.f32 %v7570_v50, %v7316_v61  ;;  %v8088_v42 = vadd.f32 %v8087_v3, %v7833_v57  ;;  %v7332_v61 = vld [vmem:[#allocation2 + $0x3b8] sm:$0xff]  ;;  %v7849_v57 = vmul.f32 %v7331_v49, %v7331_v49 }
 0x6aa   : > { %v7572_v53 = vadd.f32 %v7571_v28, %v7317_v2  ;;  %v8089_v48 = vadd.f32 %v8088_v42, %v7834_v19  ;;  %v7333_v2 = vld [vmem:[#allocation2 + $0x3c0] sm:$0xff]  ;;  %v7850_v19 = vmul.f32 %v7332_v61, %v7332_v61 }
 0x6ac   : > { %v7573_v29 = vadd.f32 %v7572_v53, %v7318_v8  ;;  %v8090_v36 = vadd.f32 %v8089_v48, %v7835_v21  ;;  %v7334_v8 = vld [vmem:[#allocation2 + $0x3c8] sm:$0xff]  ;;  %v7851_v21 = vmul.f32 %v7333_v2, %v7333_v2 }
 0x6ae   : > { %v7574_v23 = vadd.f32 %v7573_v29, %v7319_v26  ;;  %v8091_v43 = vadd.f32 %v8090_v36, %v7836_v41  ;;  %v7335_v26 = vld [vmem:[#allocation2 + $0x3d0] sm:$0xff]  ;;  %v7852_v41 = vmul.f32 %v7334_v8, %v7334_v8 }
 0x6b0   : > { %v7575_v25 = vadd.f32 %v7574_v23, %v7320_v7  ;;  %v8092_v62 = vadd.f32 %v8091_v43, %v7837_v33  ;;  %v7336_v7 = vld [vmem:[#allocation2 + $0x3d8] sm:$0xff]  ;;  %v7853_v33 = vmul.f32 %v7335_v26, %v7335_v26 }
 0x6b2   : > { %v7576_v56 = vadd.f32 %v7575_v25, %v7321_v5  ;;  %v8093_v9 = vadd.f32 %v8092_v62, %v7838_v51  ;;  %v7337_v5 = vld [vmem:[#allocation2 + $0x3e0] sm:$0xff]  ;;  %v7854_v51 = vmul.f32 %v7336_v7, %v7336_v7 }
 0x6b4   : > { %v7577_v16 = vadd.f32 %v7576_v56, %v7322_v12  ;;  %v8094_v52 = vadd.f32 %v8093_v9, %v7839_v34  ;;  %v7338_v12 = vld [vmem:[#allocation2 + $0x3e8] sm:$0xff]  ;;  %v7855_v34 = vmul.f32 %v7337_v5, %v7337_v5 }
 0x6b6   : > { %v7578_v35 = vadd.f32 %v7577_v16, %v7323_v14  ;;  %v8095_v18 = vadd.f32 %v8094_v52, %v7840_v47  ;;  %v7339_v14 = vld [vmem:[#allocation2 + $0x3f0] sm:$0xff]  ;;  %v7856_v47 = vmul.f32 %v7338_v12, %v7338_v12 }
 0x6b8   : > { %v7579_v4 = vadd.f32 %v7578_v35, %v7324_v15  ;;  %v8096_v20 = vadd.f32 %v8095_v18, %v7841_v58  ;;  %v7340_v15 = vld [vmem:[#allocation2 + $0x3f8] sm:$0xff]  ;;  %v7857_v58 = vmul.f32 %v7339_v14, %v7339_v14 }
 0x6ba   : > { %v7580_v0 = vadd.f32 %v7579_v4, %v7325_v46  ;;  %v8097_v30 = vadd.f32 %v8096_v20, %v7842_v45  ;;  %v7341_v46 = vld [vmem:[#allocation2 + $0x400] sm:$0xff]  ;;  %v7858_v45 = vmul.f32 %v7340_v15, %v7340_v15 }
 0x6bc   : > { %v7581_v54 = vadd.f32 %v7580_v0, %v7326_v27  ;;  %v8098_v38 = vadd.f32 %v8097_v30, %v7843_v37  ;;  %v7342_v27 = vld [vmem:[#allocation2 + $0x408] sm:$0xff]  ;;  %v7859_v37 = vmul.f32 %v7341_v46, %v7341_v46 }
 0x6be   : > { %v7582_v32 = vadd.f32 %v7581_v54, %v7327_v39  ;;  %v8099_v13 = vadd.f32 %v8098_v38, %v7844_v17  ;;  %v7343_v39 = vld [vmem:[#allocation2 + $0x410] sm:$0xff]  ;;  %v7860_v17 = vmul.f32 %v7342_v27, %v7342_v27 }
 0x6c0   : > { %v7583_v1 = vadd.f32 %v7582_v32, %v7328_v24  ;;  %v8100_v22 = vadd.f32 %v8099_v13, %v7845_v59  ;;  %v7344_v24 = vld [vmem:[#allocation2 + $0x418] sm:$0xff]  ;;  %v7861_v59 = vmul.f32 %v7343_v39, %v7343_v39 }
 0x6c2   : > { %v7584_v6 = vadd.f32 %v7583_v1, %v7329_v10  ;;  %v8101_v55 = vadd.f32 %v8100_v22, %v7846_v63  ;;  %v7345_v10 = vld [vmem:[#allocation2 + $0x420] sm:$0xff]  ;;  %v7862_v63 = vmul.f32 %v7344_v24, %v7344_v24 }
 0x6c4   : > { %v7585_v11 = vadd.f32 %v7584_v6, %v7330_v44  ;;  %v8102_v40 = vadd.f32 %v8101_v55, %v7847_v60  ;;  %v7346_v44 = vld [vmem:[#allocation2 + $0x428] sm:$0xff]  ;;  %v7863_v60 = vmul.f32 %v7345_v10, %v7345_v10 }
 0x6c6   : > { %v7586_v50 = vadd.f32 %v7585_v11, %v7331_v49  ;;  %v8103_v3 = vadd.f32 %v8102_v40, %v7848_v31  ;;  %v7347_v49 = vld [vmem:[#allocation2 + $0x430] sm:$0xff]  ;;  %v7864_v31 = vmul.f32 %v7346_v44, %v7346_v44 }
 0x6c8   : > { %v7587_v28 = vadd.f32 %v7586_v50, %v7332_v61  ;;  %v8104_v42 = vadd.f32 %v8103_v3, %v7849_v57  ;;  %v7348_v61 = vld [vmem:[#allocation2 + $0x438] sm:$0xff]  ;;  %v7865_v57 = vmul.f32 %v7347_v49, %v7347_v49 }
 0x6ca   : > { %v7588_v53 = vadd.f32 %v7587_v28, %v7333_v2  ;;  %v8105_v48 = vadd.f32 %v8104_v42, %v7850_v19  ;;  %v7349_v2 = vld [vmem:[#allocation2 + $0x440] sm:$0xff]  ;;  %v7866_v19 = vmul.f32 %v7348_v61, %v7348_v61 }
 0x6cc   : > { %v7589_v29 = vadd.f32 %v7588_v53, %v7334_v8  ;;  %v8106_v36 = vadd.f32 %v8105_v48, %v7851_v21  ;;  %v7350_v8 = vld [vmem:[#allocation2 + $0x448] sm:$0xff]  ;;  %v7867_v21 = vmul.f32 %v7349_v2, %v7349_v2 }
 0x6ce   : > { %v7590_v23 = vadd.f32 %v7589_v29, %v7335_v26  ;;  %v8107_v43 = vadd.f32 %v8106_v36, %v7852_v41  ;;  %v7351_v26 = vld [vmem:[#allocation2 + $0x450] sm:$0xff]  ;;  %v7868_v41 = vmul.f32 %v7350_v8, %v7350_v8 }
 0x6d0   : > { %v7591_v25 = vadd.f32 %v7590_v23, %v7336_v7  ;;  %v8108_v62 = vadd.f32 %v8107_v43, %v7853_v33  ;;  %v7352_v7 = vld [vmem:[#allocation2 + $0x458] sm:$0xff]  ;;  %v7869_v33 = vmul.f32 %v7351_v26, %v7351_v26 }
 0x6d2   : > { %v7592_v56 = vadd.f32 %v7591_v25, %v7337_v5  ;;  %v8109_v9 = vadd.f32 %v8108_v62, %v7854_v51  ;;  %v7353_v5 = vld [vmem:[#allocation2 + $0x460] sm:$0xff]  ;;  %v7870_v51 = vmul.f32 %v7352_v7, %v7352_v7 }
 0x6d4   : > { %v7593_v16 = vadd.f32 %v7592_v56, %v7338_v12  ;;  %v8110_v52 = vadd.f32 %v8109_v9, %v7855_v34  ;;  %v7354_v12 = vld [vmem:[#allocation2 + $0x468] sm:$0xff]  ;;  %v7871_v34 = vmul.f32 %v7353_v5, %v7353_v5 }
 0x6d6   : > { %v7594_v35 = vadd.f32 %v7593_v16, %v7339_v14  ;;  %v8111_v18 = vadd.f32 %v8110_v52, %v7856_v47  ;;  %v7355_v14 = vld [vmem:[#allocation2 + $0x470] sm:$0xff]  ;;  %v7872_v47 = vmul.f32 %v7354_v12, %v7354_v12 }
 0x6d8   : > { %v7595_v4 = vadd.f32 %v7594_v35, %v7340_v15  ;;  %v8112_v20 = vadd.f32 %v8111_v18, %v7857_v58  ;;  %v7356_v15 = vld [vmem:[#allocation2 + $0x478] sm:$0xff]  ;;  %v7873_v58 = vmul.f32 %v7355_v14, %v7355_v14 }
 0x6da   : > { %v7596_v0 = vadd.f32 %v7595_v4, %v7341_v46  ;;  %v8113_v30 = vadd.f32 %v8112_v20, %v7858_v45  ;;  %v7357_v46 = vld [vmem:[#allocation2 + $0x480] sm:$0xff]  ;;  %v7874_v45 = vmul.f32 %v7356_v15, %v7356_v15 }
 0x6dc   : > { %v7597_v54 = vadd.f32 %v7596_v0, %v7342_v27  ;;  %v8114_v38 = vadd.f32 %v8113_v30, %v7859_v37  ;;  %v7358_v27 = vld [vmem:[#allocation2 + $0x488] sm:$0xff]  ;;  %v7875_v37 = vmul.f32 %v7357_v46, %v7357_v46 }
 0x6de   : > { %v7598_v32 = vadd.f32 %v7597_v54, %v7343_v39  ;;  %v8115_v13 = vadd.f32 %v8114_v38, %v7860_v17  ;;  %v7359_v39 = vld [vmem:[#allocation2 + $0x490] sm:$0xff]  ;;  %v7876_v17 = vmul.f32 %v7358_v27, %v7358_v27 }
 0x6e0   : > { %v7599_v1 = vadd.f32 %v7598_v32, %v7344_v24  ;;  %v8116_v22 = vadd.f32 %v8115_v13, %v7861_v59  ;;  %v7360_v24 = vld [vmem:[#allocation2 + $0x498] sm:$0xff]  ;;  %v7877_v59 = vmul.f32 %v7359_v39, %v7359_v39 }
 0x6e2   : > { %v7600_v6 = vadd.f32 %v7599_v1, %v7345_v10  ;;  %v8117_v55 = vadd.f32 %v8116_v22, %v7862_v63  ;;  %v7361_v10 = vld [vmem:[#allocation2 + $0x4a0] sm:$0xff]  ;;  %v7878_v63 = vmul.f32 %v7360_v24, %v7360_v24 }
 0x6e4   : > { %v7601_v11 = vadd.f32 %v7600_v6, %v7346_v44  ;;  %v8118_v40 = vadd.f32 %v8117_v55, %v7863_v60  ;;  %v7362_v44 = vld [vmem:[#allocation2 + $0x4a8] sm:$0xff]  ;;  %v7879_v60 = vmul.f32 %v7361_v10, %v7361_v10 }
 0x6e6   : > { %v7602_v50 = vadd.f32 %v7601_v11, %v7347_v49  ;;  %v8119_v3 = vadd.f32 %v8118_v40, %v7864_v31  ;;  %v7363_v49 = vld [vmem:[#allocation2 + $0x4b0] sm:$0xff]  ;;  %v7880_v31 = vmul.f32 %v7362_v44, %v7362_v44 }
 0x6e8   : > { %v7603_v28 = vadd.f32 %v7602_v50, %v7348_v61  ;;  %v8120_v42 = vadd.f32 %v8119_v3, %v7865_v57  ;;  %v7364_v61 = vld [vmem:[#allocation2 + $0x4b8] sm:$0xff]  ;;  %v7881_v57 = vmul.f32 %v7363_v49, %v7363_v49 }
 0x6ea   : > { %v7604_v53 = vadd.f32 %v7603_v28, %v7349_v2  ;;  %v8121_v48 = vadd.f32 %v8120_v42, %v7866_v19  ;;  %v7365_v2 = vld [vmem:[#allocation2 + $0x4c0] sm:$0xff]  ;;  %v7882_v19 = vmul.f32 %v7364_v61, %v7364_v61 }
 0x6ec   : > { %v7605_v29 = vadd.f32 %v7604_v53, %v7350_v8  ;;  %v8122_v36 = vadd.f32 %v8121_v48, %v7867_v21  ;;  %v7366_v8 = vld [vmem:[#allocation2 + $0x4c8] sm:$0xff]  ;;  %v7883_v21 = vmul.f32 %v7365_v2, %v7365_v2 }
 0x6ee   : > { %v7606_v23 = vadd.f32 %v7605_v29, %v7351_v26  ;;  %v8123_v43 = vadd.f32 %v8122_v36, %v7868_v41  ;;  %v7367_v26 = vld [vmem:[#allocation2 + $0x4d0] sm:$0xff]  ;;  %v7884_v41 = vmul.f32 %v7366_v8, %v7366_v8 }
 0x6f0   : > { %v7607_v25 = vadd.f32 %v7606_v23, %v7352_v7  ;;  %v8124_v62 = vadd.f32 %v8123_v43, %v7869_v33  ;;  %v7368_v7 = vld [vmem:[#allocation2 + $0x4d8] sm:$0xff]  ;;  %v7885_v33 = vmul.f32 %v7367_v26, %v7367_v26 }
 0x6f2   : > { %v7608_v56 = vadd.f32 %v7607_v25, %v7353_v5  ;;  %v8125_v9 = vadd.f32 %v8124_v62, %v7870_v51  ;;  %v7369_v5 = vld [vmem:[#allocation2 + $0x4e0] sm:$0xff]  ;;  %v7886_v51 = vmul.f32 %v7368_v7, %v7368_v7 }
 0x6f4   : > { %v7609_v16 = vadd.f32 %v7608_v56, %v7354_v12  ;;  %v8126_v52 = vadd.f32 %v8125_v9, %v7871_v34  ;;  %v7370_v12 = vld [vmem:[#allocation2 + $0x4e8] sm:$0xff]  ;;  %v7887_v34 = vmul.f32 %v7369_v5, %v7369_v5 }
 0x6f6   : > { %v7610_v35 = vadd.f32 %v7609_v16, %v7355_v14  ;;  %v8127_v18 = vadd.f32 %v8126_v52, %v7872_v47  ;;  %v7371_v14 = vld [vmem:[#allocation2 + $0x4f0] sm:$0xff]  ;;  %v7888_v47 = vmul.f32 %v7370_v12, %v7370_v12 }
 0x6f8   : > { %v7611_v4 = vadd.f32 %v7610_v35, %v7356_v15  ;;  %v8128_v20 = vadd.f32 %v8127_v18, %v7873_v58  ;;  %v7372_v15 = vld [vmem:[#allocation2 + $0x4f8] sm:$0xff]  ;;  %v7889_v58 = vmul.f32 %v7371_v14, %v7371_v14 }
 0x6fa   : > { %v7612_v0 = vadd.f32 %v7611_v4, %v7357_v46  ;;  %v8129_v30 = vadd.f32 %v8128_v20, %v7874_v45  ;;  %v7373_v46 = vld [vmem:[#allocation2 + $0x500] sm:$0xff]  ;;  %v7890_v45 = vmul.f32 %v7372_v15, %v7372_v15 }
 0x6fc   : > { %v7613_v54 = vadd.f32 %v7612_v0, %v7358_v27  ;;  %v8130_v38 = vadd.f32 %v8129_v30, %v7875_v37  ;;  %v7374_v27 = vld [vmem:[#allocation2 + $0x508] sm:$0xff]  ;;  %v7891_v37 = vmul.f32 %v7373_v46, %v7373_v46 }
 0x6fe   : > { %v7614_v32 = vadd.f32 %v7613_v54, %v7359_v39  ;;  %v8131_v13 = vadd.f32 %v8130_v38, %v7876_v17  ;;  %v7375_v39 = vld [vmem:[#allocation2 + $0x510] sm:$0xff]  ;;  %v7892_v17 = vmul.f32 %v7374_v27, %v7374_v27 }
 0x700   : > { %v7615_v1 = vadd.f32 %v7614_v32, %v7360_v24  ;;  %v8132_v22 = vadd.f32 %v8131_v13, %v7877_v59  ;;  %v7376_v24 = vld [vmem:[#allocation2 + $0x518] sm:$0xff]  ;;  %v7893_v59 = vmul.f32 %v7375_v39, %v7375_v39 }
 0x702   : > { %v7616_v6 = vadd.f32 %v7615_v1, %v7361_v10  ;;  %v8133_v55 = vadd.f32 %v8132_v22, %v7878_v63  ;;  %v7377_v10 = vld [vmem:[#allocation2 + $0x520] sm:$0xff]  ;;  %v7894_v63 = vmul.f32 %v7376_v24, %v7376_v24 }
 0x704   : > { %v7617_v11 = vadd.f32 %v7616_v6, %v7362_v44  ;;  %v8134_v40 = vadd.f32 %v8133_v55, %v7879_v60  ;;  %v7378_v44 = vld [vmem:[#allocation2 + $0x528] sm:$0xff]  ;;  %v7895_v60 = vmul.f32 %v7377_v10, %v7377_v10 }
 0x706   : > { %v7618_v50 = vadd.f32 %v7617_v11, %v7363_v49  ;;  %v8135_v3 = vadd.f32 %v8134_v40, %v7880_v31  ;;  %v7379_v49 = vld [vmem:[#allocation2 + $0x530] sm:$0xff]  ;;  %v7896_v31 = vmul.f32 %v7378_v44, %v7378_v44 }
 0x708   : > { %v7619_v28 = vadd.f32 %v7618_v50, %v7364_v61  ;;  %v8136_v42 = vadd.f32 %v8135_v3, %v7881_v57  ;;  %v7380_v61 = vld [vmem:[#allocation2 + $0x538] sm:$0xff]  ;;  %v7897_v57 = vmul.f32 %v7379_v49, %v7379_v49 }
 0x70a   : > { %v7620_v53 = vadd.f32 %v7619_v28, %v7365_v2  ;;  %v8137_v48 = vadd.f32 %v8136_v42, %v7882_v19  ;;  %v7381_v2 = vld [vmem:[#allocation2 + $0x540] sm:$0xff]  ;;  %v7898_v19 = vmul.f32 %v7380_v61, %v7380_v61 }
 0x70c   : > { %v7621_v29 = vadd.f32 %v7620_v53, %v7366_v8  ;;  %v8138_v36 = vadd.f32 %v8137_v48, %v7883_v21  ;;  %v7382_v8 = vld [vmem:[#allocation2 + $0x548] sm:$0xff]  ;;  %v7899_v21 = vmul.f32 %v7381_v2, %v7381_v2 }
 0x70e   : > { %v7622_v23 = vadd.f32 %v7621_v29, %v7367_v26  ;;  %v8139_v43 = vadd.f32 %v8138_v36, %v7884_v41  ;;  %v7383_v26 = vld [vmem:[#allocation2 + $0x550] sm:$0xff]  ;;  %v7900_v41 = vmul.f32 %v7382_v8, %v7382_v8 }
 0x710   : > { %v7623_v25 = vadd.f32 %v7622_v23, %v7368_v7  ;;  %v8140_v62 = vadd.f32 %v8139_v43, %v7885_v33  ;;  %v7384_v7 = vld [vmem:[#allocation2 + $0x558] sm:$0xff]  ;;  %v7901_v33 = vmul.f32 %v7383_v26, %v7383_v26 }
 0x712   : > { %v7624_v56 = vadd.f32 %v7623_v25, %v7369_v5  ;;  %v8141_v9 = vadd.f32 %v8140_v62, %v7886_v51  ;;  %v7385_v5 = vld [vmem:[#allocation2 + $0x560] sm:$0xff]  ;;  %v7902_v51 = vmul.f32 %v7384_v7, %v7384_v7 }
 0x714   : > { %v7625_v16 = vadd.f32 %v7624_v56, %v7370_v12  ;;  %v8142_v52 = vadd.f32 %v8141_v9, %v7887_v34  ;;  %v7386_v12 = vld [vmem:[#allocation2 + $0x568] sm:$0xff]  ;;  %v7903_v34 = vmul.f32 %v7385_v5, %v7385_v5 }
 0x716   : > { %v7626_v35 = vadd.f32 %v7625_v16, %v7371_v14  ;;  %v8143_v18 = vadd.f32 %v8142_v52, %v7888_v47  ;;  %v7387_v14 = vld [vmem:[#allocation2 + $0x570] sm:$0xff]  ;;  %v7904_v47 = vmul.f32 %v7386_v12, %v7386_v12 }
 0x718   : > { %v7627_v4 = vadd.f32 %v7626_v35, %v7372_v15  ;;  %v8144_v20 = vadd.f32 %v8143_v18, %v7889_v58  ;;  %v7388_v15 = vld [vmem:[#allocation2 + $0x578] sm:$0xff]  ;;  %v7905_v58 = vmul.f32 %v7387_v14, %v7387_v14 }
 0x71a   : > { %v7628_v0 = vadd.f32 %v7627_v4, %v7373_v46  ;;  %v8145_v30 = vadd.f32 %v8144_v20, %v7890_v45  ;;  %v7389_v46 = vld [vmem:[#allocation2 + $0x580] sm:$0xff]  ;;  %v7906_v45 = vmul.f32 %v7388_v15, %v7388_v15 }
 0x71c   : > { %v7629_v54 = vadd.f32 %v7628_v0, %v7374_v27  ;;  %v8146_v38 = vadd.f32 %v8145_v30, %v7891_v37  ;;  %v7390_v27 = vld [vmem:[#allocation2 + $0x588] sm:$0xff]  ;;  %v7907_v37 = vmul.f32 %v7389_v46, %v7389_v46 }
 0x71e   : > { %v7630_v32 = vadd.f32 %v7629_v54, %v7375_v39  ;;  %v8147_v13 = vadd.f32 %v8146_v38, %v7892_v17  ;;  %v7391_v39 = vld [vmem:[#allocation2 + $0x590] sm:$0xff]  ;;  %v7908_v17 = vmul.f32 %v7390_v27, %v7390_v27 }
 0x720   : > { %v7631_v1 = vadd.f32 %v7630_v32, %v7376_v24  ;;  %v8148_v22 = vadd.f32 %v8147_v13, %v7893_v59  ;;  %v7392_v24 = vld [vmem:[#allocation2 + $0x598] sm:$0xff]  ;;  %v7909_v59 = vmul.f32 %v7391_v39, %v7391_v39 }
 0x722   : > { %v7632_v6 = vadd.f32 %v7631_v1, %v7377_v10  ;;  %v8149_v55 = vadd.f32 %v8148_v22, %v7894_v63  ;;  %v7393_v10 = vld [vmem:[#allocation2 + $0x5a0] sm:$0xff]  ;;  %v7910_v63 = vmul.f32 %v7392_v24, %v7392_v24 }
 0x724   : > { %v7633_v11 = vadd.f32 %v7632_v6, %v7378_v44  ;;  %v8150_v40 = vadd.f32 %v8149_v55, %v7895_v60  ;;  %v7394_v44 = vld [vmem:[#allocation2 + $0x5a8] sm:$0xff]  ;;  %v7911_v60 = vmul.f32 %v7393_v10, %v7393_v10 }
 0x726   : > { %v7634_v50 = vadd.f32 %v7633_v11, %v7379_v49  ;;  %v8151_v3 = vadd.f32 %v8150_v40, %v7896_v31  ;;  %v7395_v49 = vld [vmem:[#allocation2 + $0x5b0] sm:$0xff]  ;;  %v7912_v31 = vmul.f32 %v7394_v44, %v7394_v44 }
 0x728   : > { %v7635_v28 = vadd.f32 %v7634_v50, %v7380_v61  ;;  %v8152_v42 = vadd.f32 %v8151_v3, %v7897_v57  ;;  %v7396_v61 = vld [vmem:[#allocation2 + $0x5b8] sm:$0xff]  ;;  %v7913_v57 = vmul.f32 %v7395_v49, %v7395_v49 }
 0x72a   : > { %v7636_v53 = vadd.f32 %v7635_v28, %v7381_v2  ;;  %v8153_v48 = vadd.f32 %v8152_v42, %v7898_v19  ;;  %v7397_v2 = vld [vmem:[#allocation2 + $0x5c0] sm:$0xff]  ;;  %v7914_v19 = vmul.f32 %v7396_v61, %v7396_v61 }
 0x72c   : > { %v7637_v29 = vadd.f32 %v7636_v53, %v7382_v8  ;;  %v8154_v36 = vadd.f32 %v8153_v48, %v7899_v21  ;;  %v7398_v8 = vld [vmem:[#allocation2 + $0x5c8] sm:$0xff]  ;;  %v7915_v21 = vmul.f32 %v7397_v2, %v7397_v2 }
 0x72e   : > { %v7638_v23 = vadd.f32 %v7637_v29, %v7383_v26  ;;  %v8155_v43 = vadd.f32 %v8154_v36, %v7900_v41  ;;  %v7399_v26 = vld [vmem:[#allocation2 + $0x5d0] sm:$0xff]  ;;  %v7916_v41 = vmul.f32 %v7398_v8, %v7398_v8 }
 0x730   : > { %v7639_v25 = vadd.f32 %v7638_v23, %v7384_v7  ;;  %v8156_v62 = vadd.f32 %v8155_v43, %v7901_v33  ;;  %v7400_v7 = vld [vmem:[#allocation2 + $0x5d8] sm:$0xff]  ;;  %v7917_v33 = vmul.f32 %v7399_v26, %v7399_v26 }
 0x732   : > { %v7640_v56 = vadd.f32 %v7639_v25, %v7385_v5  ;;  %v8157_v9 = vadd.f32 %v8156_v62, %v7902_v51  ;;  %v7401_v5 = vld [vmem:[#allocation2 + $0x5e0] sm:$0xff]  ;;  %v7918_v51 = vmul.f32 %v7400_v7, %v7400_v7 }
 0x734   : > { %v7641_v16 = vadd.f32 %v7640_v56, %v7386_v12  ;;  %v8158_v52 = vadd.f32 %v8157_v9, %v7903_v34  ;;  %v7402_v12 = vld [vmem:[#allocation2 + $0x5e8] sm:$0xff]  ;;  %v7919_v34 = vmul.f32 %v7401_v5, %v7401_v5 }
 0x736   : > { %v7642_v35 = vadd.f32 %v7641_v16, %v7387_v14  ;;  %v8159_v18 = vadd.f32 %v8158_v52, %v7904_v47  ;;  %v7403_v14 = vld [vmem:[#allocation2 + $0x5f0] sm:$0xff]  ;;  %v7920_v47 = vmul.f32 %v7402_v12, %v7402_v12 }
 0x738   : > { %v7643_v4 = vadd.f32 %v7642_v35, %v7388_v15  ;;  %v8160_v20 = vadd.f32 %v8159_v18, %v7905_v58  ;;  %v7404_v15 = vld [vmem:[#allocation2 + $0x5f8] sm:$0xff]  ;;  %v7921_v58 = vmul.f32 %v7403_v14, %v7403_v14 }
 0x73a   : > { %v7644_v0 = vadd.f32 %v7643_v4, %v7389_v46  ;;  %v8161_v30 = vadd.f32 %v8160_v20, %v7906_v45  ;;  %v7405_v46 = vld [vmem:[#allocation2 + $0x600] sm:$0xff]  ;;  %v7922_v45 = vmul.f32 %v7404_v15, %v7404_v15 }
 0x73c   : > { %v7645_v54 = vadd.f32 %v7644_v0, %v7390_v27  ;;  %v8162_v38 = vadd.f32 %v8161_v30, %v7907_v37  ;;  %v7406_v27 = vld [vmem:[#allocation2 + $0x608] sm:$0xff]  ;;  %v7923_v37 = vmul.f32 %v7405_v46, %v7405_v46 }
 0x73e   : > { %v7646_v32 = vadd.f32 %v7645_v54, %v7391_v39  ;;  %v8163_v13 = vadd.f32 %v8162_v38, %v7908_v17  ;;  %v7407_v39 = vld [vmem:[#allocation2 + $0x610] sm:$0xff]  ;;  %v7924_v17 = vmul.f32 %v7406_v27, %v7406_v27 }
 0x740   : > { %v7647_v1 = vadd.f32 %v7646_v32, %v7392_v24  ;;  %v8164_v22 = vadd.f32 %v8163_v13, %v7909_v59  ;;  %v7408_v24 = vld [vmem:[#allocation2 + $0x618] sm:$0xff]  ;;  %v7925_v59 = vmul.f32 %v7407_v39, %v7407_v39 }
 0x742   : > { %v7648_v6 = vadd.f32 %v7647_v1, %v7393_v10  ;;  %v8165_v55 = vadd.f32 %v8164_v22, %v7910_v63  ;;  %v7409_v10 = vld [vmem:[#allocation2 + $0x620] sm:$0xff]  ;;  %v7926_v63 = vmul.f32 %v7408_v24, %v7408_v24 }
 0x744   : > { %v7649_v11 = vadd.f32 %v7648_v6, %v7394_v44  ;;  %v8166_v40 = vadd.f32 %v8165_v55, %v7911_v60  ;;  %v7410_v44 = vld [vmem:[#allocation2 + $0x628] sm:$0xff]  ;;  %v7927_v60 = vmul.f32 %v7409_v10, %v7409_v10 }
 0x746   : > { %v7650_v50 = vadd.f32 %v7649_v11, %v7395_v49  ;;  %v8167_v3 = vadd.f32 %v8166_v40, %v7912_v31  ;;  %v7411_v49 = vld [vmem:[#allocation2 + $0x630] sm:$0xff]  ;;  %v7928_v31 = vmul.f32 %v7410_v44, %v7410_v44 }
 0x748   : > { %v7651_v28 = vadd.f32 %v7650_v50, %v7396_v61  ;;  %v8168_v42 = vadd.f32 %v8167_v3, %v7913_v57  ;;  %v7412_v61 = vld [vmem:[#allocation2 + $0x638] sm:$0xff]  ;;  %v7929_v57 = vmul.f32 %v7411_v49, %v7411_v49 }
 0x74a   : > { %v7652_v53 = vadd.f32 %v7651_v28, %v7397_v2  ;;  %v8169_v48 = vadd.f32 %v8168_v42, %v7914_v19  ;;  %v7413_v2 = vld [vmem:[#allocation2 + $0x640] sm:$0xff]  ;;  %v7930_v19 = vmul.f32 %v7412_v61, %v7412_v61 }
 0x74c   : > { %v7653_v29 = vadd.f32 %v7652_v53, %v7398_v8  ;;  %v8170_v36 = vadd.f32 %v8169_v48, %v7915_v21  ;;  %v7414_v8 = vld [vmem:[#allocation2 + $0x648] sm:$0xff]  ;;  %v7931_v21 = vmul.f32 %v7413_v2, %v7413_v2 }
 0x74e   : > { %v7654_v23 = vadd.f32 %v7653_v29, %v7399_v26  ;;  %v8171_v43 = vadd.f32 %v8170_v36, %v7916_v41  ;;  %v7415_v26 = vld [vmem:[#allocation2 + $0x650] sm:$0xff]  ;;  %v7932_v41 = vmul.f32 %v7414_v8, %v7414_v8 }
 0x750   : > { %v7655_v25 = vadd.f32 %v7654_v23, %v7400_v7  ;;  %v8172_v62 = vadd.f32 %v8171_v43, %v7917_v33  ;;  %v7416_v7 = vld [vmem:[#allocation2 + $0x658] sm:$0xff]  ;;  %v7933_v33 = vmul.f32 %v7415_v26, %v7415_v26 }
 0x752   : > { %v7656_v56 = vadd.f32 %v7655_v25, %v7401_v5  ;;  %v8173_v9 = vadd.f32 %v8172_v62, %v7918_v51  ;;  %v7417_v5 = vld [vmem:[#allocation2 + $0x660] sm:$0xff]  ;;  %v7934_v51 = vmul.f32 %v7416_v7, %v7416_v7 }
 0x754   : > { %v7657_v16 = vadd.f32 %v7656_v56, %v7402_v12  ;;  %v8174_v52 = vadd.f32 %v8173_v9, %v7919_v34  ;;  %v7418_v12 = vld [vmem:[#allocation2 + $0x668] sm:$0xff]  ;;  %v7935_v34 = vmul.f32 %v7417_v5, %v7417_v5 }
 0x756   : > { %v7658_v35 = vadd.f32 %v7657_v16, %v7403_v14  ;;  %v8175_v18 = vadd.f32 %v8174_v52, %v7920_v47  ;;  %v7419_v14 = vld [vmem:[#allocation2 + $0x670] sm:$0xff]  ;;  %v7936_v47 = vmul.f32 %v7418_v12, %v7418_v12 }
 0x758   : > { %v7659_v4 = vadd.f32 %v7658_v35, %v7404_v15  ;;  %v8176_v20 = vadd.f32 %v8175_v18, %v7921_v58  ;;  %v7420_v15 = vld [vmem:[#allocation2 + $0x678] sm:$0xff]  ;;  %v7937_v58 = vmul.f32 %v7419_v14, %v7419_v14 }
 0x75a   : > { %v7660_v0 = vadd.f32 %v7659_v4, %v7405_v46  ;;  %v8177_v30 = vadd.f32 %v8176_v20, %v7922_v45  ;;  %v7421_v46 = vld [vmem:[#allocation2 + $0x680] sm:$0xff]  ;;  %v7938_v45 = vmul.f32 %v7420_v15, %v7420_v15 }
 0x75c   : > { %v7661_v54 = vadd.f32 %v7660_v0, %v7406_v27  ;;  %v8178_v38 = vadd.f32 %v8177_v30, %v7923_v37  ;;  %v7422_v27 = vld [vmem:[#allocation2 + $0x688] sm:$0xff]  ;;  %v7939_v37 = vmul.f32 %v7421_v46, %v7421_v46 }
 0x75e   : > { %v7662_v32 = vadd.f32 %v7661_v54, %v7407_v39  ;;  %v8179_v13 = vadd.f32 %v8178_v38, %v7924_v17  ;;  %v7423_v39 = vld [vmem:[#allocation2 + $0x690] sm:$0xff]  ;;  %v7940_v17 = vmul.f32 %v7422_v27, %v7422_v27 }
 0x760   : > { %v7663_v1 = vadd.f32 %v7662_v32, %v7408_v24  ;;  %v8180_v22 = vadd.f32 %v8179_v13, %v7925_v59  ;;  %v7424_v24 = vld [vmem:[#allocation2 + $0x698] sm:$0xff]  ;;  %v7941_v59 = vmul.f32 %v7423_v39, %v7423_v39 }
 0x762   : > { %v7664_v6 = vadd.f32 %v7663_v1, %v7409_v10  ;;  %v8181_v55 = vadd.f32 %v8180_v22, %v7926_v63  ;;  %v7425_v10 = vld [vmem:[#allocation2 + $0x6a0] sm:$0xff]  ;;  %v7942_v63 = vmul.f32 %v7424_v24, %v7424_v24 }
 0x764   : > { %v7665_v11 = vadd.f32 %v7664_v6, %v7410_v44  ;;  %v8182_v40 = vadd.f32 %v8181_v55, %v7927_v60  ;;  %v7426_v44 = vld [vmem:[#allocation2 + $0x6a8] sm:$0xff]  ;;  %v7943_v60 = vmul.f32 %v7425_v10, %v7425_v10 }
 0x766   : > { %v7666_v50 = vadd.f32 %v7665_v11, %v7411_v49  ;;  %v8183_v3 = vadd.f32 %v8182_v40, %v7928_v31  ;;  %v7427_v49 = vld [vmem:[#allocation2 + $0x6b0] sm:$0xff]  ;;  %v7944_v31 = vmul.f32 %v7426_v44, %v7426_v44 }
 0x768   : > { %v7667_v28 = vadd.f32 %v7666_v50, %v7412_v61  ;;  %v8184_v42 = vadd.f32 %v8183_v3, %v7929_v57  ;;  %v7428_v61 = vld [vmem:[#allocation2 + $0x6b8] sm:$0xff]  ;;  %v7945_v57 = vmul.f32 %v7427_v49, %v7427_v49 }
 0x76a   : > { %v7668_v53 = vadd.f32 %v7667_v28, %v7413_v2  ;;  %v8185_v48 = vadd.f32 %v8184_v42, %v7930_v19  ;;  %v7429_v2 = vld [vmem:[#allocation2 + $0x6c0] sm:$0xff]  ;;  %v7946_v19 = vmul.f32 %v7428_v61, %v7428_v61 }
 0x76c   : > { %v7669_v29 = vadd.f32 %v7668_v53, %v7414_v8  ;;  %v8186_v36 = vadd.f32 %v8185_v48, %v7931_v21  ;;  %v7430_v8 = vld [vmem:[#allocation2 + $0x6c8] sm:$0xff]  ;;  %v7947_v21 = vmul.f32 %v7429_v2, %v7429_v2 }
 0x76e   : > { %v7670_v23 = vadd.f32 %v7669_v29, %v7415_v26  ;;  %v8187_v43 = vadd.f32 %v8186_v36, %v7932_v41  ;;  %v7431_v26 = vld [vmem:[#allocation2 + $0x6d0] sm:$0xff]  ;;  %v7948_v41 = vmul.f32 %v7430_v8, %v7430_v8 }
 0x770   : > { %v7671_v25 = vadd.f32 %v7670_v23, %v7416_v7  ;;  %v8188_v62 = vadd.f32 %v8187_v43, %v7933_v33  ;;  %v7432_v7 = vld [vmem:[#allocation2 + $0x6d8] sm:$0xff]  ;;  %v7949_v33 = vmul.f32 %v7431_v26, %v7431_v26 }
 0x772   : > { %v7672_v56 = vadd.f32 %v7671_v25, %v7417_v5  ;;  %v8189_v9 = vadd.f32 %v8188_v62, %v7934_v51  ;;  %v7433_v5 = vld [vmem:[#allocation2 + $0x6e0] sm:$0xff]  ;;  %v7950_v51 = vmul.f32 %v7432_v7, %v7432_v7 }
 0x774   : > { %v7673_v16 = vadd.f32 %v7672_v56, %v7418_v12  ;;  %v8190_v52 = vadd.f32 %v8189_v9, %v7935_v34  ;;  %v7434_v12 = vld [vmem:[#allocation2 + $0x6e8] sm:$0xff]  ;;  %v7951_v34 = vmul.f32 %v7433_v5, %v7433_v5 }
 0x776   : > { %v7674_v35 = vadd.f32 %v7673_v16, %v7419_v14  ;;  %v8191_v18 = vadd.f32 %v8190_v52, %v7936_v47  ;;  %v7435_v14 = vld [vmem:[#allocation2 + $0x6f0] sm:$0xff]  ;;  %v7952_v47 = vmul.f32 %v7434_v12, %v7434_v12 }
 0x778   : > { %v7675_v4 = vadd.f32 %v7674_v35, %v7420_v15  ;;  %v8192_v20 = vadd.f32 %v8191_v18, %v7937_v58  ;;  %v7436_v15 = vld [vmem:[#allocation2 + $0x6f8] sm:$0xff]  ;;  %v7953_v58 = vmul.f32 %v7435_v14, %v7435_v14 }
 0x77a   : > { %v7676_v0 = vadd.f32 %v7675_v4, %v7421_v46  ;;  %v8193_v30 = vadd.f32 %v8192_v20, %v7938_v45  ;;  %v7437_v46 = vld [vmem:[#allocation2 + $0x700] sm:$0xff]  ;;  %v7954_v45 = vmul.f32 %v7436_v15, %v7436_v15 }
 0x77c   : > { %v7677_v54 = vadd.f32 %v7676_v0, %v7422_v27  ;;  %v8194_v38 = vadd.f32 %v8193_v30, %v7939_v37  ;;  %v7438_v27 = vld [vmem:[#allocation2 + $0x708] sm:$0xff]  ;;  %v7955_v37 = vmul.f32 %v7437_v46, %v7437_v46 }
 0x77e   : > { %v7678_v32 = vadd.f32 %v7677_v54, %v7423_v39  ;;  %v8195_v13 = vadd.f32 %v8194_v38, %v7940_v17  ;;  %v7439_v39 = vld [vmem:[#allocation2 + $0x710] sm:$0xff]  ;;  %v7956_v17 = vmul.f32 %v7438_v27, %v7438_v27 }
 0x780   : > { %v7679_v1 = vadd.f32 %v7678_v32, %v7424_v24  ;;  %v8196_v22 = vadd.f32 %v8195_v13, %v7941_v59  ;;  %v7440_v24 = vld [vmem:[#allocation2 + $0x718] sm:$0xff]  ;;  %v7957_v59 = vmul.f32 %v7439_v39, %v7439_v39 }
 0x782   : > { %v7680_v6 = vadd.f32 %v7679_v1, %v7425_v10  ;;  %v8197_v55 = vadd.f32 %v8196_v22, %v7942_v63  ;;  %v7441_v10 = vld [vmem:[#allocation2 + $0x720] sm:$0xff]  ;;  %v7958_v63 = vmul.f32 %v7440_v24, %v7440_v24 }
 0x784   : > { %v7681_v11 = vadd.f32 %v7680_v6, %v7426_v44  ;;  %v8198_v40 = vadd.f32 %v8197_v55, %v7943_v60  ;;  %v7442_v44 = vld [vmem:[#allocation2 + $0x728] sm:$0xff]  ;;  %v7959_v60 = vmul.f32 %v7441_v10, %v7441_v10 }
 0x786   : > { %v7682_v50 = vadd.f32 %v7681_v11, %v7427_v49  ;;  %v8199_v3 = vadd.f32 %v8198_v40, %v7944_v31  ;;  %v7443_v49 = vld [vmem:[#allocation2 + $0x730] sm:$0xff]  ;;  %v7960_v31 = vmul.f32 %v7442_v44, %v7442_v44 }
 0x788   : > { %v7683_v28 = vadd.f32 %v7682_v50, %v7428_v61  ;;  %v8200_v42 = vadd.f32 %v8199_v3, %v7945_v57  ;;  %v7444_v61 = vld [vmem:[#allocation2 + $0x738] sm:$0xff]  ;;  %v7961_v57 = vmul.f32 %v7443_v49, %v7443_v49 }
 0x78a   : > { %v7684_v53 = vadd.f32 %v7683_v28, %v7429_v2  ;;  %v8201_v48 = vadd.f32 %v8200_v42, %v7946_v19  ;;  %v7445_v2 = vld [vmem:[#allocation2 + $0x740] sm:$0xff]  ;;  %v7962_v19 = vmul.f32 %v7444_v61, %v7444_v61 }
 0x78c   : > { %v7685_v29 = vadd.f32 %v7684_v53, %v7430_v8  ;;  %v8202_v36 = vadd.f32 %v8201_v48, %v7947_v21  ;;  %v7446_v8 = vld [vmem:[#allocation2 + $0x748] sm:$0xff]  ;;  %v7963_v21 = vmul.f32 %v7445_v2, %v7445_v2 }
 0x78e   : > { %v7686_v23 = vadd.f32 %v7685_v29, %v7431_v26  ;;  %v8203_v43 = vadd.f32 %v8202_v36, %v7948_v41  ;;  %v7447_v26 = vld [vmem:[#allocation2 + $0x750] sm:$0xff]  ;;  %v7964_v41 = vmul.f32 %v7446_v8, %v7446_v8 }
 0x790   : > { %v7687_v25 = vadd.f32 %v7686_v23, %v7432_v7  ;;  %v8204_v62 = vadd.f32 %v8203_v43, %v7949_v33  ;;  %v7448_v7 = vld [vmem:[#allocation2 + $0x758] sm:$0xff]  ;;  %v7965_v33 = vmul.f32 %v7447_v26, %v7447_v26 }
 0x792   : > { %v7688_v56 = vadd.f32 %v7687_v25, %v7433_v5  ;;  %v8205_v9 = vadd.f32 %v8204_v62, %v7950_v51  ;;  %v7449_v5 = vld [vmem:[#allocation2 + $0x760] sm:$0xff]  ;;  %v7966_v51 = vmul.f32 %v7448_v7, %v7448_v7 }
 0x794   : > { %v7689_v16 = vadd.f32 %v7688_v56, %v7434_v12  ;;  %v8206_v52 = vadd.f32 %v8205_v9, %v7951_v34  ;;  %v7450_v12 = vld [vmem:[#allocation2 + $0x768] sm:$0xff]  ;;  %v7967_v34 = vmul.f32 %v7449_v5, %v7449_v5 }
 0x796   : > { %v7690_v35 = vadd.f32 %v7689_v16, %v7435_v14  ;;  %v8207_v18 = vadd.f32 %v8206_v52, %v7952_v47  ;;  %v7451_v14 = vld [vmem:[#allocation2 + $0x770] sm:$0xff]  ;;  %v7968_v47 = vmul.f32 %v7450_v12, %v7450_v12 }
 0x798   : > { %v7691_v4 = vadd.f32 %v7690_v35, %v7436_v15  ;;  %v8208_v20 = vadd.f32 %v8207_v18, %v7953_v58  ;;  %v7452_v15 = vld [vmem:[#allocation2 + $0x778] sm:$0xff]  ;;  %v7969_v58 = vmul.f32 %v7451_v14, %v7451_v14 }
 0x79a   : > { %v7692_v0 = vadd.f32 %v7691_v4, %v7437_v46  ;;  %v8209_v30 = vadd.f32 %v8208_v20, %v7954_v45  ;;  %v7453_v46 = vld [vmem:[#allocation2 + $0x780] sm:$0xff]  ;;  %v7970_v45 = vmul.f32 %v7452_v15, %v7452_v15 }
 0x79c   : > { %v7693_v54 = vadd.f32 %v7692_v0, %v7438_v27  ;;  %v8210_v38 = vadd.f32 %v8209_v30, %v7955_v37  ;;  %v7454_v27 = vld [vmem:[#allocation2 + $0x788] sm:$0xff]  ;;  %v7971_v37 = vmul.f32 %v7453_v46, %v7453_v46 }
 0x79e   : > { %v7694_v32 = vadd.f32 %v7693_v54, %v7439_v39  ;;  %v8211_v13 = vadd.f32 %v8210_v38, %v7956_v17  ;;  %v7455_v39 = vld [vmem:[#allocation2 + $0x790] sm:$0xff]  ;;  %v7972_v17 = vmul.f32 %v7454_v27, %v7454_v27 }
 0x7a0   : > { %v7695_v1 = vadd.f32 %v7694_v32, %v7440_v24  ;;  %v8212_v22 = vadd.f32 %v8211_v13, %v7957_v59  ;;  %v7456_v24 = vld [vmem:[#allocation2 + $0x798] sm:$0xff]  ;;  %v7973_v59 = vmul.f32 %v7455_v39, %v7455_v39 }
 0x7a2   : > { %v7696_v6 = vadd.f32 %v7695_v1, %v7441_v10  ;;  %v8213_v55 = vadd.f32 %v8212_v22, %v7958_v63  ;;  %v7457_v10 = vld [vmem:[#allocation2 + $0x7a0] sm:$0xff]  ;;  %v7974_v63 = vmul.f32 %v7456_v24, %v7456_v24 }
 0x7a4   : > { %v7697_v11 = vadd.f32 %v7696_v6, %v7442_v44  ;;  %v8214_v40 = vadd.f32 %v8213_v55, %v7959_v60  ;;  %v7458_v44 = vld [vmem:[#allocation2 + $0x7a8] sm:$0xff]  ;;  %v7975_v60 = vmul.f32 %v7457_v10, %v7457_v10 }
 0x7a6   : > { %v7698_v50 = vadd.f32 %v7697_v11, %v7443_v49  ;;  %v8215_v3 = vadd.f32 %v8214_v40, %v7960_v31  ;;  %v7459_v49 = vld [vmem:[#allocation2 + $0x7b0] sm:$0xff]  ;;  %v7976_v31 = vmul.f32 %v7458_v44, %v7458_v44 }
 0x7a8   : > { %v7699_v28 = vadd.f32 %v7698_v50, %v7444_v61  ;;  %v8216_v42 = vadd.f32 %v8215_v3, %v7961_v57  ;;  %v7460_v61 = vld [vmem:[#allocation2 + $0x7b8] sm:$0xff]  ;;  %v7977_v57 = vmul.f32 %v7459_v49, %v7459_v49 }
 0x7aa   : > { %v7700_v53 = vadd.f32 %v7699_v28, %v7445_v2  ;;  %v8217_v48 = vadd.f32 %v8216_v42, %v7962_v19  ;;  %v7461_v2 = vld [vmem:[#allocation2 + $0x7c0] sm:$0xff]  ;;  %v7978_v19 = vmul.f32 %v7460_v61, %v7460_v61 }
 0x7ac   : > { %v7701_v29 = vadd.f32 %v7700_v53, %v7446_v8  ;;  %v8218_v36 = vadd.f32 %v8217_v48, %v7963_v21  ;;  %v7462_v8 = vld [vmem:[#allocation2 + $0x7c8] sm:$0xff]  ;;  %v7979_v21 = vmul.f32 %v7461_v2, %v7461_v2 }
 0x7ae   : > { %v7702_v23 = vadd.f32 %v7701_v29, %v7447_v26  ;;  %v8219_v43 = vadd.f32 %v8218_v36, %v7964_v41  ;;  %v7463_v26 = vld [vmem:[#allocation2 + $0x7d0] sm:$0xff]  ;;  %v7980_v41 = vmul.f32 %v7462_v8, %v7462_v8 }
 0x7b0   : > { %v7703_v25 = vadd.f32 %v7702_v23, %v7448_v7  ;;  %v8220_v62 = vadd.f32 %v8219_v43, %v7965_v33  ;;  %v7464_v7 = vld [vmem:[#allocation2 + $0x7d8] sm:$0xff]  ;;  %v7981_v33 = vmul.f32 %v7463_v26, %v7463_v26 }
 0x7b2   : > { %v7704_v56 = vadd.f32 %v7703_v25, %v7449_v5  ;;  %v8221_v9 = vadd.f32 %v8220_v62, %v7966_v51  ;;  %v7465_v5 = vld [vmem:[#allocation2 + $0x7e0] sm:$0xff]  ;;  %v7982_v51 = vmul.f32 %v7464_v7, %v7464_v7 }
 0x7b4   : > { %v7705_v16 = vadd.f32 %v7704_v56, %v7450_v12  ;;  %v8222_v52 = vadd.f32 %v8221_v9, %v7967_v34  ;;  %v7466_v12 = vld [vmem:[#allocation2 + $0x7e8] sm:$0xff]  ;;  %v7983_v34 = vmul.f32 %v7465_v5, %v7465_v5 }
 0x7b6   : > { %v7706_v35 = vadd.f32 %v7705_v16, %v7451_v14  ;;  %v8223_v18 = vadd.f32 %v8222_v52, %v7968_v47  ;;  %v7467_v14 = vld [vmem:[#allocation2 + $0x7f0] sm:$0xff]  ;;  %v7984_v47 = vmul.f32 %v7466_v12, %v7466_v12 }
 0x7b8   : > { %v7707_v4 = vadd.f32 %v7706_v35, %v7452_v15  ;;  %v8224_v20 = vadd.f32 %v8223_v18, %v7969_v58  ;;  %v7468_v15 = vld [vmem:[#allocation2 + $0x7f8] sm:$0xff]  ;;  %v7985_v58 = vmul.f32 %v7467_v14, %v7467_v14 }
 0x7b9   : > { %v7986_v35 = vmul.f32 %v7468_v15, %v7468_v15 }
 0x7ba   : > { %v7708_v0 = vadd.f32 %v7707_v4, %v7453_v46  ;;  %v8225_v30 = vadd.f32 %v8224_v20, %v7970_v45 }
 0x7bc   : > { %v7709_v54 = vadd.f32 %v7708_v0, %v7454_v27  ;;  %v8226_v38 = vadd.f32 %v8225_v30, %v7971_v37 }
 0x7be   : > { %v7710_v32 = vadd.f32 %v7709_v54, %v7455_v39  ;;  %v8227_v13 = vadd.f32 %v8226_v38, %v7972_v17 }
 0x7c0   : > { %v7711_v1 = vadd.f32 %v7710_v32, %v7456_v24  ;;  %v8228_v22 = vadd.f32 %v8227_v13, %v7973_v59 }
 0x7c2   : > { %v7712_v6 = vadd.f32 %v7711_v1, %v7457_v10  ;;  %v8229_v55 = vadd.f32 %v8228_v22, %v7974_v63 }
 0x7c4   : > { %v7713_v11 = vadd.f32 %v7712_v6, %v7458_v44  ;;  %v8230_v40 = vadd.f32 %v8229_v55, %v7975_v60 }
 0x7c6   : > { %v7714_v50 = vadd.f32 %v7713_v11, %v7459_v49  ;;  %v8231_v3 = vadd.f32 %v8230_v40, %v7976_v31  ;;  %v8260_v49 = vlaneseq  ;;  %v8252_v31 = vld [vmem:[%s17614_s2] sm:$0x1] }
 0x7c8   : > { %v7715_v28 = vadd.f32 %v7714_v50, %v7460_v61  ;;  %v8232_v42 = vadd.f32 %v8231_v3, %v7977_v57  ;;  %v8261_v6 = vshrl.u32 %v8260_v49, 7  ;;  %v8256_v57 = vld [vmem:[%s17615_s3] sm:$0x1] }
 0x7ca   : > { %v7716_v53 = vadd.f32 %v7715_v28, %v7461_v2  ;;  %v8233_v48 = vadd.f32 %v8232_v42, %v7978_v19  ;;  %v8262_v55 = vsub.s32 0, %v8261_v6  ;;  %v14186_v19 = vld [vmem:[#allocation2] sm:$0xff] }
 0x7cc   : > { %v7717_v29 = vadd.f32 %v7716_v53, %v7462_v8  ;;  %v8234_v36 = vadd.f32 %v8233_v48, %v7979_v21  ;;  %v14187_v8 = vld [vmem:[#allocation2 + $0x8] sm:$0xff]  ;;  %v14188_v21 = vld [vmem:[#allocation2 + $0x10] sm:$0xff] }
 0x7ce   : > { %v7718_v23 = vadd.f32 %v7717_v29, %v7463_v26  ;;  %v8235_v43 = vadd.f32 %v8234_v36, %v7980_v41  ;;  %v14189_v26 = vld [vmem:[#allocation2 + $0x18] sm:$0xff]  ;;  %v14190_v41 = vld [vmem:[#allocation2 + $0x20] sm:$0xff] }
 0x7d0   : > { %v7719_v25 = vadd.f32 %v7718_v23, %v7464_v7  ;;  %v8236_v62 = vadd.f32 %v8235_v43, %v7981_v33  ;;  %v14191_v7 = vld [vmem:[#allocation2 + $0x28] sm:$0xff]  ;;  %v14192_v33 = vld [vmem:[#allocation2 + $0x30] sm:$0xff]  ;;  %v14193_v23 = vld [vmem:[#allocation2 + $0x38] sm:$0xff] }
 0x7d1   : > { %v14194_v43 = vld [vmem:[#allocation2 + $0x40] sm:$0xff] }
 0x7d2   : > { %v7720_v56 = vadd.f32 %v7719_v25, %v7465_v5  ;;  %v8237_v9 = vadd.f32 %v8236_v62, %v7982_v51  ;;  %v14195_v25 = vld [vmem:[#allocation2 + $0x48] sm:$0xff]  ;;  %v14196_v62 = vld [vmem:[#allocation2 + $0x50] sm:$0xff] }
 0x7d4   : > { %v7721_v16 = vadd.f32 %v7720_v56, %v7466_v12  ;;  %v8238_v52 = vadd.f32 %v8237_v9, %v7983_v34  ;;  %v14197_v56 = vld [vmem:[#allocation2 + $0x58] sm:$0xff]  ;;  %v14198_v9 = vld [vmem:[#allocation2 + $0x60] sm:$0xff] }
 0x7d6   : > { %v7722_v46 = vadd.f32 %v7721_v16, %v7467_v14  ;;  %v8239_v45 = vadd.f32 %v8238_v52, %v7984_v47  ;;  %v14199_v16 = vld [vmem:[#allocation2 + $0x68] sm:$0xff] }
 0x7d8   : > { %v7723_v18 = vadd.f32 %v7722_v46, %v7468_v15  ;;  %v8240_v27 = vadd.f32 %v8239_v45, %v7985_v58 }
 0x7da   : > { %v7724_v4 = vrot.slane %v7723_v18, 4  ;;  %v8241_v37 = vadd.f32 %v8240_v27, %v7986_v35 }
 0x7dc   : > { %v7725_v20 = vadd.f32 %v7724_v4, %v7723_v18  ;;  %v8242_v39 = vrot.slane %v8241_v37, 4 }
 0x7de   : > { %v7726_v0 = vrot.slane %v7725_v20, 2  ;;  %v8243_v17 = vadd.f32 %v8242_v39, %v8241_v37 }
 0x7e0   : > { %v7727_v30 = vadd.f32 %v7726_v0, %v7725_v20  ;;  %v8244_v24 = vrot.slane %v8243_v17, 2 }
 0x7e2   : > { %v7728_v54 = vrot.slane %v7727_v30, 1  ;;  %v8245_v59 = vadd.f32 %v8244_v24, %v8243_v17 }
 0x7e4   : > { %v7729_v38 = vadd.f32 %v7728_v54, %v7727_v30  ;;  %v8246_v10 = vrot.slane %v8245_v59, 1 }
 0x7e6   : > { %v7730_v32 = vmul.f32 0.00048828125, %v7729_v38  ;;  %v8247_v63 = vadd.f32 %v8246_v10, %v8245_v59 }
 0x7e8   : > { %v8249_v13 = vmul.f32 %v7730_v32, %v7730_v32  ;;  %v8248_v44 = vmul.f32 0.00048828125, %v8247_v63 }
 0x7ea   : > { %v8250_v1 = vsub.f32 %v8248_v44, %v8249_v13 }
 0x7ec   : > { %v8251_v60 = vmax.f32 %v8250_v1, 0.0 }
 0x7ee   : > { %v8253_v22 = vadd.f32 1e-05, %v8251_v60 }
 0x7f0   : > { %14184 = vrsqrt.f32 %v8253_v22 }
 0x7fa   : > { %v14185_v61 = vpop.eup %14184 }
 0x7fb   : > { %v8255_v11 = vmul.f32 %v14185_v61, %v8252_v31 }
 0x7fd   : > { %v8257_v40 = vmul.f32 %v8255_v11, %v7730_v32  ;;  %v17043_v2 = vrot.slane %v8255_v11, %v8262_v55 }
 0x7ff   : > { %v8258_v50 = vsub.f32 %v8256_v57, %v8257_v40  ;;  %v8265_v3 = vmul.f32 %v14186_v19, %v17043_v2  ;;  %v8266_v28 = vmul.f32 %v14187_v8, %v17043_v2  ;;  %v8267_v42 = vmul.f32 %v14188_v21, %v17043_v2 }
 0x800   : > { %v8268_v53 = vmul.f32 %v14189_v26, %v17043_v2  ;;  %v8269_v48 = vmul.f32 %v14190_v41, %v17043_v2  ;;  %v8270_v29 = vmul.f32 %v14191_v7, %v17043_v2  ;;  %v8271_v36 = vmul.f32 %v14192_v33, %v17043_v2 }
 0x801   : > { %v17052_v5 = vrot.slane %v8258_v50, %v8262_v55  ;;  %v8272_v51 = vmul.f32 %v14193_v23, %v17043_v2  ;;  %v8273_v12 = vmul.f32 %v14194_v43, %v17043_v2  ;;  %v8274_v34 = vmul.f32 %v14195_v25, %v17043_v2  ;;  %v14201_v23 = vld [vmem:[#allocation2 + $0x78] sm:$0xff] }
 0x802   : > { %v8275_v14 = vmul.f32 %v14196_v62, %v17043_v2  ;;  %v8276_v47 = vmul.f32 %v14197_v56, %v17043_v2  ;;  %v8277_v15 = vmul.f32 %v14198_v9, %v17043_v2  ;;  %v8278_v58 = vmul.f32 %v14199_v16, %v17043_v2  ;;  %v14203_v62 = vld [vmem:[#allocation2 + $0x88] sm:$0xff]  ;;  %v14204_v56 = vld [vmem:[#allocation2 + $0x90] sm:$0xff]  ;;  %v14205_v9 = vld [vmem:[#allocation2 + $0x98] sm:$0xff] }
 0x803   : > { %v8527_v52 = vadd.f32 %v17052_v5, %v8265_v3  ;;  %v8528_v46 = vadd.f32 %v17052_v5, %v8266_v28  ;;  %v8529_v35 = vadd.f32 %v17052_v5, %v8267_v42  ;;  %v8530_v45 = vadd.f32 %v17052_v5, %v8268_v53 }
 0x804   : > { %v8531_v18 = vadd.f32 %v17052_v5, %v8269_v48  ;;  %v8532_v27 = vadd.f32 %v17052_v5, %v8270_v29  ;;  %v8533_v4 = vadd.f32 %v17052_v5, %v8271_v36  ;;  %v8534_v37 = vadd.f32 %v17052_v5, %v8272_v51  ;;  %v14200_v48 = vld [vmem:[#allocation2 + $0x70] sm:$0xff] }
 0x805   : > { %vm8783_vm0 = vcmp.ge.f32.partialorder %v8527_v52, 0.0  ;;  %vm8784_vm1 = vcmp.ge.f32.partialorder %v8528_v46, 0.0  ;;  %v9039_v20 = vmul.f32 0.1, %v8527_v52  ;;  %v9040_v39 = vmul.f32 0.1, %v8528_v46 }
 0x806   : > { %vm8785_vm2 = vcmp.ge.f32.partialorder %v8529_v35, 0.0  ;;  %vm8786_vm3 = vcmp.ge.f32.partialorder %v8530_v45, 0.0  ;;  %v9041_v0 = vmul.f32 0.1, %v8529_v35  ;;  %v9042_v17 = vmul.f32 0.1, %v8530_v45 }
 0x807   : > { %v9295_v30 = vsel %vm8783_vm0, %v8527_v52, %v9039_v20  ;;  %v9296_v24 = vsel %vm8784_vm1, %v8528_v46, %v9040_v39  ;;  %vm8787_vm4 = vcmp.ge.f32.partialorder %v8531_v18, 0.0  ;;  %vm8788_vm5 = vcmp.ge.f32.partialorder %v8532_v27, 0.0 }
 0x808   : > { %v12391_v54 = vpack.c.bf16 %v9296_v24, %v9295_v30  ;;  %v9297_v59 = vsel %vm8785_vm2, %v8529_v35, %v9041_v0  ;;  %v9298_v38 = vsel %vm8786_vm3, %v8530_v45, %v9042_v17  ;;  %v9043_v10 = vmul.f32 0.1, %v8531_v18 }
 0x809   : > { %v12396_v32 = vpack.c.bf16 %v9298_v38, %v9297_v59  ;;  %v9044_v63 = vmul.f32 0.1, %v8532_v27  ;;  %vm8789_vm6 = vcmp.ge.f32.partialorder %v8533_v4, 0.0  ;;  %vm8790_vm7 = vcmp.ge.f32.partialorder %v8534_v37, 0.0 }
 0x80a   : > { %12392 = vst [vmem:[#allocation4] sm:$0xff] %v12391_v54   ;;  %v9299_v13 = vsel %vm8787_vm4, %v8531_v18, %v9043_v10  ;;  %v9045_v44 = vmul.f32 0.1, %v8533_v4  ;;  %v9046_v1 = vmul.f32 0.1, %v8534_v37  ;;  %v8535_v60 = vadd.f32 %v17052_v5, %v8273_v12  ;;  %v14202_v12 = vld [vmem:[#allocation2 + $0x80] sm:$0xff] }
 0x80b   : > { %13028 = vst [vmem:[#allocation4 + $0x8] sm:$0xff] %v12396_v32   ;;  %v9300_v22 = vsel %vm8788_vm5, %v8532_v27, %v9044_v63  ;;  %v8536_v49 = vadd.f32 %v17052_v5, %v8274_v34  ;;  %v8537_v6 = vadd.f32 %v17052_v5, %v8275_v14  ;;  %v8538_v31 = vadd.f32 %v17052_v5, %v8276_v47  ;;  %v14206_v32 = vld [vmem:[#allocation2 + $0xa0] sm:$0xff] }
 0x80c   : > { %v12401_v55 = vpack.c.bf16 %v9300_v22, %v9299_v13  ;;  %v9301_v61 = vsel %vm8789_vm6, %v8533_v4, %v9045_v44  ;;  %v9302_v11 = vsel %vm8790_vm7, %v8534_v37, %v9046_v1  ;;  %vm8791_vm8 = vcmp.ge.f32.partialorder %v8535_v60, 0.0  ;;  %v14207_v13 = vld [vmem:[#allocation2 + $0xa8] sm:$0xff] }
 0x80d   : > { %v12406_v57 = vpack.c.bf16 %v9302_v11, %v9301_v61  ;;  %vm8792_vm9 = vcmp.ge.f32.partialorder %v8536_v49, 0.0  ;;  %v9047_v40 = vmul.f32 0.1, %v8535_v60  ;;  %v9048_v50 = vmul.f32 0.1, %v8536_v49 }
 0x80e   : > { %13029 = vst [vmem:[#allocation4 + $0x10] sm:$0xff] %v12401_v55   ;;  %vm8793_vm10 = vcmp.ge.f32.partialorder %v8537_v6, 0.0  ;;  %vm8794_vm11 = vcmp.ge.f32.partialorder %v8538_v31, 0.0  ;;  %v9049_v19 = vmul.f32 0.1, %v8537_v6  ;;  %v8539_v21 = vadd.f32 %v17052_v5, %v8277_v15 }
 0x80f   : > { %v9050_v3 = vmul.f32 0.1, %v8538_v31  ;;  %13030 = vst [vmem:[#allocation4 + $0x18] sm:$0xff] %v12406_v57   ;;  %v9303_v8 = vsel %vm8791_vm8, %v8535_v60, %v9047_v40  ;;  %v9304_v28 = vsel %vm8792_vm9, %v8536_v49, %v9048_v50  ;;  %v8540_v42 = vadd.f32 %v17052_v5, %v8278_v58  ;;  %v14208_v60 = vld [vmem:[#allocation2 + $0xb0] sm:$0xff]  ;;  %v14209_v49 = vld [vmem:[#allocation2 + $0xb8] sm:$0xff]  ;;  %v14211_v40 = vld [vmem:[#allocation2 + $0xc8] sm:$0xff] }
 0x810   : > { %v12411_v26 = vpack.c.bf16 %v9304_v28, %v9303_v8  ;;  %v9305_v53 = vsel %vm8793_vm10, %v8537_v6, %v9049_v19  ;;  %v8279_v7 = vmul.f32 %v14200_v48, %v17043_v2  ;;  %vm8795_vm12 = vcmp.ge.f32.partialorder %v8539_v21, 0.0  ;;  %v14212_v28 = vld [vmem:[#allocation2 + $0xd0] sm:$0xff] }
 0x811   : > { %v9306_v41 = vsel %vm8794_vm11, %v8538_v31, %v9050_v3  ;;  %vm8796_vm13 = vcmp.ge.f32.partialorder %v8540_v42, 0.0  ;;  %v9051_v33 = vmul.f32 0.1, %v8539_v21  ;;  %v9052_v36 = vmul.f32 0.1, %v8540_v42  ;;  %v14210_v31 = vld [vmem:[#allocation2 + $0xc0] sm:$0xff] }
 0x812   : > { %v12416_v29 = vpack.c.bf16 %v9306_v41, %v9305_v53  ;;  %13031 = vst [vmem:[#allocation4 + $0x20] sm:$0xff] %v12411_v26   ;;  %v8280_v51 = vmul.f32 %v14201_v23, %v17043_v2  ;;  %v8541_v43 = vadd.f32 %v17052_v5, %v8279_v7  ;;  %v8281_v25 = vmul.f32 %v14202_v12, %v17043_v2 }
 0x813   : > { %v9307_v34 = vsel %vm8795_vm12, %v8539_v21, %v9051_v33  ;;  %v8282_v14 = vmul.f32 %v14203_v62, %v17043_v2  ;;  %v8283_v47 = vmul.f32 %v14204_v56, %v17043_v2  ;;  %v8284_v15 = vmul.f32 %v14205_v9, %v17043_v2  ;;  %v14214_v56 = vld [vmem:[#allocation2 + $0xe0] sm:$0xff]  ;;  %v14215_v9 = vld [vmem:[#allocation2 + $0xe8] sm:$0xff] }
 0x814   : > { %13032 = vst [vmem:[#allocation4 + $0x28] sm:$0xff] %v12416_v29   ;;  %v9308_v16 = vsel %vm8796_vm13, %v8540_v42, %v9052_v36  ;;  %v8542_v58 = vadd.f32 %v17052_v5, %v8280_v51  ;;  %vm8797_vm14 = vcmp.ge.f32.partialorder %v8541_v43, 0.0  ;;  %v9053_v52 = vmul.f32 0.1, %v8541_v43 }
 0x815   : > { %v12421_v46 = vpack.c.bf16 %v9308_v16, %v9307_v34  ;;  %v8543_v35 = vadd.f32 %v17052_v5, %v8281_v25  ;;  %v8544_v45 = vadd.f32 %v17052_v5, %v8282_v14  ;;  %v8545_v18 = vadd.f32 %v17052_v5, %v8283_v47  ;;  %v14213_v25 = vld [vmem:[#allocation2 + $0xd8] sm:$0xff] }
 0x816   : > { %vm8798_vm15 = vcmp.ge.f32.partialorder %v8542_v58, 0.0  ;;  %v9054_v27 = vmul.f32 0.1, %v8542_v58  ;;  %v9309_v4 = vsel %vm8797_vm14, %v8541_v43, %v9053_v52  ;;  %v8546_v37 = vadd.f32 %v17052_v5, %v8284_v15  ;;  %v14216_v52 = vld [vmem:[#allocation2 + $0xf0] sm:$0xff] }
 0x817   : > { %13033 = vst [vmem:[#allocation4 + $0x30] sm:$0xff] %v12421_v46   ;;  %vm8799_vm0 = vcmp.ge.f32.partialorder %v8543_v35, 0.0  ;;  %vm8800_vm1 = vcmp.ge.f32.partialorder %v8544_v45, 0.0  ;;  %v9055_v20 = vmul.f32 0.1, %v8543_v35  ;;  %vm8801_vm2 = vcmp.ge.f32.partialorder %v8545_v18, 0.0 }
 0x818   : > { %v9056_v39 = vmul.f32 0.1, %v8544_v45  ;;  %v9310_v0 = vsel %vm8798_vm15, %v8542_v58, %v9054_v27  ;;  %vm8802_vm3 = vcmp.ge.f32.partialorder %v8546_v37, 0.0  ;;  %v9057_v17 = vmul.f32 0.1, %v8545_v18 }
 0x819   : > { %v12426_v30 = vpack.c.bf16 %v9310_v0, %v9309_v4  ;;  %v9311_v24 = vsel %vm8799_vm0, %v8543_v35, %v9055_v20  ;;  %v9058_v59 = vmul.f32 0.1, %v8546_v37  ;;  %v8285_v63 = vmul.f32 %v14206_v32, %v17043_v2  ;;  %v14217_v35 = vld [vmem:[#allocation2 + $0xf8] sm:$0xff] }
 0x81a   : > { %v9312_v54 = vsel %vm8800_vm1, %v8544_v45, %v9056_v39  ;;  %v9313_v10 = vsel %vm8801_vm2, %v8545_v18, %v9057_v17  ;;  %v8286_v44 = vmul.f32 %v14207_v13, %v17043_v2  ;;  %v8287_v22 = vmul.f32 %v14208_v60, %v17043_v2  ;;  %v14218_v13 = vld [vmem:[#allocation2 + $0x100] sm:$0xff] }
 0x81b   : > { %v12431_v38 = vpack.c.bf16 %v9312_v54, %v9311_v24  ;;  %13034 = vst [vmem:[#allocation4 + $0x38] sm:$0xff] %v12426_v30   ;;  %v9314_v1 = vsel %vm8802_vm3, %v8546_v37, %v9058_v59  ;;  %v8288_v6 = vmul.f32 %v14209_v49, %v17043_v2  ;;  %v8289_v55 = vmul.f32 %v14210_v31, %v17043_v2 }
 0x81c   : > { %v12436_v61 = vpack.c.bf16 %v9314_v1, %v9313_v10  ;;  %v8547_v11 = vadd.f32 %v17052_v5, %v8285_v63  ;;  %v8548_v57 = vadd.f32 %v17052_v5, %v8286_v44  ;;  %v8290_v50 = vmul.f32 %v14211_v40, %v17043_v2  ;;  %v14219_v1 = vld [vmem:[#allocation2 + $0x108] sm:$0xff] }
 0x81d   : > { %13035 = vst [vmem:[#allocation4 + $0x40] sm:$0xff] %v12431_v38   ;;  %v8549_v19 = vadd.f32 %v17052_v5, %v8287_v22  ;;  %v8550_v3 = vadd.f32 %v17052_v5, %v8288_v6  ;;  %v8551_v8 = vadd.f32 %v17052_v5, %v8289_v55  ;;  %v8291_v21 = vmul.f32 %v14212_v28, %v17043_v2  ;;  %v14220_v6 = vld [vmem:[#allocation2 + $0x110] sm:$0xff]  ;;  %v14221_v55 = vld [vmem:[#allocation2 + $0x118] sm:$0xff] }
 0x81e   : > { %13036 = vst [vmem:[#allocation4 + $0x48] sm:$0xff] %v12436_v61   ;;  %vm8803_vm4 = vcmp.ge.f32.partialorder %v8547_v11, 0.0  ;;  %vm8804_vm5 = vcmp.ge.f32.partialorder %v8548_v57, 0.0  ;;  %v9059_v42 = vmul.f32 0.1, %v8547_v11  ;;  %v8552_v29 = vadd.f32 %v17052_v5, %v8290_v50  ;;  %v14222_v50 = vld [vmem:[#allocation2 + $0x120] sm:$0xff] }
 0x81f   : > { %v9060_v26 = vmul.f32 0.1, %v8548_v57  ;;  %vm8805_vm6 = vcmp.ge.f32.partialorder %v8549_v19, 0.0  ;;  %vm8806_vm7 = vcmp.ge.f32.partialorder %v8550_v3, 0.0  ;;  %v9061_v53 = vmul.f32 0.1, %v8549_v19 }
 0x820   : > { %v9062_v41 = vmul.f32 0.1, %v8550_v3  ;;  %v9315_v48 = vsel %vm8803_vm4, %v8547_v11, %v9059_v42  ;;  %vm8807_vm8 = vcmp.ge.f32.partialorder %v8551_v8, 0.0  ;;  %v9063_v51 = vmul.f32 0.1, %v8551_v8 }
 0x821   : > { %v9316_v7 = vsel %vm8804_vm5, %v8548_v57, %v9060_v26  ;;  %v9317_v36 = vsel %vm8805_vm6, %v8549_v19, %v9061_v53  ;;  %vm8808_vm9 = vcmp.ge.f32.partialorder %v8552_v29, 0.0  ;;  %v9064_v12 = vmul.f32 0.1, %v8552_v29 }
 0x822   : > { %v12441_v33 = vpack.c.bf16 %v9316_v7, %v9315_v48  ;;  %v9318_v23 = vsel %vm8806_vm7, %v8550_v3, %v9062_v41  ;;  %v8292_v34 = vmul.f32 %v14213_v25, %v17043_v2  ;;  %v9319_v62 = vsel %vm8807_vm8, %v8551_v8, %v9063_v51 }
 0x823   : > { %v12446_v43 = vpack.c.bf16 %v9318_v23, %v9317_v36  ;;  %v8553_v14 = vadd.f32 %v17052_v5, %v8291_v21  ;;  %v8293_v47 = vmul.f32 %v14214_v56, %v17043_v2  ;;  %v8294_v15 = vmul.f32 %v14215_v9, %v17043_v2  ;;  %v14223_v21 = vld [vmem:[#allocation2 + $0x128] sm:$0xff]  ;;  %v14225_v56 = vld [vmem:[#allocation2 + $0x138] sm:$0xff] }
 0x824   : > { %13037 = vst [vmem:[#allocation4 + $0x50] sm:$0xff] %v12441_v33   ;;  %v9320_v16 = vsel %vm8808_vm9, %v8552_v29, %v9064_v12  ;;  %v8554_v58 = vadd.f32 %v17052_v5, %v8292_v34  ;;  %v8295_v46 = vmul.f32 %v14216_v52, %v17043_v2  ;;  %v8296_v45 = vmul.f32 %v14217_v35, %v17043_v2  ;;  %v14224_v12 = vld [vmem:[#allocation2 + $0x130] sm:$0xff]  ;;  %v14227_v52 = vld [vmem:[#allocation2 + $0x148] sm:$0xff] }
 0x825   : > { %13038 = vst [vmem:[#allocation4 + $0x58] sm:$0xff] %v12446_v43   ;;  %v12451_v18 = vpack.c.bf16 %v9320_v16, %v9319_v62  ;;  %vm8809_vm10 = vcmp.ge.f32.partialorder %v8553_v14, 0.0  ;;  %v9065_v27 = vmul.f32 0.1, %v8553_v14  ;;  %v8555_v4 = vadd.f32 %v17052_v5, %v8293_v47  ;;  %v14228_v35 = vld [vmem:[#allocation2 + $0x150] sm:$0xff] }
 0x826   : > { %vm8810_vm11 = vcmp.ge.f32.partialorder %v8554_v58, 0.0  ;;  %v9066_v37 = vmul.f32 0.1, %v8554_v58  ;;  %v8556_v20 = vadd.f32 %v17052_v5, %v8294_v15  ;;  %v8557_v39 = vadd.f32 %v17052_v5, %v8295_v46  ;;  %v14226_v15 = vld [vmem:[#allocation2 + $0x140] sm:$0xff] }
 0x827   : > { %13039 = vst [vmem:[#allocation4 + $0x60] sm:$0xff] %v12451_v18   ;;  %v9321_v0 = vsel %vm8809_vm10, %v8553_v14, %v9065_v27  ;;  %vm8811_vm12 = vcmp.ge.f32.partialorder %v8555_v4, 0.0  ;;  %v9067_v17 = vmul.f32 0.1, %v8555_v4  ;;  %v8558_v30 = vadd.f32 %v17052_v5, %v8296_v45  ;;  %v14229_v18 = vld [vmem:[#allocation2 + $0x158] sm:$0xff] }
 0x828   : > { %v9322_v24 = vsel %vm8810_vm11, %v8554_v58, %v9066_v37  ;;  %vm8812_vm13 = vcmp.ge.f32.partialorder %v8556_v20, 0.0  ;;  %v9068_v54 = vmul.f32 0.1, %v8556_v20  ;;  %vm8813_vm14 = vcmp.ge.f32.partialorder %v8557_v39, 0.0 }
 0x829   : > { %v12456_v59 = vpack.c.bf16 %v9322_v24, %v9321_v0  ;;  %v9323_v38 = vsel %vm8811_vm12, %v8555_v4, %v9067_v17  ;;  %vm8814_vm15 = vcmp.ge.f32.partialorder %v8558_v30, 0.0  ;;  %v9069_v10 = vmul.f32 0.1, %v8557_v39 }
 0x82a   : > { %v9324_v32 = vsel %vm8812_vm13, %v8556_v20, %v9068_v54  ;;  %v9070_v63 = vmul.f32 0.1, %v8558_v30  ;;  %v8297_v44 = vmul.f32 %v14218_v13, %v17043_v2  ;;  %v8298_v60 = vmul.f32 %v14219_v1, %v17043_v2 }
 0x82b   : > { %13040 = vst [vmem:[#allocation4 + $0x68] sm:$0xff] %v12456_v59   ;;  %v12461_v22 = vpack.c.bf16 %v9324_v32, %v9323_v38  ;;  %v9325_v49 = vsel %vm8813_vm14, %v8557_v39, %v9069_v10  ;;  %v8299_v31 = vmul.f32 %v14220_v6, %v17043_v2  ;;  %v8300_v61 = vmul.f32 %v14221_v55, %v17043_v2  ;;  %v14230_v6 = vld [vmem:[#allocation2 + $0x160] sm:$0xff]  ;;  %v14231_v55 = vld [vmem:[#allocation2 + $0x168] sm:$0xff] }
 0x82c   : > { %v9326_v11 = vsel %vm8814_vm15, %v8558_v30, %v9070_v63  ;;  %v8559_v57 = vadd.f32 %v17052_v5, %v8297_v44  ;;  %v8560_v40 = vadd.f32 %v17052_v5, %v8298_v60  ;;  %v8301_v19 = vmul.f32 %v14222_v50, %v17043_v2  ;;  %v14233_v50 = vld [vmem:[#allocation2 + $0x178] sm:$0xff] }
 0x82d   : > { %13041 = vst [vmem:[#allocation4 + $0x70] sm:$0xff] %v12461_v22   ;;  %v12466_v3 = vpack.c.bf16 %v9326_v11, %v9325_v49  ;;  %v8561_v8 = vadd.f32 %v17052_v5, %v8299_v31  ;;  %v8562_v28 = vadd.f32 %v17052_v5, %v8300_v61  ;;  %v8302_v42 = vmul.f32 %v14223_v21, %v17043_v2 }
 0x82e   : > { %vm8815_vm0 = vcmp.ge.f32.partialorder %v8559_v57, 0.0  ;;  %vm8816_vm1 = vcmp.ge.f32.partialorder %v8560_v40, 0.0  ;;  %v9071_v26 = vmul.f32 0.1, %v8559_v57  ;;  %v9072_v53 = vmul.f32 0.1, %v8560_v40 }
 0x82f   : > { %13042 = vst [vmem:[#allocation4 + $0x78] sm:$0xff] %v12466_v3   ;;  %vm8817_vm2 = vcmp.ge.f32.partialorder %v8561_v8, 0.0  ;;  %vm8818_vm3 = vcmp.ge.f32.partialorder %v8562_v28, 0.0  ;;  %v9073_v41 = vmul.f32 0.1, %v8561_v8  ;;  %v8563_v33 = vadd.f32 %v17052_v5, %v8301_v19  ;;  %v14234_v3 = vld [vmem:[#allocation2 + $0x180] sm:$0xff] }
 0x830   : > { %v9074_v48 = vmul.f32 0.1, %v8562_v28  ;;  %v9327_v7 = vsel %vm8815_vm0, %v8559_v57, %v9071_v26  ;;  %v9328_v29 = vsel %vm8816_vm1, %v8560_v40, %v9072_v53  ;;  %v8564_v36 = vadd.f32 %v17052_v5, %v8302_v42  ;;  %v14232_v57 = vld [vmem:[#allocation2 + $0x170] sm:$0xff]  ;;  %v14235_v26 = vld [vmem:[#allocation2 + $0x188] sm:$0xff] }
 0x831   : > { %v12471_v23 = vpack.c.bf16 %v9328_v29, %v9327_v7  ;;  %v9329_v51 = vsel %vm8817_vm2, %v8561_v8, %v9073_v41  ;;  %v8303_v25 = vmul.f32 %v14224_v12, %v17043_v2  ;;  %vm8819_vm4 = vcmp.ge.f32.partialorder %v8563_v33, 0.0  ;;  %v14236_v29 = vld [vmem:[#allocation2 + $0x190] sm:$0xff] }
 0x832   : > { %v9330_v43 = vsel %vm8818_vm3, %v8562_v28, %v9074_v48  ;;  %vm8820_vm5 = vcmp.ge.f32.partialorder %v8564_v36, 0.0  ;;  %v9075_v62 = vmul.f32 0.1, %v8563_v33  ;;  %v9076_v14 = vmul.f32 0.1, %v8564_v36 }
 0x833   : > { %v12476_v34 = vpack.c.bf16 %v9330_v43, %v9329_v51  ;;  %13043 = vst [vmem:[#allocation4 + $0x80] sm:$0xff] %v12471_v23   ;;  %v8304_v47 = vmul.f32 %v14225_v56, %v17043_v2  ;;  %v8565_v9 = vadd.f32 %v17052_v5, %v8303_v25  ;;  %v8305_v16 = vmul.f32 %v14226_v15, %v17043_v2 }
 0x834   : > { %v9331_v58 = vsel %vm8819_vm4, %v8563_v33, %v9075_v62  ;;  %v8306_v46 = vmul.f32 %v14227_v52, %v17043_v2  ;;  %v8307_v45 = vmul.f32 %v14228_v35, %v17043_v2  ;;  %v8308_v27 = vmul.f32 %v14229_v18, %v17043_v2  ;;  %v14238_v35 = vld [vmem:[#allocation2 + $0x1a0] sm:$0xff]  ;;  %v14239_v18 = vld [vmem:[#allocation2 + $0x1a8] sm:$0xff] }
 0x835   : > { %13044 = vst [vmem:[#allocation4 + $0x88] sm:$0xff] %v12476_v34   ;;  %v9332_v4 = vsel %vm8820_vm5, %v8564_v36, %v9076_v14  ;;  %v8566_v37 = vadd.f32 %v17052_v5, %v8304_v47  ;;  %vm8821_vm6 = vcmp.ge.f32.partialorder %v8565_v9, 0.0  ;;  %v9077_v20 = vmul.f32 0.1, %v8565_v9 }
 0x836   : > { %v12481_v39 = vpack.c.bf16 %v9332_v4, %v9331_v58  ;;  %v8567_v0 = vadd.f32 %v17052_v5, %v8305_v16  ;;  %v8568_v17 = vadd.f32 %v17052_v5, %v8306_v46  ;;  %v8569_v30 = vadd.f32 %v17052_v5, %v8307_v45  ;;  %v14237_v16 = vld [vmem:[#allocation2 + $0x198] sm:$0xff] }
 0x837   : > { %vm8822_vm7 = vcmp.ge.f32.partialorder %v8566_v37, 0.0  ;;  %v9078_v24 = vmul.f32 0.1, %v8566_v37  ;;  %v9333_v54 = vsel %vm8821_vm6, %v8565_v9, %v9077_v20  ;;  %v8570_v59 = vadd.f32 %v17052_v5, %v8308_v27  ;;  %v14240_v20 = vld [vmem:[#allocation2 + $0x1b0] sm:$0xff] }
 0x838   : > { %13045 = vst [vmem:[#allocation4 + $0x90] sm:$0xff] %v12481_v39   ;;  %vm8823_vm8 = vcmp.ge.f32.partialorder %v8567_v0, 0.0  ;;  %vm8824_vm9 = vcmp.ge.f32.partialorder %v8568_v17, 0.0  ;;  %v9079_v38 = vmul.f32 0.1, %v8567_v0  ;;  %vm8825_vm10 = vcmp.ge.f32.partialorder %v8569_v30, 0.0 }
 0x839   : > { %v9080_v10 = vmul.f32 0.1, %v8568_v17  ;;  %v9334_v32 = vsel %vm8822_vm7, %v8566_v37, %v9078_v24  ;;  %vm8826_vm11 = vcmp.ge.f32.partialorder %v8570_v59, 0.0  ;;  %v9081_v63 = vmul.f32 0.1, %v8569_v30 }
 0x83a   : > { %v12486_v13 = vpack.c.bf16 %v9334_v32, %v9333_v54  ;;  %v9335_v44 = vsel %vm8823_vm8, %v8567_v0, %v9079_v38  ;;  %v9082_v60 = vmul.f32 0.1, %v8570_v59  ;;  %v8309_v31 = vmul.f32 %v14230_v6, %v17043_v2  ;;  %v14241_v0 = vld [vmem:[#allocation2 + $0x1b8] sm:$0xff] }
 0x83b   : > { %v9336_v1 = vsel %vm8824_vm9, %v8568_v17, %v9080_v10  ;;  %v9337_v49 = vsel %vm8825_vm10, %v8569_v30, %v9081_v63  ;;  %v8310_v61 = vmul.f32 %v14231_v55, %v17043_v2  ;;  %v8311_v40 = vmul.f32 %v14232_v57, %v17043_v2  ;;  %v14242_v55 = vld [vmem:[#allocation2 + $0x1c0] sm:$0xff] }
 0x83c   : > { %v12491_v22 = vpack.c.bf16 %v9336_v1, %v9335_v44  ;;  %13046 = vst [vmem:[#allocation4 + $0x98] sm:$0xff] %v12486_v13   ;;  %v9338_v11 = vsel %vm8826_vm11, %v8570_v59, %v9082_v60  ;;  %v8312_v19 = vmul.f32 %v14233_v50, %v17043_v2  ;;  %v8313_v8 = vmul.f32 %v14234_v3, %v17043_v2 }
 0x83d   : > { %v12496_v28 = vpack.c.bf16 %v9338_v11, %v9337_v49  ;;  %v8571_v21 = vadd.f32 %v17052_v5, %v8309_v31  ;;  %v8572_v42 = vadd.f32 %v17052_v5, %v8310_v61  ;;  %v8314_v53 = vmul.f32 %v14235_v26, %v17043_v2  ;;  %v14243_v11 = vld [vmem:[#allocation2 + $0x1c8] sm:$0xff] }
 0x83e   : > { %13047 = vst [vmem:[#allocation4 + $0xa0] sm:$0xff] %v12491_v22   ;;  %v8573_v41 = vadd.f32 %v17052_v5, %v8311_v40  ;;  %v8574_v48 = vadd.f32 %v17052_v5, %v8312_v19  ;;  %v8575_v7 = vadd.f32 %v17052_v5, %v8313_v8  ;;  %v8315_v33 = vmul.f32 %v14236_v29, %v17043_v2  ;;  %v14244_v19 = vld [vmem:[#allocation2 + $0x1d0] sm:$0xff]  ;;  %v14245_v8 = vld [vmem:[#allocation2 + $0x1d8] sm:$0xff] }
 0x83f   : > { %13048 = vst [vmem:[#allocation4 + $0xa8] sm:$0xff] %v12496_v28   ;;  %vm8827_vm12 = vcmp.ge.f32.partialorder %v8571_v21, 0.0  ;;  %vm8828_vm13 = vcmp.ge.f32.partialorder %v8572_v42, 0.0  ;;  %v9083_v36 = vmul.f32 0.1, %v8571_v21  ;;  %v8576_v34 = vadd.f32 %v17052_v5, %v8314_v53  ;;  %v14246_v53 = vld [vmem:[#allocation2 + $0x1e0] sm:$0xff] }
 0x840   : > { %v9084_v23 = vmul.f32 0.1, %v8572_v42  ;;  %vm8829_vm14 = vcmp.ge.f32.partialorder %v8573_v41, 0.0  ;;  %vm8830_vm15 = vcmp.ge.f32.partialorder %v8574_v48, 0.0  ;;  %v9085_v51 = vmul.f32 0.1, %v8573_v41 }
 0x841   : > { %v9086_v43 = vmul.f32 0.1, %v8574_v48  ;;  %v9339_v12 = vsel %vm8827_vm12, %v8571_v21, %v9083_v36  ;;  %vm8831_vm0 = vcmp.ge.f32.partialorder %v8575_v7, 0.0  ;;  %v9087_v47 = vmul.f32 0.1, %v8575_v7 }
 0x842   : > { %v9340_v25 = vsel %vm8828_vm13, %v8572_v42, %v9084_v23  ;;  %v9341_v14 = vsel %vm8829_vm14, %v8573_v41, %v9085_v51  ;;  %vm8832_vm1 = vcmp.ge.f32.partialorder %v8576_v34, 0.0  ;;  %v9088_v15 = vmul.f32 0.1, %v8576_v34 }
 0x843   : > { %v12501_v62 = vpack.c.bf16 %v9340_v25, %v9339_v12  ;;  %v9342_v56 = vsel %vm8830_vm15, %v8574_v48, %v9086_v43  ;;  %v8316_v58 = vmul.f32 %v14237_v16, %v17043_v2  ;;  %v9343_v52 = vsel %vm8831_vm0, %v8575_v7, %v9087_v47 }
 0x844   : > { %v12506_v9 = vpack.c.bf16 %v9342_v56, %v9341_v14  ;;  %v8577_v46 = vadd.f32 %v17052_v5, %v8315_v33  ;;  %v8317_v45 = vmul.f32 %v14238_v35, %v17043_v2  ;;  %v8318_v27 = vmul.f32 %v14239_v18, %v17043_v2  ;;  %v14247_v33 = vld [vmem:[#allocation2 + $0x1e8] sm:$0xff]  ;;  %v14249_v35 = vld [vmem:[#allocation2 + $0x1f8] sm:$0xff] }
 0x845   : > { %13049 = vst [vmem:[#allocation4 + $0xb0] sm:$0xff] %v12501_v62   ;;  %v9344_v4 = vsel %vm8832_vm1, %v8576_v34, %v9088_v15  ;;  %v8578_v37 = vadd.f32 %v17052_v5, %v8316_v58  ;;  %v8319_v39 = vmul.f32 %v14240_v20, %v17043_v2  ;;  %v8320_v17 = vmul.f32 %v14241_v0, %v17043_v2  ;;  %v14248_v15 = vld [vmem:[#allocation2 + $0x1f0] sm:$0xff]  ;;  %v14251_v20 = vld [vmem:[#allocation2 + $0x208] sm:$0xff] }
 0x846   : > { %13050 = vst [vmem:[#allocation4 + $0xb8] sm:$0xff] %v12506_v9   ;;  %v12511_v30 = vpack.c.bf16 %v9344_v4, %v9343_v52  ;;  %vm8833_vm2 = vcmp.ge.f32.partialorder %v8577_v46, 0.0  ;;  %v9089_v24 = vmul.f32 0.1, %v8577_v46  ;;  %v8579_v54 = vadd.f32 %v17052_v5, %v8317_v45  ;;  %v14252_v0 = vld [vmem:[#allocation2 + $0x210] sm:$0xff] }
 0x847   : > { %vm8834_vm3 = vcmp.ge.f32.partialorder %v8578_v37, 0.0  ;;  %v9090_v59 = vmul.f32 0.1, %v8578_v37  ;;  %v8580_v38 = vadd.f32 %v17052_v5, %v8318_v27  ;;  %v8581_v10 = vadd.f32 %v17052_v5, %v8319_v39  ;;  %v14250_v27 = vld [vmem:[#allocation2 + $0x200] sm:$0xff] }
 0x848   : > { %13051 = vst [vmem:[#allocation4 + $0xc0] sm:$0xff] %v12511_v30   ;;  %v9345_v32 = vsel %vm8833_vm2, %v8577_v46, %v9089_v24  ;;  %vm8835_vm4 = vcmp.ge.f32.partialorder %v8579_v54, 0.0  ;;  %v9091_v63 = vmul.f32 0.1, %v8579_v54  ;;  %v8582_v13 = vadd.f32 %v17052_v5, %v8320_v17  ;;  %v14253_v30 = vld [vmem:[#allocation2 + $0x218] sm:$0xff] }
 0x849   : > { %v9346_v44 = vsel %vm8834_vm3, %v8578_v37, %v9090_v59  ;;  %vm8836_vm5 = vcmp.ge.f32.partialorder %v8580_v38, 0.0  ;;  %v9092_v1 = vmul.f32 0.1, %v8580_v38  ;;  %vm8837_vm6 = vcmp.ge.f32.partialorder %v8581_v10, 0.0 }
 0x84a   : > { %v12516_v60 = vpack.c.bf16 %v9346_v44, %v9345_v32  ;;  %v9347_v22 = vsel %vm8835_vm4, %v8579_v54, %v9091_v63  ;;  %vm8838_vm7 = vcmp.ge.f32.partialorder %v8582_v13, 0.0  ;;  %v9093_v49 = vmul.f32 0.1, %v8581_v10 }
 0x84b   : > { %v9348_v6 = vsel %vm8836_vm5, %v8580_v38, %v9092_v1  ;;  %v9094_v31 = vmul.f32 0.1, %v8582_v13  ;;  %v8321_v61 = vmul.f32 %v14242_v55, %v17043_v2  ;;  %v8322_v57 = vmul.f32 %v14243_v11, %v17043_v2 }
 0x84c   : > { %13052 = vst [vmem:[#allocation4 + $0xc8] sm:$0xff] %v12516_v60   ;;  %v12521_v40 = vpack.c.bf16 %v9348_v6, %v9347_v22  ;;  %v9349_v50 = vsel %vm8837_vm6, %v8581_v10, %v9093_v49  ;;  %v8323_v3 = vmul.f32 %v14244_v19, %v17043_v2  ;;  %v8324_v28 = vmul.f32 %v14245_v8, %v17043_v2  ;;  %v14254_v19 = vld [vmem:[#allocation2 + $0x220] sm:$0xff]  ;;  %v14255_v8 = vld [vmem:[#allocation2 + $0x228] sm:$0xff] }
 0x84d   : > { %v9350_v21 = vsel %vm8838_vm7, %v8582_v13, %v9094_v31  ;;  %v8583_v42 = vadd.f32 %v17052_v5, %v8321_v61  ;;  %v8584_v26 = vadd.f32 %v17052_v5, %v8322_v57  ;;  %v8325_v41 = vmul.f32 %v14246_v53, %v17043_v2  ;;  %v14257_v53 = vld [vmem:[#allocation2 + $0x238] sm:$0xff] }
 0x84e   : > { %13053 = vst [vmem:[#allocation4 + $0xd0] sm:$0xff] %v12521_v40   ;;  %v12526_v48 = vpack.c.bf16 %v9350_v21, %v9349_v50  ;;  %v8585_v7 = vadd.f32 %v17052_v5, %v8323_v3  ;;  %v8586_v29 = vadd.f32 %v17052_v5, %v8324_v28  ;;  %v8326_v36 = vmul.f32 %v14247_v33, %v17043_v2 }
 0x84f   : > { %vm8839_vm8 = vcmp.ge.f32.partialorder %v8583_v42, 0.0  ;;  %vm8840_vm9 = vcmp.ge.f32.partialorder %v8584_v26, 0.0  ;;  %v9095_v23 = vmul.f32 0.1, %v8583_v42  ;;  %v9096_v51 = vmul.f32 0.1, %v8584_v26 }
 0x850   : > { %13054 = vst [vmem:[#allocation4 + $0xd8] sm:$0xff] %v12526_v48   ;;  %vm8841_vm10 = vcmp.ge.f32.partialorder %v8585_v7, 0.0  ;;  %vm8842_vm11 = vcmp.ge.f32.partialorder %v8586_v29, 0.0  ;;  %v9097_v43 = vmul.f32 0.1, %v8585_v7  ;;  %v8587_v62 = vadd.f32 %v17052_v5, %v8325_v41  ;;  %v14258_v48 = vld [vmem:[#allocation2 + $0x240] sm:$0xff] }
 0x851   : > { %v9098_v12 = vmul.f32 0.1, %v8586_v29  ;;  %v9351_v25 = vsel %vm8839_vm8, %v8583_v42, %v9095_v23  ;;  %v9352_v34 = vsel %vm8840_vm9, %v8584_v26, %v9096_v51  ;;  %v8588_v14 = vadd.f32 %v17052_v5, %v8326_v36  ;;  %v14256_v42 = vld [vmem:[#allocation2 + $0x230] sm:$0xff]  ;;  %v14259_v23 = vld [vmem:[#allocation2 + $0x248] sm:$0xff] }
 0x852   : > { %v12531_v56 = vpack.c.bf16 %v9352_v34, %v9351_v25  ;;  %v9353_v47 = vsel %vm8841_vm10, %v8585_v7, %v9097_v43  ;;  %v8327_v16 = vmul.f32 %v14248_v15, %v17043_v2  ;;  %vm8843_vm12 = vcmp.ge.f32.partialorder %v8587_v62, 0.0  ;;  %v14260_v34 = vld [vmem:[#allocation2 + $0x250] sm:$0xff] }
 0x853   : > { %v9354_v9 = vsel %vm8842_vm11, %v8586_v29, %v9098_v12  ;;  %vm8844_vm13 = vcmp.ge.f32.partialorder %v8588_v14, 0.0  ;;  %v9099_v52 = vmul.f32 0.1, %v8587_v62  ;;  %v9100_v46 = vmul.f32 0.1, %v8588_v14 }
 0x854   : > { %v12536_v58 = vpack.c.bf16 %v9354_v9, %v9353_v47  ;;  %13055 = vst [vmem:[#allocation4 + $0xe0] sm:$0xff] %v12531_v56   ;;  %v8328_v45 = vmul.f32 %v14249_v35, %v17043_v2  ;;  %v8589_v18 = vadd.f32 %v17052_v5, %v8327_v16  ;;  %v8329_v4 = vmul.f32 %v14250_v27, %v17043_v2 }
 0x855   : > { %v9355_v37 = vsel %vm8843_vm12, %v8587_v62, %v9099_v52  ;;  %v8330_v39 = vmul.f32 %v14251_v20, %v17043_v2  ;;  %v8331_v17 = vmul.f32 %v14252_v0, %v17043_v2  ;;  %v8332_v24 = vmul.f32 %v14253_v30, %v17043_v2  ;;  %v14262_v0 = vld [vmem:[#allocation2 + $0x260] sm:$0xff]  ;;  %v14263_v30 = vld [vmem:[#allocation2 + $0x268] sm:$0xff] }
 0x856   : > { %13056 = vst [vmem:[#allocation4 + $0xe8] sm:$0xff] %v12536_v58   ;;  %v9356_v54 = vsel %vm8844_vm13, %v8588_v14, %v9100_v46  ;;  %v8590_v59 = vadd.f32 %v17052_v5, %v8328_v45  ;;  %vm8845_vm14 = vcmp.ge.f32.partialorder %v8589_v18, 0.0  ;;  %v9101_v38 = vmul.f32 0.1, %v8589_v18 }
 0x857   : > { %v12541_v10 = vpack.c.bf16 %v9356_v54, %v9355_v37  ;;  %v8591_v32 = vadd.f32 %v17052_v5, %v8329_v4  ;;  %v8592_v63 = vadd.f32 %v17052_v5, %v8330_v39  ;;  %v8593_v13 = vadd.f32 %v17052_v5, %v8331_v17  ;;  %v14261_v4 = vld [vmem:[#allocation2 + $0x258] sm:$0xff] }
 0x858   : > { %vm8846_vm15 = vcmp.ge.f32.partialorder %v8590_v59, 0.0  ;;  %v9102_v44 = vmul.f32 0.1, %v8590_v59  ;;  %v9357_v1 = vsel %vm8845_vm14, %v8589_v18, %v9101_v38  ;;  %v8594_v60 = vadd.f32 %v17052_v5, %v8332_v24  ;;  %v14264_v38 = vld [vmem:[#allocation2 + $0x270] sm:$0xff] }
 0x859   : > { %13057 = vst [vmem:[#allocation4 + $0xf0] sm:$0xff] %v12541_v10   ;;  %vm8847_vm0 = vcmp.ge.f32.partialorder %v8591_v32, 0.0  ;;  %vm8848_vm1 = vcmp.ge.f32.partialorder %v8592_v63, 0.0  ;;  %v9103_v22 = vmul.f32 0.1, %v8591_v32  ;;  %vm8849_vm2 = vcmp.ge.f32.partialorder %v8593_v13, 0.0 }
 0x85a   : > { %v9104_v49 = vmul.f32 0.1, %v8592_v63  ;;  %v9358_v6 = vsel %vm8846_vm15, %v8590_v59, %v9102_v44  ;;  %vm8850_vm3 = vcmp.ge.f32.partialorder %v8594_v60, 0.0  ;;  %v9105_v31 = vmul.f32 0.1, %v8593_v13 }
 0x85b   : > { %v12546_v55 = vpack.c.bf16 %v9358_v6, %v9357_v1  ;;  %v9359_v61 = vsel %vm8847_vm0, %v8591_v32, %v9103_v22  ;;  %v9106_v57 = vmul.f32 0.1, %v8594_v60  ;;  %v8333_v3 = vmul.f32 %v14254_v19, %v17043_v2  ;;  %v14265_v32 = vld [vmem:[#allocation2 + $0x278] sm:$0xff] }
 0x85c   : > { %v9360_v11 = vsel %vm8848_vm1, %v8592_v63, %v9104_v49  ;;  %v9361_v50 = vsel %vm8849_vm2, %v8593_v13, %v9105_v31  ;;  %v8334_v28 = vmul.f32 %v14255_v8, %v17043_v2  ;;  %v8335_v26 = vmul.f32 %v14256_v42, %v17043_v2  ;;  %v14266_v8 = vld [vmem:[#allocation2 + $0x280] sm:$0xff] }
 0x85d   : > { %v12551_v40 = vpack.c.bf16 %v9360_v11, %v9359_v61  ;;  %13058 = vst [vmem:[#allocation4 + $0xf8] sm:$0xff] %v12546_v55   ;;  %v9362_v21 = vsel %vm8850_vm3, %v8594_v60, %v9106_v57  ;;  %v8336_v41 = vmul.f32 %v14257_v53, %v17043_v2  ;;  %v8337_v7 = vmul.f32 %v14258_v48, %v17043_v2 }
 0x85e   : > { %v12556_v29 = vpack.c.bf16 %v9362_v21, %v9361_v50  ;;  %v8595_v33 = vadd.f32 %v17052_v5, %v8333_v3  ;;  %v8596_v36 = vadd.f32 %v17052_v5, %v8334_v28  ;;  %v8338_v51 = vmul.f32 %v14259_v23, %v17043_v2  ;;  %v14267_v21 = vld [vmem:[#allocation2 + $0x288] sm:$0xff] }
 0x85f   : > { %13059 = vst [vmem:[#allocation4 + $0x100] sm:$0xff] %v12551_v40   ;;  %v8597_v43 = vadd.f32 %v17052_v5, %v8335_v26  ;;  %v8598_v12 = vadd.f32 %v17052_v5, %v8336_v41  ;;  %v8599_v25 = vadd.f32 %v17052_v5, %v8337_v7  ;;  %v8339_v62 = vmul.f32 %v14260_v34, %v17043_v2  ;;  %v14268_v41 = vld [vmem:[#allocation2 + $0x290] sm:$0xff]  ;;  %v14269_v7 = vld [vmem:[#allocation2 + $0x298] sm:$0xff] }
 0x860   : > { %13060 = vst [vmem:[#allocation4 + $0x108] sm:$0xff] %v12556_v29   ;;  %vm8851_vm4 = vcmp.ge.f32.partialorder %v8595_v33, 0.0  ;;  %vm8852_vm5 = vcmp.ge.f32.partialorder %v8596_v36, 0.0  ;;  %v9107_v14 = vmul.f32 0.1, %v8595_v33  ;;  %v8600_v58 = vadd.f32 %v17052_v5, %v8338_v51  ;;  %v14270_v51 = vld [vmem:[#allocation2 + $0x2a0] sm:$0xff] }
 0x861   : > { %v9108_v56 = vmul.f32 0.1, %v8596_v36  ;;  %vm8853_vm6 = vcmp.ge.f32.partialorder %v8597_v43, 0.0  ;;  %vm8854_vm7 = vcmp.ge.f32.partialorder %v8598_v12, 0.0  ;;  %v9109_v47 = vmul.f32 0.1, %v8597_v43 }
 0x862   : > { %v9110_v9 = vmul.f32 0.1, %v8598_v12  ;;  %v9363_v15 = vsel %vm8851_vm4, %v8595_v33, %v9107_v14  ;;  %vm8855_vm8 = vcmp.ge.f32.partialorder %v8599_v25, 0.0  ;;  %v9111_v45 = vmul.f32 0.1, %v8599_v25 }
 0x863   : > { %v9364_v16 = vsel %vm8852_vm5, %v8596_v36, %v9108_v56  ;;  %v9365_v46 = vsel %vm8853_vm6, %v8597_v43, %v9109_v47  ;;  %vm8856_vm9 = vcmp.ge.f32.partialorder %v8600_v58, 0.0  ;;  %v9112_v27 = vmul.f32 0.1, %v8600_v58 }
 0x864   : > { %v12561_v52 = vpack.c.bf16 %v9364_v16, %v9363_v15  ;;  %v9366_v35 = vsel %vm8854_vm7, %v8598_v12, %v9110_v9  ;;  %v8340_v37 = vmul.f32 %v14261_v4, %v17043_v2  ;;  %v9367_v20 = vsel %vm8855_vm8, %v8599_v25, %v9111_v45 }
 0x865   : > { %v12566_v18 = vpack.c.bf16 %v9366_v35, %v9365_v46  ;;  %v8601_v39 = vadd.f32 %v17052_v5, %v8339_v62  ;;  %v8341_v17 = vmul.f32 %v14262_v0, %v17043_v2  ;;  %v8342_v24 = vmul.f32 %v14263_v30, %v17043_v2  ;;  %v14271_v62 = vld [vmem:[#allocation2 + $0x2a8] sm:$0xff]  ;;  %v14273_v0 = vld [vmem:[#allocation2 + $0x2b8] sm:$0xff] }
 0x866   : > { %13061 = vst [vmem:[#allocation4 + $0x110] sm:$0xff] %v12561_v52   ;;  %v9368_v54 = vsel %vm8856_vm9, %v8600_v58, %v9112_v27  ;;  %v8602_v59 = vadd.f32 %v17052_v5, %v8340_v37  ;;  %v8343_v10 = vmul.f32 %v14264_v38, %v17043_v2  ;;  %v8344_v63 = vmul.f32 %v14265_v32, %v17043_v2  ;;  %v14272_v27 = vld [vmem:[#allocation2 + $0x2b0] sm:$0xff]  ;;  %v14275_v38 = vld [vmem:[#allocation2 + $0x2c8] sm:$0xff] }
 0x867   : > { %13062 = vst [vmem:[#allocation4 + $0x118] sm:$0xff] %v12566_v18   ;;  %v12571_v13 = vpack.c.bf16 %v9368_v54, %v9367_v20  ;;  %vm8857_vm10 = vcmp.ge.f32.partialorder %v8601_v39, 0.0  ;;  %v9113_v44 = vmul.f32 0.1, %v8601_v39  ;;  %v8603_v1 = vadd.f32 %v17052_v5, %v8341_v17  ;;  %v14276_v32 = vld [vmem:[#allocation2 + $0x2d0] sm:$0xff] }
 0x868   : > { %vm8858_vm11 = vcmp.ge.f32.partialorder %v8602_v59, 0.0  ;;  %v9114_v60 = vmul.f32 0.1, %v8602_v59  ;;  %v8604_v22 = vadd.f32 %v17052_v5, %v8342_v24  ;;  %v8605_v49 = vadd.f32 %v17052_v5, %v8343_v10  ;;  %v14274_v24 = vld [vmem:[#allocation2 + $0x2c0] sm:$0xff] }
 0x869   : > { %13063 = vst [vmem:[#allocation4 + $0x120] sm:$0xff] %v12571_v13   ;;  %v9369_v6 = vsel %vm8857_vm10, %v8601_v39, %v9113_v44  ;;  %vm8859_vm12 = vcmp.ge.f32.partialorder %v8603_v1, 0.0  ;;  %v9115_v31 = vmul.f32 0.1, %v8603_v1  ;;  %v8606_v55 = vadd.f32 %v17052_v5, %v8344_v63  ;;  %v14277_v13 = vld [vmem:[#allocation2 + $0x2d8] sm:$0xff] }
 0x86a   : > { %v9370_v61 = vsel %vm8858_vm11, %v8602_v59, %v9114_v60  ;;  %vm8860_vm13 = vcmp.ge.f32.partialorder %v8604_v22, 0.0  ;;  %v9116_v11 = vmul.f32 0.1, %v8604_v22  ;;  %vm8861_vm14 = vcmp.ge.f32.partialorder %v8605_v49, 0.0 }
 0x86b   : > { %v12576_v57 = vpack.c.bf16 %v9370_v61, %v9369_v6  ;;  %v9371_v40 = vsel %vm8859_vm12, %v8603_v1, %v9115_v31  ;;  %vm8862_vm15 = vcmp.ge.f32.partialorder %v8606_v55, 0.0  ;;  %v9117_v50 = vmul.f32 0.1, %v8605_v49 }
 0x86c   : > { %v9372_v19 = vsel %vm8860_vm13, %v8604_v22, %v9116_v11  ;;  %v9118_v3 = vmul.f32 0.1, %v8606_v55  ;;  %v8345_v28 = vmul.f32 %v14266_v8, %v17043_v2  ;;  %v8346_v42 = vmul.f32 %v14267_v21, %v17043_v2 }
 0x86d   : > { %13064 = vst [vmem:[#allocation4 + $0x128] sm:$0xff] %v12576_v57   ;;  %v12581_v26 = vpack.c.bf16 %v9372_v19, %v9371_v40  ;;  %v9373_v53 = vsel %vm8861_vm14, %v8605_v49, %v9117_v50  ;;  %v8347_v48 = vmul.f32 %v14268_v41, %v17043_v2  ;;  %v8348_v29 = vmul.f32 %v14269_v7, %v17043_v2  ;;  %v14278_v41 = vld [vmem:[#allocation2 + $0x2e0] sm:$0xff]  ;;  %v14279_v7 = vld [vmem:[#allocation2 + $0x2e8] sm:$0xff] }
 0x86e   : > { %v9374_v33 = vsel %vm8862_vm15, %v8606_v55, %v9118_v3  ;;  %v8607_v36 = vadd.f32 %v17052_v5, %v8345_v28  ;;  %v8608_v23 = vadd.f32 %v17052_v5, %v8346_v42  ;;  %v8349_v43 = vmul.f32 %v14270_v51, %v17043_v2  ;;  %v14281_v51 = vld [vmem:[#allocation2 + $0x2f8] sm:$0xff] }
 0x86f   : > { %13065 = vst [vmem:[#allocation4 + $0x130] sm:$0xff] %v12581_v26   ;;  %v12586_v12 = vpack.c.bf16 %v9374_v33, %v9373_v53  ;;  %v8609_v25 = vadd.f32 %v17052_v5, %v8347_v48  ;;  %v8610_v34 = vadd.f32 %v17052_v5, %v8348_v29  ;;  %v8350_v14 = vmul.f32 %v14271_v62, %v17043_v2 }
 0x870   : > { %vm8863_vm0 = vcmp.ge.f32.partialorder %v8607_v36, 0.0  ;;  %vm8864_vm1 = vcmp.ge.f32.partialorder %v8608_v23, 0.0  ;;  %v9119_v56 = vmul.f32 0.1, %v8607_v36  ;;  %v9120_v47 = vmul.f32 0.1, %v8608_v23 }
 0x871   : > { %13066 = vst [vmem:[#allocation4 + $0x138] sm:$0xff] %v12586_v12   ;;  %vm8865_vm2 = vcmp.ge.f32.partialorder %v8609_v25, 0.0  ;;  %vm8866_vm3 = vcmp.ge.f32.partialorder %v8610_v34, 0.0  ;;  %v9121_v9 = vmul.f32 0.1, %v8609_v25  ;;  %v8611_v52 = vadd.f32 %v17052_v5, %v8349_v43  ;;  %v14282_v12 = vld [vmem:[#allocation2 + $0x300] sm:$0xff] }
 0x872   : > { %v9122_v15 = vmul.f32 0.1, %v8610_v34  ;;  %v9375_v16 = vsel %vm8863_vm0, %v8607_v36, %v9119_v56  ;;  %v9376_v58 = vsel %vm8864_vm1, %v8608_v23, %v9120_v47  ;;  %v8612_v46 = vadd.f32 %v17052_v5, %v8350_v14  ;;  %v14280_v36 = vld [vmem:[#allocation2 + $0x2f0] sm:$0xff]  ;;  %v14283_v56 = vld [vmem:[#allocation2 + $0x308] sm:$0xff] }
 0x873   : > { %v12591_v35 = vpack.c.bf16 %v9376_v58, %v9375_v16  ;;  %v9377_v45 = vsel %vm8865_vm2, %v8609_v25, %v9121_v9  ;;  %v8351_v4 = vmul.f32 %v14272_v27, %v17043_v2  ;;  %vm8867_vm4 = vcmp.ge.f32.partialorder %v8611_v52, 0.0  ;;  %v14284_v58 = vld [vmem:[#allocation2 + $0x310] sm:$0xff] }
 0x874   : > { %v9378_v18 = vsel %vm8866_vm3, %v8610_v34, %v9122_v15  ;;  %vm8868_vm5 = vcmp.ge.f32.partialorder %v8612_v46, 0.0  ;;  %v9123_v20 = vmul.f32 0.1, %v8611_v52  ;;  %v9124_v39 = vmul.f32 0.1, %v8612_v46 }
 0x875   : > { %v12596_v37 = vpack.c.bf16 %v9378_v18, %v9377_v45  ;;  %13067 = vst [vmem:[#allocation4 + $0x140] sm:$0xff] %v12591_v35   ;;  %v8352_v17 = vmul.f32 %v14273_v0, %v17043_v2  ;;  %v8613_v30 = vadd.f32 %v17052_v5, %v8351_v4  ;;  %v8353_v54 = vmul.f32 %v14274_v24, %v17043_v2 }
 0x876   : > { %v9379_v59 = vsel %vm8867_vm4, %v8611_v52, %v9123_v20  ;;  %v8354_v10 = vmul.f32 %v14275_v38, %v17043_v2  ;;  %v8355_v63 = vmul.f32 %v14276_v32, %v17043_v2  ;;  %v8356_v44 = vmul.f32 %v14277_v13, %v17043_v2  ;;  %v14286_v32 = vld [vmem:[#allocation2 + $0x320] sm:$0xff]  ;;  %v14287_v13 = vld [vmem:[#allocation2 + $0x328] sm:$0xff] }
 0x877   : > { %13068 = vst [vmem:[#allocation4 + $0x148] sm:$0xff] %v12596_v37   ;;  %v9380_v1 = vsel %vm8868_vm5, %v8612_v46, %v9124_v39  ;;  %v8614_v60 = vadd.f32 %v17052_v5, %v8352_v17  ;;  %vm8869_vm6 = vcmp.ge.f32.partialorder %v8613_v30, 0.0  ;;  %v9125_v22 = vmul.f32 0.1, %v8613_v30 }
 0x878   : > { %v12601_v49 = vpack.c.bf16 %v9380_v1, %v9379_v59  ;;  %v8615_v6 = vadd.f32 %v17052_v5, %v8353_v54  ;;  %v8616_v31 = vadd.f32 %v17052_v5, %v8354_v10  ;;  %v8617_v55 = vadd.f32 %v17052_v5, %v8355_v63  ;;  %v14285_v54 = vld [vmem:[#allocation2 + $0x318] sm:$0xff] }
 0x879   : > { %vm8870_vm7 = vcmp.ge.f32.partialorder %v8614_v60, 0.0  ;;  %v9126_v61 = vmul.f32 0.1, %v8614_v60  ;;  %v9381_v11 = vsel %vm8869_vm6, %v8613_v30, %v9125_v22  ;;  %v8618_v57 = vadd.f32 %v17052_v5, %v8356_v44  ;;  %v14288_v22 = vld [vmem:[#allocation2 + $0x330] sm:$0xff] }
 0x87a   : > { %13069 = vst [vmem:[#allocation4 + $0x150] sm:$0xff] %v12601_v49   ;;  %vm8871_vm8 = vcmp.ge.f32.partialorder %v8615_v6, 0.0  ;;  %vm8872_vm9 = vcmp.ge.f32.partialorder %v8616_v31, 0.0  ;;  %v9127_v40 = vmul.f32 0.1, %v8615_v6  ;;  %vm8873_vm10 = vcmp.ge.f32.partialorder %v8617_v55, 0.0 }
 0x87b   : > { %v9128_v50 = vmul.f32 0.1, %v8616_v31  ;;  %v9382_v19 = vsel %vm8870_vm7, %v8614_v60, %v9126_v61  ;;  %vm8874_vm11 = vcmp.ge.f32.partialorder %v8618_v57, 0.0  ;;  %v9129_v3 = vmul.f32 0.1, %v8617_v55 }
 0x87c   : > { %v12606_v8 = vpack.c.bf16 %v9382_v19, %v9381_v11  ;;  %v9383_v28 = vsel %vm8871_vm8, %v8615_v6, %v9127_v40  ;;  %v9130_v42 = vmul.f32 0.1, %v8618_v57  ;;  %v8357_v48 = vmul.f32 %v14278_v41, %v17043_v2  ;;  %v14289_v6 = vld [vmem:[#allocation2 + $0x338] sm:$0xff] }
 0x87d   : > { %v9384_v21 = vsel %vm8872_vm9, %v8616_v31, %v9128_v50  ;;  %v9385_v53 = vsel %vm8873_vm10, %v8617_v55, %v9129_v3  ;;  %v8358_v29 = vmul.f32 %v14279_v7, %v17043_v2  ;;  %v8359_v23 = vmul.f32 %v14280_v36, %v17043_v2  ;;  %v14290_v7 = vld [vmem:[#allocation2 + $0x340] sm:$0xff] }
 0x87e   : > { %v12611_v26 = vpack.c.bf16 %v9384_v21, %v9383_v28  ;;  %13070 = vst [vmem:[#allocation4 + $0x158] sm:$0xff] %v12606_v8   ;;  %v9386_v33 = vsel %vm8874_vm11, %v8618_v57, %v9130_v42  ;;  %v8360_v43 = vmul.f32 %v14281_v51, %v17043_v2  ;;  %v8361_v25 = vmul.f32 %v14282_v12, %v17043_v2 }
 0x87f   : > { %v12616_v34 = vpack.c.bf16 %v9386_v33, %v9385_v53  ;;  %v8619_v62 = vadd.f32 %v17052_v5, %v8357_v48  ;;  %v8620_v14 = vadd.f32 %v17052_v5, %v8358_v29  ;;  %v8362_v47 = vmul.f32 %v14283_v56, %v17043_v2  ;;  %v14291_v33 = vld [vmem:[#allocation2 + $0x348] sm:$0xff] }
 0x880   : > { %13071 = vst [vmem:[#allocation4 + $0x160] sm:$0xff] %v12611_v26   ;;  %v8621_v9 = vadd.f32 %v17052_v5, %v8359_v23  ;;  %v8622_v15 = vadd.f32 %v17052_v5, %v8360_v43  ;;  %v8623_v16 = vadd.f32 %v17052_v5, %v8361_v25  ;;  %v8363_v52 = vmul.f32 %v14284_v58, %v17043_v2  ;;  %v14292_v43 = vld [vmem:[#allocation2 + $0x350] sm:$0xff]  ;;  %v14293_v25 = vld [vmem:[#allocation2 + $0x358] sm:$0xff] }
 0x881   : > { %13072 = vst [vmem:[#allocation4 + $0x168] sm:$0xff] %v12616_v34   ;;  %vm8875_vm12 = vcmp.ge.f32.partialorder %v8619_v62, 0.0  ;;  %vm8876_vm13 = vcmp.ge.f32.partialorder %v8620_v14, 0.0  ;;  %v9131_v46 = vmul.f32 0.1, %v8619_v62  ;;  %v8624_v37 = vadd.f32 %v17052_v5, %v8362_v47  ;;  %v14294_v47 = vld [vmem:[#allocation2 + $0x360] sm:$0xff] }
 0x882   : > { %v9132_v35 = vmul.f32 0.1, %v8620_v14  ;;  %vm8877_vm14 = vcmp.ge.f32.partialorder %v8621_v9, 0.0  ;;  %vm8878_vm15 = vcmp.ge.f32.partialorder %v8622_v15, 0.0  ;;  %v9133_v45 = vmul.f32 0.1, %v8621_v9 }
 0x883   : > { %v9134_v18 = vmul.f32 0.1, %v8622_v15  ;;  %v9387_v27 = vsel %vm8875_vm12, %v8619_v62, %v9131_v46  ;;  %vm8879_vm0 = vcmp.ge.f32.partialorder %v8623_v16, 0.0  ;;  %v9135_v17 = vmul.f32 0.1, %v8623_v16 }
 0x884   : > { %v9388_v4 = vsel %vm8876_vm13, %v8620_v14, %v9132_v35  ;;  %v9389_v39 = vsel %vm8877_vm14, %v8621_v9, %v9133_v45  ;;  %vm8880_vm1 = vcmp.ge.f32.partialorder %v8624_v37, 0.0  ;;  %v9136_v24 = vmul.f32 0.1, %v8624_v37 }
 0x885   : > { %v12621_v20 = vpack.c.bf16 %v9388_v4, %v9387_v27  ;;  %v9390_v0 = vsel %vm8878_vm15, %v8622_v15, %v9134_v18  ;;  %v8364_v59 = vmul.f32 %v14285_v54, %v17043_v2  ;;  %v9391_v38 = vsel %vm8879_vm0, %v8623_v16, %v9135_v17 }
 0x886   : > { %v12626_v30 = vpack.c.bf16 %v9390_v0, %v9389_v39  ;;  %v8625_v10 = vadd.f32 %v17052_v5, %v8363_v52  ;;  %v8365_v63 = vmul.f32 %v14286_v32, %v17043_v2  ;;  %v8366_v44 = vmul.f32 %v14287_v13, %v17043_v2  ;;  %v14295_v52 = vld [vmem:[#allocation2 + $0x368] sm:$0xff]  ;;  %v14297_v32 = vld [vmem:[#allocation2 + $0x378] sm:$0xff] }
 0x887   : > { %13073 = vst [vmem:[#allocation4 + $0x170] sm:$0xff] %v12621_v20   ;;  %v9392_v1 = vsel %vm8880_vm1, %v8624_v37, %v9136_v24  ;;  %v8626_v60 = vadd.f32 %v17052_v5, %v8364_v59  ;;  %v8367_v49 = vmul.f32 %v14288_v22, %v17043_v2  ;;  %v8368_v31 = vmul.f32 %v14289_v6, %v17043_v2  ;;  %v14296_v24 = vld [vmem:[#allocation2 + $0x370] sm:$0xff]  ;;  %v14299_v22 = vld [vmem:[#allocation2 + $0x388] sm:$0xff] }
 0x888   : > { %13074 = vst [vmem:[#allocation4 + $0x178] sm:$0xff] %v12626_v30   ;;  %v12631_v55 = vpack.c.bf16 %v9392_v1, %v9391_v38  ;;  %vm8881_vm2 = vcmp.ge.f32.partialorder %v8625_v10, 0.0  ;;  %v9137_v61 = vmul.f32 0.1, %v8625_v10  ;;  %v8627_v11 = vadd.f32 %v17052_v5, %v8365_v63  ;;  %v14300_v6 = vld [vmem:[#allocation2 + $0x390] sm:$0xff] }
 0x889   : > { %vm8882_vm3 = vcmp.ge.f32.partialorder %v8626_v60, 0.0  ;;  %v9138_v57 = vmul.f32 0.1, %v8626_v60  ;;  %v8628_v40 = vadd.f32 %v17052_v5, %v8366_v44  ;;  %v8629_v50 = vadd.f32 %v17052_v5, %v8367_v49  ;;  %v14298_v44 = vld [vmem:[#allocation2 + $0x380] sm:$0xff] }
 0x88a   : > { %13075 = vst [vmem:[#allocation4 + $0x180] sm:$0xff] %v12631_v55   ;;  %v9393_v19 = vsel %vm8881_vm2, %v8625_v10, %v9137_v61  ;;  %vm8883_vm4 = vcmp.ge.f32.partialorder %v8627_v11, 0.0  ;;  %v9139_v3 = vmul.f32 0.1, %v8627_v11  ;;  %v8630_v8 = vadd.f32 %v17052_v5, %v8368_v31  ;;  %v14301_v55 = vld [vmem:[#allocation2 + $0x398] sm:$0xff] }
 0x88b   : > { %v9394_v28 = vsel %vm8882_vm3, %v8626_v60, %v9138_v57  ;;  %vm8884_vm5 = vcmp.ge.f32.partialorder %v8628_v40, 0.0  ;;  %v9140_v21 = vmul.f32 0.1, %v8628_v40  ;;  %vm8885_vm6 = vcmp.ge.f32.partialorder %v8629_v50, 0.0 }
 0x88c   : > { %v12636_v42 = vpack.c.bf16 %v9394_v28, %v9393_v19  ;;  %v9395_v26 = vsel %vm8883_vm4, %v8627_v11, %v9139_v3  ;;  %vm8886_vm7 = vcmp.ge.f32.partialorder %v8630_v8, 0.0  ;;  %v9141_v53 = vmul.f32 0.1, %v8629_v50 }
 0x88d   : > { %v9396_v41 = vsel %vm8884_vm5, %v8628_v40, %v9140_v21  ;;  %v9142_v48 = vmul.f32 0.1, %v8630_v8  ;;  %v8369_v29 = vmul.f32 %v14290_v7, %v17043_v2  ;;  %v8370_v36 = vmul.f32 %v14291_v33, %v17043_v2 }
 0x88e   : > { %13076 = vst [vmem:[#allocation4 + $0x188] sm:$0xff] %v12636_v42   ;;  %v12641_v23 = vpack.c.bf16 %v9396_v41, %v9395_v26  ;;  %v9397_v51 = vsel %vm8885_vm6, %v8629_v50, %v9141_v53  ;;  %v8371_v12 = vmul.f32 %v14292_v43, %v17043_v2  ;;  %v8372_v34 = vmul.f32 %v14293_v25, %v17043_v2  ;;  %v14302_v43 = vld [vmem:[#allocation2 + $0x3a0] sm:$0xff]  ;;  %v14303_v25 = vld [vmem:[#allocation2 + $0x3a8] sm:$0xff] }
 0x88f   : > { %v9398_v62 = vsel %vm8886_vm7, %v8630_v8, %v9142_v48  ;;  %v8631_v14 = vadd.f32 %v17052_v5, %v8369_v29  ;;  %v8632_v56 = vadd.f32 %v17052_v5, %v8370_v36  ;;  %v8373_v9 = vmul.f32 %v14294_v47, %v17043_v2  ;;  %v14305_v47 = vld [vmem:[#allocation2 + $0x3b8] sm:$0xff] }
 0x890   : > { %13077 = vst [vmem:[#allocation4 + $0x190] sm:$0xff] %v12641_v23   ;;  %v12646_v15 = vpack.c.bf16 %v9398_v62, %v9397_v51  ;;  %v8633_v16 = vadd.f32 %v17052_v5, %v8371_v12  ;;  %v8634_v58 = vadd.f32 %v17052_v5, %v8372_v34  ;;  %v8374_v46 = vmul.f32 %v14295_v52, %v17043_v2 }
 0x891   : > { %vm8887_vm8 = vcmp.ge.f32.partialorder %v8631_v14, 0.0  ;;  %vm8888_vm9 = vcmp.ge.f32.partialorder %v8632_v56, 0.0  ;;  %v9143_v35 = vmul.f32 0.1, %v8631_v14  ;;  %v9144_v45 = vmul.f32 0.1, %v8632_v56 }
 0x892   : > { %13078 = vst [vmem:[#allocation4 + $0x198] sm:$0xff] %v12646_v15   ;;  %vm8889_vm10 = vcmp.ge.f32.partialorder %v8633_v16, 0.0  ;;  %vm8890_vm11 = vcmp.ge.f32.partialorder %v8634_v58, 0.0  ;;  %v9145_v18 = vmul.f32 0.1, %v8633_v16  ;;  %v8635_v20 = vadd.f32 %v17052_v5, %v8373_v9  ;;  %v14306_v15 = vld [vmem:[#allocation2 + $0x3c0] sm:$0xff] }
 0x893   : > { %v9146_v27 = vmul.f32 0.1, %v8634_v58  ;;  %v9399_v4 = vsel %vm8887_vm8, %v8631_v14, %v9143_v35  ;;  %v9400_v37 = vsel %vm8888_vm9, %v8632_v56, %v9144_v45  ;;  %v8636_v39 = vadd.f32 %v17052_v5, %v8374_v46  ;;  %v14304_v14 = vld [vmem:[#allocation2 + $0x3b0] sm:$0xff]  ;;  %v14307_v35 = vld [vmem:[#allocation2 + $0x3c8] sm:$0xff] }
 0x894   : > { %v12651_v0 = vpack.c.bf16 %v9400_v37, %v9399_v4  ;;  %v9401_v17 = vsel %vm8889_vm10, %v8633_v16, %v9145_v18  ;;  %v8375_v54 = vmul.f32 %v14296_v24, %v17043_v2  ;;  %vm8891_vm12 = vcmp.ge.f32.partialorder %v8635_v20, 0.0  ;;  %v14308_v37 = vld [vmem:[#allocation2 + $0x3d0] sm:$0xff] }
 0x895   : > { %v9402_v30 = vsel %vm8890_vm11, %v8634_v58, %v9146_v27  ;;  %vm8892_vm13 = vcmp.ge.f32.partialorder %v8636_v39, 0.0  ;;  %v9147_v38 = vmul.f32 0.1, %v8635_v20  ;;  %v9148_v10 = vmul.f32 0.1, %v8636_v39 }
 0x896   : > { %v12656_v59 = vpack.c.bf16 %v9402_v30, %v9401_v17  ;;  %13079 = vst [vmem:[#allocation4 + $0x1a0] sm:$0xff] %v12651_v0   ;;  %v8376_v63 = vmul.f32 %v14297_v32, %v17043_v2  ;;  %v8637_v13 = vadd.f32 %v17052_v5, %v8375_v54  ;;  %v8377_v1 = vmul.f32 %v14298_v44, %v17043_v2 }
 0x897   : > { %v9403_v60 = vsel %vm8891_vm12, %v8635_v20, %v9147_v38  ;;  %v8378_v49 = vmul.f32 %v14299_v22, %v17043_v2  ;;  %v8379_v31 = vmul.f32 %v14300_v6, %v17043_v2  ;;  %v8380_v61 = vmul.f32 %v14301_v55, %v17043_v2  ;;  %v14310_v6 = vld [vmem:[#allocation2 + $0x3e0] sm:$0xff]  ;;  %v14311_v55 = vld [vmem:[#allocation2 + $0x3e8] sm:$0xff] }
 0x898   : > { %13080 = vst [vmem:[#allocation4 + $0x1a8] sm:$0xff] %v12656_v59   ;;  %v9404_v11 = vsel %vm8892_vm13, %v8636_v39, %v9148_v10  ;;  %v8638_v57 = vadd.f32 %v17052_v5, %v8376_v63  ;;  %vm8893_vm14 = vcmp.ge.f32.partialorder %v8637_v13, 0.0  ;;  %v9149_v40 = vmul.f32 0.1, %v8637_v13 }
 0x899   : > { %v12661_v50 = vpack.c.bf16 %v9404_v11, %v9403_v60  ;;  %v8639_v19 = vadd.f32 %v17052_v5, %v8377_v1  ;;  %v8640_v3 = vadd.f32 %v17052_v5, %v8378_v49  ;;  %v8641_v8 = vadd.f32 %v17052_v5, %v8379_v31  ;;  %v14309_v1 = vld [vmem:[#allocation2 + $0x3d8] sm:$0xff] }
 0x89a   : > { %vm8894_vm15 = vcmp.ge.f32.partialorder %v8638_v57, 0.0  ;;  %v9150_v28 = vmul.f32 0.1, %v8638_v57  ;;  %v9405_v21 = vsel %vm8893_vm14, %v8637_v13, %v9149_v40  ;;  %v8642_v42 = vadd.f32 %v17052_v5, %v8380_v61  ;;  %v14312_v40 = vld [vmem:[#allocation2 + $0x3f0] sm:$0xff] }
 0x89b   : > { %13081 = vst [vmem:[#allocation4 + $0x1b0] sm:$0xff] %v12661_v50   ;;  %vm8895_vm0 = vcmp.ge.f32.partialorder %v8639_v19, 0.0  ;;  %vm8896_vm1 = vcmp.ge.f32.partialorder %v8640_v3, 0.0  ;;  %v9151_v26 = vmul.f32 0.1, %v8639_v19  ;;  %vm8897_vm2 = vcmp.ge.f32.partialorder %v8641_v8, 0.0 }
 0x89c   : > { %v9152_v53 = vmul.f32 0.1, %v8640_v3  ;;  %v9406_v41 = vsel %vm8894_vm15, %v8638_v57, %v9150_v28  ;;  %vm8898_vm3 = vcmp.ge.f32.partialorder %v8642_v42, 0.0  ;;  %v9153_v48 = vmul.f32 0.1, %v8641_v8 }
 0x89d   : > { %v12666_v7 = vpack.c.bf16 %v9406_v41, %v9405_v21  ;;  %v9407_v29 = vsel %vm8895_vm0, %v8639_v19, %v9151_v26  ;;  %v9154_v36 = vmul.f32 0.1, %v8642_v42  ;;  %v8381_v12 = vmul.f32 %v14302_v43, %v17043_v2  ;;  %v14313_v19 = vld [vmem:[#allocation2 + $0x3f8] sm:$0xff] }
 0x89e   : > { %v9408_v33 = vsel %vm8896_vm1, %v8640_v3, %v9152_v53  ;;  %v9409_v51 = vsel %vm8897_vm2, %v8641_v8, %v9153_v48  ;;  %v8382_v34 = vmul.f32 %v14303_v25, %v17043_v2  ;;  %v8383_v56 = vmul.f32 %v14304_v14, %v17043_v2  ;;  %v14314_v25 = vld [vmem:[#allocation2 + $0x400] sm:$0xff] }
 0x89f   : > { %v12671_v23 = vpack.c.bf16 %v9408_v33, %v9407_v29  ;;  %13082 = vst [vmem:[#allocation4 + $0x1b8] sm:$0xff] %v12666_v7   ;;  %v9410_v62 = vsel %vm8898_vm3, %v8642_v42, %v9154_v36  ;;  %v8384_v9 = vmul.f32 %v14305_v47, %v17043_v2  ;;  %v8385_v16 = vmul.f32 %v14306_v15, %v17043_v2 }
 0x8a0   : > { %v12676_v58 = vpack.c.bf16 %v9410_v62, %v9409_v51  ;;  %v8643_v52 = vadd.f32 %v17052_v5, %v8381_v12  ;;  %v8644_v46 = vadd.f32 %v17052_v5, %v8382_v34  ;;  %v8386_v45 = vmul.f32 %v14307_v35, %v17043_v2  ;;  %v14315_v62 = vld [vmem:[#allocation2 + $0x408] sm:$0xff] }
 0x8a1   : > { %13083 = vst [vmem:[#allocation4 + $0x1c0] sm:$0xff] %v12671_v23   ;;  %v8645_v18 = vadd.f32 %v17052_v5, %v8383_v56  ;;  %v8646_v27 = vadd.f32 %v17052_v5, %v8384_v9  ;;  %v8647_v4 = vadd.f32 %v17052_v5, %v8385_v16  ;;  %v8387_v20 = vmul.f32 %v14308_v37, %v17043_v2  ;;  %v14316_v9 = vld [vmem:[#allocation2 + $0x410] sm:$0xff]  ;;  %v14317_v16 = vld [vmem:[#allocation2 + $0x418] sm:$0xff] }
 0x8a2   : > { %13084 = vst [vmem:[#allocation4 + $0x1c8] sm:$0xff] %v12676_v58   ;;  %vm8899_vm4 = vcmp.ge.f32.partialorder %v8643_v52, 0.0  ;;  %vm8900_vm5 = vcmp.ge.f32.partialorder %v8644_v46, 0.0  ;;  %v9155_v39 = vmul.f32 0.1, %v8643_v52  ;;  %v8648_v59 = vadd.f32 %v17052_v5, %v8386_v45  ;;  %v14318_v45 = vld [vmem:[#allocation2 + $0x420] sm:$0xff] }
 0x8a3   : > { %v9156_v0 = vmul.f32 0.1, %v8644_v46  ;;  %vm8901_vm6 = vcmp.ge.f32.partialorder %v8645_v18, 0.0  ;;  %vm8902_vm7 = vcmp.ge.f32.partialorder %v8646_v27, 0.0  ;;  %v9157_v17 = vmul.f32 0.1, %v8645_v18 }
 0x8a4   : > { %v9158_v30 = vmul.f32 0.1, %v8646_v27  ;;  %v9411_v24 = vsel %vm8899_vm4, %v8643_v52, %v9155_v39  ;;  %vm8903_vm8 = vcmp.ge.f32.partialorder %v8647_v4, 0.0  ;;  %v9159_v63 = vmul.f32 0.1, %v8647_v4 }
 0x8a5   : > { %v9412_v54 = vsel %vm8900_vm5, %v8644_v46, %v9156_v0  ;;  %v9413_v10 = vsel %vm8901_vm6, %v8645_v18, %v9157_v17  ;;  %vm8904_vm9 = vcmp.ge.f32.partialorder %v8648_v59, 0.0  ;;  %v9160_v44 = vmul.f32 0.1, %v8648_v59 }
 0x8a6   : > { %v12681_v38 = vpack.c.bf16 %v9412_v54, %v9411_v24  ;;  %v9414_v32 = vsel %vm8902_vm7, %v8646_v27, %v9158_v30  ;;  %v8388_v60 = vmul.f32 %v14309_v1, %v17043_v2  ;;  %v9415_v22 = vsel %vm8903_vm8, %v8647_v4, %v9159_v63 }
 0x8a7   : > { %v12686_v13 = vpack.c.bf16 %v9414_v32, %v9413_v10  ;;  %v8649_v49 = vadd.f32 %v17052_v5, %v8387_v20  ;;  %v8389_v31 = vmul.f32 %v14310_v6, %v17043_v2  ;;  %v8390_v61 = vmul.f32 %v14311_v55, %v17043_v2  ;;  %v14319_v20 = vld [vmem:[#allocation2 + $0x428] sm:$0xff]  ;;  %v14321_v6 = vld [vmem:[#allocation2 + $0x438] sm:$0xff] }
 0x8a8   : > { %13085 = vst [vmem:[#allocation4 + $0x1d0] sm:$0xff] %v12681_v38   ;;  %v9416_v11 = vsel %vm8904_vm9, %v8648_v59, %v9160_v44  ;;  %v8650_v57 = vadd.f32 %v17052_v5, %v8388_v60  ;;  %v8391_v50 = vmul.f32 %v14312_v40, %v17043_v2  ;;  %v8392_v3 = vmul.f32 %v14313_v19, %v17043_v2  ;;  %v14320_v44 = vld [vmem:[#allocation2 + $0x430] sm:$0xff]  ;;  %v14323_v40 = vld [vmem:[#allocation2 + $0x448] sm:$0xff] }
 0x8a9   : > { %13086 = vst [vmem:[#allocation4 + $0x1d8] sm:$0xff] %v12686_v13   ;;  %v12691_v8 = vpack.c.bf16 %v9416_v11, %v9415_v22  ;;  %vm8905_vm10 = vcmp.ge.f32.partialorder %v8649_v49, 0.0  ;;  %v9161_v28 = vmul.f32 0.1, %v8649_v49  ;;  %v8651_v21 = vadd.f32 %v17052_v5, %v8389_v31  ;;  %v14324_v19 = vld [vmem:[#allocation2 + $0x450] sm:$0xff] }
 0x8aa   : > { %vm8906_vm11 = vcmp.ge.f32.partialorder %v8650_v57, 0.0  ;;  %v9162_v42 = vmul.f32 0.1, %v8650_v57  ;;  %v8652_v26 = vadd.f32 %v17052_v5, %v8390_v61  ;;  %v8653_v53 = vadd.f32 %v17052_v5, %v8391_v50  ;;  %v14322_v61 = vld [vmem:[#allocation2 + $0x440] sm:$0xff] }
 0x8ab   : > { %13087 = vst [vmem:[#allocation4 + $0x1e0] sm:$0xff] %v12691_v8   ;;  %v9417_v41 = vsel %vm8905_vm10, %v8649_v49, %v9161_v28  ;;  %vm8907_vm12 = vcmp.ge.f32.partialorder %v8651_v21, 0.0  ;;  %v9163_v48 = vmul.f32 0.1, %v8651_v21  ;;  %v8654_v7 = vadd.f32 %v17052_v5, %v8392_v3  ;;  %v14325_v8 = vld [vmem:[#allocation2 + $0x458] sm:$0xff] }
 0x8ac   : > { %v9418_v29 = vsel %vm8906_vm11, %v8650_v57, %v9162_v42  ;;  %vm8908_vm13 = vcmp.ge.f32.partialorder %v8652_v26, 0.0  ;;  %v9164_v33 = vmul.f32 0.1, %v8652_v26  ;;  %vm8909_vm14 = vcmp.ge.f32.partialorder %v8653_v53, 0.0 }
 0x8ad   : > { %v12696_v36 = vpack.c.bf16 %v9418_v29, %v9417_v41  ;;  %v9419_v23 = vsel %vm8907_vm12, %v8651_v21, %v9163_v48  ;;  %vm8910_vm15 = vcmp.ge.f32.partialorder %v8654_v7, 0.0  ;;  %v9165_v51 = vmul.f32 0.1, %v8653_v53 }
 0x8ae   : > { %v9420_v43 = vsel %vm8908_vm13, %v8652_v26, %v9164_v33  ;;  %v9166_v12 = vmul.f32 0.1, %v8654_v7  ;;  %v8393_v34 = vmul.f32 %v14314_v25, %v17043_v2  ;;  %v8394_v14 = vmul.f32 %v14315_v62, %v17043_v2 }
 0x8af   : > { %13088 = vst [vmem:[#allocation4 + $0x1e8] sm:$0xff] %v12696_v36   ;;  %v12701_v56 = vpack.c.bf16 %v9420_v43, %v9419_v23  ;;  %v9421_v47 = vsel %vm8909_vm14, %v8653_v53, %v9165_v51  ;;  %v8395_v15 = vmul.f32 %v14316_v9, %v17043_v2  ;;  %v8396_v58 = vmul.f32 %v14317_v16, %v17043_v2  ;;  %v14326_v9 = vld [vmem:[#allocation2 + $0x460] sm:$0xff]  ;;  %v14327_v16 = vld [vmem:[#allocation2 + $0x468] sm:$0xff] }
 0x8b0   : > { %v9422_v52 = vsel %vm8910_vm15, %v8654_v7, %v9166_v12  ;;  %v8655_v46 = vadd.f32 %v17052_v5, %v8393_v34  ;;  %v8656_v35 = vadd.f32 %v17052_v5, %v8394_v14  ;;  %v8397_v18 = vmul.f32 %v14318_v45, %v17043_v2  ;;  %v14329_v45 = vld [vmem:[#allocation2 + $0x478] sm:$0xff] }
 0x8b1   : > { %13089 = vst [vmem:[#allocation4 + $0x1f0] sm:$0xff] %v12701_v56   ;;  %v12706_v27 = vpack.c.bf16 %v9422_v52, %v9421_v47  ;;  %v8657_v4 = vadd.f32 %v17052_v5, %v8395_v15  ;;  %v8658_v37 = vadd.f32 %v17052_v5, %v8396_v58  ;;  %v8398_v39 = vmul.f32 %v14319_v20, %v17043_v2 }
 0x8b2   : > { %vm8911_vm0 = vcmp.ge.f32.partialorder %v8655_v46, 0.0  ;;  %vm8912_vm1 = vcmp.ge.f32.partialorder %v8656_v35, 0.0  ;;  %v9167_v0 = vmul.f32 0.1, %v8655_v46  ;;  %v9168_v17 = vmul.f32 0.1, %v8656_v35 }
 0x8b3   : > { %13090 = vst [vmem:[#allocation4 + $0x1f8] sm:$0xff] %v12706_v27   ;;  %vm8913_vm2 = vcmp.ge.f32.partialorder %v8657_v4, 0.0  ;;  %vm8914_vm3 = vcmp.ge.f32.partialorder %v8658_v37, 0.0  ;;  %v9169_v30 = vmul.f32 0.1, %v8657_v4  ;;  %v8659_v38 = vadd.f32 %v17052_v5, %v8397_v18  ;;  %v14330_v27 = vld [vmem:[#allocation2 + $0x480] sm:$0xff] }
 0x8b4   : > { %v9170_v24 = vmul.f32 0.1, %v8658_v37  ;;  %v9423_v54 = vsel %vm8911_vm0, %v8655_v46, %v9167_v0  ;;  %v9424_v59 = vsel %vm8912_vm1, %v8656_v35, %v9168_v17  ;;  %v8660_v10 = vadd.f32 %v17052_v5, %v8398_v39  ;;  %v14328_v46 = vld [vmem:[#allocation2 + $0x470] sm:$0xff]  ;;  %v14331_v0 = vld [vmem:[#allocation2 + $0x488] sm:$0xff] }
 0x8b5   : > { %v12711_v32 = vpack.c.bf16 %v9424_v59, %v9423_v54  ;;  %v9425_v63 = vsel %vm8913_vm2, %v8657_v4, %v9169_v30  ;;  %v8399_v1 = vmul.f32 %v14320_v44, %v17043_v2  ;;  %vm8915_vm4 = vcmp.ge.f32.partialorder %v8659_v38, 0.0  ;;  %v14332_v59 = vld [vmem:[#allocation2 + $0x490] sm:$0xff] }
 0x8b6   : > { %v9426_v13 = vsel %vm8914_vm3, %v8658_v37, %v9170_v24  ;;  %vm8916_vm5 = vcmp.ge.f32.partialorder %v8660_v10, 0.0  ;;  %v9171_v22 = vmul.f32 0.1, %v8659_v38  ;;  %v9172_v49 = vmul.f32 0.1, %v8660_v10 }
 0x8b7   : > { %v12716_v60 = vpack.c.bf16 %v9426_v13, %v9425_v63  ;;  %13091 = vst [vmem:[#allocation4 + $0x200] sm:$0xff] %v12711_v32   ;;  %v8400_v31 = vmul.f32 %v14321_v6, %v17043_v2  ;;  %v8661_v55 = vadd.f32 %v17052_v5, %v8399_v1  ;;  %v8401_v11 = vmul.f32 %v14322_v61, %v17043_v2 }
 0x8b8   : > { %v9427_v57 = vsel %vm8915_vm4, %v8659_v38, %v9171_v22  ;;  %v8402_v50 = vmul.f32 %v14323_v40, %v17043_v2  ;;  %v8403_v3 = vmul.f32 %v14324_v19, %v17043_v2  ;;  %v8404_v28 = vmul.f32 %v14325_v8, %v17043_v2  ;;  %v14334_v19 = vld [vmem:[#allocation2 + $0x4a0] sm:$0xff]  ;;  %v14335_v8 = vld [vmem:[#allocation2 + $0x4a8] sm:$0xff] }
 0x8b9   : > { %13092 = vst [vmem:[#allocation4 + $0x208] sm:$0xff] %v12716_v60   ;;  %v9428_v21 = vsel %vm8916_vm5, %v8660_v10, %v9172_v49  ;;  %v8662_v42 = vadd.f32 %v17052_v5, %v8400_v31  ;;  %vm8917_vm6 = vcmp.ge.f32.partialorder %v8661_v55, 0.0  ;;  %v9173_v26 = vmul.f32 0.1, %v8661_v55 }
 0x8ba   : > { %v12721_v53 = vpack.c.bf16 %v9428_v21, %v9427_v57  ;;  %v8663_v41 = vadd.f32 %v17052_v5, %v8401_v11  ;;  %v8664_v48 = vadd.f32 %v17052_v5, %v8402_v50  ;;  %v8665_v7 = vadd.f32 %v17052_v5, %v8403_v3  ;;  %v14333_v11 = vld [vmem:[#allocation2 + $0x498] sm:$0xff] }
 0x8bb   : > { %vm8918_vm7 = vcmp.ge.f32.partialorder %v8662_v42, 0.0  ;;  %v9174_v29 = vmul.f32 0.1, %v8662_v42  ;;  %v9429_v33 = vsel %vm8917_vm6, %v8661_v55, %v9173_v26  ;;  %v8666_v36 = vadd.f32 %v17052_v5, %v8404_v28  ;;  %v14336_v26 = vld [vmem:[#allocation2 + $0x4b0] sm:$0xff] }
 0x8bc   : > { %13093 = vst [vmem:[#allocation4 + $0x210] sm:$0xff] %v12721_v53   ;;  %vm8919_vm8 = vcmp.ge.f32.partialorder %v8663_v41, 0.0  ;;  %vm8920_vm9 = vcmp.ge.f32.partialorder %v8664_v48, 0.0  ;;  %v9175_v23 = vmul.f32 0.1, %v8663_v41  ;;  %vm8921_vm10 = vcmp.ge.f32.partialorder %v8665_v7, 0.0 }
 0x8bd   : > { %v9176_v51 = vmul.f32 0.1, %v8664_v48  ;;  %v9430_v43 = vsel %vm8918_vm7, %v8662_v42, %v9174_v29  ;;  %vm8922_vm11 = vcmp.ge.f32.partialorder %v8666_v36, 0.0  ;;  %v9177_v12 = vmul.f32 0.1, %v8665_v7 }
 0x8be   : > { %v12726_v25 = vpack.c.bf16 %v9430_v43, %v9429_v33  ;;  %v9431_v34 = vsel %vm8919_vm8, %v8663_v41, %v9175_v23  ;;  %v9178_v14 = vmul.f32 0.1, %v8666_v36  ;;  %v8405_v15 = vmul.f32 %v14326_v9, %v17043_v2  ;;  %v14337_v41 = vld [vmem:[#allocation2 + $0x4b8] sm:$0xff] }
 0x8bf   : > { %v9432_v62 = vsel %vm8920_vm9, %v8664_v48, %v9176_v51  ;;  %v9433_v47 = vsel %vm8921_vm10, %v8665_v7, %v9177_v12  ;;  %v8406_v58 = vmul.f32 %v14327_v16, %v17043_v2  ;;  %v8407_v35 = vmul.f32 %v14328_v46, %v17043_v2  ;;  %v14338_v16 = vld [vmem:[#allocation2 + $0x4c0] sm:$0xff] }
 0x8c0   : > { %v12731_v56 = vpack.c.bf16 %v9432_v62, %v9431_v34  ;;  %13094 = vst [vmem:[#allocation4 + $0x218] sm:$0xff] %v12726_v25   ;;  %v9434_v52 = vsel %vm8922_vm11, %v8666_v36, %v9178_v14  ;;  %v8408_v18 = vmul.f32 %v14329_v45, %v17043_v2  ;;  %v8409_v4 = vmul.f32 %v14330_v27, %v17043_v2 }
 0x8c1   : > { %v12736_v37 = vpack.c.bf16 %v9434_v52, %v9433_v47  ;;  %v8667_v20 = vadd.f32 %v17052_v5, %v8405_v15  ;;  %v8668_v39 = vadd.f32 %v17052_v5, %v8406_v58  ;;  %v8410_v17 = vmul.f32 %v14331_v0, %v17043_v2  ;;  %v14339_v52 = vld [vmem:[#allocation2 + $0x4c8] sm:$0xff] }
 0x8c2   : > { %13095 = vst [vmem:[#allocation4 + $0x220] sm:$0xff] %v12731_v56   ;;  %v8669_v30 = vadd.f32 %v17052_v5, %v8407_v35  ;;  %v8670_v24 = vadd.f32 %v17052_v5, %v8408_v18  ;;  %v8671_v54 = vadd.f32 %v17052_v5, %v8409_v4  ;;  %v8411_v38 = vmul.f32 %v14332_v59, %v17043_v2  ;;  %v14340_v18 = vld [vmem:[#allocation2 + $0x4d0] sm:$0xff]  ;;  %v14341_v4 = vld [vmem:[#allocation2 + $0x4d8] sm:$0xff] }
 0x8c3   : > { %13096 = vst [vmem:[#allocation4 + $0x228] sm:$0xff] %v12736_v37   ;;  %vm8923_vm12 = vcmp.ge.f32.partialorder %v8667_v20, 0.0  ;;  %vm8924_vm13 = vcmp.ge.f32.partialorder %v8668_v39, 0.0  ;;  %v9179_v10 = vmul.f32 0.1, %v8667_v20  ;;  %v8672_v60 = vadd.f32 %v17052_v5, %v8410_v17  ;;  %v14342_v17 = vld [vmem:[#allocation2 + $0x4e0] sm:$0xff] }
 0x8c4   : > { %v9180_v32 = vmul.f32 0.1, %v8668_v39  ;;  %vm8925_vm14 = vcmp.ge.f32.partialorder %v8669_v30, 0.0  ;;  %vm8926_vm15 = vcmp.ge.f32.partialorder %v8670_v24, 0.0  ;;  %v9181_v63 = vmul.f32 0.1, %v8669_v30 }
 0x8c5   : > { %v9182_v13 = vmul.f32 0.1, %v8670_v24  ;;  %v9435_v44 = vsel %vm8923_vm12, %v8667_v20, %v9179_v10  ;;  %vm8927_vm0 = vcmp.ge.f32.partialorder %v8671_v54, 0.0  ;;  %v9183_v31 = vmul.f32 0.1, %v8671_v54 }
 0x8c6   : > { %v9436_v1 = vsel %vm8924_vm13, %v8668_v39, %v9180_v32  ;;  %v9437_v49 = vsel %vm8925_vm14, %v8669_v30, %v9181_v63  ;;  %vm8928_vm1 = vcmp.ge.f32.partialorder %v8672_v60, 0.0  ;;  %v9184_v61 = vmul.f32 0.1, %v8672_v60 }
 0x8c7   : > { %v12741_v22 = vpack.c.bf16 %v9436_v1, %v9435_v44  ;;  %v9438_v6 = vsel %vm8926_vm15, %v8670_v24, %v9182_v13  ;;  %v8412_v57 = vmul.f32 %v14333_v11, %v17043_v2  ;;  %v9439_v40 = vsel %vm8927_vm0, %v8671_v54, %v9183_v31 }
 0x8c8   : > { %v12746_v55 = vpack.c.bf16 %v9438_v6, %v9437_v49  ;;  %v8673_v50 = vadd.f32 %v17052_v5, %v8411_v38  ;;  %v8413_v3 = vmul.f32 %v14334_v19, %v17043_v2  ;;  %v8414_v28 = vmul.f32 %v14335_v8, %v17043_v2  ;;  %v14343_v38 = vld [vmem:[#allocation2 + $0x4e8] sm:$0xff]  ;;  %v14345_v19 = vld [vmem:[#allocation2 + $0x4f8] sm:$0xff] }
 0x8c9   : > { %13097 = vst [vmem:[#allocation4 + $0x230] sm:$0xff] %v12741_v22   ;;  %v9440_v21 = vsel %vm8928_vm1, %v8672_v60, %v9184_v61  ;;  %v8674_v42 = vadd.f32 %v17052_v5, %v8412_v57  ;;  %v8415_v53 = vmul.f32 %v14336_v26, %v17043_v2  ;;  %v8416_v48 = vmul.f32 %v14337_v41, %v17043_v2  ;;  %v14344_v61 = vld [vmem:[#allocation2 + $0x4f0] sm:$0xff]  ;;  %v14347_v26 = vld [vmem:[#allocation2 + $0x508] sm:$0xff] }
 0x8ca   : > { %13098 = vst [vmem:[#allocation4 + $0x238] sm:$0xff] %v12746_v55   ;;  %v12751_v7 = vpack.c.bf16 %v9440_v21, %v9439_v40  ;;  %vm8929_vm2 = vcmp.ge.f32.partialorder %v8673_v50, 0.0  ;;  %v9185_v29 = vmul.f32 0.1, %v8673_v50  ;;  %v8675_v33 = vadd.f32 %v17052_v5, %v8413_v3  ;;  %v14348_v41 = vld [vmem:[#allocation2 + $0x510] sm:$0xff] }
 0x8cb   : > { %vm8930_vm3 = vcmp.ge.f32.partialorder %v8674_v42, 0.0  ;;  %v9186_v36 = vmul.f32 0.1, %v8674_v42  ;;  %v8676_v23 = vadd.f32 %v17052_v5, %v8414_v28  ;;  %v8677_v51 = vadd.f32 %v17052_v5, %v8415_v53  ;;  %v14346_v28 = vld [vmem:[#allocation2 + $0x500] sm:$0xff] }
 0x8cc   : > { %13099 = vst [vmem:[#allocation4 + $0x240] sm:$0xff] %v12751_v7   ;;  %v9441_v43 = vsel %vm8929_vm2, %v8673_v50, %v9185_v29  ;;  %vm8931_vm4 = vcmp.ge.f32.partialorder %v8675_v33, 0.0  ;;  %v9187_v12 = vmul.f32 0.1, %v8675_v33  ;;  %v8678_v25 = vadd.f32 %v17052_v5, %v8416_v48  ;;  %v14349_v7 = vld [vmem:[#allocation2 + $0x518] sm:$0xff] }
 0x8cd   : > { %v9442_v34 = vsel %vm8930_vm3, %v8674_v42, %v9186_v36  ;;  %vm8932_vm5 = vcmp.ge.f32.partialorder %v8676_v23, 0.0  ;;  %v9188_v62 = vmul.f32 0.1, %v8676_v23  ;;  %vm8933_vm6 = vcmp.ge.f32.partialorder %v8677_v51, 0.0 }
 0x8ce   : > { %v12756_v14 = vpack.c.bf16 %v9442_v34, %v9441_v43  ;;  %v9443_v56 = vsel %vm8931_vm4, %v8675_v33, %v9187_v12  ;;  %vm8934_vm7 = vcmp.ge.f32.partialorder %v8678_v25, 0.0  ;;  %v9189_v47 = vmul.f32 0.1, %v8677_v51 }
 0x8cf   : > { %v9444_v9 = vsel %vm8932_vm5, %v8676_v23, %v9188_v62  ;;  %v9190_v15 = vmul.f32 0.1, %v8678_v25  ;;  %v8417_v58 = vmul.f32 %v14338_v16, %v17043_v2  ;;  %v8418_v46 = vmul.f32 %v14339_v52, %v17043_v2 }
 0x8d0   : > { %13100 = vst [vmem:[#allocation4 + $0x248] sm:$0xff] %v12756_v14   ;;  %v12761_v35 = vpack.c.bf16 %v9444_v9, %v9443_v56  ;;  %v9445_v45 = vsel %vm8933_vm6, %v8677_v51, %v9189_v47  ;;  %v8419_v27 = vmul.f32 %v14340_v18, %v17043_v2  ;;  %v8420_v37 = vmul.f32 %v14341_v4, %v17043_v2  ;;  %v14350_v18 = vld [vmem:[#allocation2 + $0x520] sm:$0xff]  ;;  %v14351_v4 = vld [vmem:[#allocation2 + $0x528] sm:$0xff] }
 0x8d1   : > { %v9446_v20 = vsel %vm8934_vm7, %v8678_v25, %v9190_v15  ;;  %v8679_v39 = vadd.f32 %v17052_v5, %v8417_v58  ;;  %v8680_v0 = vadd.f32 %v17052_v5, %v8418_v46  ;;  %v8421_v30 = vmul.f32 %v14342_v17, %v17043_v2  ;;  %v14353_v17 = vld [vmem:[#allocation2 + $0x538] sm:$0xff] }
 0x8d2   : > { %13101 = vst [vmem:[#allocation4 + $0x250] sm:$0xff] %v12761_v35   ;;  %v12766_v24 = vpack.c.bf16 %v9446_v20, %v9445_v45  ;;  %v8681_v54 = vadd.f32 %v17052_v5, %v8419_v27  ;;  %v8682_v59 = vadd.f32 %v17052_v5, %v8420_v37  ;;  %v8422_v10 = vmul.f32 %v14343_v38, %v17043_v2 }
 0x8d3   : > { %vm8935_vm8 = vcmp.ge.f32.partialorder %v8679_v39, 0.0  ;;  %vm8936_vm9 = vcmp.ge.f32.partialorder %v8680_v0, 0.0  ;;  %v9191_v32 = vmul.f32 0.1, %v8679_v39  ;;  %v9192_v63 = vmul.f32 0.1, %v8680_v0 }
 0x8d4   : > { %13102 = vst [vmem:[#allocation4 + $0x258] sm:$0xff] %v12766_v24   ;;  %vm8937_vm10 = vcmp.ge.f32.partialorder %v8681_v54, 0.0  ;;  %vm8938_vm11 = vcmp.ge.f32.partialorder %v8682_v59, 0.0  ;;  %v9193_v13 = vmul.f32 0.1, %v8681_v54  ;;  %v8683_v22 = vadd.f32 %v17052_v5, %v8421_v30  ;;  %v14354_v24 = vld [vmem:[#allocation2 + $0x540] sm:$0xff] }
 0x8d5   : > { %v9194_v44 = vmul.f32 0.1, %v8682_v59  ;;  %v9447_v1 = vsel %vm8935_vm8, %v8679_v39, %v9191_v32  ;;  %v9448_v60 = vsel %vm8936_vm9, %v8680_v0, %v9192_v63  ;;  %v8684_v49 = vadd.f32 %v17052_v5, %v8422_v10  ;;  %v14352_v39 = vld [vmem:[#allocation2 + $0x530] sm:$0xff]  ;;  %v14355_v32 = vld [vmem:[#allocation2 + $0x548] sm:$0xff] }
 0x8d6   : > { %v12771_v6 = vpack.c.bf16 %v9448_v60, %v9447_v1  ;;  %v9449_v31 = vsel %vm8937_vm10, %v8681_v54, %v9193_v13  ;;  %v8423_v11 = vmul.f32 %v14344_v61, %v17043_v2  ;;  %vm8939_vm12 = vcmp.ge.f32.partialorder %v8683_v22, 0.0  ;;  %v14356_v60 = vld [vmem:[#allocation2 + $0x550] sm:$0xff] }
 0x8d7   : > { %v9450_v55 = vsel %vm8938_vm11, %v8682_v59, %v9194_v44  ;;  %vm8940_vm13 = vcmp.ge.f32.partialorder %v8684_v49, 0.0  ;;  %v9195_v40 = vmul.f32 0.1, %v8683_v22  ;;  %v9196_v50 = vmul.f32 0.1, %v8684_v49 }
 0x8d8   : > { %v12776_v57 = vpack.c.bf16 %v9450_v55, %v9449_v31  ;;  %13103 = vst [vmem:[#allocation4 + $0x260] sm:$0xff] %v12771_v6   ;;  %v8424_v3 = vmul.f32 %v14345_v19, %v17043_v2  ;;  %v8685_v8 = vadd.f32 %v17052_v5, %v8423_v11  ;;  %v8425_v21 = vmul.f32 %v14346_v28, %v17043_v2 }
 0x8d9   : > { %v9451_v42 = vsel %vm8939_vm12, %v8683_v22, %v9195_v40  ;;  %v8426_v53 = vmul.f32 %v14347_v26, %v17043_v2  ;;  %v8427_v48 = vmul.f32 %v14348_v41, %v17043_v2  ;;  %v8428_v29 = vmul.f32 %v14349_v7, %v17043_v2  ;;  %v14358_v41 = vld [vmem:[#allocation2 + $0x560] sm:$0xff]  ;;  %v14359_v7 = vld [vmem:[#allocation2 + $0x568] sm:$0xff] }
 0x8da   : > { %13104 = vst [vmem:[#allocation4 + $0x268] sm:$0xff] %v12776_v57   ;;  %v9452_v33 = vsel %vm8940_vm13, %v8684_v49, %v9196_v50  ;;  %v8686_v36 = vadd.f32 %v17052_v5, %v8424_v3  ;;  %vm8941_vm14 = vcmp.ge.f32.partialorder %v8685_v8, 0.0  ;;  %v9197_v23 = vmul.f32 0.1, %v8685_v8 }
 0x8db   : > { %v12781_v51 = vpack.c.bf16 %v9452_v33, %v9451_v42  ;;  %v8687_v43 = vadd.f32 %v17052_v5, %v8425_v21  ;;  %v8688_v12 = vadd.f32 %v17052_v5, %v8426_v53  ;;  %v8689_v25 = vadd.f32 %v17052_v5, %v8427_v48  ;;  %v14357_v21 = vld [vmem:[#allocation2 + $0x558] sm:$0xff] }
 0x8dc   : > { %vm8942_vm15 = vcmp.ge.f32.partialorder %v8686_v36, 0.0  ;;  %v9198_v34 = vmul.f32 0.1, %v8686_v36  ;;  %v9453_v62 = vsel %vm8941_vm14, %v8685_v8, %v9197_v23  ;;  %v8690_v14 = vadd.f32 %v17052_v5, %v8428_v29  ;;  %v14360_v23 = vld [vmem:[#allocation2 + $0x570] sm:$0xff] }
 0x8dd   : > { %13105 = vst [vmem:[#allocation4 + $0x270] sm:$0xff] %v12781_v51   ;;  %vm8943_vm0 = vcmp.ge.f32.partialorder %v8687_v43, 0.0  ;;  %vm8944_vm1 = vcmp.ge.f32.partialorder %v8688_v12, 0.0  ;;  %v9199_v56 = vmul.f32 0.1, %v8687_v43  ;;  %vm8945_vm2 = vcmp.ge.f32.partialorder %v8689_v25, 0.0 }
 0x8de   : > { %v9200_v47 = vmul.f32 0.1, %v8688_v12  ;;  %v9454_v9 = vsel %vm8942_vm15, %v8686_v36, %v9198_v34  ;;  %vm8946_vm3 = vcmp.ge.f32.partialorder %v8690_v14, 0.0  ;;  %v9201_v15 = vmul.f32 0.1, %v8689_v25 }
 0x8df   : > { %v12786_v16 = vpack.c.bf16 %v9454_v9, %v9453_v62  ;;  %v9455_v58 = vsel %vm8943_vm0, %v8687_v43, %v9199_v56  ;;  %v9202_v46 = vmul.f32 0.1, %v8690_v14  ;;  %v8429_v27 = vmul.f32 %v14350_v18, %v17043_v2  ;;  %v14361_v43 = vld [vmem:[#allocation2 + $0x578] sm:$0xff] }
 0x8e0   : > { %v9456_v52 = vsel %vm8944_vm1, %v8688_v12, %v9200_v47  ;;  %v9457_v45 = vsel %vm8945_vm2, %v8689_v25, %v9201_v15  ;;  %v8430_v37 = vmul.f32 %v14351_v4, %v17043_v2  ;;  %v8431_v0 = vmul.f32 %v14352_v39, %v17043_v2  ;;  %v14362_v4 = vld [vmem:[#allocation2 + $0x580] sm:$0xff] }
 0x8e1   : > { %v12791_v35 = vpack.c.bf16 %v9456_v52, %v9455_v58  ;;  %13106 = vst [vmem:[#allocation4 + $0x278] sm:$0xff] %v12786_v16   ;;  %v9458_v20 = vsel %vm8946_vm3, %v8690_v14, %v9202_v46  ;;  %v8432_v30 = vmul.f32 %v14353_v17, %v17043_v2  ;;  %v8433_v54 = vmul.f32 %v14354_v24, %v17043_v2 }
 0x8e2   : > { %v12796_v59 = vpack.c.bf16 %v9458_v20, %v9457_v45  ;;  %v8691_v38 = vadd.f32 %v17052_v5, %v8429_v27  ;;  %v8692_v10 = vadd.f32 %v17052_v5, %v8430_v37  ;;  %v8434_v63 = vmul.f32 %v14355_v32, %v17043_v2  ;;  %v14363_v20 = vld [vmem:[#allocation2 + $0x588] sm:$0xff] }
 0x8e3   : > { %13107 = vst [vmem:[#allocation4 + $0x280] sm:$0xff] %v12791_v35   ;;  %v8693_v13 = vadd.f32 %v17052_v5, %v8431_v0  ;;  %v8694_v44 = vadd.f32 %v17052_v5, %v8432_v30  ;;  %v8695_v1 = vadd.f32 %v17052_v5, %v8433_v54  ;;  %v8435_v22 = vmul.f32 %v14356_v60, %v17043_v2  ;;  %v14364_v30 = vld [vmem:[#allocation2 + $0x590] sm:$0xff]  ;;  %v14365_v54 = vld [vmem:[#allocation2 + $0x598] sm:$0xff] }
 0x8e4   : > { %13108 = vst [vmem:[#allocation4 + $0x288] sm:$0xff] %v12796_v59   ;;  %vm8947_vm4 = vcmp.ge.f32.partialorder %v8691_v38, 0.0  ;;  %vm8948_vm5 = vcmp.ge.f32.partialorder %v8692_v10, 0.0  ;;  %v9203_v49 = vmul.f32 0.1, %v8691_v38  ;;  %v8696_v57 = vadd.f32 %v17052_v5, %v8434_v63  ;;  %v14366_v63 = vld [vmem:[#allocation2 + $0x5a0] sm:$0xff] }
 0x8e5   : > { %v9204_v6 = vmul.f32 0.1, %v8692_v10  ;;  %vm8949_vm6 = vcmp.ge.f32.partialorder %v8693_v13, 0.0  ;;  %vm8950_vm7 = vcmp.ge.f32.partialorder %v8694_v44, 0.0  ;;  %v9205_v31 = vmul.f32 0.1, %v8693_v13 }
 0x8e6   : > { %v9206_v55 = vmul.f32 0.1, %v8694_v44  ;;  %v9459_v61 = vsel %vm8947_vm4, %v8691_v38, %v9203_v49  ;;  %vm8951_vm8 = vcmp.ge.f32.partialorder %v8695_v1, 0.0  ;;  %v9207_v3 = vmul.f32 0.1, %v8695_v1 }
 0x8e7   : > { %v9460_v11 = vsel %vm8948_vm5, %v8692_v10, %v9204_v6  ;;  %v9461_v50 = vsel %vm8949_vm6, %v8693_v13, %v9205_v31  ;;  %vm8952_vm9 = vcmp.ge.f32.partialorder %v8696_v57, 0.0  ;;  %v9208_v28 = vmul.f32 0.1, %v8696_v57 }
 0x8e8   : > { %v12801_v40 = vpack.c.bf16 %v9460_v11, %v9459_v61  ;;  %v9462_v19 = vsel %vm8950_vm7, %v8694_v44, %v9206_v55  ;;  %v8436_v42 = vmul.f32 %v14357_v21, %v17043_v2  ;;  %v9463_v26 = vsel %vm8951_vm8, %v8695_v1, %v9207_v3 }
 0x8e9   : > { %v12806_v8 = vpack.c.bf16 %v9462_v19, %v9461_v50  ;;  %v8697_v53 = vadd.f32 %v17052_v5, %v8435_v22  ;;  %v8437_v48 = vmul.f32 %v14358_v41, %v17043_v2  ;;  %v8438_v29 = vmul.f32 %v14359_v7, %v17043_v2  ;;  %v14367_v22 = vld [vmem:[#allocation2 + $0x5a8] sm:$0xff]  ;;  %v14369_v41 = vld [vmem:[#allocation2 + $0x5b8] sm:$0xff] }
 0x8ea   : > { %13109 = vst [vmem:[#allocation4 + $0x290] sm:$0xff] %v12801_v40   ;;  %v9464_v33 = vsel %vm8952_vm9, %v8696_v57, %v9208_v28  ;;  %v8698_v36 = vadd.f32 %v17052_v5, %v8436_v42  ;;  %v8439_v51 = vmul.f32 %v14360_v23, %v17043_v2  ;;  %v8440_v12 = vmul.f32 %v14361_v43, %v17043_v2  ;;  %v14368_v28 = vld [vmem:[#allocation2 + $0x5b0] sm:$0xff]  ;;  %v14371_v23 = vld [vmem:[#allocation2 + $0x5c8] sm:$0xff] }
 0x8eb   : > { %13110 = vst [vmem:[#allocation4 + $0x298] sm:$0xff] %v12806_v8   ;;  %v12811_v25 = vpack.c.bf16 %v9464_v33, %v9463_v26  ;;  %vm8953_vm10 = vcmp.ge.f32.partialorder %v8697_v53, 0.0  ;;  %v9209_v34 = vmul.f32 0.1, %v8697_v53  ;;  %v8699_v62 = vadd.f32 %v17052_v5, %v8437_v48  ;;  %v14372_v43 = vld [vmem:[#allocation2 + $0x5d0] sm:$0xff] }
 0x8ec   : > { %vm8954_vm11 = vcmp.ge.f32.partialorder %v8698_v36, 0.0  ;;  %v9210_v14 = vmul.f32 0.1, %v8698_v36  ;;  %v8700_v56 = vadd.f32 %v17052_v5, %v8438_v29  ;;  %v8701_v47 = vadd.f32 %v17052_v5, %v8439_v51  ;;  %v14370_v29 = vld [vmem:[#allocation2 + $0x5c0] sm:$0xff] }
 0x8ed   : > { %13111 = vst [vmem:[#allocation4 + $0x2a0] sm:$0xff] %v12811_v25   ;;  %v9465_v9 = vsel %vm8953_vm10, %v8697_v53, %v9209_v34  ;;  %vm8955_vm12 = vcmp.ge.f32.partialorder %v8699_v62, 0.0  ;;  %v9211_v15 = vmul.f32 0.1, %v8699_v62  ;;  %v8702_v16 = vadd.f32 %v17052_v5, %v8440_v12  ;;  %v14373_v25 = vld [vmem:[#allocation2 + $0x5d8] sm:$0xff] }
 0x8ee   : > { %v9466_v58 = vsel %vm8954_vm11, %v8698_v36, %v9210_v14  ;;  %vm8956_vm13 = vcmp.ge.f32.partialorder %v8700_v56, 0.0  ;;  %v9212_v52 = vmul.f32 0.1, %v8700_v56  ;;  %vm8957_vm14 = vcmp.ge.f32.partialorder %v8701_v47, 0.0 }
 0x8ef   : > { %v12816_v46 = vpack.c.bf16 %v9466_v58, %v9465_v9  ;;  %v9467_v35 = vsel %vm8955_vm12, %v8699_v62, %v9211_v15  ;;  %vm8958_vm15 = vcmp.ge.f32.partialorder %v8702_v16, 0.0  ;;  %v9213_v45 = vmul.f32 0.1, %v8701_v47 }
 0x8f0   : > { %v9468_v18 = vsel %vm8956_vm13, %v8700_v56, %v9212_v52  ;;  %v9214_v27 = vmul.f32 0.1, %v8702_v16  ;;  %v8441_v37 = vmul.f32 %v14362_v4, %v17043_v2  ;;  %v8442_v39 = vmul.f32 %v14363_v20, %v17043_v2 }
 0x8f1   : > { %13112 = vst [vmem:[#allocation4 + $0x2a8] sm:$0xff] %v12816_v46   ;;  %v12821_v0 = vpack.c.bf16 %v9468_v18, %v9467_v35  ;;  %v9469_v17 = vsel %vm8957_vm14, %v8701_v47, %v9213_v45  ;;  %v8443_v24 = vmul.f32 %v14364_v30, %v17043_v2  ;;  %v8444_v59 = vmul.f32 %v14365_v54, %v17043_v2  ;;  %v14374_v30 = vld [vmem:[#allocation2 + $0x5e0] sm:$0xff]  ;;  %v14375_v54 = vld [vmem:[#allocation2 + $0x5e8] sm:$0xff] }
 0x8f2   : > { %v9470_v38 = vsel %vm8958_vm15, %v8702_v16, %v9214_v27  ;;  %v8703_v10 = vadd.f32 %v17052_v5, %v8441_v37  ;;  %v8704_v32 = vadd.f32 %v17052_v5, %v8442_v39  ;;  %v8445_v13 = vmul.f32 %v14366_v63, %v17043_v2  ;;  %v14377_v63 = vld [vmem:[#allocation2 + $0x5f8] sm:$0xff] }
 0x8f3   : > { %13113 = vst [vmem:[#allocation4 + $0x2b0] sm:$0xff] %v12821_v0   ;;  %v12826_v44 = vpack.c.bf16 %v9470_v38, %v9469_v17  ;;  %v8705_v1 = vadd.f32 %v17052_v5, %v8443_v24  ;;  %v8706_v60 = vadd.f32 %v17052_v5, %v8444_v59  ;;  %v8446_v49 = vmul.f32 %v14367_v22, %v17043_v2 }
 0x8f4   : > { %vm8959_vm0 = vcmp.ge.f32.partialorder %v8703_v10, 0.0  ;;  %vm8960_vm1 = vcmp.ge.f32.partialorder %v8704_v32, 0.0  ;;  %v9215_v6 = vmul.f32 0.1, %v8703_v10  ;;  %v9216_v31 = vmul.f32 0.1, %v8704_v32 }
 0x8f5   : > { %13114 = vst [vmem:[#allocation4 + $0x2b8] sm:$0xff] %v12826_v44   ;;  %vm8961_vm2 = vcmp.ge.f32.partialorder %v8705_v1, 0.0  ;;  %vm8962_vm3 = vcmp.ge.f32.partialorder %v8706_v60, 0.0  ;;  %v9217_v55 = vmul.f32 0.1, %v8705_v1  ;;  %v8707_v40 = vadd.f32 %v17052_v5, %v8445_v13  ;;  %v14378_v44 = vld [vmem:[#allocation2 + $0x600] sm:$0xff] }
 0x8f6   : > { %v9218_v61 = vmul.f32 0.1, %v8706_v60  ;;  %v9471_v11 = vsel %vm8959_vm0, %v8703_v10, %v9215_v6  ;;  %v9472_v57 = vsel %vm8960_vm1, %v8704_v32, %v9216_v31  ;;  %v8708_v50 = vadd.f32 %v17052_v5, %v8446_v49  ;;  %v14376_v10 = vld [vmem:[#allocation2 + $0x5f0] sm:$0xff]  ;;  %v14379_v6 = vld [vmem:[#allocation2 + $0x608] sm:$0xff] }
 0x8f7   : > { %v12831_v19 = vpack.c.bf16 %v9472_v57, %v9471_v11  ;;  %v9473_v3 = vsel %vm8961_vm2, %v8705_v1, %v9217_v55  ;;  %v8447_v21 = vmul.f32 %v14368_v28, %v17043_v2  ;;  %vm8963_vm4 = vcmp.ge.f32.partialorder %v8707_v40, 0.0  ;;  %v14380_v57 = vld [vmem:[#allocation2 + $0x610] sm:$0xff] }
 0x8f8   : > { %v9474_v8 = vsel %vm8962_vm3, %v8706_v60, %v9218_v61  ;;  %vm8964_vm5 = vcmp.ge.f32.partialorder %v8708_v50, 0.0  ;;  %v9219_v26 = vmul.f32 0.1, %v8707_v40  ;;  %v9220_v53 = vmul.f32 0.1, %v8708_v50 }
 0x8f9   : > { %v12836_v42 = vpack.c.bf16 %v9474_v8, %v9473_v3  ;;  %13115 = vst [vmem:[#allocation4 + $0x2c0] sm:$0xff] %v12831_v19   ;;  %v8448_v48 = vmul.f32 %v14369_v41, %v17043_v2  ;;  %v8709_v7 = vadd.f32 %v17052_v5, %v8447_v21  ;;  %v8449_v33 = vmul.f32 %v14370_v29, %v17043_v2 }
 0x8fa   : > { %v9475_v36 = vsel %vm8963_vm4, %v8707_v40, %v9219_v26  ;;  %v8450_v51 = vmul.f32 %v14371_v23, %v17043_v2  ;;  %v8451_v12 = vmul.f32 %v14372_v43, %v17043_v2  ;;  %v8452_v34 = vmul.f32 %v14373_v25, %v17043_v2  ;;  %v14382_v43 = vld [vmem:[#allocation2 + $0x620] sm:$0xff]  ;;  %v14383_v25 = vld [vmem:[#allocation2 + $0x628] sm:$0xff] }
 0x8fb   : > { %13116 = vst [vmem:[#allocation4 + $0x2c8] sm:$0xff] %v12836_v42   ;;  %v9476_v62 = vsel %vm8964_vm5, %v8708_v50, %v9220_v53  ;;  %v8710_v14 = vadd.f32 %v17052_v5, %v8448_v48  ;;  %vm8965_vm6 = vcmp.ge.f32.partialorder %v8709_v7, 0.0  ;;  %v9221_v56 = vmul.f32 0.1, %v8709_v7 }
 0x8fc   : > { %v12841_v47 = vpack.c.bf16 %v9476_v62, %v9475_v36  ;;  %v8711_v9 = vadd.f32 %v17052_v5, %v8449_v33  ;;  %v8712_v15 = vadd.f32 %v17052_v5, %v8450_v51  ;;  %v8713_v16 = vadd.f32 %v17052_v5, %v8451_v12  ;;  %v14381_v33 = vld [vmem:[#allocation2 + $0x618] sm:$0xff] }
 0x8fd   : > { %vm8966_vm7 = vcmp.ge.f32.partialorder %v8710_v14, 0.0  ;;  %v9222_v58 = vmul.f32 0.1, %v8710_v14  ;;  %v9477_v52 = vsel %vm8965_vm6, %v8709_v7, %v9221_v56  ;;  %v8714_v46 = vadd.f32 %v17052_v5, %v8452_v34  ;;  %v14384_v56 = vld [vmem:[#allocation2 + $0x630] sm:$0xff] }
 0x8fe   : > { %13117 = vst [vmem:[#allocation4 + $0x2d0] sm:$0xff] %v12841_v47   ;;  %vm8967_vm8 = vcmp.ge.f32.partialorder %v8711_v9, 0.0  ;;  %vm8968_vm9 = vcmp.ge.f32.partialorder %v8712_v15, 0.0  ;;  %v9223_v35 = vmul.f32 0.1, %v8711_v9  ;;  %vm8969_vm10 = vcmp.ge.f32.partialorder %v8713_v16, 0.0 }
 0x8ff   : > { %v9224_v45 = vmul.f32 0.1, %v8712_v15  ;;  %v9478_v18 = vsel %vm8966_vm7, %v8710_v14, %v9222_v58  ;;  %vm8970_vm11 = vcmp.ge.f32.partialorder %v8714_v46, 0.0  ;;  %v9225_v27 = vmul.f32 0.1, %v8713_v16 }
 0x900   : > { %v12846_v4 = vpack.c.bf16 %v9478_v18, %v9477_v52  ;;  %v9479_v37 = vsel %vm8967_vm8, %v8711_v9, %v9223_v35  ;;  %v9226_v39 = vmul.f32 0.1, %v8714_v46  ;;  %v8453_v24 = vmul.f32 %v14374_v30, %v17043_v2  ;;  %v14385_v9 = vld [vmem:[#allocation2 + $0x638] sm:$0xff] }
 0x901   : > { %v9480_v20 = vsel %vm8968_vm9, %v8712_v15, %v9224_v45  ;;  %v9481_v17 = vsel %vm8969_vm10, %v8713_v16, %v9225_v27  ;;  %v8454_v59 = vmul.f32 %v14375_v54, %v17043_v2  ;;  %v8455_v32 = vmul.f32 %v14376_v10, %v17043_v2  ;;  %v14386_v54 = vld [vmem:[#allocation2 + $0x640] sm:$0xff] }
 0x902   : > { %v12851_v0 = vpack.c.bf16 %v9480_v20, %v9479_v37  ;;  %13118 = vst [vmem:[#allocation4 + $0x2d8] sm:$0xff] %v12846_v4   ;;  %v9482_v38 = vsel %vm8970_vm11, %v8714_v46, %v9226_v39  ;;  %v8456_v13 = vmul.f32 %v14377_v63, %v17043_v2  ;;  %v8457_v1 = vmul.f32 %v14378_v44, %v17043_v2 }
 0x903   : > { %v12856_v60 = vpack.c.bf16 %v9482_v38, %v9481_v17  ;;  %v8715_v22 = vadd.f32 %v17052_v5, %v8453_v24  ;;  %v8716_v49 = vadd.f32 %v17052_v5, %v8454_v59  ;;  %v8458_v31 = vmul.f32 %v14379_v6, %v17043_v2  ;;  %v14387_v38 = vld [vmem:[#allocation2 + $0x648] sm:$0xff] }
 0x904   : > { %13119 = vst [vmem:[#allocation4 + $0x2e0] sm:$0xff] %v12851_v0   ;;  %v8717_v55 = vadd.f32 %v17052_v5, %v8455_v32  ;;  %v8718_v61 = vadd.f32 %v17052_v5, %v8456_v13  ;;  %v8719_v11 = vadd.f32 %v17052_v5, %v8457_v1  ;;  %v8459_v40 = vmul.f32 %v14380_v57, %v17043_v2  ;;  %v14388_v13 = vld [vmem:[#allocation2 + $0x650] sm:$0xff]  ;;  %v14389_v1 = vld [vmem:[#allocation2 + $0x658] sm:$0xff] }
 0x905   : > { %13120 = vst [vmem:[#allocation4 + $0x2e8] sm:$0xff] %v12856_v60   ;;  %vm8971_vm12 = vcmp.ge.f32.partialorder %v8715_v22, 0.0  ;;  %vm8972_vm13 = vcmp.ge.f32.partialorder %v8716_v49, 0.0  ;;  %v9227_v50 = vmul.f32 0.1, %v8715_v22  ;;  %v8720_v42 = vadd.f32 %v17052_v5, %v8458_v31  ;;  %v14390_v31 = vld [vmem:[#allocation2 + $0x660] sm:$0xff] }
 0x906   : > { %v9228_v19 = vmul.f32 0.1, %v8716_v49  ;;  %vm8973_vm14 = vcmp.ge.f32.partialorder %v8717_v55, 0.0  ;;  %vm8974_vm15 = vcmp.ge.f32.partialorder %v8718_v61, 0.0  ;;  %v9229_v3 = vmul.f32 0.1, %v8717_v55 }
 0x907   : > { %v9230_v8 = vmul.f32 0.1, %v8718_v61  ;;  %v9483_v28 = vsel %vm8971_vm12, %v8715_v22, %v9227_v50  ;;  %vm8975_vm0 = vcmp.ge.f32.partialorder %v8719_v11, 0.0  ;;  %v9231_v48 = vmul.f32 0.1, %v8719_v11 }
 0x908   : > { %v9484_v21 = vsel %vm8972_vm13, %v8716_v49, %v9228_v19  ;;  %v9485_v53 = vsel %vm8973_vm14, %v8717_v55, %v9229_v3  ;;  %vm8976_vm1 = vcmp.ge.f32.partialorder %v8720_v42, 0.0  ;;  %v9232_v29 = vmul.f32 0.1, %v8720_v42 }
 0x909   : > { %v12861_v26 = vpack.c.bf16 %v9484_v21, %v9483_v28  ;;  %v9486_v41 = vsel %vm8974_vm15, %v8718_v61, %v9230_v8  ;;  %v8460_v36 = vmul.f32 %v14381_v33, %v17043_v2  ;;  %v9487_v23 = vsel %vm8975_vm0, %v8719_v11, %v9231_v48 }
 0x90a   : > { %v12866_v7 = vpack.c.bf16 %v9486_v41, %v9485_v53  ;;  %v8721_v51 = vadd.f32 %v17052_v5, %v8459_v40  ;;  %v8461_v12 = vmul.f32 %v14382_v43, %v17043_v2  ;;  %v8462_v34 = vmul.f32 %v14383_v25, %v17043_v2  ;;  %v14391_v40 = vld [vmem:[#allocation2 + $0x668] sm:$0xff]  ;;  %v14393_v43 = vld [vmem:[#allocation2 + $0x678] sm:$0xff] }
 0x90b   : > { %13121 = vst [vmem:[#allocation4 + $0x2f0] sm:$0xff] %v12861_v26   ;;  %v9488_v62 = vsel %vm8976_vm1, %v8720_v42, %v9232_v29  ;;  %v8722_v14 = vadd.f32 %v17052_v5, %v8460_v36  ;;  %v8463_v47 = vmul.f32 %v14384_v56, %v17043_v2  ;;  %v8464_v15 = vmul.f32 %v14385_v9, %v17043_v2  ;;  %v14392_v29 = vld [vmem:[#allocation2 + $0x670] sm:$0xff]  ;;  %v14395_v56 = vld [vmem:[#allocation2 + $0x688] sm:$0xff] }
 0x90c   : > { %13122 = vst [vmem:[#allocation4 + $0x2f8] sm:$0xff] %v12866_v7   ;;  %v12871_v16 = vpack.c.bf16 %v9488_v62, %v9487_v23  ;;  %vm8977_vm2 = vcmp.ge.f32.partialorder %v8721_v51, 0.0  ;;  %v9233_v58 = vmul.f32 0.1, %v8721_v51  ;;  %v8723_v52 = vadd.f32 %v17052_v5, %v8461_v12  ;;  %v14396_v9 = vld [vmem:[#allocation2 + $0x690] sm:$0xff] }
 0x90d   : > { %vm8978_vm3 = vcmp.ge.f32.partialorder %v8722_v14, 0.0  ;;  %v9234_v46 = vmul.f32 0.1, %v8722_v14  ;;  %v8724_v35 = vadd.f32 %v17052_v5, %v8462_v34  ;;  %v8725_v45 = vadd.f32 %v17052_v5, %v8463_v47  ;;  %v14394_v34 = vld [vmem:[#allocation2 + $0x680] sm:$0xff] }
 0x90e   : > { %13123 = vst [vmem:[#allocation4 + $0x300] sm:$0xff] %v12871_v16   ;;  %v9489_v18 = vsel %vm8977_vm2, %v8721_v51, %v9233_v58  ;;  %vm8979_vm4 = vcmp.ge.f32.partialorder %v8723_v52, 0.0  ;;  %v9235_v27 = vmul.f32 0.1, %v8723_v52  ;;  %v8726_v4 = vadd.f32 %v17052_v5, %v8464_v15  ;;  %v14397_v16 = vld [vmem:[#allocation2 + $0x698] sm:$0xff] }
 0x90f   : > { %v9490_v37 = vsel %vm8978_vm3, %v8722_v14, %v9234_v46  ;;  %vm8980_vm5 = vcmp.ge.f32.partialorder %v8724_v35, 0.0  ;;  %v9236_v20 = vmul.f32 0.1, %v8724_v35  ;;  %vm8981_vm6 = vcmp.ge.f32.partialorder %v8725_v45, 0.0 }
 0x910   : > { %v12876_v39 = vpack.c.bf16 %v9490_v37, %v9489_v18  ;;  %v9491_v0 = vsel %vm8979_vm4, %v8723_v52, %v9235_v27  ;;  %vm8982_vm7 = vcmp.ge.f32.partialorder %v8726_v4, 0.0  ;;  %v9237_v17 = vmul.f32 0.1, %v8725_v45 }
 0x911   : > { %v9492_v30 = vsel %vm8980_vm5, %v8724_v35, %v9236_v20  ;;  %v9238_v24 = vmul.f32 0.1, %v8726_v4  ;;  %v8465_v59 = vmul.f32 %v14386_v54, %v17043_v2  ;;  %v8466_v10 = vmul.f32 %v14387_v38, %v17043_v2 }
 0x912   : > { %13124 = vst [vmem:[#allocation4 + $0x308] sm:$0xff] %v12876_v39   ;;  %v12881_v32 = vpack.c.bf16 %v9492_v30, %v9491_v0  ;;  %v9493_v63 = vsel %vm8981_vm6, %v8725_v45, %v9237_v17  ;;  %v8467_v44 = vmul.f32 %v14388_v13, %v17043_v2  ;;  %v8468_v60 = vmul.f32 %v14389_v1, %v17043_v2  ;;  %v14398_v13 = vld [vmem:[#allocation2 + $0x6a0] sm:$0xff]  ;;  %v14399_v1 = vld [vmem:[#allocation2 + $0x6a8] sm:$0xff] }
 0x913   : > { %v9494_v22 = vsel %vm8982_vm7, %v8726_v4, %v9238_v24  ;;  %v8727_v49 = vadd.f32 %v17052_v5, %v8465_v59  ;;  %v8728_v6 = vadd.f32 %v17052_v5, %v8466_v10  ;;  %v8469_v55 = vmul.f32 %v14390_v31, %v17043_v2  ;;  %v14401_v31 = vld [vmem:[#allocation2 + $0x6b8] sm:$0xff] }
 0x914   : > { %13125 = vst [vmem:[#allocation4 + $0x310] sm:$0xff] %v12881_v32   ;;  %v12886_v61 = vpack.c.bf16 %v9494_v22, %v9493_v63  ;;  %v8729_v11 = vadd.f32 %v17052_v5, %v8467_v44  ;;  %v8730_v57 = vadd.f32 %v17052_v5, %v8468_v60  ;;  %v8470_v50 = vmul.f32 %v14391_v40, %v17043_v2 }
 0x915   : > { %vm8983_vm8 = vcmp.ge.f32.partialorder %v8727_v49, 0.0  ;;  %vm8984_vm9 = vcmp.ge.f32.partialorder %v8728_v6, 0.0  ;;  %v9239_v19 = vmul.f32 0.1, %v8727_v49  ;;  %v9240_v3 = vmul.f32 0.1, %v8728_v6 }
 0x916   : > { %13126 = vst [vmem:[#allocation4 + $0x318] sm:$0xff] %v12886_v61   ;;  %vm8985_vm10 = vcmp.ge.f32.partialorder %v8729_v11, 0.0  ;;  %vm8986_vm11 = vcmp.ge.f32.partialorder %v8730_v57, 0.0  ;;  %v9241_v8 = vmul.f32 0.1, %v8729_v11  ;;  %v8731_v26 = vadd.f32 %v17052_v5, %v8469_v55  ;;  %v14402_v61 = vld [vmem:[#allocation2 + $0x6c0] sm:$0xff] }
 0x917   : > { %v9242_v28 = vmul.f32 0.1, %v8730_v57  ;;  %v9495_v21 = vsel %vm8983_vm8, %v8727_v49, %v9239_v19  ;;  %v9496_v42 = vsel %vm8984_vm9, %v8728_v6, %v9240_v3  ;;  %v8732_v53 = vadd.f32 %v17052_v5, %v8470_v50  ;;  %v14400_v49 = vld [vmem:[#allocation2 + $0x6b0] sm:$0xff]  ;;  %v14403_v19 = vld [vmem:[#allocation2 + $0x6c8] sm:$0xff] }
 0x918   : > { %v12891_v41 = vpack.c.bf16 %v9496_v42, %v9495_v21  ;;  %v9497_v48 = vsel %vm8985_vm10, %v8729_v11, %v9241_v8  ;;  %v8471_v33 = vmul.f32 %v14392_v29, %v17043_v2  ;;  %vm8987_vm12 = vcmp.ge.f32.partialorder %v8731_v26, 0.0  ;;  %v14404_v42 = vld [vmem:[#allocation2 + $0x6d0] sm:$0xff] }
 0x919   : > { %v9498_v7 = vsel %vm8986_vm11, %v8730_v57, %v9242_v28  ;;  %vm8988_vm13 = vcmp.ge.f32.partialorder %v8732_v53, 0.0  ;;  %v9243_v23 = vmul.f32 0.1, %v8731_v26  ;;  %v9244_v51 = vmul.f32 0.1, %v8732_v53 }
 0x91a   : > { %v12896_v36 = vpack.c.bf16 %v9498_v7, %v9497_v48  ;;  %13127 = vst [vmem:[#allocation4 + $0x320] sm:$0xff] %v12891_v41   ;;  %v8472_v12 = vmul.f32 %v14393_v43, %v17043_v2  ;;  %v8733_v25 = vadd.f32 %v17052_v5, %v8471_v33  ;;  %v8473_v62 = vmul.f32 %v14394_v34, %v17043_v2 }
 0x91b   : > { %v9499_v14 = vsel %vm8987_vm12, %v8731_v26, %v9243_v23  ;;  %v8474_v47 = vmul.f32 %v14395_v56, %v17043_v2  ;;  %v8475_v15 = vmul.f32 %v14396_v9, %v17043_v2  ;;  %v8476_v58 = vmul.f32 %v14397_v16, %v17043_v2  ;;  %v14406_v9 = vld [vmem:[#allocation2 + $0x6e0] sm:$0xff]  ;;  %v14407_v16 = vld [vmem:[#allocation2 + $0x6e8] sm:$0xff] }
 0x91c   : > { %13128 = vst [vmem:[#allocation4 + $0x328] sm:$0xff] %v12896_v36   ;;  %v9500_v52 = vsel %vm8988_vm13, %v8732_v53, %v9244_v51  ;;  %v8734_v46 = vadd.f32 %v17052_v5, %v8472_v12  ;;  %vm8989_vm14 = vcmp.ge.f32.partialorder %v8733_v25, 0.0  ;;  %v9245_v35 = vmul.f32 0.1, %v8733_v25 }
 0x91d   : > { %v12901_v45 = vpack.c.bf16 %v9500_v52, %v9499_v14  ;;  %v8735_v18 = vadd.f32 %v17052_v5, %v8473_v62  ;;  %v8736_v27 = vadd.f32 %v17052_v5, %v8474_v47  ;;  %v8737_v4 = vadd.f32 %v17052_v5, %v8475_v15  ;;  %v14405_v62 = vld [vmem:[#allocation2 + $0x6d8] sm:$0xff] }
 0x91e   : > { %vm8990_vm15 = vcmp.ge.f32.partialorder %v8734_v46, 0.0  ;;  %v9246_v37 = vmul.f32 0.1, %v8734_v46  ;;  %v9501_v20 = vsel %vm8989_vm14, %v8733_v25, %v9245_v35  ;;  %v8738_v39 = vadd.f32 %v17052_v5, %v8476_v58  ;;  %v14408_v35 = vld [vmem:[#allocation2 + $0x6f0] sm:$0xff] }
 0x91f   : > { %13129 = vst [vmem:[#allocation4 + $0x330] sm:$0xff] %v12901_v45   ;;  %vm8991_vm0 = vcmp.ge.f32.partialorder %v8735_v18, 0.0  ;;  %vm8992_vm1 = vcmp.ge.f32.partialorder %v8736_v27, 0.0  ;;  %v9247_v0 = vmul.f32 0.1, %v8735_v18  ;;  %vm8993_vm2 = vcmp.ge.f32.partialorder %v8737_v4, 0.0 }
 0x920   : > { %v9248_v17 = vmul.f32 0.1, %v8736_v27  ;;  %v9502_v30 = vsel %vm8990_vm15, %v8734_v46, %v9246_v37  ;;  %vm8994_vm3 = vcmp.ge.f32.partialorder %v8738_v39, 0.0  ;;  %v9249_v24 = vmul.f32 0.1, %v8737_v4 }
 0x921   : > { %v12906_v54 = vpack.c.bf16 %v9502_v30, %v9501_v20  ;;  %v9503_v59 = vsel %vm8991_vm0, %v8735_v18, %v9247_v0  ;;  %v9250_v10 = vmul.f32 0.1, %v8738_v39  ;;  %v8477_v44 = vmul.f32 %v14398_v13, %v17043_v2  ;;  %v14409_v18 = vld [vmem:[#allocation2 + $0x6f8] sm:$0xff] }
 0x922   : > { %v9504_v38 = vsel %vm8992_vm1, %v8736_v27, %v9248_v17  ;;  %v9505_v63 = vsel %vm8993_vm2, %v8737_v4, %v9249_v24  ;;  %v8478_v60 = vmul.f32 %v14399_v1, %v17043_v2  ;;  %v8479_v6 = vmul.f32 %v14400_v49, %v17043_v2  ;;  %v14410_v1 = vld [vmem:[#allocation2 + $0x700] sm:$0xff] }
 0x923   : > { %v12911_v32 = vpack.c.bf16 %v9504_v38, %v9503_v59  ;;  %13130 = vst [vmem:[#allocation4 + $0x338] sm:$0xff] %v12906_v54   ;;  %v9506_v22 = vsel %vm8994_vm3, %v8738_v39, %v9250_v10  ;;  %v8480_v55 = vmul.f32 %v14401_v31, %v17043_v2  ;;  %v8481_v11 = vmul.f32 %v14402_v61, %v17043_v2 }
 0x924   : > { %v12916_v57 = vpack.c.bf16 %v9506_v22, %v9505_v63  ;;  %v8739_v40 = vadd.f32 %v17052_v5, %v8477_v44  ;;  %v8740_v50 = vadd.f32 %v17052_v5, %v8478_v60  ;;  %v8482_v3 = vmul.f32 %v14403_v19, %v17043_v2  ;;  %v14411_v22 = vld [vmem:[#allocation2 + $0x708] sm:$0xff] }
 0x925   : > { %13131 = vst [vmem:[#allocation4 + $0x340] sm:$0xff] %v12911_v32   ;;  %v8741_v8 = vadd.f32 %v17052_v5, %v8479_v6  ;;  %v8742_v28 = vadd.f32 %v17052_v5, %v8480_v55  ;;  %v8743_v21 = vadd.f32 %v17052_v5, %v8481_v11  ;;  %v8483_v26 = vmul.f32 %v14404_v42, %v17043_v2  ;;  %v14412_v55 = vld [vmem:[#allocation2 + $0x710] sm:$0xff]  ;;  %v14413_v11 = vld [vmem:[#allocation2 + $0x718] sm:$0xff] }
 0x926   : > { %13132 = vst [vmem:[#allocation4 + $0x348] sm:$0xff] %v12916_v57   ;;  %vm8995_vm4 = vcmp.ge.f32.partialorder %v8739_v40, 0.0  ;;  %vm8996_vm5 = vcmp.ge.f32.partialorder %v8740_v50, 0.0  ;;  %v9251_v53 = vmul.f32 0.1, %v8739_v40  ;;  %v8744_v36 = vadd.f32 %v17052_v5, %v8482_v3  ;;  %v14414_v3 = vld [vmem:[#allocation2 + $0x720] sm:$0xff] }
 0x927   : > { %v9252_v41 = vmul.f32 0.1, %v8740_v50  ;;  %vm8997_vm6 = vcmp.ge.f32.partialorder %v8741_v8, 0.0  ;;  %vm8998_vm7 = vcmp.ge.f32.partialorder %v8742_v28, 0.0  ;;  %v9253_v48 = vmul.f32 0.1, %v8741_v8 }
 0x928   : > { %v9254_v7 = vmul.f32 0.1, %v8742_v28  ;;  %v9507_v29 = vsel %vm8995_vm4, %v8739_v40, %v9251_v53  ;;  %vm8999_vm8 = vcmp.ge.f32.partialorder %v8743_v21, 0.0  ;;  %v9255_v12 = vmul.f32 0.1, %v8743_v21 }
 0x929   : > { %v9508_v33 = vsel %vm8996_vm5, %v8740_v50, %v9252_v41  ;;  %v9509_v51 = vsel %vm8997_vm6, %v8741_v8, %v9253_v48  ;;  %vm9000_vm9 = vcmp.ge.f32.partialorder %v8744_v36, 0.0  ;;  %v9256_v34 = vmul.f32 0.1, %v8744_v36 }
 0x92a   : > { %v12921_v23 = vpack.c.bf16 %v9508_v33, %v9507_v29  ;;  %v9510_v43 = vsel %vm8998_vm7, %v8742_v28, %v9254_v7  ;;  %v8484_v14 = vmul.f32 %v14405_v62, %v17043_v2  ;;  %v9511_v56 = vsel %vm8999_vm8, %v8743_v21, %v9255_v12 }
 0x92b   : > { %v12926_v25 = vpack.c.bf16 %v9510_v43, %v9509_v51  ;;  %v8745_v47 = vadd.f32 %v17052_v5, %v8483_v26  ;;  %v8485_v15 = vmul.f32 %v14406_v9, %v17043_v2  ;;  %v8486_v58 = vmul.f32 %v14407_v16, %v17043_v2  ;;  %v14415_v26 = vld [vmem:[#allocation2 + $0x728] sm:$0xff]  ;;  %v14417_v9 = vld [vmem:[#allocation2 + $0x738] sm:$0xff] }
 0x92c   : > { %13133 = vst [vmem:[#allocation4 + $0x350] sm:$0xff] %v12921_v23   ;;  %v9512_v52 = vsel %vm9000_vm9, %v8744_v36, %v9256_v34  ;;  %v8746_v46 = vadd.f32 %v17052_v5, %v8484_v14  ;;  %v8487_v45 = vmul.f32 %v14408_v35, %v17043_v2  ;;  %v8488_v27 = vmul.f32 %v14409_v18, %v17043_v2  ;;  %v14416_v34 = vld [vmem:[#allocation2 + $0x730] sm:$0xff]  ;;  %v14419_v35 = vld [vmem:[#allocation2 + $0x748] sm:$0xff] }
 0x92d   : > { %13134 = vst [vmem:[#allocation4 + $0x358] sm:$0xff] %v12926_v25   ;;  %v12931_v4 = vpack.c.bf16 %v9512_v52, %v9511_v56  ;;  %vm9001_vm10 = vcmp.ge.f32.partialorder %v8745_v47, 0.0  ;;  %v9257_v37 = vmul.f32 0.1, %v8745_v47  ;;  %v8747_v20 = vadd.f32 %v17052_v5, %v8485_v15  ;;  %v14420_v18 = vld [vmem:[#allocation2 + $0x750] sm:$0xff] }
 0x92e   : > { %vm9002_vm11 = vcmp.ge.f32.partialorder %v8746_v46, 0.0  ;;  %v9258_v39 = vmul.f32 0.1, %v8746_v46  ;;  %v8748_v0 = vadd.f32 %v17052_v5, %v8486_v58  ;;  %v8749_v17 = vadd.f32 %v17052_v5, %v8487_v45  ;;  %v14418_v58 = vld [vmem:[#allocation2 + $0x740] sm:$0xff] }
 0x92f   : > { %13135 = vst [vmem:[#allocation4 + $0x360] sm:$0xff] %v12931_v4   ;;  %v9513_v30 = vsel %vm9001_vm10, %v8745_v47, %v9257_v37  ;;  %vm9003_vm12 = vcmp.ge.f32.partialorder %v8747_v20, 0.0  ;;  %v9259_v24 = vmul.f32 0.1, %v8747_v20  ;;  %v8750_v54 = vadd.f32 %v17052_v5, %v8488_v27  ;;  %v14421_v4 = vld [vmem:[#allocation2 + $0x758] sm:$0xff] }
 0x930   : > { %v9514_v59 = vsel %vm9002_vm11, %v8746_v46, %v9258_v39  ;;  %vm9004_vm13 = vcmp.ge.f32.partialorder %v8748_v0, 0.0  ;;  %v9260_v38 = vmul.f32 0.1, %v8748_v0  ;;  %vm9005_vm14 = vcmp.ge.f32.partialorder %v8749_v17, 0.0 }
 0x931   : > { %v12936_v10 = vpack.c.bf16 %v9514_v59, %v9513_v30  ;;  %v9515_v32 = vsel %vm9003_vm12, %v8747_v20, %v9259_v24  ;;  %vm9006_vm15 = vcmp.ge.f32.partialorder %v8750_v54, 0.0  ;;  %v9261_v63 = vmul.f32 0.1, %v8749_v17 }
 0x932   : > { %v9516_v13 = vsel %vm9004_vm13, %v8748_v0, %v9260_v38  ;;  %v9262_v44 = vmul.f32 0.1, %v8750_v54  ;;  %v8489_v60 = vmul.f32 %v14410_v1, %v17043_v2  ;;  %v8490_v49 = vmul.f32 %v14411_v22, %v17043_v2 }
 0x933   : > { %13136 = vst [vmem:[#allocation4 + $0x368] sm:$0xff] %v12936_v10   ;;  %v12941_v6 = vpack.c.bf16 %v9516_v13, %v9515_v32  ;;  %v9517_v31 = vsel %vm9005_vm14, %v8749_v17, %v9261_v63  ;;  %v8491_v61 = vmul.f32 %v14412_v55, %v17043_v2  ;;  %v8492_v57 = vmul.f32 %v14413_v11, %v17043_v2  ;;  %v14422_v55 = vld [vmem:[#allocation2 + $0x760] sm:$0xff]  ;;  %v14423_v11 = vld [vmem:[#allocation2 + $0x768] sm:$0xff] }
 0x934   : > { %v9518_v40 = vsel %vm9006_vm15, %v8750_v54, %v9262_v44  ;;  %v8751_v50 = vadd.f32 %v17052_v5, %v8489_v60  ;;  %v8752_v19 = vadd.f32 %v17052_v5, %v8490_v49  ;;  %v8493_v8 = vmul.f32 %v14414_v3, %v17043_v2  ;;  %v14425_v3 = vld [vmem:[#allocation2 + $0x778] sm:$0xff] }
 0x935   : > { %13137 = vst [vmem:[#allocation4 + $0x370] sm:$0xff] %v12941_v6   ;;  %v12946_v28 = vpack.c.bf16 %v9518_v40, %v9517_v31  ;;  %v8753_v21 = vadd.f32 %v17052_v5, %v8491_v61  ;;  %v8754_v42 = vadd.f32 %v17052_v5, %v8492_v57  ;;  %v8494_v53 = vmul.f32 %v14415_v26, %v17043_v2 }
 0x936   : > { %vm9007_vm0 = vcmp.ge.f32.partialorder %v8751_v50, 0.0  ;;  %vm9008_vm1 = vcmp.ge.f32.partialorder %v8752_v19, 0.0  ;;  %v9263_v41 = vmul.f32 0.1, %v8751_v50  ;;  %v9264_v48 = vmul.f32 0.1, %v8752_v19 }
 0x937   : > { %13138 = vst [vmem:[#allocation4 + $0x378] sm:$0xff] %v12946_v28   ;;  %vm9009_vm2 = vcmp.ge.f32.partialorder %v8753_v21, 0.0  ;;  %vm9010_vm3 = vcmp.ge.f32.partialorder %v8754_v42, 0.0  ;;  %v9265_v7 = vmul.f32 0.1, %v8753_v21  ;;  %v8755_v23 = vadd.f32 %v17052_v5, %v8493_v8  ;;  %v14426_v28 = vld [vmem:[#allocation2 + $0x780] sm:$0xff] }
 0x938   : > { %v9266_v29 = vmul.f32 0.1, %v8754_v42  ;;  %v9519_v33 = vsel %vm9007_vm0, %v8751_v50, %v9263_v41  ;;  %v9520_v36 = vsel %vm9008_vm1, %v8752_v19, %v9264_v48  ;;  %v8756_v51 = vadd.f32 %v17052_v5, %v8494_v53  ;;  %v14424_v50 = vld [vmem:[#allocation2 + $0x770] sm:$0xff]  ;;  %v14427_v41 = vld [vmem:[#allocation2 + $0x788] sm:$0xff] }
 0x939   : > { %v12951_v43 = vpack.c.bf16 %v9520_v36, %v9519_v33  ;;  %v9521_v12 = vsel %vm9009_vm2, %v8753_v21, %v9265_v7  ;;  %v8495_v62 = vmul.f32 %v14416_v34, %v17043_v2  ;;  %vm9011_vm4 = vcmp.ge.f32.partialorder %v8755_v23, 0.0  ;;  %v14428_v36 = vld [vmem:[#allocation2 + $0x790] sm:$0xff] }
 0x93a   : > { %v9522_v25 = vsel %vm9010_vm3, %v8754_v42, %v9266_v29  ;;  %vm9012_vm5 = vcmp.ge.f32.partialorder %v8756_v51, 0.0  ;;  %v9267_v56 = vmul.f32 0.1, %v8755_v23  ;;  %v9268_v47 = vmul.f32 0.1, %v8756_v51 }
 0x93b   : > { %v12956_v14 = vpack.c.bf16 %v9522_v25, %v9521_v12  ;;  %13139 = vst [vmem:[#allocation4 + $0x380] sm:$0xff] %v12951_v43   ;;  %v8496_v15 = vmul.f32 %v14417_v9, %v17043_v2  ;;  %v8757_v16 = vadd.f32 %v17052_v5, %v8495_v62  ;;  %v8497_v52 = vmul.f32 %v14418_v58, %v17043_v2 }
 0x93c   : > { %v9523_v46 = vsel %vm9011_vm4, %v8755_v23, %v9267_v56  ;;  %v8498_v45 = vmul.f32 %v14419_v35, %v17043_v2  ;;  %v8499_v27 = vmul.f32 %v14420_v18, %v17043_v2  ;;  %v8500_v37 = vmul.f32 %v14421_v4, %v17043_v2  ;;  %v14430_v18 = vld [vmem:[#allocation2 + $0x7a0] sm:$0xff]  ;;  %v14431_v4 = vld [vmem:[#allocation2 + $0x7a8] sm:$0xff] }
 0x93d   : > { %13140 = vst [vmem:[#allocation4 + $0x388] sm:$0xff] %v12956_v14   ;;  %v9524_v20 = vsel %vm9012_vm5, %v8756_v51, %v9268_v47  ;;  %v8758_v39 = vadd.f32 %v17052_v5, %v8496_v15  ;;  %vm9013_vm6 = vcmp.ge.f32.partialorder %v8757_v16, 0.0  ;;  %v9269_v0 = vmul.f32 0.1, %v8757_v16 }
 0x93e   : > { %v12961_v17 = vpack.c.bf16 %v9524_v20, %v9523_v46  ;;  %v8759_v30 = vadd.f32 %v17052_v5, %v8497_v52  ;;  %v8760_v24 = vadd.f32 %v17052_v5, %v8498_v45  ;;  %v8761_v54 = vadd.f32 %v17052_v5, %v8499_v27  ;;  %v14429_v52 = vld [vmem:[#allocation2 + $0x798] sm:$0xff] }
 0x93f   : > { %vm9014_vm7 = vcmp.ge.f32.partialorder %v8758_v39, 0.0  ;;  %v9270_v59 = vmul.f32 0.1, %v8758_v39  ;;  %v9525_v38 = vsel %vm9013_vm6, %v8757_v16, %v9269_v0  ;;  %v8762_v10 = vadd.f32 %v17052_v5, %v8500_v37  ;;  %v14432_v0 = vld [vmem:[#allocation2 + $0x7b0] sm:$0xff] }
 0x940   : > { %13141 = vst [vmem:[#allocation4 + $0x390] sm:$0xff] %v12961_v17   ;;  %vm9015_vm8 = vcmp.ge.f32.partialorder %v8759_v30, 0.0  ;;  %vm9016_vm9 = vcmp.ge.f32.partialorder %v8760_v24, 0.0  ;;  %v9271_v32 = vmul.f32 0.1, %v8759_v30  ;;  %vm9017_vm10 = vcmp.ge.f32.partialorder %v8761_v54, 0.0 }
 0x941   : > { %v9272_v63 = vmul.f32 0.1, %v8760_v24  ;;  %v9526_v13 = vsel %vm9014_vm7, %v8758_v39, %v9270_v59  ;;  %vm9018_vm11 = vcmp.ge.f32.partialorder %v8762_v10, 0.0  ;;  %v9273_v44 = vmul.f32 0.1, %v8761_v54 }
 0x942   : > { %v12966_v1 = vpack.c.bf16 %v9526_v13, %v9525_v38  ;;  %v9527_v60 = vsel %vm9015_vm8, %v8759_v30, %v9271_v32  ;;  %v9274_v49 = vmul.f32 0.1, %v8762_v10  ;;  %v8501_v61 = vmul.f32 %v14422_v55, %v17043_v2  ;;  %v14433_v30 = vld [vmem:[#allocation2 + $0x7b8] sm:$0xff] }
 0x943   : > { %v9528_v22 = vsel %vm9016_vm9, %v8760_v24, %v9272_v63  ;;  %v9529_v31 = vsel %vm9017_vm10, %v8761_v54, %v9273_v44  ;;  %v8502_v57 = vmul.f32 %v14423_v11, %v17043_v2  ;;  %v8503_v19 = vmul.f32 %v14424_v50, %v17043_v2  ;;  %v14434_v11 = vld [vmem:[#allocation2 + $0x7c0] sm:$0xff] }
 0x944   : > { %v12971_v6 = vpack.c.bf16 %v9528_v22, %v9527_v60  ;;  %13142 = vst [vmem:[#allocation4 + $0x398] sm:$0xff] %v12966_v1   ;;  %v9530_v40 = vsel %vm9018_vm11, %v8762_v10, %v9274_v49  ;;  %v8504_v8 = vmul.f32 %v14425_v3, %v17043_v2  ;;  %v8505_v21 = vmul.f32 %v14426_v28, %v17043_v2 }
 0x945   : > { %v12976_v42 = vpack.c.bf16 %v9530_v40, %v9529_v31  ;;  %v8763_v26 = vadd.f32 %v17052_v5, %v8501_v61  ;;  %v8764_v53 = vadd.f32 %v17052_v5, %v8502_v57  ;;  %v8506_v48 = vmul.f32 %v14427_v41, %v17043_v2  ;;  %v14435_v40 = vld [vmem:[#allocation2 + $0x7c8] sm:$0xff] }
 0x946   : > { %13143 = vst [vmem:[#allocation4 + $0x3a0] sm:$0xff] %v12971_v6   ;;  %v8765_v7 = vadd.f32 %v17052_v5, %v8503_v19  ;;  %v8766_v29 = vadd.f32 %v17052_v5, %v8504_v8  ;;  %v8767_v33 = vadd.f32 %v17052_v5, %v8505_v21  ;;  %v8507_v23 = vmul.f32 %v14428_v36, %v17043_v2  ;;  %v14436_v8 = vld [vmem:[#allocation2 + $0x7d0] sm:$0xff]  ;;  %v14437_v21 = vld [vmem:[#allocation2 + $0x7d8] sm:$0xff] }
 0x947   : > { %13144 = vst [vmem:[#allocation4 + $0x3a8] sm:$0xff] %v12976_v42   ;;  %vm9019_vm12 = vcmp.ge.f32.partialorder %v8763_v26, 0.0  ;;  %vm9020_vm13 = vcmp.ge.f32.partialorder %v8764_v53, 0.0  ;;  %v9275_v51 = vmul.f32 0.1, %v8763_v26  ;;  %v8768_v14 = vadd.f32 %v17052_v5, %v8506_v48  ;;  %v14438_v48 = vld [vmem:[#allocation2 + $0x7e0] sm:$0xff] }
 0x948   : > { %v9276_v43 = vmul.f32 0.1, %v8764_v53  ;;  %vm9021_vm14 = vcmp.ge.f32.partialorder %v8765_v7, 0.0  ;;  %vm9022_vm15 = vcmp.ge.f32.partialorder %v8766_v29, 0.0  ;;  %v9277_v12 = vmul.f32 0.1, %v8765_v7 }
 0x949   : > { %v9278_v25 = vmul.f32 0.1, %v8766_v29  ;;  %v9531_v34 = vsel %vm9019_vm12, %v8763_v26, %v9275_v51  ;;  %vm9023_vm0 = vcmp.ge.f32.partialorder %v8767_v33, 0.0  ;;  %v9279_v15 = vmul.f32 0.1, %v8767_v33 }
 0x94a   : > { %v9532_v62 = vsel %vm9020_vm13, %v8764_v53, %v9276_v43  ;;  %v9533_v47 = vsel %vm9021_vm14, %v8765_v7, %v9277_v12  ;;  %vm9024_vm1 = vcmp.ge.f32.partialorder %v8768_v14, 0.0  ;;  %v9280_v58 = vmul.f32 0.1, %v8768_v14 }
 0x94b   : > { %v12981_v56 = vpack.c.bf16 %v9532_v62, %v9531_v34  ;;  %v9534_v9 = vsel %vm9022_vm15, %v8766_v29, %v9278_v25  ;;  %v8508_v46 = vmul.f32 %v14429_v52, %v17043_v2  ;;  %v9535_v35 = vsel %vm9023_vm0, %v8767_v33, %v9279_v15 }
 0x94c   : > { %v12986_v16 = vpack.c.bf16 %v9534_v9, %v9533_v47  ;;  %v8769_v45 = vadd.f32 %v17052_v5, %v8507_v23  ;;  %v8509_v27 = vmul.f32 %v14430_v18, %v17043_v2  ;;  %v8510_v37 = vmul.f32 %v14431_v4, %v17043_v2  ;;  %v14439_v23 = vld [vmem:[#allocation2 + $0x7e8] sm:$0xff]  ;;  %v14441_v18 = vld [vmem:[#allocation2 + $0x7f8] sm:$0xff] }
 0x94d   : > { %13145 = vst [vmem:[#allocation4 + $0x3b0] sm:$0xff] %v12981_v56   ;;  %v9536_v20 = vsel %vm9024_vm1, %v8768_v14, %v9280_v58  ;;  %v8770_v39 = vadd.f32 %v17052_v5, %v8508_v46  ;;  %v8511_v17 = vmul.f32 %v14432_v0, %v17043_v2  ;;  %v8512_v24 = vmul.f32 %v14433_v30, %v17043_v2  ;;  %v14440_v58 = vld [vmem:[#allocation2 + $0x7f0] sm:$0xff] }
 0x94e   : > { %13146 = vst [vmem:[#allocation4 + $0x3b8] sm:$0xff] %v12986_v16   ;;  %v12991_v54 = vpack.c.bf16 %v9536_v20, %v9535_v35  ;;  %vm9025_vm2 = vcmp.ge.f32.partialorder %v8769_v45, 0.0  ;;  %v9281_v59 = vmul.f32 0.1, %v8769_v45  ;;  %v8771_v38 = vadd.f32 %v17052_v5, %v8509_v27 }
 0x94f   : > { %vm9026_vm3 = vcmp.ge.f32.partialorder %v8770_v39, 0.0  ;;  %v9282_v10 = vmul.f32 0.1, %v8770_v39  ;;  %v8772_v32 = vadd.f32 %v17052_v5, %v8510_v37  ;;  %v8773_v63 = vadd.f32 %v17052_v5, %v8511_v17 }
 0x950   : > { %13147 = vst [vmem:[#allocation4 + $0x3c0] sm:$0xff] %v12991_v54   ;;  %v9537_v13 = vsel %vm9025_vm2, %v8769_v45, %v9281_v59  ;;  %vm9027_vm4 = vcmp.ge.f32.partialorder %v8771_v38, 0.0  ;;  %v9283_v44 = vmul.f32 0.1, %v8771_v38  ;;  %v8774_v1 = vadd.f32 %v17052_v5, %v8512_v24 }
 0x951   : > { %v9538_v60 = vsel %vm9026_vm3, %v8770_v39, %v9282_v10  ;;  %vm9028_vm5 = vcmp.ge.f32.partialorder %v8772_v32, 0.0  ;;  %v9284_v22 = vmul.f32 0.1, %v8772_v32  ;;  %vm9029_vm6 = vcmp.ge.f32.partialorder %v8773_v63, 0.0 }
 0x952   : > { %v12996_v49 = vpack.c.bf16 %v9538_v60, %v9537_v13  ;;  %v9539_v6 = vsel %vm9027_vm4, %v8771_v38, %v9283_v44  ;;  %vm9030_vm7 = vcmp.ge.f32.partialorder %v8774_v1, 0.0  ;;  %v9285_v31 = vmul.f32 0.1, %v8773_v63 }
 0x953   : > { %v9540_v55 = vsel %vm9028_vm5, %v8772_v32, %v9284_v22  ;;  %v9286_v61 = vmul.f32 0.1, %v8774_v1  ;;  %v8513_v57 = vmul.f32 %v14434_v11, %v17043_v2  ;;  %v8514_v50 = vmul.f32 %v14435_v40, %v17043_v2 }
 0x954   : > { %13148 = vst [vmem:[#allocation4 + $0x3c8] sm:$0xff] %v12996_v49   ;;  %v13001_v19 = vpack.c.bf16 %v9540_v55, %v9539_v6  ;;  %v9541_v3 = vsel %vm9029_vm6, %v8773_v63, %v9285_v31  ;;  %v8515_v28 = vmul.f32 %v14436_v8, %v17043_v2  ;;  %v8516_v42 = vmul.f32 %v14437_v21, %v17043_v2 }
 0x955   : > { %v9542_v26 = vsel %vm9030_vm7, %v8774_v1, %v9286_v61  ;;  %v8775_v53 = vadd.f32 %v17052_v5, %v8513_v57  ;;  %v8776_v41 = vadd.f32 %v17052_v5, %v8514_v50  ;;  %v8517_v7 = vmul.f32 %v14438_v48, %v17043_v2 }
 0x956   : > { %13149 = vst [vmem:[#allocation4 + $0x3d0] sm:$0xff] %v13001_v19   ;;  %v13006_v29 = vpack.c.bf16 %v9542_v26, %v9541_v3  ;;  %v8777_v33 = vadd.f32 %v17052_v5, %v8515_v28  ;;  %v8778_v36 = vadd.f32 %v17052_v5, %v8516_v42  ;;  %v8518_v51 = vmul.f32 %v14439_v23, %v17043_v2 }
 0x957   : > { %vm9031_vm8 = vcmp.ge.f32.partialorder %v8775_v53, 0.0  ;;  %vm9032_vm9 = vcmp.ge.f32.partialorder %v8776_v41, 0.0  ;;  %v9287_v43 = vmul.f32 0.1, %v8775_v53  ;;  %v9288_v12 = vmul.f32 0.1, %v8776_v41 }
 0x958   : > { %13150 = vst [vmem:[#allocation4 + $0x3d8] sm:$0xff] %v13006_v29   ;;  %vm9033_vm10 = vcmp.ge.f32.partialorder %v8777_v33, 0.0  ;;  %vm9034_vm11 = vcmp.ge.f32.partialorder %v8778_v36, 0.0  ;;  %v9289_v25 = vmul.f32 0.1, %v8777_v33  ;;  %v8779_v56 = vadd.f32 %v17052_v5, %v8517_v7 }
 0x959   : > { %v9290_v34 = vmul.f32 0.1, %v8778_v36  ;;  %v9543_v62 = vsel %vm9031_vm8, %v8775_v53, %v9287_v43  ;;  %v9544_v14 = vsel %vm9032_vm9, %v8776_v41, %v9288_v12  ;;  %v8780_v47 = vadd.f32 %v17052_v5, %v8518_v51 }
 0x95a   : > { %v13011_v9 = vpack.c.bf16 %v9544_v14, %v9543_v62  ;;  %v9545_v15 = vsel %vm9033_vm10, %v8777_v33, %v9289_v25  ;;  %v8519_v52 = vmul.f32 %v14440_v58, %v17043_v2  ;;  %vm9035_vm12 = vcmp.ge.f32.partialorder %v8779_v56, 0.0 }
 0x95b   : > { %v9546_v16 = vsel %vm9034_vm11, %v8778_v36, %v9290_v34  ;;  %vm9036_vm13 = vcmp.ge.f32.partialorder %v8780_v47, 0.0  ;;  %v9291_v35 = vmul.f32 0.1, %v8779_v56  ;;  %v9292_v45 = vmul.f32 0.1, %v8780_v47 }
 0x95c   : > { %v13016_v46 = vpack.c.bf16 %v9546_v16, %v9545_v15  ;;  %13151 = vst [vmem:[#allocation4 + $0x3e0] sm:$0xff] %v13011_v9   ;;  %v8520_v27 = vmul.f32 %v14441_v18, %v17043_v2  ;;  %v8781_v4 = vadd.f32 %v17052_v5, %v8519_v52 }
 0x95d   : > { %v9547_v37 = vsel %vm9035_vm12, %v8779_v56, %v9291_v35  ;;  %v9548_v20 = vsel %vm9036_vm13, %v8780_v47, %v9292_v45 }
 0x95e   : > { %13152 = vst [vmem:[#allocation4 + $0x3e8] sm:$0xff] %v13016_v46   ;;  %v8782_v39 = vadd.f32 %v17052_v5, %v8520_v27  ;;  %vm9037_vm14 = vcmp.ge.f32.partialorder %v8781_v4, 0.0  ;;  %v9293_v0 = vmul.f32 0.1, %v8781_v4  ;;  %v13021_v17 = vpack.c.bf16 %v9548_v20, %v9547_v37 }
 0x960   : > { %vm9038_vm15 = vcmp.ge.f32.partialorder %v8782_v39, 0.0  ;;  %v9294_v30 = vmul.f32 0.1, %v8782_v39  ;;  %v9549_v24 = vsel %vm9037_vm14, %v8781_v4, %v9293_v0  ;;  %13153 = vst [vmem:[#allocation4 + $0x3f0] sm:$0xff] %v13021_v17  }
 0x962   : > { %v9550_v54 = vsel %vm9038_vm15, %v8782_v39, %v9294_v30 }
 0x963   : > { %v13026_v59 = vpack.c.bf16 %v9550_v54, %v9549_v24 }
 0x965   : > { %13154 = vst [vmem:[#allocation4 + $0x3f8] sm:$0xff] %v13026_v59  }
 0x966 PF: > { %p17571_p12 = scmp.eq.s32.totalorder %s10941_s20, 2  ;;  %s14514_s25 = smov [#allocation4]  }
 0x967   : > { %s10839_s26 = sshll.u32 %s14514_s25, 4  ;;  %s10840_s26 = int_to_ptr.vmem [resolvable:$true] %s10839_s26 }
 0x968   : > { %s14442_s27 = scalar_lea.vmem %s10840_s26, 16384  ;;  %p14449_p2 = scmp.lt.s32.totalorder %s10840_s26, %s10840_s26 }
 0x969   : > { %p14443_p13 = scmp.ne.s32.totalorder %s10840_s26, %s14442_s27  ;;  %p14450_p3 = scmp.lt.s32.totalorder %s14442_s27, %s14442_s27 }
 0x96b   : > { %p14444_p0 = pnand %p14443_p13, %p17571_p12  ;;  %p14451_p4 = por %p14450_p3, %p14449_p2 }
 0x96d   : > { %p14445_p1 = pneg %p14444_p0 }
 0x96f   : > { %p14452_p5 = pnand %p14451_p4, %p14445_p1 }
 0x971   : > { %14455 = shalt.err (!%p14452_p5)
}
 0x972   : > { %s14456_s20 = scalar_lea.hbm %s17616_s4, 16384 }
 0x973   : > { %p14457_p6 = scmp.ne.s32.totalorder %s17616_s4, %s14456_s20  ;;  %p14462_p9 = scmp.lt.u32.totalorder %s14456_s20, %s17616_s4 }
 0x975   : > { %p14458_p7 = pnand %p14457_p6, %p17571_p12 }
 0x977   : > { %p14459_p8 = pneg %p14458_p7 }
 0x979   : > { %p14464_p10 = pnand %p14462_p9, %p14459_p8 }
 0x97b   : > { %14467 = shalt.err (!%p14464_p10)
}
 0x97c   : > { %s14515_s8 = smov 64   ;;  %s14516_s9 = smov 4  }
 0x97d   : > { %13598 = dma.vmem_to_hbm [thread:$0]  (%p17571_p12), %s10840_s26, 16384, %s17616_s4, [#allocation5], %s14515_s8, %s14515_s8, %s14516_s9  }
 0x97e   : > { %14489 = dma.done.wait (%p17571_p12), [#allocation5], 16384  }
 0x97f   : > { %14491 = vsyncadd (%p17571_p12), [#allocation5], 4294950912 }
 0x980 PF: > { %s15_s19 = sadd.s32 1, %s14510_s19   ;;  %s17786_s15 = smov %s14498_s16 }
 0x981   : > { %p12_p11 = scmp.ge.s32.totalorder %s15_s19, 5   ;;  %s17787_s16 = smov %s14578_s24 }
 0x982   : > { %s17788_s17 = smov %s14506_s18  ;;  %s17789_s18 = smov %s17791_s21 }
 0x983   :  { %14 = sbr.rel (!%p12_p11) target bundleno = 3 (0x3), region = 118 }
 0x98a   :  { %10855 = vsyncpa [#allocation5], 1 }
 0x98b   :  { %10857 = vsyncpa [#allocation5 + $0x1], 1 }

</bundles_post_ra>
